<compile_context>
chip_gen: v6e
topology: v6e:2x2x1
jax: 0.10.0
libtpu: 0.0.40
codegen_flags: <defaults>
</compile_context>

<pallas_src>
import functools

import jax
import jax.numpy as jnp
from jax.experimental import pallas as pl
from jax.experimental.pallas import tpu as pltpu

EPS = 1e-5                       # torch.nn.LayerNorm default eps
F32 = jnp.float32
BF16 = jnp.bfloat16
_NEG_INF = -1e30


# ---------------------------------------------------------------------------
# helpers
# ---------------------------------------------------------------------------
def _layer_norm(x, gamma, beta):
    x = x.astype(F32)
    mu = jnp.mean(x, axis=-1, keepdims=True)
    var = jnp.mean((x - mu) ** 2, axis=-1, keepdims=True)
    return (x - mu) * jax.lax.rsqrt(var + EPS) * gamma + beta


@functools.lru_cache(maxsize=None)
def _vmem_limit():
    """Scoped-VMEM request: ~75% of physical (v7x: ~48 MiB, v5e/v6e: ~96 MiB)."""
    cap = None
    try:
        cap = getattr(pltpu.get_tpu_info(), "vmem_capacity_bytes", None)
    except Exception:
        cap = None
    if not cap:
        cap = 64 * 1024 * 1024   # conservative fallback (v7x per-core physical VMEM)
    return int(min(cap * 3 // 4, 112 * 1024 * 1024))


@functools.lru_cache(maxsize=None)
def _supports_buffered():
    if not hasattr(pl, "Buffered"):
        return False
    try:
        pl.BlockSpec((8, 128), lambda i: (i, 0), pipeline_mode=pl.Buffered(1))
        return True
    except Exception:
        return False


def _single_buffered_spec(shape, index_map):
    """Block whose index is constant across the k axis: single-buffer it (VMEM win)."""
    if _supports_buffered():
        return pl.BlockSpec(shape, index_map, pipeline_mode=pl.Buffered(1))
    return pl.BlockSpec(shape, index_map)


def _pad_len(n):
    """Pad N to a multiple of 128 so every stage keeps lane-aligned row/k tiles."""
    return n if n <= 128 else ((n + 127) // 128) * 128


def _rep_spec(shape, grid_rank):
    """BlockSpec replicating a small parameter tensor to every grid step."""
    zeros = (0,) * len(shape)
    if grid_rank == 2:
        return pl.BlockSpec(shape, lambda b, i, z=zeros: z)
    return pl.BlockSpec(shape, lambda b, i, k, z=zeros: z)


def _cost(flops, bytes_accessed, transcendentals=0):
    return pl.CostEstimate(flops=int(flops), transcendentals=int(transcendentals),
                           bytes_accessed=int(bytes_accessed))


def _fit_row_tile(npad, bytes_per_row, fixed_bytes, frac=0.5):
    """Largest row tile (multiple of 8) whose estimated working set fits the budget."""
    if npad <= 128:
        return npad
    budget = int(_vmem_limit() * frac)
    for t in (256, 128, 64, 32, 16, 8):
        if npad % t == 0 and fixed_bytes + t * bytes_per_row <= budget:
            return t
    return 8


def _tri_tiles(npad, de, dh):
    """(row tile, k tile) for the triangle mixes; both must be multiples of 128."""
    if npad <= 128:
        return npad, npad
    budget = int(_vmem_limit() * 0.55)
    eres_bufs = 1 if _supports_buffered() else 2
    for ti in (256, 128):                        # larger ti -> higher arithmetic intensity
        if npad % ti:
            continue
        for tk in (256, 128):                    # tk = 256 fills the 256-deep MXU (v6e/v7x)
            if npad % tk:
                continue
            acc = dh * ti * npad * 4                       # f32 accumulator scratch
            lt = 2 * dh * ti * tk * 2                      # double-buffered bf16 operand
            rt = 2 * dh * npad * tk * 2                    # strip operand
            eres = eres_bufs * ti * npad * de * 2          # k-invariant residual (bf16)
            eout = 2 * ti * npad * de * 2                  # edge output (bf16)
            lrn = 2 * 2 * dh * ti * npad * 2               # fused next-stage L/R outputs
            if acc + lt + rt + eres + eout + lrn <= budget:
                return ti, tk
    # TODO(synk): if even 128x128 overflows VMEM (very large N*dh), add a column grid axis
    # so the accumulator shrinks to (dh, ti, tj).
    return 128, 128


# ---------------------------------------------------------------------------
# 1) NodeUpdate: NodeAttentionWithEdgeBias (+res) fused with node Transition (+res)
#    (the k|v projection over all nodes is hoisted to the wrapper, once per block)
# ---------------------------------------------------------------------------
def _node_update_kernel(node_ref, kv_ref, edge_ref,
                        nn_g, nn_b, en_g, en_b, w_qg, bg, wb, wo, bo,
                        t_g, t_b, t_w1, t_b1, t_w2, t_b2,
                        out_ref, *, heads, head_dim, n_valid):
    hidden = heads * head_dim
    node_row = node_ref[0].astype(F32)            # (tn, Dn)
    kv = kv_ref[0]                                # (Npad, 2*hidden) bf16 (precomputed)
    edge_row = edge_ref[0]                        # (tn, Npad, De) bf16
    n_row = node_row.shape[0]
    n_all = kv.shape[0]

    x_row = _layer_norm(node_row, nn_g[0], nn_b[0]).astype(BF16)
    y_row = _layer_norm(edge_row, en_g[0], en_b[0]).astype(BF16)

    # fused q|gate projection (1/sqrt(head_dim) is folded into the q weight)
    qg = jnp.dot(x_row, w_qg[...], preferred_element_type=F32)        # (tn, 2*hidden)
    q = qg[:, :hidden]
    g = jax.nn.sigmoid(qg[:, hidden:] + bg[0])
    k = kv[:, :hidden]
    v = kv[:, hidden:]

    # head-batched (leading-batch) layout
    q_h = jnp.transpose(q.reshape(n_row, heads, head_dim), (1, 0, 2)).astype(BF16)
    k_h = jnp.transpose(k.reshape(n_all, heads, head_dim), (1, 0, 2))
    v_h = jnp.transpose(v.reshape(n_all, heads, head_dim), (1, 0, 2))

    bias = jnp.einsum('ijd,dh->hij', y_row, wb[...],
                      preferred_element_type=F32)                     # (H, tn, Npad)
    logits = jnp.einsum('hid,hjd->hij', q_h, k_h,
                        preferred_element_type=F32) + bias
    if n_valid < n_all:                                               # static padding mask
        col = jax.lax.broadcasted_iota(jnp.int32, (1, 1, n_all), 2)
        logits = jnp.where(col < n_valid, logits, _NEG_INF)
    m = jnp.max(logits, axis=-1, keepdims=True)
    p = jnp.exp(logits - m)
    attn = p * pl.reciprocal(jnp.sum(p, axis=-1, keepdims=True), approx=True)
    o_h = jnp.einsum('hij,hjd->hid', attn.astype(BF16), v_h,
                     preferred_element_type=F32)                      # (H, tn, hd)
    o = jnp.transpose(o_h, (1, 0, 2)).reshape(n_row, hidden) * g
    attn_out = jnp.dot(o.astype(BF16), wo[...], preferred_element_type=F32) + bo[0]
    node1 = node_row + attn_out

    # fused node Transition (+ residual)
    h = _layer_norm(node1, t_g[0], t_b[0]).astype(BF16)
    h = jnp.dot(h, t_w1[...], preferred_element_type=F32) + t_b1[0]
    h = jnp.maximum(h, 0.0).astype(BF16)
    h = jnp.dot(h, t_w2[...], preferred_element_type=F32) + t_b2[0]
    out_ref[0] = (node1 + h).astype(out_ref.dtype)


def node_update(node, edge, ap, tp, n_valid):
    B, Np, Dn = node.shape
    De = edge.shape[-1]
    heads = ap['wb'].shape[1]
    hidden = ap['w_qg'].shape[1] // 2
    head_dim = hidden // heads

    # hoisted k|v projection: LayerNorm(node) @ W_kv once per block (plain XLA matmul)
    xn = _layer_norm(node, ap['nn_g'], ap['nn_b'])
    kv = jnp.dot(xn.astype(BF16), ap['w_kv'], preferred_element_type=F32).astype(BF16)

    per_row = 6 * Np * De + 12 * heads * Np + 16 * (Dn + 4 * hidden)
    tn = _fit_row_tile(Np, per_row, fixed_bytes=8 * Np * hidden, frac=0.5)
    grid = (B, Np // tn)
    params = [ap['nn_g'], ap['nn_b'], ap['en_g'], ap['en_b'],
              ap['w_qg'], ap['bg'], ap['wb'], ap['wo'], ap['bo'],
              tp['g'], tp['b'], tp['w1'], tp['b1'], tp['w2'], tp['b2']]
    kernel = functools.partial(_node_update_kernel, heads=heads, head_dim=head_dim,
                               n_valid=n_valid)
    flops = (2 * B * Np * Dn * 2 * hidden + 4 * B * heads * Np * Np * head_dim
             + 2 * B * Np * Np * De * heads + 2 * B * Np * hidden * Dn
             + 8 * B * Np * Dn * Dn)
    bytes_acc = 8 * B * Np * Dn + 2 * B * Np * 2 * hidden + 2 * B * Np * Np * De
    return pl.pallas_call(
        kernel,
        out_shape=jax.ShapeDtypeStruct((B, Np, Dn), node.dtype),
        grid=grid,
        in_specs=[pl.BlockSpec((1, tn, Dn), lambda b, i: (b, i, 0)),
                  pl.BlockSpec((1, Np, 2 * hidden), lambda b, i: (b, 0, 0)),
                  pl.BlockSpec((1, tn, Np, De), lambda b, i: (b, i, 0, 0))]
                 + [_rep_spec(w.shape, 2) for w in params],
        out_specs=pl.BlockSpec((1, tn, Dn), lambda b, i: (b, i, 0)),
        compiler_params=pltpu.CompilerParams(
            dimension_semantics=("parallel", "parallel"),
            vmem_limit_bytes=_vmem_limit()),
        cost_estimate=_cost(flops, bytes_acc,
                            transcendentals=B * heads * Np * Np + B * Np * hidden),
    )(node, kv, edge, *params)


# ---------------------------------------------------------------------------
# 2) edge_pre: edge += NodeToEdge(node), then triangle(outgoing) gated L/R projections
#    (q/k projections and the diff-branch images are hoisted to the wrapper;
#     gated L/R are stored feature-major (B, Dh, N, N) bf16 so the mix is transpose-free)
# ---------------------------------------------------------------------------
def _edge_pre_kernel(q_ref, k_ref, qd_ref, kd_ref, edge_ref,
                     wo_prod, bo2, t_ng, t_nb, t_wlrg, t_blrg,
                     edge1_ref, lt_ref, rt_ref, *, dh, n_valid):
    q_all = q_ref[0]                              # (Npad, Hn) f32
    kr = k_ref[0]                                 # (ti, Hn) f32
    qd = qd_ref[0]                                # (Npad, De) f32  (= q @ Wo_diff)
    kd = kd_ref[0]                                # (ti, De) f32    (= k @ Wo_diff)
    edge_row = edge_ref[0].astype(F32)            # (ti, Npad, De)
    ti, npad = edge_row.shape[0], edge_row.shape[1]

    # ---- NodeToEdge for this row tile: only `prod` is materialised;
    #      cat([prod,diff]) @ Wo == prod @ Wp + (q@Wd)[cols] - (k@Wd)[rows]
    prod = (q_all[None, :, :] * kr[:, None, :]).astype(BF16)           # (ti, Npad, Hn)
    n2e = (jnp.dot(prod, wo_prod[...], preferred_element_type=F32)
           + qd[None, :, :] - kd[:, None, :] + bo2[0])
    edge1 = edge_row + n2e
    edge1_ref[0] = edge1.astype(edge1_ref.dtype)

    # ---- triangle(outgoing): fused left|right|left_gate projection, gated ----
    x = _layer_norm(edge1, t_ng[0], t_nb[0]).astype(BF16)
    lrg = jnp.dot(x, t_wlrg[...], preferred_element_type=F32) + t_blrg[0]   # (ti,Npad,3dh)
    gate = jax.nn.sigmoid(lrg[..., 2 * dh:])
    # NOTE: the reference applies left_gate to BOTH operands (right_gate unused) - kept.
    lt = lrg[..., :dh] * gate
    rt = lrg[..., dh:2 * dh] * gate
    if n_valid < npad:                            # zero padded rows/cols -> masked k-sums
        row0 = pl.program_id(1) * ti
        ri = jax.lax.broadcasted_iota(jnp.int32, (ti, npad, 1), 0) + row0
        cj = jax.lax.broadcasted_iota(jnp.int32, (ti, npad, 1), 1)
        valid = jnp.logical_and(ri < n_valid, cj < n_valid)
        lt = jnp.where(valid, lt, 0.0)
        rt = jnp.where(valid, rt, 0.0)
    # cast before the feature-major transpose: XLU moves bf16 and only 2*dh planes
    lt_ref[0] = jnp.transpose(lt.astype(BF16), (2, 0, 1))
    rt_ref[0] = jnp.transpose(rt.astype(BF16), (2, 0, 1))


def edge_pre(q_all, k_all, qd, kd, edge, n2e_p, tri_p, n_valid):
    B, Np, Hn = q_all.shape
    De = edge.shape[-1]
    dh = tri_p['w_lrg'].shape[1] // 3
    per_row = 14 * Np * De + 2 * Np * Hn + 28 * Np * dh
    ti = _fit_row_tile(Np, per_row, fixed_bytes=8 * Np * (Hn + De), frac=0.5)
    grid = (B, Np // ti)
    params = [n2e_p['wo_prod'], n2e_p['bo'],
              tri_p['ng'], tri_p['nb'], tri_p['w_lrg'], tri_p['b_lrg']]
    out_shape = (jax.ShapeDtypeStruct((B, Np, Np, De), BF16),
                 jax.ShapeDtypeStruct((B, dh, Np, Np), BF16),
                 jax.ShapeDtypeStruct((B, dh, Np, Np), BF16))
    kernel = functools.partial(_edge_pre_kernel, dh=dh, n_valid=n_valid)
    flops = 2 * B * Np * Np * (Hn * De + 3 * De * dh)
    bytes_acc = 4 * B * Np * Np * De + 4 * B * dh * Np * Np + 4 * B * Np * (Hn + De)
    return pl.pallas_call(
        kernel, out_shape=out_shape, grid=grid,
        in_specs=[pl.BlockSpec((1, Np, Hn), lambda b, i: (b, 0, 0)),
                  pl.BlockSpec((1, ti, Hn), lambda b, i: (b, i, 0)),
                  pl.BlockSpec((1, Np, De), lambda b, i: (b, 0, 0)),
                  pl.BlockSpec((1, ti, De), lambda b, i: (b, i, 0)),
                  pl.BlockSpec((1, ti, Np, De), lambda b, i: (b, i, 0, 0))]
                 + [_rep_spec(w.shape, 2) for w in params],
        out_specs=(pl.BlockSpec((1, ti, Np, De), lambda b, i: (b, i, 0, 0)),
                   pl.BlockSpec((1, dh, ti, Np), lambda b, i: (b, 0, i, 0)),
                   pl.BlockSpec((1, dh, ti, Np), lambda b, i: (b, 0, i, 0))),
        compiler_params=pltpu.CompilerParams(
            dimension_semantics=("parallel", "parallel"),
            vmem_limit_bytes=_vmem_limit()),
        cost_estimate=_cost(flops, bytes_acc, transcendentals=B * Np * Np * dh),
    )(q_all, k_all, qd, kd, edge, *params)


# ---------------------------------------------------------------------------
# Triangle epilogue (shared): out LayerNorm over d, out_gate (recomputed from the
# resident residual tile), output projection, residual add.
# ---------------------------------------------------------------------------
def _tri_epilogue(mixed_t, x_res, ng, nb, wog, bog, ong, onb, wo, bo):
    # mixed_t : (dh, ti, N) f32 fully accumulated mix; x_res : (ti, N, De) f32 residual in
    xin = _layer_norm(x_res, ng, nb).astype(BF16)
    ogate = jax.nn.sigmoid(jnp.dot(xin, wog, preferred_element_type=F32) + bog)  # (ti,N,dh)
    mu = jnp.mean(mixed_t, axis=0, keepdims=True)                  # LayerNorm over d (axis 0)
    var = jnp.mean((mixed_t - mu) ** 2, axis=0, keepdims=True)
    normed_t = (mixed_t - mu) * jax.lax.rsqrt(var + EPS)
    normed = jnp.transpose(normed_t, (1, 2, 0)) * ong + onb        # (ti, N, dh)
    gated = (normed * ogate).astype(BF16)
    out = jnp.dot(gated, wo, preferred_element_type=F32) + bo      # (ti, N, De)
    return x_res + out


# ---------------------------------------------------------------------------
# 3) triangle(outgoing) mix (+res) fused with triangle(ingoing) projections
#    outgoing (ref: '...ikd,...jkd->...ijd'):  out[d,i,j] = sum_k L[d,i,k] * R[d,j,k]
# ---------------------------------------------------------------------------
def _tri_out_mix_kernel(lt_ref, rt_ref, eres_ref,
                        ng, nb, wog, bog, ong, onb, wo, bo,
                        n_ng, n_nb, n_wlrg, n_blrg,
                        eout_ref, ltn_ref, rtn_ref, acc_ref, *, dh, n_valid):
    kk = pl.program_id(2)

    @pl.when(kk == 0)
    def _():
        acc_ref[...] = jnp.zeros_like(acc_ref)

    acc_ref[...] += jnp.einsum('dik,djk->dij', lt_ref[0], rt_ref[0],
                               preferred_element_type=F32)

    @pl.when(kk == pl.num_programs(2) - 1)
    def _():
        edge_res = eres_ref[0].astype(F32)                 # (ti, Npad, De)
        ti, npad = edge_res.shape[0], edge_res.shape[1]
        edge_new = _tri_epilogue(acc_ref[...], edge_res,
                                 ng[0], nb[0], wog[...], bog[0],
                                 ong[0], onb[0], wo[...], bo[0])
        eout_ref[0] = edge_new.astype(eout_ref.dtype)
        # fused: gated left/right projections feeding the following ingoing triangle
        x = _layer_norm(edge_new, n_ng[0], n_nb[0]).astype(BF16)
        lrg = jnp.dot(x, n_wlrg[...], preferred_element_type=F32) + n_blrg[0]
        gate = jax.nn.sigmoid(lrg[..., 2 * dh:])
        lt = lrg[..., :dh] * gate
        rt = lrg[..., dh:2 * dh] * gate
        if n_valid < npad:
            row0 = pl.program_id(1) * ti
            ri = jax.lax.broadcasted_iota(jnp.int32, (ti, npad, 1), 0) + row0
            cj = jax.lax.broadcasted_iota(jnp.int32, (ti, npad, 1), 1)
            valid = jnp.logical_and(ri < n_valid, cj < n_valid)
            lt = jnp.where(valid, lt, 0.0)
            rt = jnp.where(valid, rt, 0.0)
        ltn_ref[0] = jnp.transpose(lt.astype(BF16), (2, 0, 1))
        rtn_ref[0] = jnp.transpose(rt.astype(BF16), (2, 0, 1))


def tri_out_mix(lt, rt, edge1, tri_p, tri_in_p, n_valid):
    B, dh, Np, _ = lt.shape
    De = edge1.shape[-1]
    ti, tk = _tri_tiles(Np, De, dh)
    grid = (B, Np // ti, Np // tk)
    params = [tri_p['ng'], tri_p['nb'], tri_p['wog'], tri_p['bog'],
              tri_p['ong'], tri_p['onb'], tri_p['wo'], tri_p['bo'],
              tri_in_p['ng'], tri_in_p['nb'], tri_in_p['w_lrg'], tri_in_p['b_lrg']]
    out_shape = (jax.ShapeDtypeStruct((B, Np, Np, De), BF16),
                 jax.ShapeDtypeStruct((B, dh, Np, Np), BF16),
                 jax.ShapeDtypeStruct((B, dh, Np, Np), BF16))
    kernel = functools.partial(_tri_out_mix_kernel, dh=dh, n_valid=n_valid)
    flops = 2 * B * dh * Np * Np * Np + 2 * B * Np * Np * (2 * De * dh + 3 * De * dh)
    bytes_acc = 6 * B * dh * Np * Np + 4 * B * Np * Np * De
    return pl.pallas_call(
        kernel, out_shape=out_shape, grid=grid,
        in_specs=[pl.BlockSpec((1, dh, ti, tk), lambda b, i, k: (b, 0, i, k)),
                  pl.BlockSpec((1, dh, Np, tk), lambda b, i, k: (b, 0, 0, k)),
                  _single_buffered_spec((1, ti, Np, De), lambda b, i, k: (b, i, 0, 0))]
                 + [_rep_spec(w.shape, 3) for w in params],
        out_specs=(pl.BlockSpec((1, ti, Np, De), lambda b, i, k: (b, i, 0, 0)),
                   pl.BlockSpec((1, dh, ti, Np), lambda b, i, k: (b, 0, i, 0)),
                   pl.BlockSpec((1, dh, ti, Np), lambda b, i, k: (b, 0, i, 0))),
        scratch_shapes=[pltpu.VMEM((dh, ti, Np), F32)],
        compiler_params=pltpu.CompilerParams(
            dimension_semantics=("parallel", "parallel", "arbitrary"),
            vmem_limit_bytes=_vmem_limit()),
        cost_estimate=_cost(flops, bytes_acc, transcendentals=2 * B * Np * Np * dh),
    )(lt, rt, edge1, *params)


# ---------------------------------------------------------------------------
# 4) triangle(ingoing) mix (+res) fused with the edge Transition (+res)
#    ingoing (ref: '...kjd,...kid->...ijd'):  out[d,i,j] = sum_k L[d,k,j] * R[d,k,i]
# ---------------------------------------------------------------------------
def _tri_in_mix_kernel(lt_ref, rt_ref, eres_ref,
                       ng, nb, wog, bog, ong, onb, wo, bo,
                       t_g, t_b, t_w1, t_b1, t_w2, t_b2,
                       eout_ref, acc_ref):
    kk = pl.program_id(2)

    @pl.when(kk == 0)
    def _():
        acc_ref[...] = jnp.zeros_like(acc_ref)

    acc_ref[...] += jnp.einsum('dkj,dki->dij', lt_ref[0], rt_ref[0],
                               preferred_element_type=F32)

    @pl.when(kk == pl.num_programs(2) - 1)
    def _():
        edge_res = eres_ref[0].astype(F32)
        edge_new = _tri_epilogue(acc_ref[...], edge_res,
                                 ng[0], nb[0], wog[...], bog[0],
                                 ong[0], onb[0], wo[...], bo[0])
        # fused edge Transition (+ residual)
        h = _layer_norm(edge_new, t_g[0], t_b[0]).astype(BF16)
        h = jnp.dot(h, t_w1[...], preferred_element_type=F32) + t_b1[0]
        h = jnp.maximum(h, 0.0).astype(BF16)
        h = jnp.dot(h, t_w2[...], preferred_element_type=F32) + t_b2[0]
        eout_ref[0] = (edge_new + h).astype(eout_ref.dtype)


def tri_in_mix(lt, rt, edge2, tri_p, trans_p):
    B, dh, Np, _ = lt.shape
    De = edge2.shape[-1]
    ti, tk = _tri_tiles(Np, De, dh)
    grid = (B, Np // ti, Np // tk)
    params = [tri_p['ng'], tri_p['nb'], tri_p['wog'], tri_p['bog'],
              tri_p['ong'], tri_p['onb'], tri_p['wo'], tri_p['bo'],
              trans_p['g'], trans_p['b'], trans_p['w1'], trans_p['b1'],
              trans_p['w2'], trans_p['b2']]
    flops = 2 * B * dh * Np * Np * Np + 2 * B * Np * Np * (2 * De * dh + 4 * De * De)
    bytes_acc = 4 * B * dh * Np * Np + 4 * B * Np * Np * De
    return pl.pallas_call(
        _tri_in_mix_kernel,
        out_shape=jax.ShapeDtypeStruct((B, Np, Np, De), BF16),
        grid=grid,
        in_specs=[pl.BlockSpec((1, dh, tk, Np), lambda b, i, k: (b, 0, k, 0)),
                  pl.BlockSpec((1, dh, tk, ti), lambda b, i, k: (b, 0, k, i)),
                  _single_buffered_spec((1, ti, Np, De), lambda b, i, k: (b, i, 0, 0))]
                 + [_rep_spec(w.shape, 3) for w in params],
        out_specs=pl.BlockSpec((1, ti, Np, De), lambda b, i, k: (b, i, 0, 0)),
        scratch_shapes=[pltpu.VMEM((dh, ti, Np), F32)],
        compiler_params=pltpu.CompilerParams(
            dimension_semantics=("parallel", "parallel", "arbitrary"),
            vmem_limit_bytes=_vmem_limit()),
        cost_estimate=_cost(flops, bytes_acc, transcendentals=2 * B * Np * Np * dh),
    )(lt, rt, edge2, *params)


# ---------------------------------------------------------------------------
# GraphBlock / GraphModule wrappers
# ---------------------------------------------------------------------------
def graph_block(node, edge, p, n_valid):
    # NodeUpdate: node + attention(node, edge); then + transition   (fused kernel)
    node = node_update(node, edge, p['attn'], p['node_trans'], n_valid)

    # NodeToEdge per-node projections, hoisted out of the row-tiled edge kernel.
    n2e = p['n2e']
    s = _layer_norm(node, n2e['g'], n2e['b']).astype(BF16)
    q_all = jnp.dot(s, n2e['wp_q'], preferred_element_type=F32) + n2e['bp_q']
    k_all = jnp.dot(s, n2e['wp_k'], preferred_element_type=F32) + n2e['bp_k']
    # diff-branch images for the concat-free o_proj: diff@Wd = (q@Wd)[cols] - (k@Wd)[rows]
    qd = jnp.dot(q_all.astype(BF16), n2e['wo_diff'], preferred_element_type=F32)
    kd = jnp.dot(k_all.astype(BF16), n2e['wo_diff'], preferred_element_type=F32)

    # Edge path (row-tiled, bf16 residual stream): n2e residual -> tri(out) -> tri(in) -> trans
    # TODO(synk): nn.Dropout(p=0.1) inside EdgeUpdate is stochastic; treated as identity (eval mode).
    edge1, lt, rt = edge_pre(q_all, k_all, qd, kd, edge, n2e, p['tri_out'], n_valid)
    edge2, lt2, rt2 = tri_out_mix(lt, rt, edge1, p['tri_out'], p['tri_in'], n_valid)
    edge3 = tri_in_mix(lt2, rt2, edge2, p['tri_in'], p['edge_trans'])
    return node, edge3


def graph_module(node, edge, params_list):
    B, N, _ = node.shape
    out_dtype = edge.dtype
    Np = _pad_len(N)
    if Np != N:  # pad to a multiple of 128 so all stages keep lane-aligned tiling
        node = jnp.pad(node, ((0, 0), (0, Np - N), (0, 0)))
        edge = jnp.pad(edge, ((0, 0), (0, Np - N), (0, Np - N), (0, 0)))
    edge = edge.astype(BF16)                 # bf16 residual stream between kernels
    for p in params_list:
        node, edge = graph_block(node, edge, p, N)
    if Np != N:
        node = node[:, :N]
        edge = edge[:, :N, :N]
    return node, edge.astype(out_dtype)


# ---------------------------------------------------------------------------
# Deterministic synthetic parameters (mirrors the torch __init__ shapes/inits,
# re-packed into the fused layouts used by the kernels; matmul weights are bf16)
# ---------------------------------------------------------------------------
def _w(key, shape, scale=0.1):
    return scale * jax.random.normal(key, shape, dtype=F32)


def make_transition_params(key, dim, n=2):
    k1, k2, k3, k4 = jax.random.split(key, 4)
    return dict(g=jnp.ones((1, dim), F32), b=jnp.zeros((1, dim), F32),
                w1=_w(k1, (dim, dim * n)).astype(BF16), b1=_w(k2, (1, dim * n)),
                w2=_w(k3, (dim * n, dim)).astype(BF16), b2=_w(k4, (1, dim)))


def make_triangle_params(key, dim):
    # hidden_dim = dim; gate linears initialised weight=0 / bias=1 as in the reference.
    ks = jax.random.split(key, 6)
    wl, bl = _w(ks[0], (dim, dim)), _w(ks[1], (1, dim))
    wr, br = _w(ks[2], (dim, dim)), _w(ks[3], (1, dim))
    wlg, blg = jnp.zeros((dim, dim), F32), jnp.ones((1, dim), F32)
    # NOTE: right_gate params exist in the reference but their output is unused
    # (left_gate is applied to both operands) - that behaviour is reproduced exactly.
    return dict(
        ng=jnp.ones((1, dim), F32), nb=jnp.zeros((1, dim), F32),
        w_lrg=jnp.concatenate([wl, wr, wlg], axis=1).astype(BF16),  # fused left|right|left_gate
        b_lrg=jnp.concatenate([bl, br, blg], axis=1),
        wog=jnp.zeros((dim, dim), BF16), bog=jnp.ones((1, dim), F32),
        ong=jnp.ones((1, dim), F32), onb=jnp.zeros((1, dim), F32),
        wo=_w(ks[4], (dim, dim)).astype(BF16), bo=_w(ks[5], (1, dim)))


def make_attn_params(key, node_dim, edge_dim, heads=8, head_dim=32):
    hidden = heads * head_dim
    ks = jax.random.split(key, 8)
    wq, wk = _w(ks[0], (node_dim, hidden)), _w(ks[1], (node_dim, hidden))
    wv, wg = _w(ks[2], (node_dim, hidden)), _w(ks[3], (node_dim, hidden))
    return dict(
        nn_g=jnp.ones((1, node_dim), F32), nn_b=jnp.zeros((1, node_dim), F32),
        en_g=jnp.ones((1, edge_dim), F32), en_b=jnp.zeros((1, edge_dim), F32),
        w_kv=jnp.concatenate([wk, wv], axis=1).astype(BF16),                 # fused k|v
        w_qg=jnp.concatenate([wq * head_dim ** -0.5, wg], axis=1).astype(BF16),  # scale folded
        bg=_w(ks[4], (1, hidden)),
        wb=_w(ks[5], (edge_dim, heads)).astype(BF16),
        wo=_w(ks[6], (hidden, node_dim)).astype(BF16), bo=_w(ks[7], (1, node_dim)))


def make_n2e_params(key, node_dim, edge_dim):
    hidden = node_dim  # default hidden_dim = node_dim
    k1, k2 = jax.random.split(key, 2)
    wp = _w(k1, (node_dim, 2 * hidden))
    wo = _w(k2, (2 * hidden, edge_dim))
    return dict(
        g=jnp.ones((1, node_dim), F32), b=jnp.zeros((1, node_dim), F32),
        wp_q=wp[:, :hidden].astype(BF16), wp_k=wp[:, hidden:].astype(BF16),
        bp_q=jnp.zeros((1, hidden), F32), bp_k=jnp.zeros((1, hidden), F32),
        wo_prod=wo[:hidden].astype(BF16), wo_diff=wo[hidden:].astype(BF16),  # concat-free o_proj
        bo=jnp.zeros((1, edge_dim), F32))


def make_block_params(key, node_dim, edge_dim):
    ks = jax.random.split(key, 6)
    return dict(
        attn=make_attn_params(ks[0], node_dim, edge_dim),
        node_trans=make_transition_params(ks[1], node_dim),
        n2e=make_n2e_params(ks[2], node_dim, edge_dim),
        tri_out=make_triangle_params(ks[3], edge_dim),
        tri_in=make_triangle_params(ks[4], edge_dim),
        edge_trans=make_transition_params(ks[5], edge_dim))


# ---------------------------------------------------------------------------
if __name__ == "__main__":
    B, N, node_dim, edge_dim, depth = 2, 8, 32, 16, 2

    key = jax.random.PRNGKey(0)
    k_node, k_edge, k_params = jax.random.split(key, 3)
    node = jax.random.normal(k_node, (B, N, node_dim), dtype=F32)
    edge = jax.random.normal(k_edge, (B, N, N, edge_dim), dtype=F32)

    block_keys = jax.random.split(k_params, depth)
    params = [make_block_params(k, node_dim, edge_dim) for k in block_keys]

    fwd = jax.jit(graph_module)
    node_out, edge_out = fwd(node, edge, params)
    node_out = jax.block_until_ready(node_out)
    edge_out = jax.block_until_ready(edge_out)

    assert node_out.shape == (B, N, node_dim)
    assert edge_out.shape == (B, N, N, edge_dim)
    assert bool(jnp.all(jnp.isfinite(node_out))) and bool(jnp.all(jnp.isfinite(edge_out)))
    print("KERNEL_OK")
</pallas_src>

<mosaic_0001>
module attributes {stable_mosaic.version = 11 : i64} {
  func.func @_edge_pre_kernel(%arg0: i32, %arg1: i32, %arg2: memref<1x8x32xf32, #tpu.memory_space<vmem>>, %arg3: memref<1x8x32xf32, #tpu.memory_space<vmem>>, %arg4: memref<1x8x16xf32, #tpu.memory_space<vmem>>, %arg5: memref<1x8x16xf32, #tpu.memory_space<vmem>>, %arg6: memref<1x8x8x16xbf16, #tpu.memory_space<vmem>>, %arg7: memref<32x16xbf16, #tpu.memory_space<vmem>>, %arg8: memref<1x16xf32, #tpu.memory_space<vmem>>, %arg9: memref<1x16xf32, #tpu.memory_space<vmem>>, %arg10: memref<1x16xf32, #tpu.memory_space<vmem>>, %arg11: memref<16x48xbf16, #tpu.memory_space<vmem>>, %arg12: memref<1x48xf32, #tpu.memory_space<vmem>>, %arg13: memref<1x8x8x16xbf16, #tpu.memory_space<vmem>>, %arg14: memref<1x16x8x8xbf16, #tpu.memory_space<vmem>>, %arg15: memref<1x16x8x8xbf16, #tpu.memory_space<vmem>>) attributes {dimension_semantics = [#tpu.dimension_semantics<parallel>, #tpu.dimension_semantics<parallel>], iteration_bounds = array<i64: 2, 1>, scalar_prefetch = 0 : i64, scratch_operands = 0 : i64, tpu.core_type = #tpu.core_type<tc>, window_params = [{transform_indices = @transform_0, window_bounds = array<i64: 1, 8, 32>}, {transform_indices = @transform_1, window_bounds = array<i64: 1, 8, 32>}, {transform_indices = @transform_2, window_bounds = array<i64: 1, 8, 16>}, {transform_indices = @transform_3, window_bounds = array<i64: 1, 8, 16>}, {transform_indices = @transform_4, window_bounds = array<i64: 1, 8, 8, 16>}, {pipeline_mode = #tpu.pipeline_mode<synchronous>, transform_indices = @transform_5, window_bounds = array<i64: 32, 16>}, {pipeline_mode = #tpu.pipeline_mode<synchronous>, transform_indices = @transform_6, window_bounds = array<i64: 1, 16>}, {pipeline_mode = #tpu.pipeline_mode<synchronous>, transform_indices = @transform_7, window_bounds = array<i64: 1, 16>}, {pipeline_mode = #tpu.pipeline_mode<synchronous>, transform_indices = @transform_8, window_bounds = array<i64: 1, 16>}, {pipeline_mode = #tpu.pipeline_mode<synchronous>, transform_indices = @transform_9, window_bounds = array<i64: 16, 48>}, {pipeline_mode = #tpu.pipeline_mode<synchronous>, transform_indices = @transform_10, window_bounds = array<i64: 1, 48>}, {transform_indices = @transform_11, window_bounds = array<i64: 1, 8, 8, 16>}, {transform_indices = @transform_12, window_bounds = array<i64: 1, 16, 8, 8>}, {transform_indices = @transform_13, window_bounds = array<i64: 1, 16, 8, 8>}]} {
    %c0 = arith.constant 0 : index
    %c0_0 = arith.constant 0 : index
    %c0_1 = arith.constant 0 : index
    %0 = vector.load %arg2[%c0, %c0_0, %c0_1] : memref<1x8x32xf32, #tpu.memory_space<vmem>>, vector<1x8x32xf32>
    %1 = vector.shape_cast %0 : vector<1x8x32xf32> to vector<8x32xf32>
    %c0_2 = arith.constant 0 : index
    %c0_3 = arith.constant 0 : index
    %c0_4 = arith.constant 0 : index
    %2 = vector.load %arg3[%c0_2, %c0_3, %c0_4] : memref<1x8x32xf32, #tpu.memory_space<vmem>>, vector<1x8x32xf32>
    %3 = vector.shape_cast %2 : vector<1x8x32xf32> to vector<8x32xf32>
    %c0_5 = arith.constant 0 : index
    %c0_6 = arith.constant 0 : index
    %c0_7 = arith.constant 0 : index
    %4 = vector.load %arg4[%c0_5, %c0_6, %c0_7] : memref<1x8x16xf32, #tpu.memory_space<vmem>>, vector<1x8x16xf32>
    %5 = vector.shape_cast %4 : vector<1x8x16xf32> to vector<8x16xf32>
    %c0_8 = arith.constant 0 : index
    %c0_9 = arith.constant 0 : index
    %c0_10 = arith.constant 0 : index
    %6 = vector.load %arg5[%c0_8, %c0_9, %c0_10] : memref<1x8x16xf32, #tpu.memory_space<vmem>>, vector<1x8x16xf32>
    %7 = vector.shape_cast %6 : vector<1x8x16xf32> to vector<8x16xf32>
    %c0_11 = arith.constant 0 : index
    %c0_12 = arith.constant 0 : index
    %c0_13 = arith.constant 0 : index
    %c0_14 = arith.constant 0 : index
    %8 = vector.load %arg6[%c0_11, %c0_12, %c0_13, %c0_14] : memref<1x8x8x16xbf16, #tpu.memory_space<vmem>>, vector<1x8x8x16xbf16>
    %9 = vector.shape_cast %8 : vector<1x8x8x16xbf16> to vector<8x8x16xbf16>
    %10 = arith.extf %9 : vector<8x8x16xbf16> to vector<8x8x16xf32>
    %11 = vector.shape_cast %1 : vector<8x32xf32> to vector<1x8x32xf32>
    %12 = vector.shape_cast %3 : vector<8x32xf32> to vector<8x1x32xf32>
    %13 = vector.broadcast %11 : vector<1x8x32xf32> to vector<8x8x32xf32>
    %14 = vector.broadcast %12 : vector<8x1x32xf32> to vector<8x8x32xf32>
    %15 = arith.mulf %13, %14 : vector<8x8x32xf32>
    %16 = arith.truncf %15 : vector<8x8x32xf32> to vector<8x8x32xbf16>
    %c0_15 = arith.constant 0 : index
    %c0_16 = arith.constant 0 : index
    %17 = vector.load %arg7[%c0_15, %c0_16] : memref<32x16xbf16, #tpu.memory_space<vmem>>, vector<32x16xbf16>
    %cst = arith.constant dense<0.000000e+00> : vector<8x8x16xf32>
    %18 = tpu.matmul %16, %17, %cst {dimension_numbers = #tpu.dot_dimension_numbers<[2], [0], [0, 1], [1], [0, 0, 0, 1, 1, 1], [], []>} : vector<8x8x32xbf16>, vector<32x16xbf16>, vector<8x8x16xf32> -> vector<8x8x16xf32>
    %19 = vector.shape_cast %5 : vector<8x16xf32> to vector<1x8x16xf32>
    %20 = vector.broadcast %19 : vector<1x8x16xf32> to vector<8x8x16xf32>
    %21 = arith.addf %18, %20 : vector<8x8x16xf32>
    %22 = vector.shape_cast %7 : vector<8x16xf32> to vector<8x1x16xf32>
    %23 = vector.broadcast %22 : vector<8x1x16xf32> to vector<8x8x16xf32>
    %24 = arith.subf %21, %23 : vector<8x8x16xf32>
    %c0_17 = arith.constant 0 : index
    %c0_18 = arith.constant 0 : index
    %25 = vector.load %arg8[%c0_17, %c0_18] : memref<1x16xf32, #tpu.memory_space<vmem>>, vector<1x16xf32>
    %26 = vector.shape_cast %25 : vector<1x16xf32> to vector<16xf32>
    %27 = vector.shape_cast %26 : vector<16xf32> to vector<1x1x16xf32>
    %28 = vector.broadcast %27 : vector<1x1x16xf32> to vector<8x8x16xf32>
    %29 = arith.addf %24, %28 : vector<8x8x16xf32>
    %30 = arith.addf %10, %29 : vector<8x8x16xf32>
    %31 = arith.truncf %30 : vector<8x8x16xf32> to vector<8x8x16xbf16>
    %c0_19 = arith.constant 0 : index
    %c0_20 = arith.constant 0 : index
    %c0_21 = arith.constant 0 : index
    %c0_22 = arith.constant 0 : index
    %32 = vector.load %arg13[%c0_19, %c0_20, %c0_21, %c0_22] : memref<1x8x8x16xbf16, #tpu.memory_space<vmem>>, vector<1x8x8x16xbf16>
    %33 = vector.shape_cast %32 : vector<1x8x8x16xbf16> to vector<8x8x16xbf16>
    %34 = vector.shape_cast %31 : vector<8x8x16xbf16> to vector<1x8x8x16xbf16>
    tpu.vector_store %arg13[%c0_19, %c0_20, %c0_21, %c0_22], %34 {strides = array<i32>} : memref<1x8x8x16xbf16, #tpu.memory_space<vmem>>, vector<1x8x8x16xbf16>,
    %c0_23 = arith.constant 0 : index
    %c0_24 = arith.constant 0 : index
    %35 = vector.load %arg9[%c0_23, %c0_24] : memref<1x16xf32, #tpu.memory_space<vmem>>, vector<1x16xf32>
    %36 = vector.shape_cast %35 : vector<1x16xf32> to vector<16xf32>
    %c0_25 = arith.constant 0 : index
    %c0_26 = arith.constant 0 : index
    %37 = vector.load %arg10[%c0_25, %c0_26] : memref<1x16xf32, #tpu.memory_space<vmem>>, vector<1x16xf32>
    %38 = vector.shape_cast %37 : vector<1x16xf32> to vector<16xf32>
    %cst_27 = arith.constant dense<0.000000e+00> : vector<8x8xf32>
    %39 = vector.multi_reduction <add>, %30, %cst_27 [2] : vector<8x8x16xf32> to vector<8x8xf32>
    %40 = vector.shape_cast %39 : vector<8x8xf32> to vector<8x8x1xf32>
    %cst_28 = arith.constant 1.600000e+01 : f32
    %41 = vector.broadcast %cst_28 : f32 to vector<8x8x1xf32>
    %42 = arith.divf %40, %41 : vector<8x8x1xf32>
    %43 = vector.broadcast %42 : vector<8x8x1xf32> to vector<8x8x16xf32>
    %44 = arith.subf %30, %43 : vector<8x8x16xf32>
    %45 = arith.mulf %44, %44 : vector<8x8x16xf32>
    %cst_29 = arith.constant dense<0.000000e+00> : vector<8x8xf32>
    %46 = vector.multi_reduction <add>, %45, %cst_29 [2] : vector<8x8x16xf32> to vector<8x8xf32>
    %47 = vector.shape_cast %46 : vector<8x8xf32> to vector<8x8x1xf32>
    %cst_30 = arith.constant 1.600000e+01 : f32
    %48 = vector.broadcast %cst_30 : f32 to vector<8x8x1xf32>
    %49 = arith.divf %47, %48 : vector<8x8x1xf32>
    %50 = vector.broadcast %42 : vector<8x8x1xf32> to vector<8x8x16xf32>
    %51 = arith.subf %30, %50 : vector<8x8x16xf32>
    %cst_31 = arith.constant 9.99999974E-6 : f32
    %52 = vector.broadcast %cst_31 : f32 to vector<8x8x1xf32>
    %53 = arith.addf %49, %52 : vector<8x8x1xf32>
    %54 = math.rsqrt %53 : vector<8x8x1xf32>
    %55 = vector.broadcast %54 : vector<8x8x1xf32> to vector<8x8x16xf32>
    %56 = arith.mulf %51, %55 : vector<8x8x16xf32>
    %57 = vector.shape_cast %36 : vector<16xf32> to vector<1x1x16xf32>
    %58 = vector.broadcast %57 : vector<1x1x16xf32> to vector<8x8x16xf32>
    %59 = arith.mulf %56, %58 : vector<8x8x16xf32>
    %60 = vector.shape_cast %38 : vector<16xf32> to vector<1x1x16xf32>
    %61 = vector.broadcast %60 : vector<1x1x16xf32> to vector<8x8x16xf32>
    %62 = arith.addf %59, %61 : vector<8x8x16xf32>
    %63 = arith.truncf %62 : vector<8x8x16xf32> to vector<8x8x16xbf16>
    %c0_32 = arith.constant 0 : index
    %c0_33 = arith.constant 0 : index
    %64 = vector.load %arg11[%c0_32, %c0_33] : memref<16x48xbf16, #tpu.memory_space<vmem>>, vector<16x48xbf16>
    %cst_34 = arith.constant dense<0.000000e+00> : vector<8x8x48xf32>
    %65 = tpu.matmul %63, %64, %cst_34 {dimension_numbers = #tpu.dot_dimension_numbers<[2], [0], [0, 1], [1], [0, 0, 0, 1, 1, 1], [], []>} : vector<8x8x16xbf16>, vector<16x48xbf16>, vector<8x8x48xf32> -> vector<8x8x48xf32>
    %c0_35 = arith.constant 0 : index
    %c0_36 = arith.constant 0 : index
    %66 = vector.load %arg12[%c0_35, %c0_36] : memref<1x48xf32, #tpu.memory_space<vmem>>, vector<1x48xf32>
    %67 = vector.shape_cast %66 : vector<1x48xf32> to vector<48xf32>
    %68 = vector.shape_cast %67 : vector<48xf32> to vector<1x1x48xf32>
    %69 = vector.broadcast %68 : vector<1x1x48xf32> to vector<8x8x48xf32>
    %70 = arith.addf %65, %69 : vector<8x8x48xf32>
    %71 = vector.extract_strided_slice %70 {offsets = [0, 0, 32], sizes = [8, 8, 16], strides = [1, 1, 1]} : vector<8x8x48xf32> to vector<8x8x16xf32>
    %72 = arith.negf %71 : vector<8x8x16xf32>
    %73 = math.exp %72 : vector<8x8x16xf32>
    %cst_37 = arith.constant 1.000000e+00 : f32
    %74 = vector.broadcast %cst_37 : f32 to vector<8x8x16xf32>
    %75 = arith.addf %74, %73 : vector<8x8x16xf32>
    %76 = arith.divf %74, %75 : vector<8x8x16xf32>
    %77 = vector.extract_strided_slice %70 {offsets = [0, 0, 0], sizes = [8, 8, 16], strides = [1, 1, 1]} : vector<8x8x48xf32> to vector<8x8x16xf32>
    %78 = arith.mulf %77, %76 : vector<8x8x16xf32>
    %79 = vector.extract_strided_slice %70 {offsets = [0, 0, 16], sizes = [8, 8, 16], strides = [1, 1, 1]} : vector<8x8x48xf32> to vector<8x8x16xf32>
    %80 = arith.mulf %79, %76 : vector<8x8x16xf32>
    %81 = arith.truncf %78 : vector<8x8x16xf32> to vector<8x8x16xbf16>
    %82 = tpu.transpose %81, [2, 0, 1] : vector<8x8x16xbf16> -> vector<16x8x8xbf16>
    %c0_38 = arith.constant 0 : index
    %c0_39 = arith.constant 0 : index
    %c0_40 = arith.constant 0 : index
    %c0_41 = arith.constant 0 : index
    %83 = vector.load %arg14[%c0_38, %c0_39, %c0_40, %c0_41] : memref<1x16x8x8xbf16, #tpu.memory_space<vmem>>, vector<1x16x8x8xbf16>
    %84 = vector.shape_cast %83 : vector<1x16x8x8xbf16> to vector<16x8x8xbf16>
    %85 = vector.shape_cast %82 : vector<16x8x8xbf16> to vector<1x16x8x8xbf16>
    tpu.vector_store %arg14[%c0_38, %c0_39, %c0_40, %c0_41], %85 {strides = array<i32>} : memref<1x16x8x8xbf16, #tpu.memory_space<vmem>>, vector<1x16x8x8xbf16>,
    %86 = arith.truncf %80 : vector<8x8x16xf32> to vector<8x8x16xbf16>
    %87 = tpu.transpose %86, [2, 0, 1] : vector<8x8x16xbf16> -> vector<16x8x8xbf16>
    %c0_42 = arith.constant 0 : index
    %c0_43 = arith.constant 0 : index
    %c0_44 = arith.constant 0 : index
    %c0_45 = arith.constant 0 : index
    %88 = vector.load %arg15[%c0_42, %c0_43, %c0_44, %c0_45] : memref<1x16x8x8xbf16, #tpu.memory_space<vmem>>, vector<1x16x8x8xbf16>
    %89 = vector.shape_cast %88 : vector<1x16x8x8xbf16> to vector<16x8x8xbf16>
    %90 = vector.shape_cast %87 : vector<16x8x8xbf16> to vector<1x16x8x8xbf16>
    tpu.vector_store %arg15[%c0_42, %c0_43, %c0_44, %c0_45], %90 {strides = array<i32>} : memref<1x16x8x8xbf16, #tpu.memory_space<vmem>>, vector<1x16x8x8xbf16>,
    return
  }
  func.func @transform_0(%arg0: i32, %arg1: i32) -> (i32, i32, i32) {
    %c0_i32 = arith.constant 0 : i32
    %c0_i32_0 = arith.constant 0 : i32
    %c0_i32_1 = arith.constant 0 : i32
    return %arg0, %c0_i32, %c0_i32_0 : i32, i32, i32
  }
  func.func @transform_1(%arg0: i32, %arg1: i32) -> (i32, i32, i32) {
    %c0_i32 = arith.constant 0 : i32
    %c0_i32_0 = arith.constant 0 : i32
    return %arg0, %arg1, %c0_i32 : i32, i32, i32
  }
  func.func @transform_2(%arg0: i32, %arg1: i32) -> (i32, i32, i32) {
    %c0_i32 = arith.constant 0 : i32
    %c0_i32_0 = arith.constant 0 : i32
    %c0_i32_1 = arith.constant 0 : i32
    return %arg0, %c0_i32, %c0_i32_0 : i32, i32, i32
  }
  func.func @transform_3(%arg0: i32, %arg1: i32) -> (i32, i32, i32) {
    %c0_i32 = arith.constant 0 : i32
    %c0_i32_0 = arith.constant 0 : i32
    return %arg0, %arg1, %c0_i32 : i32, i32, i32
  }
  func.func @transform_4(%arg0: i32, %arg1: i32) -> (i32, i32, i32, i32) {
    %c0_i32 = arith.constant 0 : i32
    %c0_i32_0 = arith.constant 0 : i32
    %c0_i32_1 = arith.constant 0 : i32
    return %arg0, %arg1, %c0_i32, %c0_i32_0 : i32, i32, i32, i32
  }
  func.func @transform_5(%arg0: i32, %arg1: i32) -> (i32, i32) {
    %c0_i32 = arith.constant 0 : i32
    %c0_i32_0 = arith.constant 0 : i32
    %c0_i32_1 = arith.constant 0 : i32
    return %c0_i32, %c0_i32_0 : i32, i32
  }
  func.func @transform_6(%arg0: i32, %arg1: i32) -> (i32, i32) {
    %c0_i32 = arith.constant 0 : i32
    %c0_i32_0 = arith.constant 0 : i32
    %c0_i32_1 = arith.constant 0 : i32
    return %c0_i32, %c0_i32_0 : i32, i32
  }
  func.func @transform_7(%arg0: i32, %arg1: i32) -> (i32, i32) {
    %c0_i32 = arith.constant 0 : i32
    %c0_i32_0 = arith.constant 0 : i32
    %c0_i32_1 = arith.constant 0 : i32
    return %c0_i32, %c0_i32_0 : i32, i32
  }
  func.func @transform_8(%arg0: i32, %arg1: i32) -> (i32, i32) {
    %c0_i32 = arith.constant 0 : i32
    %c0_i32_0 = arith.constant 0 : i32
    %c0_i32_1 = arith.constant 0 : i32
    return %c0_i32, %c0_i32_0 : i32, i32
  }
  func.func @transform_9(%arg0: i32, %arg1: i32) -> (i32, i32) {
    %c0_i32 = arith.constant 0 : i32
    %c0_i32_0 = arith.constant 0 : i32
    %c0_i32_1 = arith.constant 0 : i32
    return %c0_i32, %c0_i32_0 : i32, i32
  }
  func.func @transform_10(%arg0: i32, %arg1: i32) -> (i32, i32) {
    %c0_i32 = arith.constant 0 : i32
    %c0_i32_0 = arith.constant 0 : i32
    %c0_i32_1 = arith.constant 0 : i32
    return %c0_i32, %c0_i32_0 : i32, i32
  }
  func.func @transform_11(%arg0: i32, %arg1: i32) -> (i32, i32, i32, i32) {
    %c0_i32 = arith.constant 0 : i32
    %c0_i32_0 = arith.constant 0 : i32
    %c0_i32_1 = arith.constant 0 : i32
    return %arg0, %arg1, %c0_i32, %c0_i32_0 : i32, i32, i32, i32
  }
  func.func @transform_12(%arg0: i32, %arg1: i32) -> (i32, i32, i32, i32) {
    %c0_i32 = arith.constant 0 : i32
    %c0_i32_0 = arith.constant 0 : i32
    %c0_i32_1 = arith.constant 0 : i32
    return %arg0, %c0_i32, %arg1, %c0_i32_0 : i32, i32, i32, i32
  }
  func.func @transform_13(%arg0: i32, %arg1: i32) -> (i32, i32, i32, i32) {
    %c0_i32 = arith.constant 0 : i32
    %c0_i32_0 = arith.constant 0 : i32
    %c0_i32_1 = arith.constant 0 : i32
    return %arg0, %c0_i32, %arg1, %c0_i32_0 : i32, i32, i32, i32
  }
}

module attributes {stable_mosaic.version = 11 : i64} {
  func.func @_node_update_kernel(%arg0: i32, %arg1: i32, %arg2: memref<1x8x32xf32, #tpu.memory_space<vmem>>, %arg3: memref<1x8x512xbf16, #tpu.memory_space<vmem>>, %arg4: memref<1x8x8x16xbf16, #tpu.memory_space<vmem>>, %arg5: memref<1x32xf32, #tpu.memory_space<vmem>>, %arg6: memref<1x32xf32, #tpu.memory_space<vmem>>, %arg7: memref<1x16xf32, #tpu.memory_space<vmem>>, %arg8: memref<1x16xf32, #tpu.memory_space<vmem>>, %arg9: memref<32x512xbf16, #tpu.memory_space<vmem>>, %arg10: memref<1x256xf32, #tpu.memory_space<vmem>>, %arg11: memref<16x8xbf16, #tpu.memory_space<vmem>>, %arg12: memref<256x32xbf16, #tpu.memory_space<vmem>>, %arg13: memref<1x32xf32, #tpu.memory_space<vmem>>, %arg14: memref<1x32xf32, #tpu.memory_space<vmem>>, %arg15: memref<1x32xf32, #tpu.memory_space<vmem>>, %arg16: memref<32x64xbf16, #tpu.memory_space<vmem>>, %arg17: memref<1x64xf32, #tpu.memory_space<vmem>>, %arg18: memref<64x32xbf16, #tpu.memory_space<vmem>>, %arg19: memref<1x32xf32, #tpu.memory_space<vmem>>, %arg20: memref<1x8x32xf32, #tpu.memory_space<vmem>>) attributes {dimension_semantics = [#tpu.dimension_semantics<parallel>, #tpu.dimension_semantics<parallel>], iteration_bounds = array<i64: 2, 1>, scalar_prefetch = 0 : i64, scratch_operands = 0 : i64, tpu.core_type = #tpu.core_type<tc>, window_params = [{transform_indices = @transform_0, window_bounds = array<i64: 1, 8, 32>}, {transform_indices = @transform_1, window_bounds = array<i64: 1, 8, 512>}, {transform_indices = @transform_2, window_bounds = array<i64: 1, 8, 8, 16>}, {pipeline_mode = #tpu.pipeline_mode<synchronous>, transform_indices = @transform_3, window_bounds = array<i64: 1, 32>}, {pipeline_mode = #tpu.pipeline_mode<synchronous>, transform_indices = @transform_4, window_bounds = array<i64: 1, 32>}, {pipeline_mode = #tpu.pipeline_mode<synchronous>, transform_indices = @transform_5, window_bounds = array<i64: 1, 16>}, {pipeline_mode = #tpu.pipeline_mode<synchronous>, transform_indices = @transform_6, window_bounds = array<i64: 1, 16>}, {pipeline_mode = #tpu.pipeline_mode<synchronous>, transform_indices = @transform_7, window_bounds = array<i64: 32, 512>}, {pipeline_mode = #tpu.pipeline_mode<synchronous>, transform_indices = @transform_8, window_bounds = array<i64: 1, 256>}, {pipeline_mode = #tpu.pipeline_mode<synchronous>, transform_indices = @transform_9, window_bounds = array<i64: 16, 8>}, {pipeline_mode = #tpu.pipeline_mode<synchronous>, transform_indices = @transform_10, window_bounds = array<i64: 256, 32>}, {pipeline_mode = #tpu.pipeline_mode<synchronous>, transform_indices = @transform_11, window_bounds = array<i64: 1, 32>}, {pipeline_mode = #tpu.pipeline_mode<synchronous>, transform_indices = @transform_12, window_bounds = array<i64: 1, 32>}, {pipeline_mode = #tpu.pipeline_mode<synchronous>, transform_indices = @transform_13, window_bounds = array<i64: 1, 32>}, {pipeline_mode = #tpu.pipeline_mode<synchronous>, transform_indices = @transform_14, window_bounds = array<i64: 32, 64>}, {pipeline_mode = #tpu.pipeline_mode<synchronous>, transform_indices = @transform_15, window_bounds = array<i64: 1, 64>}, {pipeline_mode = #tpu.pipeline_mode<synchronous>, transform_indices = @transform_16, window_bounds = array<i64: 64, 32>}, {pipeline_mode = #tpu.pipeline_mode<synchronous>, transform_indices = @transform_17, window_bounds = array<i64: 1, 32>}, {transform_indices = @transform_18, window_bounds = array<i64: 1, 8, 32>}]} {
    %c0 = arith.constant 0 : index
    %c0_0 = arith.constant 0 : index
    %c0_1 = arith.constant 0 : index
    %0 = vector.load %arg2[%c0, %c0_0, %c0_1] : memref<1x8x32xf32, #tpu.memory_space<vmem>>, vector<1x8x32xf32>
    %1 = vector.shape_cast %0 : vector<1x8x32xf32> to vector<8x32xf32>
    %c0_2 = arith.constant 0 : index
    %c0_3 = arith.constant 0 : index
    %c0_4 = arith.constant 0 : index
    %2 = vector.load %arg3[%c0_2, %c0_3, %c0_4] : memref<1x8x512xbf16, #tpu.memory_space<vmem>>, vector<1x8x512xbf16>
    %3 = vector.shape_cast %2 : vector<1x8x512xbf16> to vector<8x512xbf16>
    %c0_5 = arith.constant 0 : index
    %c0_6 = arith.constant 0 : index
    %c0_7 = arith.constant 0 : index
    %c0_8 = arith.constant 0 : index
    %4 = vector.load %arg4[%c0_5, %c0_6, %c0_7, %c0_8] : memref<1x8x8x16xbf16, #tpu.memory_space<vmem>>, vector<1x8x8x16xbf16>
    %5 = vector.shape_cast %4 : vector<1x8x8x16xbf16> to vector<8x8x16xbf16>
    %c0_9 = arith.constant 0 : index
    %c0_10 = arith.constant 0 : index
    %6 = vector.load %arg5[%c0_9, %c0_10] : memref<1x32xf32, #tpu.memory_space<vmem>>, vector<1x32xf32>
    %7 = vector.shape_cast %6 : vector<1x32xf32> to vector<32xf32>
    %c0_11 = arith.constant 0 : index
    %c0_12 = arith.constant 0 : index
    %8 = vector.load %arg6[%c0_11, %c0_12] : memref<1x32xf32, #tpu.memory_space<vmem>>, vector<1x32xf32>
    %9 = vector.shape_cast %8 : vector<1x32xf32> to vector<32xf32>
    %cst = arith.constant dense<0.000000e+00> : vector<8xf32>
    %10 = vector.multi_reduction <add>, %1, %cst [1] : vector<8x32xf32> to vector<8xf32>
    %11 = vector.shape_cast %10 : vector<8xf32> to vector<8x1xf32>
    %cst_13 = arith.constant 3.200000e+01 : f32
    %12 = vector.broadcast %cst_13 : f32 to vector<8x1xf32>
    %13 = arith.divf %11, %12 : vector<8x1xf32>
    %14 = vector.broadcast %13 : vector<8x1xf32> to vector<8x32xf32>
    %15 = arith.subf %1, %14 : vector<8x32xf32>
    %16 = arith.mulf %15, %15 : vector<8x32xf32>
    %cst_14 = arith.constant dense<0.000000e+00> : vector<8xf32>
    %17 = vector.multi_reduction <add>, %16, %cst_14 [1] : vector<8x32xf32> to vector<8xf32>
    %18 = vector.shape_cast %17 : vector<8xf32> to vector<8x1xf32>
    %cst_15 = arith.constant 3.200000e+01 : f32
    %19 = vector.broadcast %cst_15 : f32 to vector<8x1xf32>
    %20 = arith.divf %18, %19 : vector<8x1xf32>
    %21 = vector.broadcast %13 : vector<8x1xf32> to vector<8x32xf32>
    %22 = arith.subf %1, %21 : vector<8x32xf32>
    %cst_16 = arith.constant 9.99999974E-6 : f32
    %23 = vector.broadcast %cst_16 : f32 to vector<8x1xf32>
    %24 = arith.addf %20, %23 : vector<8x1xf32>
    %25 = math.rsqrt %24 : vector<8x1xf32>
    %26 = vector.broadcast %25 : vector<8x1xf32> to vector<8x32xf32>
    %27 = arith.mulf %22, %26 : vector<8x32xf32>
    %28 = vector.shape_cast %7 : vector<32xf32> to vector<1x32xf32>
    %29 = vector.broadcast %28 : vector<1x32xf32> to vector<8x32xf32>
    %30 = arith.mulf %27, %29 : vector<8x32xf32>
    %31 = vector.shape_cast %9 : vector<32xf32> to vector<1x32xf32>
    %32 = vector.broadcast %31 : vector<1x32xf32> to vector<8x32xf32>
    %33 = arith.addf %30, %32 : vector<8x32xf32>
    %34 = arith.truncf %33 : vector<8x32xf32> to vector<8x32xbf16>
    %c0_17 = arith.constant 0 : index
    %c0_18 = arith.constant 0 : index
    %35 = vector.load %arg7[%c0_17, %c0_18] : memref<1x16xf32, #tpu.memory_space<vmem>>, vector<1x16xf32>
    %36 = vector.shape_cast %35 : vector<1x16xf32> to vector<16xf32>
    %c0_19 = arith.constant 0 : index
    %c0_20 = arith.constant 0 : index
    %37 = vector.load %arg8[%c0_19, %c0_20] : memref<1x16xf32, #tpu.memory_space<vmem>>, vector<1x16xf32>
    %38 = vector.shape_cast %37 : vector<1x16xf32> to vector<16xf32>
    %39 = arith.extf %5 : vector<8x8x16xbf16> to vector<8x8x16xf32>
    %cst_21 = arith.constant dense<0.000000e+00> : vector<8x8xf32>
    %40 = vector.multi_reduction <add>, %39, %cst_21 [2] : vector<8x8x16xf32> to vector<8x8xf32>
    %41 = vector.shape_cast %40 : vector<8x8xf32> to vector<8x8x1xf32>
    %cst_22 = arith.constant 1.600000e+01 : f32
    %42 = vector.broadcast %cst_22 : f32 to vector<8x8x1xf32>
    %43 = arith.divf %41, %42 : vector<8x8x1xf32>
    %44 = vector.broadcast %43 : vector<8x8x1xf32> to vector<8x8x16xf32>
    %45 = arith.subf %39, %44 : vector<8x8x16xf32>
    %46 = arith.mulf %45, %45 : vector<8x8x16xf32>
    %cst_23 = arith.constant dense<0.000000e+00> : vector<8x8xf32>
    %47 = vector.multi_reduction <add>, %46, %cst_23 [2] : vector<8x8x16xf32> to vector<8x8xf32>
    %48 = vector.shape_cast %47 : vector<8x8xf32> to vector<8x8x1xf32>
    %cst_24 = arith.constant 1.600000e+01 : f32
    %49 = vector.broadcast %cst_24 : f32 to vector<8x8x1xf32>
    %50 = arith.divf %48, %49 : vector<8x8x1xf32>
    %51 = vector.broadcast %43 : vector<8x8x1xf32> to vector<8x8x16xf32>
    %52 = arith.subf %39, %51 : vector<8x8x16xf32>
    %cst_25 = arith.constant 9.99999974E-6 : f32
    %53 = vector.broadcast %cst_25 : f32 to vector<8x8x1xf32>
    %54 = arith.addf %50, %53 : vector<8x8x1xf32>
    %55 = math.rsqrt %54 : vector<8x8x1xf32>
    %56 = vector.broadcast %55 : vector<8x8x1xf32> to vector<8x8x16xf32>
    %57 = arith.mulf %52, %56 : vector<8x8x16xf32>
    %58 = vector.shape_cast %36 : vector<16xf32> to vector<1x1x16xf32>
    %59 = vector.broadcast %58 : vector<1x1x16xf32> to vector<8x8x16xf32>
    %60 = arith.mulf %57, %59 : vector<8x8x16xf32>
    %61 = vector.shape_cast %38 : vector<16xf32> to vector<1x1x16xf32>
    %62 = vector.broadcast %61 : vector<1x1x16xf32> to vector<8x8x16xf32>
    %63 = arith.addf %60, %62 : vector<8x8x16xf32>
    %64 = arith.truncf %63 : vector<8x8x16xf32> to vector<8x8x16xbf16>
    %c0_26 = arith.constant 0 : index
    %c0_27 = arith.constant 0 : index
    %65 = vector.load %arg9[%c0_26, %c0_27] : memref<32x512xbf16, #tpu.memory_space<vmem>>, vector<32x512xbf16>
    %cst_28 = arith.constant dense<0.000000e+00> : vector<8x512xf32>
    %66 = tpu.matmul %34, %65, %cst_28 {dimension_numbers = #tpu.dot_dimension_numbers<[1], [0], [0], [1], [0, 0, 1, 1], [], []>} : vector<8x32xbf16>, vector<32x512xbf16>, vector<8x512xf32> -> vector<8x512xf32>
    %67 = vector.extract_strided_slice %66 {offsets = [0, 0], sizes = [8, 256], strides = [1, 1]} : vector<8x512xf32> to vector<8x256xf32>
    %68 = vector.extract_strided_slice %66 {offsets = [0, 256], sizes = [8, 256], strides = [1, 1]} : vector<8x512xf32> to vector<8x256xf32>
    %c0_29 = arith.constant 0 : index
    %c0_30 = arith.constant 0 : index
    %69 = vector.load %arg10[%c0_29, %c0_30] : memref<1x256xf32, #tpu.memory_space<vmem>>, vector<1x256xf32>
    %70 = vector.shape_cast %69 : vector<1x256xf32> to vector<256xf32>
    %71 = vector.shape_cast %70 : vector<256xf32> to vector<1x256xf32>
    %72 = vector.broadcast %71 : vector<1x256xf32> to vector<8x256xf32>
    %73 = arith.addf %68, %72 : vector<8x256xf32>
    %74 = arith.negf %73 : vector<8x256xf32>
    %75 = math.exp %74 : vector<8x256xf32>
    %cst_31 = arith.constant 1.000000e+00 : f32
    %76 = vector.broadcast %cst_31 : f32 to vector<8x256xf32>
    %77 = arith.addf %76, %75 : vector<8x256xf32>
    %78 = arith.divf %76, %77 : vector<8x256xf32>
    %79 = vector.extract_strided_slice %3 {offsets = [0, 0], sizes = [8, 256], strides = [1, 1]} : vector<8x512xbf16> to vector<8x256xbf16>
    %80 = vector.extract_strided_slice %3 {offsets = [0, 256], sizes = [8, 256], strides = [1, 1]} : vector<8x512xbf16> to vector<8x256xbf16>
    %81 = vector.shape_cast %67 : vector<8x256xf32> to vector<8x8x32xf32>
    %82 = tpu.transpose %81, [1, 0, 2] : vector<8x8x32xf32> -> vector<8x8x32xf32>
    %83 = arith.truncf %82 : vector<8x8x32xf32> to vector<8x8x32xbf16>
    %84 = vector.shape_cast %79 : vector<8x256xbf16> to vector<8x8x32xbf16>
    %85 = tpu.transpose %84, [1, 0, 2] : vector<8x8x32xbf16> -> vector<8x8x32xbf16>
    %86 = vector.shape_cast %80 : vector<8x256xbf16> to vector<8x8x32xbf16>
    %87 = tpu.transpose %86, [1, 0, 2] : vector<8x8x32xbf16> -> vector<8x8x32xbf16>
    %c0_32 = arith.constant 0 : index
    %c0_33 = arith.constant 0 : index
    %88 = vector.load %arg11[%c0_32, %c0_33] : memref<16x8xbf16, #tpu.memory_space<vmem>>, vector<16x8xbf16>
    "tpu.trace_start"() <{level = 10 : i32, message = "ijd,dh->hij"}> : () -> ()
    %cst_34 = arith.constant dense<0.000000e+00> : vector<8x8x8xf32>
    %89 = tpu.matmul %88, %64, %cst_34 {dimension_numbers = #tpu.dot_dimension_numbers<[0], [2], [1], [0, 1], [0, 1, 1, 0, 1, 1], [], []>} : vector<16x8xbf16>, vector<8x8x16xbf16>, vector<8x8x8xf32> -> vector<8x8x8xf32>
    "tpu.trace_stop"() : () -> ()
    "tpu.trace_start"() <{level = 10 : i32, message = "hid,hjd->hij"}> : () -> ()
    %cst_35 = arith.constant dense<0.000000e+00> : vector<8x8x8xf32>
    %90 = tpu.matmul %83, %85, %cst_35 {dimension_numbers = #tpu.dot_dimension_numbers<[2], [2], [1], [1], [0, 0, 0, 1, 1, 1], [0], [0]>} : vector<8x8x32xbf16>, vector<8x8x32xbf16>, vector<8x8x8xf32> -> vector<8x8x8xf32>
    "tpu.trace_stop"() : () -> ()
    %91 = arith.addf %90, %89 : vector<8x8x8xf32>
    %cst_36 = arith.constant dense<0xFF800000> : vector<8x8xf32>
    %92 = vector.multi_reduction <maximumf>, %91, %cst_36 [2] : vector<8x8x8xf32> to vector<8x8xf32>
    %93 = vector.shape_cast %92 : vector<8x8xf32> to vector<8x8x1xf32>
    %94 = vector.broadcast %93 : vector<8x8x1xf32> to vector<8x8x8xf32>
    %95 = arith.subf %91, %94 : vector<8x8x8xf32>
    %96 = math.exp %95 : vector<8x8x8xf32>
    %cst_37 = arith.constant dense<0.000000e+00> : vector<8x8xf32>
    %97 = vector.multi_reduction <add>, %96, %cst_37 [2] : vector<8x8x8xf32> to vector<8x8xf32>
    %98 = vector.shape_cast %97 : vector<8x8xf32> to vector<8x8x1xf32>
    %99 = tpu.reciprocal %98 {approx = true} : vector<8x8x1xf32> -> vector<8x8x1xf32>
    %100 = vector.broadcast %99 : vector<8x8x1xf32> to vector<8x8x8xf32>
    %101 = arith.mulf %96, %100 : vector<8x8x8xf32>
    %102 = arith.truncf %101 : vector<8x8x8xf32> to vector<8x8x8xbf16>
    "tpu.trace_start"() <{level = 10 : i32, message = "hij,hjd->hid"}> : () -> ()
    %cst_38 = arith.constant dense<0.000000e+00> : vector<8x8x32xf32>
    %103 = tpu.matmul %102, %87, %cst_38 {dimension_numbers = #tpu.dot_dimension_numbers<[2], [1], [1], [2], [0, 0, 0, 1, 1, 2], [0], [0]>} : vector<8x8x8xbf16>, vector<8x8x32xbf16>, vector<8x8x32xf32> -> vector<8x8x32xf32>
    "tpu.trace_stop"() : () -> ()
    %104 = tpu.transpose %103, [1, 0, 2] : vector<8x8x32xf32> -> vector<8x8x32xf32>
    %105 = vector.shape_cast %104 : vector<8x8x32xf32> to vector<8x256xf32>
    %106 = arith.mulf %105, %78 : vector<8x256xf32>
    %107 = arith.truncf %106 : vector<8x256xf32> to vector<8x256xbf16>
    %c0_39 = arith.constant 0 : index
    %c0_40 = arith.constant 0 : index
    %108 = vector.load %arg12[%c0_39, %c0_40] : memref<256x32xbf16, #tpu.memory_space<vmem>>, vector<256x32xbf16>
    %cst_41 = arith.constant dense<0.000000e+00> : vector<8x32xf32>
    %109 = tpu.matmul %107, %108, %cst_41 {dimension_numbers = #tpu.dot_dimension_numbers<[1], [0], [0], [1], [0, 0, 1, 1], [], []>} : vector<8x256xbf16>, vector<256x32xbf16>, vector<8x32xf32> -> vector<8x32xf32>
    %c0_42 = arith.constant 0 : index
    %c0_43 = arith.constant 0 : index
    %110 = vector.load %arg13[%c0_42, %c0_43] : memref<1x32xf32, #tpu.memory_space<vmem>>, vector<1x32xf32>
    %111 = vector.shape_cast %110 : vector<1x32xf32> to vector<32xf32>
    %112 = vector.shape_cast %111 : vector<32xf32> to vector<1x32xf32>
    %113 = vector.broadcast %112 : vector<1x32xf32> to vector<8x32xf32>
    %114 = arith.addf %109, %113 : vector<8x32xf32>
    %115 = arith.addf %1, %114 : vector<8x32xf32>
    %c0_44 = arith.constant 0 : index
    %c0_45 = arith.constant 0 : index
    %116 = vector.load %arg14[%c0_44, %c0_45] : memref<1x32xf32, #tpu.memory_space<vmem>>, vector<1x32xf32>
    %117 = vector.shape_cast %116 : vector<1x32xf32> to vector<32xf32>
    %c0_46 = arith.constant 0 : index
    %c0_47 = arith.constant 0 : index
    %118 = vector.load %arg15[%c0_46, %c0_47] : memref<1x32xf32, #tpu.memory_space<vmem>>, vector<1x32xf32>
    %119 = vector.shape_cast %118 : vector<1x32xf32> to vector<32xf32>
    %cst_48 = arith.constant dense<0.000000e+00> : vector<8xf32>
    %120 = vector.multi_reduction <add>, %115, %cst_48 [1] : vector<8x32xf32> to vector<8xf32>
    %121 = vector.shape_cast %120 : vector<8xf32> to vector<8x1xf32>
    %cst_49 = arith.constant 3.200000e+01 : f32
    %122 = vector.broadcast %cst_49 : f32 to vector<8x1xf32>
    %123 = arith.divf %121, %122 : vector<8x1xf32>
    %124 = vector.broadcast %123 : vector<8x1xf32> to vector<8x32xf32>
    %125 = arith.subf %115, %124 : vector<8x32xf32>
    %126 = arith.mulf %125, %125 : vector<8x32xf32>
    %cst_50 = arith.constant dense<0.000000e+00> : vector<8xf32>
    %127 = vector.multi_reduction <add>, %126, %cst_50 [1] : vector<8x32xf32> to vector<8xf32>
    %128 = vector.shape_cast %127 : vector<8xf32> to vector<8x1xf32>
    %cst_51 = arith.constant 3.200000e+01 : f32
    %129 = vector.broadcast %cst_51 : f32 to vector<8x1xf32>
    %130 = arith.divf %128, %129 : vector<8x1xf32>
    %131 = vector.broadcast %123 : vector<8x1xf32> to vector<8x32xf32>
    %132 = arith.subf %115, %131 : vector<8x32xf32>
    %cst_52 = arith.constant 9.99999974E-6 : f32
    %133 = vector.broadcast %cst_52 : f32 to vector<8x1xf32>
    %134 = arith.addf %130, %133 : vector<8x1xf32>
    %135 = math.rsqrt %134 : vector<8x1xf32>
    %136 = vector.broadcast %135 : vector<8x1xf32> to vector<8x32xf32>
    %137 = arith.mulf %132, %136 : vector<8x32xf32>
    %138 = vector.shape_cast %117 : vector<32xf32> to vector<1x32xf32>
    %139 = vector.broadcast %138 : vector<1x32xf32> to vector<8x32xf32>
    %140 = arith.mulf %137, %139 : vector<8x32xf32>
    %141 = vector.shape_cast %119 : vector<32xf32> to vector<1x32xf32>
    %142 = vector.broadcast %141 : vector<1x32xf32> to vector<8x32xf32>
    %143 = arith.addf %140, %142 : vector<8x32xf32>
    %144 = arith.truncf %143 : vector<8x32xf32> to vector<8x32xbf16>
    %c0_53 = arith.constant 0 : index
    %c0_54 = arith.constant 0 : index
    %145 = vector.load %arg16[%c0_53, %c0_54] : memref<32x64xbf16, #tpu.memory_space<vmem>>, vector<32x64xbf16>
    %cst_55 = arith.constant dense<0.000000e+00> : vector<8x64xf32>
    %146 = tpu.matmul %144, %145, %cst_55 {dimension_numbers = #tpu.dot_dimension_numbers<[1], [0], [0], [1], [0, 0, 1, 1], [], []>} : vector<8x32xbf16>, vector<32x64xbf16>, vector<8x64xf32> -> vector<8x64xf32>
    %c0_56 = arith.constant 0 : index
    %c0_57 = arith.constant 0 : index
    %147 = vector.load %arg17[%c0_56, %c0_57] : memref<1x64xf32, #tpu.memory_space<vmem>>, vector<1x64xf32>
    %148 = vector.shape_cast %147 : vector<1x64xf32> to vector<64xf32>
    %149 = vector.shape_cast %148 : vector<64xf32> to vector<1x64xf32>
    %150 = vector.broadcast %149 : vector<1x64xf32> to vector<8x64xf32>
    %151 = arith.addf %146, %150 : vector<8x64xf32>
    %cst_58 = arith.constant 0.000000e+00 : f32
    %152 = vector.broadcast %cst_58 : f32 to vector<8x64xf32>
    %153 = arith.maximumf %151, %152 : vector<8x64xf32>
    %154 = arith.truncf %153 : vector<8x64xf32> to vector<8x64xbf16>
    %c0_59 = arith.constant 0 : index
    %c0_60 = arith.constant 0 : index
    %155 = vector.load %arg18[%c0_59, %c0_60] : memref<64x32xbf16, #tpu.memory_space<vmem>>, vector<64x32xbf16>
    %cst_61 = arith.constant dense<0.000000e+00> : vector<8x32xf32>
    %156 = tpu.matmul %154, %155, %cst_61 {dimension_numbers = #tpu.dot_dimension_numbers<[1], [0], [0], [1], [0, 0, 1, 1], [], []>} : vector<8x64xbf16>, vector<64x32xbf16>, vector<8x32xf32> -> vector<8x32xf32>
    %c0_62 = arith.constant 0 : index
    %c0_63 = arith.constant 0 : index
    %157 = vector.load %arg19[%c0_62, %c0_63] : memref<1x32xf32, #tpu.memory_space<vmem>>, vector<1x32xf32>
    %158 = vector.shape_cast %157 : vector<1x32xf32> to vector<32xf32>
    %159 = vector.shape_cast %158 : vector<32xf32> to vector<1x32xf32>
    %160 = vector.broadcast %159 : vector<1x32xf32> to vector<8x32xf32>
    %161 = arith.addf %156, %160 : vector<8x32xf32>
    %162 = arith.addf %115, %161 : vector<8x32xf32>
    %c0_64 = arith.constant 0 : index
    %c0_65 = arith.constant 0 : index
    %c0_66 = arith.constant 0 : index
    %163 = vector.load %arg20[%c0_64, %c0_65, %c0_66] : memref<1x8x32xf32, #tpu.memory_space<vmem>>, vector<1x8x32xf32>
    %164 = vector.shape_cast %163 : vector<1x8x32xf32> to vector<8x32xf32>
    %165 = vector.shape_cast %162 : vector<8x32xf32> to vector<1x8x32xf32>
    tpu.vector_store %arg20[%c0_64, %c0_65, %c0_66], %165 {strides = array<i32>} : memref<1x8x32xf32, #tpu.memory_space<vmem>>, vector<1x8x32xf32>,
    return
  }
  func.func @transform_0(%arg0: i32, %arg1: i32) -> (i32, i32, i32) {
    %c0_i32 = arith.constant 0 : i32
    %c0_i32_0 = arith.constant 0 : i32
    return %arg0, %arg1, %c0_i32 : i32, i32, i32
  }
  func.func @transform_1(%arg0: i32, %arg1: i32) -> (i32, i32, i32) {
    %c0_i32 = arith.constant 0 : i32
    %c0_i32_0 = arith.constant 0 : i32
    %c0_i32_1 = arith.constant 0 : i32
    return %arg0, %c0_i32, %c0_i32_0 : i32, i32, i32
  }
  func.func @transform_2(%arg0: i32, %arg1: i32) -> (i32, i32, i32, i32) {
    %c0_i32 = arith.constant 0 : i32
    %c0_i32_0 = arith.constant 0 : i32
    %c0_i32_1 = arith.constant 0 : i32
    return %arg0, %arg1, %c0_i32, %c0_i32_0 : i32, i32, i32, i32
  }
  func.func @transform_3(%arg0: i32, %arg1: i32) -> (i32, i32) {
    %c0_i32 = arith.constant 0 : i32
    %c0_i32_0 = arith.constant 0 : i32
    %c0_i32_1 = arith.constant 0 : i32
    return %c0_i32, %c0_i32_0 : i32, i32
  }
  func.func @transform_4(%arg0: i32, %arg1: i32) -> (i32, i32) {
    %c0_i32 = arith.constant 0 : i32
    %c0_i32_0 = arith.constant 0 : i32
    %c0_i32_1 = arith.constant 0 : i32
    return %c0_i32, %c0_i32_0 : i32, i32
  }
  func.func @transform_5(%arg0: i32, %arg1: i32) -> (i32, i32) {
    %c0_i32 = arith.constant 0 : i32
    %c0_i32_0 = arith.constant 0 : i32
    %c0_i32_1 = arith.constant 0 : i32
    return %c0_i32, %c0_i32_0 : i32, i32
  }
  func.func @transform_6(%arg0: i32, %arg1: i32) -> (i32, i32) {
    %c0_i32 = arith.constant 0 : i32
    %c0_i32_0 = arith.constant 0 : i32
    %c0_i32_1 = arith.constant 0 : i32
    return %c0_i32, %c0_i32_0 : i32, i32
  }
  func.func @transform_7(%arg0: i32, %arg1: i32) -> (i32, i32) {
    %c0_i32 = arith.constant 0 : i32
    %c0_i32_0 = arith.constant 0 : i32
    %c0_i32_1 = arith.constant 0 : i32
    return %c0_i32, %c0_i32_0 : i32, i32
  }
  func.func @transform_8(%arg0: i32, %arg1: i32) -> (i32, i32) {
    %c0_i32 = arith.constant 0 : i32
    %c0_i32_0 = arith.constant 0 : i32
    %c0_i32_1 = arith.constant 0 : i32
    return %c0_i32, %c0_i32_0 : i32, i32
  }
  func.func @transform_9(%arg0: i32, %arg1: i32) -> (i32, i32) {
    %c0_i32 = arith.constant 0 : i32
    %c0_i32_0 = arith.constant 0 : i32
    %c0_i32_1 = arith.constant 0 : i32
    return %c0_i32, %c0_i32_0 : i32, i32
  }
  func.func @transform_10(%arg0: i32, %arg1: i32) -> (i32, i32) {
    %c0_i32 = arith.constant 0 : i32
    %c0_i32_0 = arith.constant 0 : i32
    %c0_i32_1 = arith.constant 0 : i32
    return %c0_i32, %c0_i32_0 : i32, i32
  }
  func.func @transform_11(%arg0: i32, %arg1: i32) -> (i32, i32) {
    %c0_i32 = arith.constant 0 : i32
    %c0_i32_0 = arith.constant 0 : i32
    %c0_i32_1 = arith.constant 0 : i32
    return %c0_i32, %c0_i32_0 : i32, i32
  }
  func.func @transform_12(%arg0: i32, %arg1: i32) -> (i32, i32) {
    %c0_i32 = arith.constant 0 : i32
    %c0_i32_0 = arith.constant 0 : i32
    %c0_i32_1 = arith.constant 0 : i32
    return %c0_i32, %c0_i32_0 : i32, i32
  }
  func.func @transform_13(%arg0: i32, %arg1: i32) -> (i32, i32) {
    %c0_i32 = arith.constant 0 : i32
    %c0_i32_0 = arith.constant 0 : i32
    %c0_i32_1 = arith.constant 0 : i32
    return %c0_i32, %c0_i32_0 : i32, i32
  }
  func.func @transform_14(%arg0: i32, %arg1: i32) -> (i32, i32) {
    %c0_i32 = arith.constant 0 : i32
    %c0_i32_0 = arith.constant 0 : i32
    %c0_i32_1 = arith.constant 0 : i32
    return %c0_i32, %c0_i32_0 : i32, i32
  }
  func.func @transform_15(%arg0: i32, %arg1: i32) -> (i32, i32) {
    %c0_i32 = arith.constant 0 : i32
    %c0_i32_0 = arith.constant 0 : i32
    %c0_i32_1 = arith.constant 0 : i32
    return %c0_i32, %c0_i32_0 : i32, i32
  }
  func.func @transform_16(%arg0: i32, %arg1: i32) -> (i32, i32) {
    %c0_i32 = arith.constant 0 : i32
    %c0_i32_0 = arith.constant 0 : i32
    %c0_i32_1 = arith.constant 0 : i32
    return %c0_i32, %c0_i32_0 : i32, i32
  }
  func.func @transform_17(%arg0: i32, %arg1: i32) -> (i32, i32) {
    %c0_i32 = arith.constant 0 : i32
    %c0_i32_0 = arith.constant 0 : i32
    %c0_i32_1 = arith.constant 0 : i32
    return %c0_i32, %c0_i32_0 : i32, i32
  }
  func.func @transform_18(%arg0: i32, %arg1: i32) -> (i32, i32, i32) {
    %c0_i32 = arith.constant 0 : i32
    %c0_i32_0 = arith.constant 0 : i32
    return %arg0, %arg1, %c0_i32 : i32, i32, i32
  }
}

module attributes {stable_mosaic.version = 11 : i64} {
  func.func @_tri_out_mix_kernel(%arg0: i32, %arg1: i32, %arg2: i32, %arg3: memref<1x16x8x8xbf16, #tpu.memory_space<vmem>>, %arg4: memref<1x16x8x8xbf16, #tpu.memory_space<vmem>>, %arg5: memref<1x8x8x16xbf16, #tpu.memory_space<vmem>>, %arg6: memref<1x16xf32, #tpu.memory_space<vmem>>, %arg7: memref<1x16xf32, #tpu.memory_space<vmem>>, %arg8: memref<16x16xbf16, #tpu.memory_space<vmem>>, %arg9: memref<1x16xf32, #tpu.memory_space<vmem>>, %arg10: memref<1x16xf32, #tpu.memory_space<vmem>>, %arg11: memref<1x16xf32, #tpu.memory_space<vmem>>, %arg12: memref<16x16xbf16, #tpu.memory_space<vmem>>, %arg13: memref<1x16xf32, #tpu.memory_space<vmem>>, %arg14: memref<1x16xf32, #tpu.memory_space<vmem>>, %arg15: memref<1x16xf32, #tpu.memory_space<vmem>>, %arg16: memref<16x48xbf16, #tpu.memory_space<vmem>>, %arg17: memref<1x48xf32, #tpu.memory_space<vmem>>, %arg18: memref<1x8x8x16xbf16, #tpu.memory_space<vmem>>, %arg19: memref<1x16x8x8xbf16, #tpu.memory_space<vmem>>, %arg20: memref<1x16x8x8xbf16, #tpu.memory_space<vmem>>, %arg21: memref<16x8x8xf32, #tpu.memory_space<vmem>>) attributes {dimension_semantics = [#tpu.dimension_semantics<parallel>, #tpu.dimension_semantics<parallel>, #tpu.dimension_semantics<arbitrary>], iteration_bounds = array<i64: 2, 1, 1>, scalar_prefetch = 0 : i64, scratch_operands = 1 : i64, tpu.core_type = #tpu.core_type<tc>, window_params = [{transform_indices = @transform_0, window_bounds = array<i64: 1, 16, 8, 8>}, {transform_indices = @transform_1, window_bounds = array<i64: 1, 16, 8, 8>}, {pipeline_mode = #tpu.pipeline_mode<synchronous>, transform_indices = @transform_2, window_bounds = array<i64: 1, 8, 8, 16>}, {pipeline_mode = #tpu.pipeline_mode<synchronous>, transform_indices = @transform_3, window_bounds = array<i64: 1, 16>}, {pipeline_mode = #tpu.pipeline_mode<synchronous>, transform_indices = @transform_4, window_bounds = array<i64: 1, 16>}, {pipeline_mode = #tpu.pipeline_mode<synchronous>, transform_indices = @transform_5, window_bounds = array<i64: 16, 16>}, {pipeline_mode = #tpu.pipeline_mode<synchronous>, transform_indices = @transform_6, window_bounds = array<i64: 1, 16>}, {pipeline_mode = #tpu.pipeline_mode<synchronous>, transform_indices = @transform_7, window_bounds = array<i64: 1, 16>}, {pipeline_mode = #tpu.pipeline_mode<synchronous>, transform_indices = @transform_8, window_bounds = array<i64: 1, 16>}, {pipeline_mode = #tpu.pipeline_mode<synchronous>, transform_indices = @transform_9, window_bounds = array<i64: 16, 16>}, {pipeline_mode = #tpu.pipeline_mode<synchronous>, transform_indices = @transform_10, window_bounds = array<i64: 1, 16>}, {pipeline_mode = #tpu.pipeline_mode<synchronous>, transform_indices = @transform_11, window_bounds = array<i64: 1, 16>}, {pipeline_mode = #tpu.pipeline_mode<synchronous>, transform_indices = @transform_12, window_bounds = array<i64: 1, 16>}, {pipeline_mode = #tpu.pipeline_mode<synchronous>, transform_indices = @transform_13, window_bounds = array<i64: 16, 48>}, {pipeline_mode = #tpu.pipeline_mode<synchronous>, transform_indices = @transform_14, window_bounds = array<i64: 1, 48>}, {transform_indices = @transform_15, window_bounds = array<i64: 1, 8, 8, 16>}, {transform_indices = @transform_16, window_bounds = array<i64: 1, 16, 8, 8>}, {transform_indices = @transform_17, window_bounds = array<i64: 1, 16, 8, 8>}]} {
    %c0_i32 = arith.constant 0 : i32
    %0 = arith.cmpi eq, %arg2, %c0_i32 : i32
    %1 = arith.extui %0 : i1 to i32
    %c0_i32_0 = arith.constant 0 : i32
    %2 = arith.cmpi ne, %1, %c0_i32_0 : i32
    scf.if %2 {
      %cst_16 = arith.constant 0.000000e+00 : f32
      %14 = vector.broadcast %cst_16 : f32 to vector<16x8x8xf32>
      %c0_17 = arith.constant 0 : index
      %c0_18 = arith.constant 0 : index
      %c0_19 = arith.constant 0 : index
      %15 = vector.load %arg21[%c0_17, %c0_18, %c0_19] : memref<16x8x8xf32, #tpu.memory_space<vmem>>, vector<16x8x8xf32>
      tpu.vector_store %arg21[%c0_17, %c0_18, %c0_19], %14 {strides = array<i32>} : memref<16x8x8xf32, #tpu.memory_space<vmem>>, vector<16x8x8xf32>,
    } else {
    }
    %c0 = arith.constant 0 : index
    %c0_1 = arith.constant 0 : index
    %c0_2 = arith.constant 0 : index
    %3 = vector.load %arg21[%c0, %c0_1, %c0_2] : memref<16x8x8xf32, #tpu.memory_space<vmem>>, vector<16x8x8xf32>
    %c0_3 = arith.constant 0 : index
    %c0_4 = arith.constant 0 : index
    %c0_5 = arith.constant 0 : index
    %c0_6 = arith.constant 0 : index
    %4 = vector.load %arg3[%c0_3, %c0_4, %c0_5, %c0_6] : memref<1x16x8x8xbf16, #tpu.memory_space<vmem>>, vector<1x16x8x8xbf16>
    %5 = vector.shape_cast %4 : vector<1x16x8x8xbf16> to vector<16x8x8xbf16>
    %c0_7 = arith.constant 0 : index
    %c0_8 = arith.constant 0 : index
    %c0_9 = arith.constant 0 : index
    %c0_10 = arith.constant 0 : index
    %6 = vector.load %arg4[%c0_7, %c0_8, %c0_9, %c0_10] : memref<1x16x8x8xbf16, #tpu.memory_space<vmem>>, vector<1x16x8x8xbf16>
    %7 = vector.shape_cast %6 : vector<1x16x8x8xbf16> to vector<16x8x8xbf16>
    "tpu.trace_start"() <{level = 10 : i32, message = "dik,djk->dij"}> : () -> ()
    %cst = arith.constant dense<0.000000e+00> : vector<16x8x8xf32>
    %8 = tpu.matmul %5, %7, %cst {dimension_numbers = #tpu.dot_dimension_numbers<[2], [2], [1], [1], [0, 0, 0, 1, 1, 1], [0], [0]>} : vector<16x8x8xbf16>, vector<16x8x8xbf16>, vector<16x8x8xf32> -> vector<16x8x8xf32>
    "tpu.trace_stop"() : () -> ()
    %9 = arith.addf %3, %8 : vector<16x8x8xf32>
    %c0_11 = arith.constant 0 : index
    %c0_12 = arith.constant 0 : index
    %c0_13 = arith.constant 0 : index
    %10 = vector.load %arg21[%c0_11, %c0_12, %c0_13] : memref<16x8x8xf32, #tpu.memory_space<vmem>>, vector<16x8x8xf32>
    tpu.vector_store %arg21[%c0_11, %c0_12, %c0_13], %9 {strides = array<i32>} : memref<16x8x8xf32, #tpu.memory_space<vmem>>, vector<16x8x8xf32>,
    %c0_i32_14 = arith.constant 0 : i32
    %11 = arith.cmpi eq, %arg2, %c0_i32_14 : i32
    %12 = arith.extui %11 : i1 to i32
    %c0_i32_15 = arith.constant 0 : i32
    %13 = arith.cmpi ne, %12, %c0_i32_15 : i32
    scf.if %13 {
      %c0_16 = arith.constant 0 : index
      %c0_17 = arith.constant 0 : index
      %c0_18 = arith.constant 0 : index
      %c0_19 = arith.constant 0 : index
      %14 = vector.load %arg5[%c0_16, %c0_17, %c0_18, %c0_19] : memref<1x8x8x16xbf16, #tpu.memory_space<vmem>>, vector<1x8x8x16xbf16>
      %15 = vector.shape_cast %14 : vector<1x8x8x16xbf16> to vector<8x8x16xbf16>
      %16 = arith.extf %15 : vector<8x8x16xbf16> to vector<8x8x16xf32>
      %c0_20 = arith.constant 0 : index
      %c0_21 = arith.constant 0 : index
      %c0_22 = arith.constant 0 : index
      %17 = vector.load %arg21[%c0_20, %c0_21, %c0_22] : memref<16x8x8xf32, #tpu.memory_space<vmem>>, vector<16x8x8xf32>
      %c0_23 = arith.constant 0 : index
      %c0_24 = arith.constant 0 : index
      %18 = vector.load %arg6[%c0_23, %c0_24] : memref<1x16xf32, #tpu.memory_space<vmem>>, vector<1x16xf32>
      %19 = vector.shape_cast %18 : vector<1x16xf32> to vector<16xf32>
      %c0_25 = arith.constant 0 : index
      %c0_26 = arith.constant 0 : index
      %20 = vector.load %arg7[%c0_25, %c0_26] : memref<1x16xf32, #tpu.memory_space<vmem>>, vector<1x16xf32>
      %21 = vector.shape_cast %20 : vector<1x16xf32> to vector<16xf32>
      %c0_27 = arith.constant 0 : index
      %c0_28 = arith.constant 0 : index
      %22 = vector.load %arg8[%c0_27, %c0_28] : memref<16x16xbf16, #tpu.memory_space<vmem>>, vector<16x16xbf16>
      %c0_29 = arith.constant 0 : index
      %c0_30 = arith.constant 0 : index
      %23 = vector.load %arg9[%c0_29, %c0_30] : memref<1x16xf32, #tpu.memory_space<vmem>>, vector<1x16xf32>
      %24 = vector.shape_cast %23 : vector<1x16xf32> to vector<16xf32>
      %c0_31 = arith.constant 0 : index
      %c0_32 = arith.constant 0 : index
      %25 = vector.load %arg10[%c0_31, %c0_32] : memref<1x16xf32, #tpu.memory_space<vmem>>, vector<1x16xf32>
      %26 = vector.shape_cast %25 : vector<1x16xf32> to vector<16xf32>
      %c0_33 = arith.constant 0 : index
      %c0_34 = arith.constant 0 : index
      %27 = vector.load %arg11[%c0_33, %c0_34] : memref<1x16xf32, #tpu.memory_space<vmem>>, vector<1x16xf32>
      %28 = vector.shape_cast %27 : vector<1x16xf32> to vector<16xf32>
      %c0_35 = arith.constant 0 : index
      %c0_36 = arith.constant 0 : index
      %29 = vector.load %arg12[%c0_35, %c0_36] : memref<16x16xbf16, #tpu.memory_space<vmem>>, vector<16x16xbf16>
      %c0_37 = arith.constant 0 : index
      %c0_38 = arith.constant 0 : index
      %30 = vector.load %arg13[%c0_37, %c0_38] : memref<1x16xf32, #tpu.memory_space<vmem>>, vector<1x16xf32>
      %31 = vector.shape_cast %30 : vector<1x16xf32> to vector<16xf32>
      %cst_39 = arith.constant dense<0.000000e+00> : vector<8x8xf32>
      %32 = vector.multi_reduction <add>, %16, %cst_39 [2] : vector<8x8x16xf32> to vector<8x8xf32>
      %33 = vector.shape_cast %32 : vector<8x8xf32> to vector<8x8x1xf32>
      %cst_40 = arith.constant 1.600000e+01 : f32
      %34 = vector.broadcast %cst_40 : f32 to vector<8x8x1xf32>
      %35 = arith.divf %33, %34 : vector<8x8x1xf32>
      %36 = vector.broadcast %35 : vector<8x8x1xf32> to vector<8x8x16xf32>
      %37 = arith.subf %16, %36 : vector<8x8x16xf32>
      %38 = arith.mulf %37, %37 : vector<8x8x16xf32>
      %cst_41 = arith.constant dense<0.000000e+00> : vector<8x8xf32>
      %39 = vector.multi_reduction <add>, %38, %cst_41 [2] : vector<8x8x16xf32> to vector<8x8xf32>
      %40 = vector.shape_cast %39 : vector<8x8xf32> to vector<8x8x1xf32>
      %cst_42 = arith.constant 1.600000e+01 : f32
      %41 = vector.broadcast %cst_42 : f32 to vector<8x8x1xf32>
      %42 = arith.divf %40, %41 : vector<8x8x1xf32>
      %43 = vector.broadcast %35 : vector<8x8x1xf32> to vector<8x8x16xf32>
      %44 = arith.subf %16, %43 : vector<8x8x16xf32>
      %cst_43 = arith.constant 9.99999974E-6 : f32
      %45 = vector.broadcast %cst_43 : f32 to vector<8x8x1xf32>
      %46 = arith.addf %42, %45 : vector<8x8x1xf32>
      %47 = math.rsqrt %46 : vector<8x8x1xf32>
      %48 = vector.broadcast %47 : vector<8x8x1xf32> to vector<8x8x16xf32>
      %49 = arith.mulf %44, %48 : vector<8x8x16xf32>
      %50 = vector.shape_cast %19 : vector<16xf32> to vector<1x1x16xf32>
      %51 = vector.broadcast %50 : vector<1x1x16xf32> to vector<8x8x16xf32>
      %52 = arith.mulf %49, %51 : vector<8x8x16xf32>
      %53 = vector.shape_cast %21 : vector<16xf32> to vector<1x1x16xf32>
      %54 = vector.broadcast %53 : vector<1x1x16xf32> to vector<8x8x16xf32>
      %55 = arith.addf %52, %54 : vector<8x8x16xf32>
      %56 = arith.truncf %55 : vector<8x8x16xf32> to vector<8x8x16xbf16>
      %cst_44 = arith.constant dense<0.000000e+00> : vector<8x8x16xf32>
      %57 = tpu.matmul %56, %22, %cst_44 {dimension_numbers = #tpu.dot_dimension_numbers<[2], [0], [0, 1], [1], [0, 0, 0, 1, 1, 1], [], []>} : vector<8x8x16xbf16>, vector<16x16xbf16>, vector<8x8x16xf32> -> vector<8x8x16xf32>
      %58 = vector.shape_cast %24 : vector<16xf32> to vector<1x1x16xf32>
      %59 = vector.broadcast %58 : vector<1x1x16xf32> to vector<8x8x16xf32>
      %60 = arith.addf %57, %59 : vector<8x8x16xf32>
      %61 = arith.negf %60 : vector<8x8x16xf32>
      %62 = math.exp %61 : vector<8x8x16xf32>
      %cst_45 = arith.constant 1.000000e+00 : f32
      %63 = vector.broadcast %cst_45 : f32 to vector<8x8x16xf32>
      %64 = arith.addf %63, %62 : vector<8x8x16xf32>
      %65 = arith.divf %63, %64 : vector<8x8x16xf32>
      %cst_46 = arith.constant dense<0.000000e+00> : vector<8x8xf32>
      %66 = vector.multi_reduction <add>, %17, %cst_46 [0] : vector<16x8x8xf32> to vector<8x8xf32>
      %67 = vector.shape_cast %66 : vector<8x8xf32> to vector<1x8x8xf32>
      %cst_47 = arith.constant 1.600000e+01 : f32
      %68 = vector.broadcast %cst_47 : f32 to vector<1x8x8xf32>
      %69 = arith.divf %67, %68 : vector<1x8x8xf32>
      %70 = vector.broadcast %69 : vector<1x8x8xf32> to vector<16x8x8xf32>
      %71 = arith.subf %17, %70 : vector<16x8x8xf32>
      %72 = arith.mulf %71, %71 : vector<16x8x8xf32>
      %cst_48 = arith.constant dense<0.000000e+00> : vector<8x8xf32>
      %73 = vector.multi_reduction <add>, %72, %cst_48 [0] : vector<16x8x8xf32> to vector<8x8xf32>
      %74 = vector.shape_cast %73 : vector<8x8xf32> to vector<1x8x8xf32>
      %cst_49 = arith.constant 1.600000e+01 : f32
      %75 = vector.broadcast %cst_49 : f32 to vector<1x8x8xf32>
      %76 = arith.divf %74, %75 : vector<1x8x8xf32>
      %77 = vector.broadcast %69 : vector<1x8x8xf32> to vector<16x8x8xf32>
      %78 = arith.subf %17, %77 : vector<16x8x8xf32>
      %cst_50 = arith.constant 9.99999974E-6 : f32
      %79 = vector.broadcast %cst_50 : f32 to vector<1x8x8xf32>
      %80 = arith.addf %76, %79 : vector<1x8x8xf32>
      %81 = math.rsqrt %80 : vector<1x8x8xf32>
      %82 = vector.broadcast %81 : vector<1x8x8xf32> to vector<16x8x8xf32>
      %83 = arith.mulf %78, %82 : vector<16x8x8xf32>
      %84 = tpu.transpose %83, [1, 2, 0] : vector<16x8x8xf32> -> vector<8x8x16xf32>
      %85 = vector.shape_cast %26 : vector<16xf32> to vector<1x1x16xf32>
      %86 = vector.broadcast %85 : vector<1x1x16xf32> to vector<8x8x16xf32>
      %87 = arith.mulf %84, %86 : vector<8x8x16xf32>
      %88 = vector.shape_cast %28 : vector<16xf32> to vector<1x1x16xf32>
      %89 = vector.broadcast %88 : vector<1x1x16xf32> to vector<8x8x16xf32>
      %90 = arith.addf %87, %89 : vector<8x8x16xf32>
      %91 = arith.mulf %90, %65 : vector<8x8x16xf32>
      %92 = arith.truncf %91 : vector<8x8x16xf32> to vector<8x8x16xbf16>
      %cst_51 = arith.constant dense<0.000000e+00> : vector<8x8x16xf32>
      %93 = tpu.matmul %92, %29, %cst_51 {dimension_numbers = #tpu.dot_dimension_numbers<[2], [0], [0, 1], [1], [0, 0, 0, 1, 1, 1], [], []>} : vector<8x8x16xbf16>, vector<16x16xbf16>, vector<8x8x16xf32> -> vector<8x8x16xf32>
      %94 = vector.shape_cast %31 : vector<16xf32> to vector<1x1x16xf32>
      %95 = vector.broadcast %94 : vector<1x1x16xf32> to vector<8x8x16xf32>
      %96 = arith.addf %93, %95 : vector<8x8x16xf32>
      %97 = arith.addf %16, %96 : vector<8x8x16xf32>
      %98 = arith.truncf %97 : vector<8x8x16xf32> to vector<8x8x16xbf16>
      %c0_52 = arith.constant 0 : index
      %c0_53 = arith.constant 0 : index
      %c0_54 = arith.constant 0 : index
      %c0_55 = arith.constant 0 : index
      %99 = vector.load %arg18[%c0_52, %c0_53, %c0_54, %c0_55] : memref<1x8x8x16xbf16, #tpu.memory_space<vmem>>, vector<1x8x8x16xbf16>
      %100 = vector.shape_cast %99 : vector<1x8x8x16xbf16> to vector<8x8x16xbf16>
      %101 = vector.shape_cast %98 : vector<8x8x16xbf16> to vector<1x8x8x16xbf16>
      tpu.vector_store %arg18[%c0_52, %c0_53, %c0_54, %c0_55], %101 {strides = array<i32>} : memref<1x8x8x16xbf16, #tpu.memory_space<vmem>>, vector<1x8x8x16xbf16>,
      %c0_56 = arith.constant 0 : index
      %c0_57 = arith.constant 0 : index
      %102 = vector.load %arg14[%c0_56, %c0_57] : memref<1x16xf32, #tpu.memory_space<vmem>>, vector<1x16xf32>
      %103 = vector.shape_cast %102 : vector<1x16xf32> to vector<16xf32>
      %c0_58 = arith.constant 0 : index
      %c0_59 = arith.constant 0 : index
      %104 = vector.load %arg15[%c0_58, %c0_59] : memref<1x16xf32, #tpu.memory_space<vmem>>, vector<1x16xf32>
      %105 = vector.shape_cast %104 : vector<1x16xf32> to vector<16xf32>
      %cst_60 = arith.constant dense<0.000000e+00> : vector<8x8xf32>
      %106 = vector.multi_reduction <add>, %97, %cst_60 [2] : vector<8x8x16xf32> to vector<8x8xf32>
      %107 = vector.shape_cast %106 : vector<8x8xf32> to vector<8x8x1xf32>
      %cst_61 = arith.constant 1.600000e+01 : f32
      %108 = vector.broadcast %cst_61 : f32 to vector<8x8x1xf32>
      %109 = arith.divf %107, %108 : vector<8x8x1xf32>
      %110 = vector.broadcast %109 : vector<8x8x1xf32> to vector<8x8x16xf32>
      %111 = arith.subf %97, %110 : vector<8x8x16xf32>
      %112 = arith.mulf %111, %111 : vector<8x8x16xf32>
      %cst_62 = arith.constant dense<0.000000e+00> : vector<8x8xf32>
      %113 = vector.multi_reduction <add>, %112, %cst_62 [2] : vector<8x8x16xf32> to vector<8x8xf32>
      %114 = vector.shape_cast %113 : vector<8x8xf32> to vector<8x8x1xf32>
      %cst_63 = arith.constant 1.600000e+01 : f32
      %115 = vector.broadcast %cst_63 : f32 to vector<8x8x1xf32>
      %116 = arith.divf %114, %115 : vector<8x8x1xf32>
      %117 = vector.broadcast %109 : vector<8x8x1xf32> to vector<8x8x16xf32>
      %118 = arith.subf %97, %117 : vector<8x8x16xf32>
      %cst_64 = arith.constant 9.99999974E-6 : f32
      %119 = vector.broadcast %cst_64 : f32 to vector<8x8x1xf32>
      %120 = arith.addf %116, %119 : vector<8x8x1xf32>
      %121 = math.rsqrt %120 : vector<8x8x1xf32>
      %122 = vector.broadcast %121 : vector<8x8x1xf32> to vector<8x8x16xf32>
      %123 = arith.mulf %118, %122 : vector<8x8x16xf32>
      %124 = vector.shape_cast %103 : vector<16xf32> to vector<1x1x16xf32>
      %125 = vector.broadcast %124 : vector<1x1x16xf32> to vector<8x8x16xf32>
      %126 = arith.mulf %123, %125 : vector<8x8x16xf32>
      %127 = vector.shape_cast %105 : vector<16xf32> to vector<1x1x16xf32>
      %128 = vector.broadcast %127 : vector<1x1x16xf32> to vector<8x8x16xf32>
      %129 = arith.addf %126, %128 : vector<8x8x16xf32>
      %130 = arith.truncf %129 : vector<8x8x16xf32> to vector<8x8x16xbf16>
      %c0_65 = arith.constant 0 : index
      %c0_66 = arith.constant 0 : index
      %131 = vector.load %arg16[%c0_65, %c0_66] : memref<16x48xbf16, #tpu.memory_space<vmem>>, vector<16x48xbf16>
      %cst_67 = arith.constant dense<0.000000e+00> : vector<8x8x48xf32>
      %132 = tpu.matmul %130, %131, %cst_67 {dimension_numbers = #tpu.dot_dimension_numbers<[2], [0], [0, 1], [1], [0, 0, 0, 1, 1, 1], [], []>} : vector<8x8x16xbf16>, vector<16x48xbf16>, vector<8x8x48xf32> -> vector<8x8x48xf32>
      %c0_68 = arith.constant 0 : index
      %c0_69 = arith.constant 0 : index
      %133 = vector.load %arg17[%c0_68, %c0_69] : memref<1x48xf32, #tpu.memory_space<vmem>>, vector<1x48xf32>
      %134 = vector.shape_cast %133 : vector<1x48xf32> to vector<48xf32>
      %135 = vector.shape_cast %134 : vector<48xf32> to vector<1x1x48xf32>
      %136 = vector.broadcast %135 : vector<1x1x48xf32> to vector<8x8x48xf32>
      %137 = arith.addf %132, %136 : vector<8x8x48xf32>
      %138 = vector.extract_strided_slice %137 {offsets = [0, 0, 32], sizes = [8, 8, 16], strides = [1, 1, 1]} : vector<8x8x48xf32> to vector<8x8x16xf32>
      %139 = arith.negf %138 : vector<8x8x16xf32>
      %140 = math.exp %139 : vector<8x8x16xf32>
      %cst_70 = arith.constant 1.000000e+00 : f32
      %141 = vector.broadcast %cst_70 : f32 to vector<8x8x16xf32>
      %142 = arith.addf %141, %140 : vector<8x8x16xf32>
      %143 = arith.divf %141, %142 : vector<8x8x16xf32>
      %144 = vector.extract_strided_slice %137 {offsets = [0, 0, 0], sizes = [8, 8, 16], strides = [1, 1, 1]} : vector<8x8x48xf32> to vector<8x8x16xf32>
      %145 = arith.mulf %144, %143 : vector<8x8x16xf32>
      %146 = vector.extract_strided_slice %137 {offsets = [0, 0, 16], sizes = [8, 8, 16], strides = [1, 1, 1]} : vector<8x8x48xf32> to vector<8x8x16xf32>
      %147 = arith.mulf %146, %143 : vector<8x8x16xf32>
      %148 = arith.truncf %145 : vector<8x8x16xf32> to vector<8x8x16xbf16>
      %149 = tpu.transpose %148, [2, 0, 1] : vector<8x8x16xbf16> -> vector<16x8x8xbf16>
      %c0_71 = arith.constant 0 : index
      %c0_72 = arith.constant 0 : index
      %c0_73 = arith.constant 0 : index
      %c0_74 = arith.constant 0 : index
      %150 = vector.load %arg19[%c0_71, %c0_72, %c0_73, %c0_74] : memref<1x16x8x8xbf16, #tpu.memory_space<vmem>>, vector<1x16x8x8xbf16>
      %151 = vector.shape_cast %150 : vector<1x16x8x8xbf16> to vector<16x8x8xbf16>
      %152 = vector.shape_cast %149 : vector<16x8x8xbf16> to vector<1x16x8x8xbf16>
      tpu.vector_store %arg19[%c0_71, %c0_72, %c0_73, %c0_74], %152 {strides = array<i32>} : memref<1x16x8x8xbf16, #tpu.memory_space<vmem>>, vector<1x16x8x8xbf16>,
      %153 = arith.truncf %147 : vector<8x8x16xf32> to vector<8x8x16xbf16>
      %154 = tpu.transpose %153, [2, 0, 1] : vector<8x8x16xbf16> -> vector<16x8x8xbf16>
      %c0_75 = arith.constant 0 : index
      %c0_76 = arith.constant 0 : index
      %c0_77 = arith.constant 0 : index
      %c0_78 = arith.constant 0 : index
      %155 = vector.load %arg20[%c0_75, %c0_76, %c0_77, %c0_78] : memref<1x16x8x8xbf16, #tpu.memory_space<vmem>>, vector<1x16x8x8xbf16>
      %156 = vector.shape_cast %155 : vector<1x16x8x8xbf16> to vector<16x8x8xbf16>
      %157 = vector.shape_cast %154 : vector<16x8x8xbf16> to vector<1x16x8x8xbf16>
      tpu.vector_store %arg20[%c0_75, %c0_76, %c0_77, %c0_78], %157 {strides = array<i32>} : memref<1x16x8x8xbf16, #tpu.memory_space<vmem>>, vector<1x16x8x8xbf16>,
    } else {
    }
    return
  }
  func.func @transform_0(%arg0: i32, %arg1: i32, %arg2: i32) -> (i32, i32, i32, i32) {
    %c0_i32 = arith.constant 0 : i32
    %c0_i32_0 = arith.constant 0 : i32
    return %arg0, %c0_i32, %arg1, %arg2 : i32, i32, i32, i32
  }
  func.func @transform_1(%arg0: i32, %arg1: i32, %arg2: i32) -> (i32, i32, i32, i32) {
    %c0_i32 = arith.constant 0 : i32
    %c0_i32_0 = arith.constant 0 : i32
    %c0_i32_1 = arith.constant 0 : i32
    return %arg0, %c0_i32, %c0_i32_0, %arg2 : i32, i32, i32, i32
  }
  func.func @transform_2(%arg0: i32, %arg1: i32, %arg2: i32) -> (i32, i32, i32, i32) {
    %c0_i32 = arith.constant 0 : i32
    %c0_i32_0 = arith.constant 0 : i32
    %c0_i32_1 = arith.constant 0 : i32
    return %arg0, %arg1, %c0_i32, %c0_i32_0 : i32, i32, i32, i32
  }
  func.func @transform_3(%arg0: i32, %arg1: i32, %arg2: i32) -> (i32, i32) {
    %c0_i32 = arith.constant 0 : i32
    %c0_i32_0 = arith.constant 0 : i32
    %c0_i32_1 = arith.constant 0 : i32
    return %c0_i32, %c0_i32_0 : i32, i32
  }
  func.func @transform_4(%arg0: i32, %arg1: i32, %arg2: i32) -> (i32, i32) {
    %c0_i32 = arith.constant 0 : i32
    %c0_i32_0 = arith.constant 0 : i32
    %c0_i32_1 = arith.constant 0 : i32
    return %c0_i32, %c0_i32_0 : i32, i32
  }
  func.func @transform_5(%arg0: i32, %arg1: i32, %arg2: i32) -> (i32, i32) {
    %c0_i32 = arith.constant 0 : i32
    %c0_i32_0 = arith.constant 0 : i32
    %c0_i32_1 = arith.constant 0 : i32
    return %c0_i32, %c0_i32_0 : i32, i32
  }
  func.func @transform_6(%arg0: i32, %arg1: i32, %arg2: i32) -> (i32, i32) {
    %c0_i32 = arith.constant 0 : i32
    %c0_i32_0 = arith.constant 0 : i32
    %c0_i32_1 = arith.constant 0 : i32
    return %c0_i32, %c0_i32_0 : i32, i32
  }
  func.func @transform_7(%arg0: i32, %arg1: i32, %arg2: i32) -> (i32, i32) {
    %c0_i32 = arith.constant 0 : i32
    %c0_i32_0 = arith.constant 0 : i32
    %c0_i32_1 = arith.constant 0 : i32
    return %c0_i32, %c0_i32_0 : i32, i32
  }
  func.func @transform_8(%arg0: i32, %arg1: i32, %arg2: i32) -> (i32, i32) {
    %c0_i32 = arith.constant 0 : i32
    %c0_i32_0 = arith.constant 0 : i32
    %c0_i32_1 = arith.constant 0 : i32
    return %c0_i32, %c0_i32_0 : i32, i32
  }
  func.func @transform_9(%arg0: i32, %arg1: i32, %arg2: i32) -> (i32, i32) {
    %c0_i32 = arith.constant 0 : i32
    %c0_i32_0 = arith.constant 0 : i32
    %c0_i32_1 = arith.constant 0 : i32
    return %c0_i32, %c0_i32_0 : i32, i32
  }
  func.func @transform_10(%arg0: i32, %arg1: i32, %arg2: i32) -> (i32, i32) {
    %c0_i32 = arith.constant 0 : i32
    %c0_i32_0 = arith.constant 0 : i32
    %c0_i32_1 = arith.constant 0 : i32
    return %c0_i32, %c0_i32_0 : i32, i32
  }
  func.func @transform_11(%arg0: i32, %arg1: i32, %arg2: i32) -> (i32, i32) {
    %c0_i32 = arith.constant 0 : i32
    %c0_i32_0 = arith.constant 0 : i32
    %c0_i32_1 = arith.constant 0 : i32
    return %c0_i32, %c0_i32_0 : i32, i32
  }
  func.func @transform_12(%arg0: i32, %arg1: i32, %arg2: i32) -> (i32, i32) {
    %c0_i32 = arith.constant 0 : i32
    %c0_i32_0 = arith.constant 0 : i32
    %c0_i32_1 = arith.constant 0 : i32
    return %c0_i32, %c0_i32_0 : i32, i32
  }
  func.func @transform_13(%arg0: i32, %arg1: i32, %arg2: i32) -> (i32, i32) {
    %c0_i32 = arith.constant 0 : i32
    %c0_i32_0 = arith.constant 0 : i32
    %c0_i32_1 = arith.constant 0 : i32
    return %c0_i32, %c0_i32_0 : i32, i32
  }
  func.func @transform_14(%arg0: i32, %arg1: i32, %arg2: i32) -> (i32, i32) {
    %c0_i32 = arith.constant 0 : i32
    %c0_i32_0 = arith.constant 0 : i32
    %c0_i32_1 = arith.constant 0 : i32
    return %c0_i32, %c0_i32_0 : i32, i32
  }
  func.func @transform_15(%arg0: i32, %arg1: i32, %arg2: i32) -> (i32, i32, i32, i32) {
    %c0_i32 = arith.constant 0 : i32
    %c0_i32_0 = arith.constant 0 : i32
    %c0_i32_1 = arith.constant 0 : i32
    return %arg0, %arg1, %c0_i32, %c0_i32_0 : i32, i32, i32, i32
  }
  func.func @transform_16(%arg0: i32, %arg1: i32, %arg2: i32) -> (i32, i32, i32, i32) {
    %c0_i32 = arith.constant 0 : i32
    %c0_i32_0 = arith.constant 0 : i32
    %c0_i32_1 = arith.constant 0 : i32
    return %arg0, %c0_i32, %arg1, %c0_i32_0 : i32, i32, i32, i32
  }
  func.func @transform_17(%arg0: i32, %arg1: i32, %arg2: i32) -> (i32, i32, i32, i32) {
    %c0_i32 = arith.constant 0 : i32
    %c0_i32_0 = arith.constant 0 : i32
    %c0_i32_1 = arith.constant 0 : i32
    return %arg0, %c0_i32, %arg1, %c0_i32_0 : i32, i32, i32, i32
  }
}

module attributes {stable_mosaic.version = 11 : i64} {
  func.func @_tri_in_mix_kernel(%arg0: i32, %arg1: i32, %arg2: i32, %arg3: memref<1x16x8x8xbf16, #tpu.memory_space<vmem>>, %arg4: memref<1x16x8x8xbf16, #tpu.memory_space<vmem>>, %arg5: memref<1x8x8x16xbf16, #tpu.memory_space<vmem>>, %arg6: memref<1x16xf32, #tpu.memory_space<vmem>>, %arg7: memref<1x16xf32, #tpu.memory_space<vmem>>, %arg8: memref<16x16xbf16, #tpu.memory_space<vmem>>, %arg9: memref<1x16xf32, #tpu.memory_space<vmem>>, %arg10: memref<1x16xf32, #tpu.memory_space<vmem>>, %arg11: memref<1x16xf32, #tpu.memory_space<vmem>>, %arg12: memref<16x16xbf16, #tpu.memory_space<vmem>>, %arg13: memref<1x16xf32, #tpu.memory_space<vmem>>, %arg14: memref<1x16xf32, #tpu.memory_space<vmem>>, %arg15: memref<1x16xf32, #tpu.memory_space<vmem>>, %arg16: memref<16x32xbf16, #tpu.memory_space<vmem>>, %arg17: memref<1x32xf32, #tpu.memory_space<vmem>>, %arg18: memref<32x16xbf16, #tpu.memory_space<vmem>>, %arg19: memref<1x16xf32, #tpu.memory_space<vmem>>, %arg20: memref<1x8x8x16xbf16, #tpu.memory_space<vmem>>, %arg21: memref<16x8x8xf32, #tpu.memory_space<vmem>>) attributes {dimension_semantics = [#tpu.dimension_semantics<parallel>, #tpu.dimension_semantics<parallel>, #tpu.dimension_semantics<arbitrary>], iteration_bounds = array<i64: 2, 1, 1>, scalar_prefetch = 0 : i64, scratch_operands = 1 : i64, tpu.core_type = #tpu.core_type<tc>, window_params = [{transform_indices = @transform_0, window_bounds = array<i64: 1, 16, 8, 8>}, {transform_indices = @transform_1, window_bounds = array<i64: 1, 16, 8, 8>}, {pipeline_mode = #tpu.pipeline_mode<synchronous>, transform_indices = @transform_2, window_bounds = array<i64: 1, 8, 8, 16>}, {pipeline_mode = #tpu.pipeline_mode<synchronous>, transform_indices = @transform_3, window_bounds = array<i64: 1, 16>}, {pipeline_mode = #tpu.pipeline_mode<synchronous>, transform_indices = @transform_4, window_bounds = array<i64: 1, 16>}, {pipeline_mode = #tpu.pipeline_mode<synchronous>, transform_indices = @transform_5, window_bounds = array<i64: 16, 16>}, {pipeline_mode = #tpu.pipeline_mode<synchronous>, transform_indices = @transform_6, window_bounds = array<i64: 1, 16>}, {pipeline_mode = #tpu.pipeline_mode<synchronous>, transform_indices = @transform_7, window_bounds = array<i64: 1, 16>}, {pipeline_mode = #tpu.pipeline_mode<synchronous>, transform_indices = @transform_8, window_bounds = array<i64: 1, 16>}, {pipeline_mode = #tpu.pipeline_mode<synchronous>, transform_indices = @transform_9, window_bounds = array<i64: 16, 16>}, {pipeline_mode = #tpu.pipeline_mode<synchronous>, transform_indices = @transform_10, window_bounds = array<i64: 1, 16>}, {pipeline_mode = #tpu.pipeline_mode<synchronous>, transform_indices = @transform_11, window_bounds = array<i64: 1, 16>}, {pipeline_mode = #tpu.pipeline_mode<synchronous>, transform_indices = @transform_12, window_bounds = array<i64: 1, 16>}, {pipeline_mode = #tpu.pipeline_mode<synchronous>, transform_indices = @transform_13, window_bounds = array<i64: 16, 32>}, {pipeline_mode = #tpu.pipeline_mode<synchronous>, transform_indices = @transform_14, window_bounds = array<i64: 1, 32>}, {pipeline_mode = #tpu.pipeline_mode<synchronous>, transform_indices = @transform_15, window_bounds = array<i64: 32, 16>}, {pipeline_mode = #tpu.pipeline_mode<synchronous>, transform_indices = @transform_16, window_bounds = array<i64: 1, 16>}, {transform_indices = @transform_17, window_bounds = array<i64: 1, 8, 8, 16>}]} {
    %c0_i32 = arith.constant 0 : i32
    %0 = arith.cmpi eq, %arg2, %c0_i32 : i32
    %1 = arith.extui %0 : i1 to i32
    %c0_i32_0 = arith.constant 0 : i32
    %2 = arith.cmpi ne, %1, %c0_i32_0 : i32
    scf.if %2 {
      %cst_16 = arith.constant 0.000000e+00 : f32
      %14 = vector.broadcast %cst_16 : f32 to vector<16x8x8xf32>
      %c0_17 = arith.constant 0 : index
      %c0_18 = arith.constant 0 : index
      %c0_19 = arith.constant 0 : index
      %15 = vector.load %arg21[%c0_17, %c0_18, %c0_19] : memref<16x8x8xf32, #tpu.memory_space<vmem>>, vector<16x8x8xf32>
      tpu.vector_store %arg21[%c0_17, %c0_18, %c0_19], %14 {strides = array<i32>} : memref<16x8x8xf32, #tpu.memory_space<vmem>>, vector<16x8x8xf32>,
    } else {
    }
    %c0 = arith.constant 0 : index
    %c0_1 = arith.constant 0 : index
    %c0_2 = arith.constant 0 : index
    %3 = vector.load %arg21[%c0, %c0_1, %c0_2] : memref<16x8x8xf32, #tpu.memory_space<vmem>>, vector<16x8x8xf32>
    %c0_3 = arith.constant 0 : index
    %c0_4 = arith.constant 0 : index
    %c0_5 = arith.constant 0 : index
    %c0_6 = arith.constant 0 : index
    %4 = vector.load %arg3[%c0_3, %c0_4, %c0_5, %c0_6] : memref<1x16x8x8xbf16, #tpu.memory_space<vmem>>, vector<1x16x8x8xbf16>
    %5 = vector.shape_cast %4 : vector<1x16x8x8xbf16> to vector<16x8x8xbf16>
    %c0_7 = arith.constant 0 : index
    %c0_8 = arith.constant 0 : index
    %c0_9 = arith.constant 0 : index
    %c0_10 = arith.constant 0 : index
    %6 = vector.load %arg4[%c0_7, %c0_8, %c0_9, %c0_10] : memref<1x16x8x8xbf16, #tpu.memory_space<vmem>>, vector<1x16x8x8xbf16>
    %7 = vector.shape_cast %6 : vector<1x16x8x8xbf16> to vector<16x8x8xbf16>
    "tpu.trace_start"() <{level = 10 : i32, message = "dkj,dki->dij"}> : () -> ()
    %cst = arith.constant dense<0.000000e+00> : vector<16x8x8xf32>
    %8 = tpu.matmul %7, %5, %cst {dimension_numbers = #tpu.dot_dimension_numbers<[1], [1], [2], [2], [0, 0, 0, 2, 1, 2], [0], [0]>} : vector<16x8x8xbf16>, vector<16x8x8xbf16>, vector<16x8x8xf32> -> vector<16x8x8xf32>
    "tpu.trace_stop"() : () -> ()
    %9 = arith.addf %3, %8 : vector<16x8x8xf32>
    %c0_11 = arith.constant 0 : index
    %c0_12 = arith.constant 0 : index
    %c0_13 = arith.constant 0 : index
    %10 = vector.load %arg21[%c0_11, %c0_12, %c0_13] : memref<16x8x8xf32, #tpu.memory_space<vmem>>, vector<16x8x8xf32>
    tpu.vector_store %arg21[%c0_11, %c0_12, %c0_13], %9 {strides = array<i32>} : memref<16x8x8xf32, #tpu.memory_space<vmem>>, vector<16x8x8xf32>,
    %c0_i32_14 = arith.constant 0 : i32
    %11 = arith.cmpi eq, %arg2, %c0_i32_14 : i32
    %12 = arith.extui %11 : i1 to i32
    %c0_i32_15 = arith.constant 0 : i32
    %13 = arith.cmpi ne, %12, %c0_i32_15 : i32
    scf.if %13 {
      %c0_16 = arith.constant 0 : index
      %c0_17 = arith.constant 0 : index
      %c0_18 = arith.constant 0 : index
      %c0_19 = arith.constant 0 : index
      %14 = vector.load %arg5[%c0_16, %c0_17, %c0_18, %c0_19] : memref<1x8x8x16xbf16, #tpu.memory_space<vmem>>, vector<1x8x8x16xbf16>
      %15 = vector.shape_cast %14 : vector<1x8x8x16xbf16> to vector<8x8x16xbf16>
      %16 = arith.extf %15 : vector<8x8x16xbf16> to vector<8x8x16xf32>
      %c0_20 = arith.constant 0 : index
      %c0_21 = arith.constant 0 : index
      %c0_22 = arith.constant 0 : index
      %17 = vector.load %arg21[%c0_20, %c0_21, %c0_22] : memref<16x8x8xf32, #tpu.memory_space<vmem>>, vector<16x8x8xf32>
      %c0_23 = arith.constant 0 : index
      %c0_24 = arith.constant 0 : index
      %18 = vector.load %arg6[%c0_23, %c0_24] : memref<1x16xf32, #tpu.memory_space<vmem>>, vector<1x16xf32>
      %19 = vector.shape_cast %18 : vector<1x16xf32> to vector<16xf32>
      %c0_25 = arith.constant 0 : index
      %c0_26 = arith.constant 0 : index
      %20 = vector.load %arg7[%c0_25, %c0_26] : memref<1x16xf32, #tpu.memory_space<vmem>>, vector<1x16xf32>
      %21 = vector.shape_cast %20 : vector<1x16xf32> to vector<16xf32>
      %c0_27 = arith.constant 0 : index
      %c0_28 = arith.constant 0 : index
      %22 = vector.load %arg8[%c0_27, %c0_28] : memref<16x16xbf16, #tpu.memory_space<vmem>>, vector<16x16xbf16>
      %c0_29 = arith.constant 0 : index
      %c0_30 = arith.constant 0 : index
      %23 = vector.load %arg9[%c0_29, %c0_30] : memref<1x16xf32, #tpu.memory_space<vmem>>, vector<1x16xf32>
      %24 = vector.shape_cast %23 : vector<1x16xf32> to vector<16xf32>
      %c0_31 = arith.constant 0 : index
      %c0_32 = arith.constant 0 : index
      %25 = vector.load %arg10[%c0_31, %c0_32] : memref<1x16xf32, #tpu.memory_space<vmem>>, vector<1x16xf32>
      %26 = vector.shape_cast %25 : vector<1x16xf32> to vector<16xf32>
      %c0_33 = arith.constant 0 : index
      %c0_34 = arith.constant 0 : index
      %27 = vector.load %arg11[%c0_33, %c0_34] : memref<1x16xf32, #tpu.memory_space<vmem>>, vector<1x16xf32>
      %28 = vector.shape_cast %27 : vector<1x16xf32> to vector<16xf32>
      %c0_35 = arith.constant 0 : index
      %c0_36 = arith.constant 0 : index
      %29 = vector.load %arg12[%c0_35, %c0_36] : memref<16x16xbf16, #tpu.memory_space<vmem>>, vector<16x16xbf16>
      %c0_37 = arith.constant 0 : index
      %c0_38 = arith.constant 0 : index
      %30 = vector.load %arg13[%c0_37, %c0_38] : memref<1x16xf32, #tpu.memory_space<vmem>>, vector<1x16xf32>
      %31 = vector.shape_cast %30 : vector<1x16xf32> to vector<16xf32>
      %cst_39 = arith.constant dense<0.000000e+00> : vector<8x8xf32>
      %32 = vector.multi_reduction <add>, %16, %cst_39 [2] : vector<8x8x16xf32> to vector<8x8xf32>
      %33 = vector.shape_cast %32 : vector<8x8xf32> to vector<8x8x1xf32>
      %cst_40 = arith.constant 1.600000e+01 : f32
      %34 = vector.broadcast %cst_40 : f32 to vector<8x8x1xf32>
      %35 = arith.divf %33, %34 : vector<8x8x1xf32>
      %36 = vector.broadcast %35 : vector<8x8x1xf32> to vector<8x8x16xf32>
      %37 = arith.subf %16, %36 : vector<8x8x16xf32>
      %38 = arith.mulf %37, %37 : vector<8x8x16xf32>
      %cst_41 = arith.constant dense<0.000000e+00> : vector<8x8xf32>
      %39 = vector.multi_reduction <add>, %38, %cst_41 [2] : vector<8x8x16xf32> to vector<8x8xf32>
      %40 = vector.shape_cast %39 : vector<8x8xf32> to vector<8x8x1xf32>
      %cst_42 = arith.constant 1.600000e+01 : f32
      %41 = vector.broadcast %cst_42 : f32 to vector<8x8x1xf32>
      %42 = arith.divf %40, %41 : vector<8x8x1xf32>
      %43 = vector.broadcast %35 : vector<8x8x1xf32> to vector<8x8x16xf32>
      %44 = arith.subf %16, %43 : vector<8x8x16xf32>
      %cst_43 = arith.constant 9.99999974E-6 : f32
      %45 = vector.broadcast %cst_43 : f32 to vector<8x8x1xf32>
      %46 = arith.addf %42, %45 : vector<8x8x1xf32>
      %47 = math.rsqrt %46 : vector<8x8x1xf32>
      %48 = vector.broadcast %47 : vector<8x8x1xf32> to vector<8x8x16xf32>
      %49 = arith.mulf %44, %48 : vector<8x8x16xf32>
      %50 = vector.shape_cast %19 : vector<16xf32> to vector<1x1x16xf32>
      %51 = vector.broadcast %50 : vector<1x1x16xf32> to vector<8x8x16xf32>
      %52 = arith.mulf %49, %51 : vector<8x8x16xf32>
      %53 = vector.shape_cast %21 : vector<16xf32> to vector<1x1x16xf32>
      %54 = vector.broadcast %53 : vector<1x1x16xf32> to vector<8x8x16xf32>
      %55 = arith.addf %52, %54 : vector<8x8x16xf32>
      %56 = arith.truncf %55 : vector<8x8x16xf32> to vector<8x8x16xbf16>
      %cst_44 = arith.constant dense<0.000000e+00> : vector<8x8x16xf32>
      %57 = tpu.matmul %56, %22, %cst_44 {dimension_numbers = #tpu.dot_dimension_numbers<[2], [0], [0, 1], [1], [0, 0, 0, 1, 1, 1], [], []>} : vector<8x8x16xbf16>, vector<16x16xbf16>, vector<8x8x16xf32> -> vector<8x8x16xf32>
      %58 = vector.shape_cast %24 : vector<16xf32> to vector<1x1x16xf32>
      %59 = vector.broadcast %58 : vector<1x1x16xf32> to vector<8x8x16xf32>
      %60 = arith.addf %57, %59 : vector<8x8x16xf32>
      %61 = arith.negf %60 : vector<8x8x16xf32>
      %62 = math.exp %61 : vector<8x8x16xf32>
      %cst_45 = arith.constant 1.000000e+00 : f32
      %63 = vector.broadcast %cst_45 : f32 to vector<8x8x16xf32>
      %64 = arith.addf %63, %62 : vector<8x8x16xf32>
      %65 = arith.divf %63, %64 : vector<8x8x16xf32>
      %cst_46 = arith.constant dense<0.000000e+00> : vector<8x8xf32>
      %66 = vector.multi_reduction <add>, %17, %cst_46 [0] : vector<16x8x8xf32> to vector<8x8xf32>
      %67 = vector.shape_cast %66 : vector<8x8xf32> to vector<1x8x8xf32>
      %cst_47 = arith.constant 1.600000e+01 : f32
      %68 = vector.broadcast %cst_47 : f32 to vector<1x8x8xf32>
      %69 = arith.divf %67, %68 : vector<1x8x8xf32>
      %70 = vector.broadcast %69 : vector<1x8x8xf32> to vector<16x8x8xf32>
      %71 = arith.subf %17, %70 : vector<16x8x8xf32>
      %72 = arith.mulf %71, %71 : vector<16x8x8xf32>
      %cst_48 = arith.constant dense<0.000000e+00> : vector<8x8xf32>
      %73 = vector.multi_reduction <add>, %72, %cst_48 [0] : vector<16x8x8xf32> to vector<8x8xf32>
      %74 = vector.shape_cast %73 : vector<8x8xf32> to vector<1x8x8xf32>
      %cst_49 = arith.constant 1.600000e+01 : f32
      %75 = vector.broadcast %cst_49 : f32 to vector<1x8x8xf32>
      %76 = arith.divf %74, %75 : vector<1x8x8xf32>
      %77 = vector.broadcast %69 : vector<1x8x8xf32> to vector<16x8x8xf32>
      %78 = arith.subf %17, %77 : vector<16x8x8xf32>
      %cst_50 = arith.constant 9.99999974E-6 : f32
      %79 = vector.broadcast %cst_50 : f32 to vector<1x8x8xf32>
      %80 = arith.addf %76, %79 : vector<1x8x8xf32>
      %81 = math.rsqrt %80 : vector<1x8x8xf32>
      %82 = vector.broadcast %81 : vector<1x8x8xf32> to vector<16x8x8xf32>
      %83 = arith.mulf %78, %82 : vector<16x8x8xf32>
      %84 = tpu.transpose %83, [1, 2, 0] : vector<16x8x8xf32> -> vector<8x8x16xf32>
      %85 = vector.shape_cast %26 : vector<16xf32> to vector<1x1x16xf32>
      %86 = vector.broadcast %85 : vector<1x1x16xf32> to vector<8x8x16xf32>
      %87 = arith.mulf %84, %86 : vector<8x8x16xf32>
      %88 = vector.shape_cast %28 : vector<16xf32> to vector<1x1x16xf32>
      %89 = vector.broadcast %88 : vector<1x1x16xf32> to vector<8x8x16xf32>
      %90 = arith.addf %87, %89 : vector<8x8x16xf32>
      %91 = arith.mulf %90, %65 : vector<8x8x16xf32>
      %92 = arith.truncf %91 : vector<8x8x16xf32> to vector<8x8x16xbf16>
      %cst_51 = arith.constant dense<0.000000e+00> : vector<8x8x16xf32>
      %93 = tpu.matmul %92, %29, %cst_51 {dimension_numbers = #tpu.dot_dimension_numbers<[2], [0], [0, 1], [1], [0, 0, 0, 1, 1, 1], [], []>} : vector<8x8x16xbf16>, vector<16x16xbf16>, vector<8x8x16xf32> -> vector<8x8x16xf32>
      %94 = vector.shape_cast %31 : vector<16xf32> to vector<1x1x16xf32>
      %95 = vector.broadcast %94 : vector<1x1x16xf32> to vector<8x8x16xf32>
      %96 = arith.addf %93, %95 : vector<8x8x16xf32>
      %97 = arith.addf %16, %96 : vector<8x8x16xf32>
      %c0_52 = arith.constant 0 : index
      %c0_53 = arith.constant 0 : index
      %98 = vector.load %arg14[%c0_52, %c0_53] : memref<1x16xf32, #tpu.memory_space<vmem>>, vector<1x16xf32>
      %99 = vector.shape_cast %98 : vector<1x16xf32> to vector<16xf32>
      %c0_54 = arith.constant 0 : index
      %c0_55 = arith.constant 0 : index
      %100 = vector.load %arg15[%c0_54, %c0_55] : memref<1x16xf32, #tpu.memory_space<vmem>>, vector<1x16xf32>
      %101 = vector.shape_cast %100 : vector<1x16xf32> to vector<16xf32>
      %cst_56 = arith.constant dense<0.000000e+00> : vector<8x8xf32>
      %102 = vector.multi_reduction <add>, %97, %cst_56 [2] : vector<8x8x16xf32> to vector<8x8xf32>
      %103 = vector.shape_cast %102 : vector<8x8xf32> to vector<8x8x1xf32>
      %cst_57 = arith.constant 1.600000e+01 : f32
      %104 = vector.broadcast %cst_57 : f32 to vector<8x8x1xf32>
      %105 = arith.divf %103, %104 : vector<8x8x1xf32>
      %106 = vector.broadcast %105 : vector<8x8x1xf32> to vector<8x8x16xf32>
      %107 = arith.subf %97, %106 : vector<8x8x16xf32>
      %108 = arith.mulf %107, %107 : vector<8x8x16xf32>
      %cst_58 = arith.constant dense<0.000000e+00> : vector<8x8xf32>
      %109 = vector.multi_reduction <add>, %108, %cst_58 [2] : vector<8x8x16xf32> to vector<8x8xf32>
      %110 = vector.shape_cast %109 : vector<8x8xf32> to vector<8x8x1xf32>
      %cst_59 = arith.constant 1.600000e+01 : f32
      %111 = vector.broadcast %cst_59 : f32 to vector<8x8x1xf32>
      %112 = arith.divf %110, %111 : vector<8x8x1xf32>
      %113 = vector.broadcast %105 : vector<8x8x1xf32> to vector<8x8x16xf32>
      %114 = arith.subf %97, %113 : vector<8x8x16xf32>
      %cst_60 = arith.constant 9.99999974E-6 : f32
      %115 = vector.broadcast %cst_60 : f32 to vector<8x8x1xf32>
      %116 = arith.addf %112, %115 : vector<8x8x1xf32>
      %117 = math.rsqrt %116 : vector<8x8x1xf32>
      %118 = vector.broadcast %117 : vector<8x8x1xf32> to vector<8x8x16xf32>
      %119 = arith.mulf %114, %118 : vector<8x8x16xf32>
      %120 = vector.shape_cast %99 : vector<16xf32> to vector<1x1x16xf32>
      %121 = vector.broadcast %120 : vector<1x1x16xf32> to vector<8x8x16xf32>
      %122 = arith.mulf %119, %121 : vector<8x8x16xf32>
      %123 = vector.shape_cast %101 : vector<16xf32> to vector<1x1x16xf32>
      %124 = vector.broadcast %123 : vector<1x1x16xf32> to vector<8x8x16xf32>
      %125 = arith.addf %122, %124 : vector<8x8x16xf32>
      %126 = arith.truncf %125 : vector<8x8x16xf32> to vector<8x8x16xbf16>
      %c0_61 = arith.constant 0 : index
      %c0_62 = arith.constant 0 : index
      %127 = vector.load %arg16[%c0_61, %c0_62] : memref<16x32xbf16, #tpu.memory_space<vmem>>, vector<16x32xbf16>
      %cst_63 = arith.constant dense<0.000000e+00> : vector<8x8x32xf32>
      %128 = tpu.matmul %126, %127, %cst_63 {dimension_numbers = #tpu.dot_dimension_numbers<[2], [0], [0, 1], [1], [0, 0, 0, 1, 1, 1], [], []>} : vector<8x8x16xbf16>, vector<16x32xbf16>, vector<8x8x32xf32> -> vector<8x8x32xf32>
      %c0_64 = arith.constant 0 : index
      %c0_65 = arith.constant 0 : index
      %129 = vector.load %arg17[%c0_64, %c0_65] : memref<1x32xf32, #tpu.memory_space<vmem>>, vector<1x32xf32>
      %130 = vector.shape_cast %129 : vector<1x32xf32> to vector<32xf32>
      %131 = vector.shape_cast %130 : vector<32xf32> to vector<1x1x32xf32>
      %132 = vector.broadcast %131 : vector<1x1x32xf32> to vector<8x8x32xf32>
      %133 = arith.addf %128, %132 : vector<8x8x32xf32>
      %cst_66 = arith.constant 0.000000e+00 : f32
      %134 = vector.broadcast %cst_66 : f32 to vector<8x8x32xf32>
      %135 = arith.maximumf %133, %134 : vector<8x8x32xf32>
      %136 = arith.truncf %135 : vector<8x8x32xf32> to vector<8x8x32xbf16>
      %c0_67 = arith.constant 0 : index
      %c0_68 = arith.constant 0 : index
      %137 = vector.load %arg18[%c0_67, %c0_68] : memref<32x16xbf16, #tpu.memory_space<vmem>>, vector<32x16xbf16>
      %cst_69 = arith.constant dense<0.000000e+00> : vector<8x8x16xf32>
      %138 = tpu.matmul %136, %137, %cst_69 {dimension_numbers = #tpu.dot_dimension_numbers<[2], [0], [0, 1], [1], [0, 0, 0, 1, 1, 1], [], []>} : vector<8x8x32xbf16>, vector<32x16xbf16>, vector<8x8x16xf32> -> vector<8x8x16xf32>
      %c0_70 = arith.constant 0 : index
      %c0_71 = arith.constant 0 : index
      %139 = vector.load %arg19[%c0_70, %c0_71] : memref<1x16xf32, #tpu.memory_space<vmem>>, vector<1x16xf32>
      %140 = vector.shape_cast %139 : vector<1x16xf32> to vector<16xf32>
      %141 = vector.shape_cast %140 : vector<16xf32> to vector<1x1x16xf32>
      %142 = vector.broadcast %141 : vector<1x1x16xf32> to vector<8x8x16xf32>
      %143 = arith.addf %138, %142 : vector<8x8x16xf32>
      %144 = arith.addf %97, %143 : vector<8x8x16xf32>
      %145 = arith.truncf %144 : vector<8x8x16xf32> to vector<8x8x16xbf16>
      %c0_72 = arith.constant 0 : index
      %c0_73 = arith.constant 0 : index
      %c0_74 = arith.constant 0 : index
      %c0_75 = arith.constant 0 : index
      %146 = vector.load %arg20[%c0_72, %c0_73, %c0_74, %c0_75] : memref<1x8x8x16xbf16, #tpu.memory_space<vmem>>, vector<1x8x8x16xbf16>
      %147 = vector.shape_cast %146 : vector<1x8x8x16xbf16> to vector<8x8x16xbf16>
      %148 = vector.shape_cast %145 : vector<8x8x16xbf16> to vector<1x8x8x16xbf16>
      tpu.vector_store %arg20[%c0_72, %c0_73, %c0_74, %c0_75], %148 {strides = array<i32>} : memref<1x8x8x16xbf16, #tpu.memory_space<vmem>>, vector<1x8x8x16xbf16>,
    } else {
    }
    return
  }
  func.func @transform_0(%arg0: i32, %arg1: i32, %arg2: i32) -> (i32, i32, i32, i32) {
    %c0_i32 = arith.constant 0 : i32
    %c0_i32_0 = arith.constant 0 : i32
    %c0_i32_1 = arith.constant 0 : i32
    return %arg0, %c0_i32, %arg2, %c0_i32_0 : i32, i32, i32, i32
  }
  func.func @transform_1(%arg0: i32, %arg1: i32, %arg2: i32) -> (i32, i32, i32, i32) {
    %c0_i32 = arith.constant 0 : i32
    %c0_i32_0 = arith.constant 0 : i32
    return %arg0, %c0_i32, %arg2, %arg1 : i32, i32, i32, i32
  }
  func.func @transform_2(%arg0: i32, %arg1: i32, %arg2: i32) -> (i32, i32, i32, i32) {
    %c0_i32 = arith.constant 0 : i32
    %c0_i32_0 = arith.constant 0 : i32
    %c0_i32_1 = arith.constant 0 : i32
    return %arg0, %arg1, %c0_i32, %c0_i32_0 : i32, i32, i32, i32
  }
  func.func @transform_3(%arg0: i32, %arg1: i32, %arg2: i32) -> (i32, i32) {
    %c0_i32 = arith.constant 0 : i32
    %c0_i32_0 = arith.constant 0 : i32
    %c0_i32_1 = arith.constant 0 : i32
    return %c0_i32, %c0_i32_0 : i32, i32
  }
  func.func @transform_4(%arg0: i32, %arg1: i32, %arg2: i32) -> (i32, i32) {
    %c0_i32 = arith.constant 0 : i32
    %c0_i32_0 = arith.constant 0 : i32
    %c0_i32_1 = arith.constant 0 : i32
    return %c0_i32, %c0_i32_0 : i32, i32
  }
  func.func @transform_5(%arg0: i32, %arg1: i32, %arg2: i32) -> (i32, i32) {
    %c0_i32 = arith.constant 0 : i32
    %c0_i32_0 = arith.constant 0 : i32
    %c0_i32_1 = arith.constant 0 : i32
    return %c0_i32, %c0_i32_0 : i32, i32
  }
  func.func @transform_6(%arg0: i32, %arg1: i32, %arg2: i32) -> (i32, i32) {
    %c0_i32 = arith.constant 0 : i32
    %c0_i32_0 = arith.constant 0 : i32
    %c0_i32_1 = arith.constant 0 : i32
    return %c0_i32, %c0_i32_0 : i32, i32
  }
  func.func @transform_7(%arg0: i32, %arg1: i32, %arg2: i32) -> (i32, i32) {
    %c0_i32 = arith.constant 0 : i32
    %c0_i32_0 = arith.constant 0 : i32
    %c0_i32_1 = arith.constant 0 : i32
    return %c0_i32, %c0_i32_0 : i32, i32
  }
  func.func @transform_8(%arg0: i32, %arg1: i32, %arg2: i32) -> (i32, i32) {
    %c0_i32 = arith.constant 0 : i32
    %c0_i32_0 = arith.constant 0 : i32
    %c0_i32_1 = arith.constant 0 : i32
    return %c0_i32, %c0_i32_0 : i32, i32
  }
  func.func @transform_9(%arg0: i32, %arg1: i32, %arg2: i32) -> (i32, i32) {
    %c0_i32 = arith.constant 0 : i32
    %c0_i32_0 = arith.constant 0 : i32
    %c0_i32_1 = arith.constant 0 : i32
    return %c0_i32, %c0_i32_0 : i32, i32
  }
  func.func @transform_10(%arg0: i32, %arg1: i32, %arg2: i32) -> (i32, i32) {
    %c0_i32 = arith.constant 0 : i32
    %c0_i32_0 = arith.constant 0 : i32
    %c0_i32_1 = arith.constant 0 : i32
    return %c0_i32, %c0_i32_0 : i32, i32
  }
  func.func @transform_11(%arg0: i32, %arg1: i32, %arg2: i32) -> (i32, i32) {
    %c0_i32 = arith.constant 0 : i32
    %c0_i32_0 = arith.constant 0 : i32
    %c0_i32_1 = arith.constant 0 : i32
    return %c0_i32, %c0_i32_0 : i32, i32
  }
  func.func @transform_12(%arg0: i32, %arg1: i32, %arg2: i32) -> (i32, i32) {
    %c0_i32 = arith.constant 0 : i32
    %c0_i32_0 = arith.constant 0 : i32
    %c0_i32_1 = arith.constant 0 : i32
    return %c0_i32, %c0_i32_0 : i32, i32
  }
  func.func @transform_13(%arg0: i32, %arg1: i32, %arg2: i32) -> (i32, i32) {
    %c0_i32 = arith.constant 0 : i32
    %c0_i32_0 = arith.constant 0 : i32
    %c0_i32_1 = arith.constant 0 : i32
    return %c0_i32, %c0_i32_0 : i32, i32
  }
  func.func @transform_14(%arg0: i32, %arg1: i32, %arg2: i32) -> (i32, i32) {
    %c0_i32 = arith.constant 0 : i32
    %c0_i32_0 = arith.constant 0 : i32
    %c0_i32_1 = arith.constant 0 : i32
    return %c0_i32, %c0_i32_0 : i32, i32
  }
  func.func @transform_15(%arg0: i32, %arg1: i32, %arg2: i32) -> (i32, i32) {
    %c0_i32 = arith.constant 0 : i32
    %c0_i32_0 = arith.constant 0 : i32
    %c0_i32_1 = arith.constant 0 : i32
    return %c0_i32, %c0_i32_0 : i32, i32
  }
  func.func @transform_16(%arg0: i32, %arg1: i32, %arg2: i32) -> (i32, i32) {
    %c0_i32 = arith.constant 0 : i32
    %c0_i32_0 = arith.constant 0 : i32
    %c0_i32_1 = arith.constant 0 : i32
    return %c0_i32, %c0_i32_0 : i32, i32
  }
  func.func @transform_17(%arg0: i32, %arg1: i32, %arg2: i32) -> (i32, i32, i32, i32) {
    %c0_i32 = arith.constant 0 : i32
    %c0_i32_0 = arith.constant 0 : i32
    %c0_i32_1 = arith.constant 0 : i32
    return %arg0, %arg1, %c0_i32, %c0_i32_0 : i32, i32, i32, i32
  }
}

</mosaic_0001>

<bundles_post_ra>
// kernel: graph_module.9
= control target key start
LH: loop header
LB: loop body
LE: loop exit
PB: predicated region body
PF: predicated region fallthrough
CT: control target
= control target key end

     0   :  { %s2571_s25 = smov 0   ;;  %s2573_s26 = smov 0   ;;  %s2986_s0 = inlined_call_operand.vmem [shape: f32[2,8,32], index: 0, kind: input, shape index: {}]   ;;  %s2987_s1 = inlined_call_operand.vmem [shape: f32[2,8,32], index: 1, kind: input, shape index: {}]   ;;  %s2988_s2 = inlined_call_operand.vmem [shape: f32[2,8,16], index: 2, kind: input, shape index: {}]   ;;  %s2989_s3 = inlined_call_operand.vmem [shape: f32[2,8,16], index: 3, kind: input, shape index: {}]   ;;  %s2990_s4 = inlined_call_operand.vmem [shape: bf16[2,8,8,16], index: 4, kind: input, shape index: {}]   ;;  %s2991_s5 = inlined_call_operand.vmem [shape: bf16[32,16], index: 5, kind: input, shape index: {}]   ;;  %s2992_s6 = inlined_call_operand.vmem [shape: f32[1,16], index: 6, kind: input, shape index: {}]   ;;  %s2993_s7 = inlined_call_operand.vmem [shape: f32[1,16], index: 7, kind: input, shape index: {}]   ;;  %s2994_s8 = inlined_call_operand.vmem [shape: f32[1,16], index: 8, kind: input, shape index: {}]   ;;  %s2995_s9 = inlined_call_operand.vmem [shape: bf16[16,48], index: 9, kind: input, shape index: {}]   ;;  %s2996_s10 = inlined_call_operand.vmem [shape: f32[1,48], index: 10, kind: input, shape index: {}]   ;;  %s2997_s11 = inlined_call_operand.vmem [shape: bf16[2,8,8,16], index: 11, kind: output, shape index: {0}]   ;;  %s2998_s12 = inlined_call_operand.vmem [shape: bf16[2,16,8,8], index: 12, kind: output, shape index: {1}]   ;;  %s2999_s13 = inlined_call_operand.vmem [shape: bf16[2,16,8,8], index: 13, kind: output, shape index: {2}]  }
   0x1   :  { %s2575_s27 = smov 0  }
   0x2 LB: > { %s36_s28 = sadd.s32 1, %s2489_s26  ;;  %p2278_p0 = scmp.ge.s32.totalorder %s2493_s27, 1  ;;  %s2493_s27 = sphi %s2575_s27, %s24_s27   ;;  %s2489_s26 = sphi %s2573_s26, %s3001_s26   ;;  %s2485_s25 = sphi %s2571_s25, %s3000_s25  }
   0x3   : > { %p38_p1 = scmp.ge.s32.totalorder %s36_s28, 2  ;;  %p463_p2 = scmp.lt.s32.totalorder %s2493_s27, 3 }
   0x5   : > { %s3003_s28 = smov (%p38_p1, %s36_s28), 0  ;;  %p464_p3 = pnand %p2278_p0, %p463_p2 }
   0x6   : > { %p553_p4 = scmp.lt.s32.totalorder (!%p464_p3), %s2485_s25, 1  ;;  %s2497_s21 = smov (!%p464_p3), 96  }
   0x7   : > { %467 = sbr.rel (%p464_p3) target bundleno = 1185 (0x4a1), region = 64 }
   0xc   : > { %v2418_v0 = vld [vmem:[%s2991_s5 + $0x8] sm:$0xff]   ;;  %v637_v1 = vlaneseq  ;;  %v2419_v2 = vld [vmem:[%s2991_s5] sm:$0xff]   ;;  %s3005_s25 = smov (!%p553_p4, %s2485_s25), 1  ;;  %v2495_v3 = vmov 1966171168   ;;  %vm774_vm0 = vcmask 261120  }
   0xd   : > { %2366 = vmatprep.subr.bf16.mxu0 %v2418_v0  ;;  %v635_v4 = vunpack.c.l.s4 %v2495_v3  ;;  %s2600_s16 = sshll.u32 %s3005_s25, 3  ;;  %s2324_s30 = sshll.u32 %s3005_s25, 5  ;;  %v2660_v61 = vld [vmem:[%s2992_s6] ss:$0 sm:$0xff]  ;;  %vm992_vm1 = vcmask 130048   ;;  %vm981_vm2 = vcmask 125952  }
   0xe   : > { %2367 = vmatpush3.bf16.msra.mxu0 %v2418_v0  ;;  %v2597_v5 = vshrl.u32 %v637_v1, 7  ;;  %s563_s19 = scalar_lea.vmem %s2987_s1, %s2600_s16  ;;  %s556_s22 = scalar_lea.vmem %s2986_s0, %s2600_s16  ;;  %vm1670_vm3 = vcmask 60416  }
   0xf   : > { %2368 = vmatprep.subr.bf16.mxu0 %v2419_v2  ;;  %v636_v6 = vunpack.c.0.s8 %v635_v4  ;;  %v613_v7 = vld [vmem:[%s563_s19] sm:$0xff]  ;;  %s574_s29 = scalar_lea.vmem %s2989_s3, %s2600_s16  ;;  %s567_s17 = scalar_lea.vmem %s2988_s2, %s2600_s16 }
  0x10   : > { %v633_v8 = vcombine.high %v613_v7, %v613_v7  ;;  %v2616_v12 = vsub.s32 0, %v2597_v5  ;;  %v612_v17 = vld [vmem:[%s556_s22] sm:$0xff]  ;;  %s2648_s20 = scalar_lea.vmem %s2990_s4, %s2324_s30  ;;  %s2683_s24 = scalar_lea.vmem %s2997_s11, %s2324_s30 }
  0x11   : > { %v2607_v9 = vsub.s32 %v636_v6, %v2597_v5  ;;  %v615_v44 = vld [vmem:[%s574_s29] sm:$0xff]  ;;  %v2352_v57 = vld [vmem:[%s2648_s20 + $0x8] sm:$0xff]   ;;  %s2496_s16 = smov 112   ;;  %s2326_s22 = sshll.u32 %s3005_s25, 6 }
  0x12   : > { %2369 = vmatpush3.bf16.msra.mxu0 %v2419_v2  ;;  %v853_v48 = vcombine.high %v615_v44, %v615_v44  ;;  %v2650_v52 = vld [vmem:[%s567_s17] sm:$0xff]  ;;  %v2342_v3 = vunpack.c.l.bf16 %v2352_v57  ;;  %s2860_s29 = scalar_lea.vmem %s2998_s12, %s2326_s22  ;;  %s2923_s15 = scalar_lea.vmem %s2999_s13, %s2326_s22 }
  0x13   : > { %v640_v10 = vrot.slane %v613_v7, %v2607_v9  ;;  %v647_v11 = vrot.slane %v633_v8, %v2607_v9  ;;  %v860_v45 = vrot.slane %v615_v44, %v2607_v9  ;;  %v2337_v4 = vld [vmem:[%s2648_s20] sm:$0xff]  }
  0x14   : > { %v867_v51 = vrot.slane %v853_v48, %v2607_v9 }
  0x15   : > { %v648_v13 = vcombine.high %v640_v10, %v640_v10  ;;  %v656_v14 = vrot.slane %v640_v10, %v2607_v9  ;;  %v649_v15 = vcombine.high %v647_v11, %v647_v11  ;;  %v663_v16 = vrot.slane %v647_v11, %v2607_v9 }
  0x16   : > { %v876_v46 = vrot.slane %v860_v45, %v2607_v9  ;;  %v868_v47 = vcombine.high %v860_v45, %v860_v45  ;;  %v883_v56 = vrot.slane %v867_v51, %v2607_v9  ;;  %v869_v58 = vcombine.high %v867_v51, %v867_v51 }
  0x17   : > { %v670_v18 = vrot.slane %v648_v13, %v2607_v9  ;;  %v678_v19 = vcombine.high %v656_v14, %v656_v14  ;;  %v685_v20 = vrot.slane %v656_v14, %v2616_v12  ;;  %v677_v21 = vrot.slane %v649_v15, %v2607_v9 }
  0x18   : > { %v701_v22 = vrot.slane %v663_v16, %v2616_v12  ;;  %v679_v23 = vcombine.high %v663_v16, %v663_v16  ;;  %v898_v49 = vcombine.high %v876_v46, %v876_v46  ;;  %v890_v50 = vrot.slane %v868_v47, %v2607_v9 }
  0x19   : > { %v680_v24 = vcombine.high %v670_v18, %v670_v18  ;;  %v689_v25 = vrot.slane %v670_v18, %v2616_v12  ;;  %v722_v26 = vmul.f32 %v685_v20, %v612_v17  ;;  %v693_v27 = vrot.slane %v678_v19, %v2616_v12 }
  0x1a   : > { %v705_v28 = vrot.slane %v677_v21, %v2616_v12  ;;  %v726_v29 = vmul.f32 %v701_v22, %v612_v17  ;;  %v681_v30 = vcombine.high %v677_v21, %v677_v21  ;;  %v709_v37 = vrot.slane %v679_v23, %v2616_v12  ;;  %v2354_v22 = vld [vmem:[%s2648_s20 + $0x18] sm:$0xff]  }
  0x1b   : > { %v723_v31 = vmul.f32 %v689_v25, %v612_v17  ;;  %v697_v32 = vrot.slane %v680_v24, %v2616_v12  ;;  %v724_v33 = vmul.f32 %v693_v27, %v612_v17  ;;  %v913_v53 = vrot.slane %v898_v49, %v2616_v12 }
  0x1c   : > { %v727_v34 = vmul.f32 %v705_v28, %v612_v17  ;;  %v713_v38 = vrot.slane %v681_v30, %v2616_v12  ;;  %v728_v41 = vmul.f32 %v709_v37, %v612_v17  ;;  %v900_v54 = vcombine.high %v890_v50, %v890_v50  ;;  %v2353_v30 = vld [vmem:[%s2648_s20 + $0x10] sm:$0xff]  }
  0x1d   : > { %v2328_v35 = vpack.c.bf16 %v723_v31, %v722_v26  ;;  %v725_v36 = vmul.f32 %v697_v32, %v612_v17  ;;  %v905_v60 = vrot.slane %v876_v46, %v2616_v12  ;;  %v899_v63 = vcombine.high %v883_v56, %v883_v56 }
  0x1e   : > { %v2330_v39 = vpack.c.bf16 %v727_v34, %v726_v29  ;;  %v729_v42 = vmul.f32 %v713_v38, %v612_v17  ;;  %v917_v2 = vrot.slane %v900_v54, %v2616_v12  ;;  %v909_v7 = vrot.slane %v890_v50, %v2616_v12 }
  0x1f   : > { %2370 = vmatprep.mubr.msk.bf16.mxu0 %vm774_vm0, %v2328_v35  ;;  %v2329_v40 = vpack.c.bf16 %v725_v36, %v724_v33  ;;  %v897_v8 = vrot.slane %v869_v58, %v2607_v9  ;;  %v929_v15 = vrot.slane %v899_v63, %v2616_v12  ;;  %v2338_v17 = vunpack.c.l.bf16 %v2337_v4 }
  0x20   : > { %v2331_v43 = vpack.c.bf16 %v729_v42, %v728_v41  ;;  %v2343_v18 = vunpack.c.h.bf16 %v2352_v57  ;;  %v921_v24 = vrot.slane %v883_v56, %v2616_v12  ;;  %v2339_v25 = vunpack.c.h.bf16 %v2337_v4 }
  0x21   : > { %2371 = vmatmul.mubr.msk.bf16.vlgmr.msra.gmra.mxu0 %vm774_vm0, %v2329_v40  ;;  %v901_v16 = vcombine.high %v897_v8, %v897_v8  ;;  %v2350_v35 = vunpack.c.l.bf16 %v2354_v22  ;;  %v2346_v44 = vunpack.c.l.bf16 %v2353_v30 }
  0x22   : > { %2374 = vmatprep.mubr.msk.bf16.mxu0 %vm774_vm0, %v2330_v39 }
  0x23   : > { %v933_v33 = vrot.slane %v901_v16, %v2616_v12 }
  0x29   : > { %2375 = vmatmul.mubr.msk.bf16.gmra.mxu0 %vm774_vm0, %v2331_v43  ;;  %v925_v43 = vrot.slane %v897_v8, %v2616_v12 }
  0xe1   : > { %v2372_v55 = vpop.f32.mrf.mxu0 }
  0xe2   : > { %v830_v59 = vadd.f32 %v2372_v55, %v2650_v52 }
  0xe3   : > { %v821_v62 = vpop.f32.mrf.mxu0 }
  0xe4   : > { %v944_v0 = vsub.f32 %v830_v59, %v913_v53  ;;  %v822_v1 = vadd.f32 %v821_v62, %v2650_v52  ;;  %v2351_v53 = vunpack.c.h.bf16 %v2354_v22  ;;  %v2347_v59 = vunpack.c.h.bf16 %v2353_v30 }
  0xe5   : > { %v2373_v6 = vpop.f32.mrf.mxu0 }
  0xe6   : > { %v959_v10 = vadd.f32 %v2660_v61, %v944_v0  ;;  %v942_v11 = vsub.f32 %v822_v1, %v905_v60  ;;  %v833_v13 = vadd.f32 %v2373_v6, %v2650_v52 }
  0xe7   : > { %v824_v14 = vpop.f32.mrf.mxu0 }
  0xe8   : > { %v957_v19 = vadd.f32 %v2660_v61, %v942_v11  ;;  %v945_v20 = vsub.f32 %v833_v13, %v917_v2  ;;  %v825_v21 = vadd.f32 %v824_v14, %v2650_v52  ;;  %v2672_v9 = vadd.f32 %v2342_v3, %v959_v10 }
  0xe9   : > { %v2376_v23 = vpop.f32.mrf.mxu0 }
  0xea   : > { %v960_v26 = vadd.f32 %v2660_v61, %v945_v20  ;;  %v943_v27 = vsub.f32 %v825_v21, %v909_v7  ;;  %v846_v28 = vadd.f32 %v2376_v23, %v2650_v52  ;;  %v999_v29 = vsel %vm992_vm1, %v2672_v9, 0.0 }
  0xeb   : > { %1000 = vadd.xlane.f32.xlu1 %v999_v29  ;;  %v975_v31 = vpack.c.bf16 %v2672_v9, %v2672_v9  ;;  %v837_v32 = vpop.f32.mrf.mxu0  ;;  %v965_v34 = vadd.f32 %v2338_v17, %v957_v19 }
  0xec   : > { %v958_v36 = vadd.f32 %v2660_v61, %v943_v27  ;;  %v948_v37 = vsub.f32 %v846_v28, %v929_v15  ;;  %v838_v38 = vadd.f32 %v837_v32, %v2650_v52  ;;  %v968_v39 = vadd.f32 %v2343_v18, %v960_v26 }
  0xed   : > { %984 = vst.msk [vmem:[%s2683_s24 + $0x8] sm:$0xf] %vm981_vm2, %v975_v31  ;;  %v2377_v40 = vpop.f32.mrf.mxu0  ;;  %v993_v41 = vsel %vm992_vm1, %v965_v34, 0.0  ;;  %v973_v42 = vpack.c.bf16 %v965_v34, %v965_v34 }
  0xee   : > { %v963_v45 = vadd.f32 %v2660_v61, %v948_v37  ;;  %v946_v46 = vsub.f32 %v838_v38, %v921_v24  ;;  %v849_v47 = vadd.f32 %v2377_v40, %v2650_v52  ;;  %994 = vadd.xlane.f32.xlu0 %v993_v41  ;;  %v1002_v48 = vsel %vm992_vm1, %v968_v39, 0.0 }
  0xef   : > { %982 = vst.msk [vmem:[%s2683_s24] sm:$0xf] %vm981_vm2, %v973_v42  ;;  %1003 = vadd.xlane.f32.xlu1 %v1002_v48  ;;  %v976_v49 = vpack.c.bf16 %v968_v39, %v968_v39  ;;  %v840_v50 = vpop.f32.mrf.mxu0  ;;  %v966_v51 = vadd.f32 %v2339_v25, %v958_v36 }
  0xf0   : > { %v961_v12 = vadd.f32 %v2660_v61, %v946_v46  ;;  %v949_v54 = vsub.f32 %v849_v47, %v933_v33  ;;  %v841_v55 = vadd.f32 %v840_v50, %v2650_v52  ;;  %v971_v56 = vadd.f32 %v2350_v35, %v963_v45 }
  0xf1   : > { %985 = vst.msk [vmem:[%s2683_s24 + $0xc] sm:$0xf] %vm981_vm2, %v976_v49  ;;  %v974_v57 = vpack.c.bf16 %v966_v51, %v966_v51  ;;  %v996_v58 = vsel %vm992_vm1, %v966_v51, 0.0 }
  0xf2   : > { %v964_v60 = vadd.f32 %v2660_v61, %v949_v54  ;;  %v947_v62 = vsub.f32 %v841_v55, %v925_v43  ;;  %997 = vadd.xlane.f32.xlu0 %v996_v58  ;;  %v969_v63 = vadd.f32 %v2346_v44, %v961_v12  ;;  %v979_v0 = vpack.c.bf16 %v971_v56, %v971_v56 }
  0xf3   : > { %983 = vst.msk [vmem:[%s2683_s24 + $0x4] sm:$0xf] %vm981_vm2, %v974_v57  ;;  %v1011_v7 = vsel %vm992_vm1, %v971_v56, 0.0 }
  0xf4   : > { %v962_v52 = vadd.f32 %v2660_v61, %v947_v62  ;;  %v977_v1 = vpack.c.bf16 %v969_v63, %v969_v63  ;;  %v1005_v2 = vsel %vm992_vm1, %v969_v63, 0.0  ;;  %988 = vst.msk [vmem:[%s2683_s24 + $0x18] sm:$0xf] %vm981_vm2, %v979_v0  ;;  %v972_v3 = vadd.f32 %v2351_v53, %v964_v60 }
  0xf6   : > { %986 = vst.msk [vmem:[%s2683_s24 + $0x10] sm:$0xf] %vm981_vm2, %v977_v1  ;;  %1006 = vadd.xlane.f32.xlu0 %v1005_v2  ;;  %v970_v4 = vadd.f32 %v2347_v59, %v962_v52  ;;  %v980_v6 = vpack.c.bf16 %v972_v3, %v972_v3  ;;  %v1014_v61 = vsel %vm992_vm1, %v972_v3, 0.0 }
  0xf8   : > { %v1008_v8 = vsel %vm992_vm1, %v970_v4, 0.0  ;;  %v978_v10 = vpack.c.bf16 %v970_v4, %v970_v4  ;;  %989 = vst.msk [vmem:[%s2683_s24 + $0x1c] sm:$0xf] %vm981_vm2, %v980_v6 }
  0xf9   : > { %1009 = vadd.xlane.f32.xlu1 %v1008_v8 }
  0xfa   : > { %987 = vst.msk [vmem:[%s2683_s24 + $0x14] sm:$0xf] %vm981_vm2, %v978_v10  ;;  %1012 = vadd.xlane.f32.xlu0 %v1011_v7 }
  0xfd   : > { %1015 = vadd.xlane.f32.xlu1 %v1014_v61 }
 0x174   : > { %v1001_v11 = vpop.xlane.xlu1 %1000 }
 0x175   : > { %v1020_v13 = vmul.f32 0.0625, %v1001_v11 }
 0x177   : > { %v995_v14 = vpop.xlane.xlu0 %994  ;;  %v2724_v17 = vsub.f32 %v2672_v9, %v1020_v13 }
 0x178   : > { %v1018_v15 = vmul.f32 0.0625, %v995_v14  ;;  %v1004_v16 = vpop.xlane.xlu1 %1003 }
 0x179   : > { %v1021_v19 = vmul.f32 0.0625, %v1004_v16  ;;  %v1036_v26 = vmul.f32 %v2724_v17, %v2724_v17  ;;  %v2302_v16 = vld [vmem:[%s2993_s7] ss:$0 sm:$0xff] }
 0x17a   : > { %v2726_v18 = vsub.f32 %v965_v34, %v1018_v15 }
 0x17b   : > { %v998_v20 = vpop.xlane.xlu0 %997  ;;  %v2730_v23 = vsub.f32 %v968_v39, %v1021_v19  ;;  %v1048_v31 = vsel %vm992_vm1, %v1036_v26, 0.0 }
 0x17c   : > { %v1019_v21 = vmul.f32 0.0625, %v998_v20  ;;  %v1034_v22 = vmul.f32 %v2726_v18, %v2726_v18 }
 0x17d   : > { %v1037_v33 = vmul.f32 %v2730_v23, %v2730_v23 }
 0x17e   : > { %v2732_v24 = vsub.f32 %v966_v51, %v1019_v21  ;;  %v1042_v25 = vsel %vm992_vm1, %v1034_v22, 0.0  ;;  %v2422_v51 = vld [vmem:[%s2995_s9] sm:$0xff]  }
 0x17f   : > { %1043 = vadd.xlane.f32.xlu0 %v1042_v25  ;;  %v1007_v9 = vpop.xlane.xlu0 %1006  ;;  %v1051_v41 = vsel %vm992_vm1, %v1037_v33, 0.0  ;;  %2378 = vmatprep.subr.bf16.mxu1 %v2422_v51  ;;  %v2303_v25 = vld [vmem:[%s2994_s8] ss:$0 sm:$0xff] }
 0x180   : > { %v1022_v27 = vmul.f32 0.0625, %v1007_v9  ;;  %v1035_v28 = vmul.f32 %v2732_v24, %v2732_v24  ;;  %2379 = vmatpush3.bf16.msra.mxu1 %v2422_v51 }
 0x182   : > { %v2739_v29 = vsub.f32 %v969_v63, %v1022_v27  ;;  %v1010_v30 = vpop.xlane.xlu1 %1009  ;;  %v1045_v32 = vsel %vm992_vm1, %v1035_v28, 0.0 }
 0x183   : > { %v1023_v34 = vmul.f32 0.0625, %v1010_v30  ;;  %1049 = vadd.xlane.f32.xlu0 %v1048_v31  ;;  %1046 = vadd.xlane.f32.xlu1 %v1045_v32  ;;  %v1013_v35 = vpop.xlane.xlu0 %1012 }
 0x184   : > { %v1024_v36 = vmul.f32 0.0625, %v1013_v35  ;;  %v1038_v37 = vmul.f32 %v2739_v29, %v2739_v29 }
 0x185   : > { %v2747_v38 = vsub.f32 %v970_v4, %v1023_v34 }
 0x186   : > { %v2749_v39 = vsub.f32 %v971_v56, %v1024_v36  ;;  %v1016_v40 = vpop.xlane.xlu1 %1015  ;;  %v1054_v42 = vsel %vm992_vm1, %v1038_v37, 0.0 }
 0x187   : > { %v1025_v43 = vmul.f32 0.0625, %v1016_v40  ;;  %1052 = vadd.xlane.f32.xlu1 %v1051_v41  ;;  %1055 = vadd.xlane.f32.xlu0 %v1054_v42  ;;  %v1039_v44 = vmul.f32 %v2747_v38, %v2747_v38 }
 0x188   : > { %v1040_v45 = vmul.f32 %v2749_v39, %v2749_v39 }
 0x189   : > { %v2757_v46 = vsub.f32 %v972_v3, %v1025_v43  ;;  %v1057_v47 = vsel %vm992_vm1, %v1039_v44, 0.0 }
 0x18a   : > { %v1060_v48 = vsel %vm992_vm1, %v1040_v45, 0.0 }
 0x18b   : > { %1058 = vadd.xlane.f32.xlu1 %v1057_v47  ;;  %1061 = vadd.xlane.f32.xlu0 %v1060_v48  ;;  %v1041_v49 = vmul.f32 %v2757_v46, %v2757_v46 }
 0x18d   : > { %v1063_v50 = vsel %vm992_vm1, %v1041_v49, 0.0 }
 0x18f   : > { %1064 = vadd.xlane.f32.xlu1 %v1063_v50 }
 0x208   : > { %v1044_v53 = vpop.xlane.xlu0 %1043 }
 0x209   : > { %v1066_v12 = vmul.f32 0.0625, %v1044_v53 }
 0x20b   : > { %v1074_v54 = vadd.f32 1e-05, %v1066_v12 }
 0x20c   : > { %v1047_v55 = vpop.xlane.xlu1 %1046  ;;  %v1050_v56 = vpop.xlane.xlu0 %1049 }
 0x20d   : > { %2423 = vrsqrt.f32 %v1074_v54  ;;  %v1067_v57 = vmul.f32 0.0625, %v1047_v55  ;;  %v1068_v58 = vmul.f32 0.0625, %v1050_v56 }
 0x20f   : > { %v1075_v59 = vadd.f32 1e-05, %v1067_v57  ;;  %v1076_v60 = vadd.f32 1e-05, %v1068_v58 }
 0x210   : > { %v1053_v62 = vpop.xlane.xlu1 %1052  ;;  %v1056_v63 = vpop.xlane.xlu0 %1055 }
 0x211   : > { %2425 = vrsqrt.f32 %v1075_v59  ;;  %v1069_v0 = vmul.f32 0.0625, %v1053_v62  ;;  %v1070_v52 = vmul.f32 0.0625, %v1056_v63 }
 0x212   : > { %2427 = vrsqrt.f32 %v1076_v60 }
 0x213   : > { %v1077_v1 = vadd.f32 1e-05, %v1069_v0  ;;  %v1078_v2 = vadd.f32 1e-05, %v1070_v52 }
 0x214   : > { %v1059_v3 = vpop.xlane.xlu1 %1058  ;;  %v1062_v4 = vpop.xlane.xlu0 %1061 }
 0x215   : > { %2429 = vrsqrt.f32 %v1077_v1  ;;  %v1071_v6 = vmul.f32 0.0625, %v1059_v3  ;;  %v1072_v7 = vmul.f32 0.0625, %v1062_v4 }
 0x216   : > { %2431 = vrsqrt.f32 %v1078_v2 }
 0x217   : > { %v1079_v8 = vadd.f32 1e-05, %v1071_v6  ;;  %v1080_v10 = vadd.f32 1e-05, %v1072_v7 }
 0x218   : > { %v1065_v61 = vpop.xlane.xlu1 %1064 }
 0x219   : > { %2433 = vrsqrt.f32 %v1079_v8  ;;  %v1073_v11 = vmul.f32 0.0625, %v1065_v61 }
 0x21a   : > { %v2424_v13 = vpop.eup %2423  ;;  %2435 = vrsqrt.f32 %v1080_v10 }
 0x21b   : > { %v1081_v14 = vadd.f32 1e-05, %v1073_v11  ;;  %v1090_v15 = vmul.f32 %v2424_v13, %v2726_v18 }
 0x21d   : > { %2437 = vrsqrt.f32 %v1081_v14  ;;  %v1104_v22 = vmul.f32 %v2302_v16, %v1090_v15 }
 0x21e   : > { %v2426_v19 = vpop.eup %2425 }
 0x21f   : > { %v2428_v20 = vpop.eup %2427  ;;  %v1091_v21 = vmul.f32 %v2426_v19, %v2732_v24  ;;  %v1118_v18 = vadd.f32 %v2303_v25, %v1104_v22 }
 0x220   : > { %v1092_v26 = vmul.f32 %v2428_v20, %v2724_v17 }
 0x221   : > { %v1105_v9 = vmul.f32 %v2302_v16, %v1091_v21 }
 0x222   : > { %v2430_v27 = vpop.eup %2429  ;;  %v1106_v32 = vmul.f32 %v2302_v16, %v1092_v26 }
 0x223   : > { %v2432_v28 = vpop.eup %2431  ;;  %v1119_v30 = vadd.f32 %v2303_v25, %v1105_v9  ;;  %v1093_v31 = vmul.f32 %v2430_v27, %v2730_v23 }
 0x224   : > { %v1094_v33 = vmul.f32 %v2432_v28, %v2739_v29  ;;  %v1120_v37 = vadd.f32 %v2303_v25, %v1106_v32 }
 0x225   : > { %v2332_v34 = vpack.c.bf16 %v1119_v30, %v1118_v18  ;;  %v1107_v35 = vmul.f32 %v2302_v16, %v1093_v31 }
 0x226   : > { %v2434_v24 = vpop.eup %2433  ;;  %v1108_v41 = vmul.f32 %v2302_v16, %v1094_v33 }
 0x227   : > { %v2436_v36 = vpop.eup %2435  ;;  %2380 = vmatprep.mubr.msk.bf16.mxu1 %vm992_vm1, %v2332_v34  ;;  %v1121_v40 = vadd.f32 %v2303_v25, %v1107_v35  ;;  %v1095_v17 = vmul.f32 %v2434_v24, %v2747_v38 }
 0x228   : > { %v1096_v42 = vmul.f32 %v2436_v36, %v2749_v39  ;;  %v1122_v23 = vadd.f32 %v2303_v25, %v1108_v41  ;;  %v2304_v39 = vld [vmem:[%s2996_s10] ss:$0 sm:$0xff] }
 0x229   : > { %v2333_v43 = vpack.c.bf16 %v1121_v40, %v1120_v37  ;;  %v1109_v44 = vmul.f32 %v2302_v16, %v1095_v17 }
 0x22a   : > { %v2438_v45 = vpop.eup %2437  ;;  %v1110_v48 = vmul.f32 %v2302_v16, %v1096_v42 }
 0x22b   : > { %2381 = vmatmul.mubr.msk.bf16.vlgmr.msra.gmra.mxu1 %vm992_vm1, %v2333_v43  ;;  %v1123_v29 = vadd.f32 %v2303_v25, %v1109_v44  ;;  %v1097_v47 = vmul.f32 %v2438_v45, %v2757_v46 }
 0x22c   : > { %v1124_v51 = vadd.f32 %v2303_v25, %v1110_v48 }
 0x22d   : > { %v2334_v49 = vpack.c.bf16 %v1123_v29, %v1122_v23  ;;  %v1111_v50 = vmul.f32 %v2302_v16, %v1097_v47 }
 0x22f   : > { %2384 = vmatprep.mubr.msk.bf16.mxu1 %vm992_vm1, %v2334_v49  ;;  %v1125_v53 = vadd.f32 %v2303_v25, %v1111_v50 }
 0x231   : > { %v2335_v38 = vpack.c.bf16 %v1125_v53, %v1124_v51 }
 0x233   : > { %2385 = vmatmul.mubr.msk.bf16.gmra.mxu1 %vm992_vm1, %v2335_v38 }
 0x2eb   : > { %v2382_v12 = vpop.f32.mrf.mxu1 }
 0x2ec   : > { %v2788_v54 = vadd.f32 %v2382_v12, %v2304_v39 }
 0x2ed   : > { %v1215_v55 = vpop.f32.mrf.mxu1 }
 0x2ee   : > { %v2316_v46 = vmul.f32 -1.442695, %v2788_v54  ;;  %v2791_v56 = vadd.f32 %v2304_v39, %v1215_v55 }
 0x2ef   : > { %v2383_v57 = vpop.f32.mrf.mxu1 }
 0x2f0   : > { %2439 = vpow2.f32 %v2316_v46  ;;  %v2314_v58 = vmul.f32 -1.442695, %v2791_v56  ;;  %v2794_v59 = vadd.f32 %v2383_v57, %v2304_v39 }
 0x2f1   : > { %v1218_v60 = vpop.f32.mrf.mxu1 }
 0x2f2   : > { %2441 = vpow2.f32 %v2314_v58  ;;  %v2317_v62 = vmul.f32 -1.442695, %v2794_v59  ;;  %v2797_v63 = vadd.f32 %v2304_v39, %v1218_v60 }
 0x2f3   : > { %v2386_v0 = vpop.f32.mrf.mxu1 }
 0x2f4   : > { %2443 = vpow2.f32 %v2317_v62  ;;  %v2315_v52 = vmul.f32 -1.442695, %v2797_v63  ;;  %v2800_v1 = vadd.f32 %v2386_v0, %v2304_v39 }
 0x2f5   : > { %v1231_v2 = vpop.f32.mrf.mxu1 }
 0x2f6   : > { %2445 = vpow2.f32 %v2315_v52  ;;  %v2320_v3 = vmul.f32 -1.442695, %v2800_v1  ;;  %v2803_v4 = vadd.f32 %v2304_v39, %v1231_v2 }
 0x2f7   : > { %v2387_v6 = vpop.f32.mrf.mxu1 }
 0x2f8   : > { %2447 = vpow2.f32 %v2320_v3  ;;  %v2318_v7 = vmul.f32 -1.442695, %v2803_v4  ;;  %v2806_v8 = vadd.f32 %v2387_v6, %v2304_v39 }
 0x2f9   : > { %v1234_v10 = vpop.f32.mrf.mxu1 }
 0x2fa   : > { %2449 = vpow2.f32 %v2318_v7  ;;  %v2321_v61 = vmul.f32 -1.442695, %v2806_v8  ;;  %v2809_v11 = vadd.f32 %v2304_v39, %v1234_v10 }
 0x2fc   : > { %v2319_v13 = vmul.f32 -1.442695, %v2809_v11  ;;  %2451 = vpow2.f32 %v2321_v61 }
 0x2fd   : > { %v2440_v14 = vpop.eup %2439 }
 0x2fe   : > { %v1272_v15 = vadd.f32 1.0, %v2440_v14  ;;  %2453 = vpow2.f32 %v2319_v13 }
 0x2ff   : > { %v2442_v16 = vpop.eup %2441 }
 0x300   : > { %2455 = vrcp.f32 %v1272_v15  ;;  %v1270_v19 = vadd.f32 1.0, %v2442_v16 }
 0x301   : > { %v2444_v20 = vpop.eup %2443 }
 0x302   : > { %2457 = vrcp.f32 %v1270_v19  ;;  %v1273_v21 = vadd.f32 1.0, %v2444_v20 }
 0x303   : > { %v2446_v22 = vpop.eup %2445 }
 0x304   : > { %2459 = vrcp.f32 %v1273_v21  ;;  %v1271_v25 = vadd.f32 1.0, %v2446_v22 }
 0x305   : > { %v2448_v26 = vpop.eup %2447 }
 0x306   : > { %v1276_v9 = vadd.f32 1.0, %v2448_v26  ;;  %2461 = vrcp.f32 %v1271_v25 }
 0x307   : > { %v2450_v27 = vpop.eup %2449 }
 0x308   : > { %2463 = vrcp.f32 %v1276_v9  ;;  %v1274_v28 = vadd.f32 1.0, %v2450_v27 }
 0x309   : > { %v2452_v18 = vpop.eup %2451 }
 0x30a   : > { %2465 = vrcp.f32 %v1274_v28  ;;  %v1277_v33 = vadd.f32 1.0, %v2452_v18 }
 0x30b   : > { %v2454_v30 = vpop.eup %2453 }
 0x30c   : > { %v1275_v31 = vadd.f32 1.0, %v2454_v30 }
 0x30d   : > { %v2456_v32 = vpop.eup %2455 }
 0x30e   : > { %2467 = vrcp.f32 %v1275_v31  ;;  %1338 = vrot.lane.b32.xlu1 %v2456_v32, %s2496_s16 }
 0x30f   : > { %v2458_v34 = vpop.eup %2457  ;;  %2469 = vrcp.f32 %v1277_v33 }
 0x310   : > { %1334 = vrot.lane.b32.xlu0 %v2458_v34, %s2496_s16 }
 0x311   : > { %v2460_v35 = vpop.eup %2459 }
 0x312   : > { %1340 = vrot.lane.b32.xlu1 %v2460_v35, %s2496_s16 }
 0x313   : > { %v2462_v24 = vpop.eup %2461 }
 0x315   : > { %v2464_v36 = vpop.eup %2463 }
 0x316   : > { %1336 = vrot.lane.b32.xlu1 %v2462_v24, %s2496_s16  ;;  %1346 = vrot.lane.b32.xlu0 %v2464_v36, %s2496_s16 }
 0x317   : > { %v2466_v37 = vpop.eup %2465 }
 0x31a   : > { %1342 = vrot.lane.b32.xlu0 %v2466_v37, %s2496_s16 }
 0x31b   : > { %v2468_v40 = vpop.eup %2467 }
 0x31c   : > { %1344 = vrot.lane.b32.xlu1 %v2468_v40, %s2496_s16  ;;  %v2470_v17 = vpop.eup %2469 }
 0x31e   : > { %1302 = vrot.lane.b32.xlu0 %v2458_v34, %s2497_s21 }
 0x320   : > { %1348 = vrot.lane.b32.xlu1 %v2470_v17, %s2496_s16 }
 0x322   : > { %1306 = vrot.lane.b32.xlu0 %v2456_v32, %s2497_s21 }
 0x324   : > { %1304 = vrot.lane.b32.xlu1 %v2462_v24, %s2497_s21 }
 0x326   : > { %1310 = vrot.lane.b32.xlu0 %v2466_v37, %s2497_s21  ;;  %v2498_v37 = vmov 1983009808  }
 0x328   : > { %1308 = vrot.lane.b32.xlu1 %v2460_v35, %s2497_s21 }
 0x32a   : > { %1314 = vrot.lane.b32.xlu0 %v2464_v36, %s2497_s21 }
 0x32c   : > { %1316 = vrot.lane.b32.xlu1 %v2470_v17, %s2497_s21 }
 0x330   : > { %1312 = vrot.lane.b32.xlu1 %v2468_v40, %s2497_s21  ;;  %v1537_v40 = vunpack.c.l.s4 %v2498_v37 }
 0x380   : > { %v1339_v41 = vpop.permute.xlu1 %1338 }
 0x381   : > { %v1360_v42 = vmul.f32 %v1339_v41, %v2788_v54 }
 0x382   : > { %v1335_v43 = vpop.permute.xlu0 %1334 }
 0x383   : > { %v1689_v44 = vpack.c.bf16 %v1360_v42, %v1360_v42  ;;  %v1358_v45 = vmul.f32 %v1335_v43, %v2791_v56  ;;  %v1538_v42 = vunpack.c.0.s8 %v1537_v40  ;;  %v2499_v43 = vmov 1934713408  }
 0x384   : > { %v1341_v23 = vpop.permute.xlu1 %1340 }
 0x385   : > { %v1361_v29 = vmul.f32 %v1341_v23, %v2794_v59  ;;  %1707 = vrot.lane.b32.xlu0 %v1689_v44, %s2496_s16  ;;  %v1687_v47 = vpack.c.bf16 %v1358_v45, %v1358_v45  ;;  %v1569_v44 = vunpack.c.l.s4 %v2499_v43 }
 0x387   : > { %v1690_v48 = vpack.c.bf16 %v1361_v29, %v1361_v29 }
 0x388   : > { %v1337_v49 = vpop.permute.xlu1 %1336  ;;  %v1347_v38 = vpop.permute.xlu0 %1346 }
 0x389   : > { %v1359_v50 = vmul.f32 %v1337_v49, %v2797_v63  ;;  %1709 = vrot.lane.b32.xlu1 %v1690_v48, %s2496_s16  ;;  %1703 = vrot.lane.b32.xlu0 %v1687_v47, %s2496_s16  ;;  %v1364_v52 = vmul.f32 %v1347_v38, %v2800_v1  ;;  %v1570_v38 = vunpack.c.0.s8 %v1569_v44 }
 0x38b   : > { %v1688_v51 = vpack.c.bf16 %v1359_v50, %v1359_v50  ;;  %v1693_v3 = vpack.c.bf16 %v1364_v52, %v1364_v52 }
 0x38c   : > { %v1343_v57 = vpop.permute.xlu0 %1342 }
 0x38d   : > { %1705 = vrot.lane.b32.xlu1 %v1688_v51, %s2496_s16  ;;  %v1362_v6 = vmul.f32 %v1343_v57, %v2803_v4 }
 0x38e   : > { %v1345_v53 = vpop.permute.xlu1 %1344 }
 0x38f   : > { %v1363_v55 = vmul.f32 %v1345_v53, %v2809_v11  ;;  %v1691_v10 = vpack.c.bf16 %v1362_v6, %v1362_v6  ;;  %v2845_v53 = vsub.s32 %v1538_v42, %v2597_v5 }
 0x390   : > { %v1303_v60 = vpop.permute.xlu0 %1302 }
 0x391   : > { %v1692_v58 = vpack.c.bf16 %v1363_v55, %v1363_v55  ;;  %v1326_v62 = vmul.f32 %v1303_v60, %v2791_v56 }
 0x392   : > { %v1349_v39 = vpop.permute.xlu1 %1348 }
 0x393   : > { %v1365_v12 = vmul.f32 %v1349_v39, %v2806_v8  ;;  %v1366_v0 = vpack.c.bf16 %v1326_v62, %v1326_v62 }
 0x394   : > { %v1307_v21 = vpop.permute.xlu0 %1306 }
 0x395   : > { %v1694_v46 = vpack.c.bf16 %v1365_v12, %v1365_v12  ;;  %v1328_v22 = vmul.f32 %v1307_v21, %v2788_v54 }
 0x396   : > { %v1305_v2 = vpop.permute.xlu1 %1304 }
 0x397   : > { %1717 = vrot.lane.b32.xlu1 %v1694_v46, %s2496_s16  ;;  %v1327_v13 = vmul.f32 %v1305_v2, %v2797_v63  ;;  %v1368_v26 = vpack.c.bf16 %v1328_v22, %v1328_v22 }
 0x398   : > { %v1311_v25 = vpop.permute.xlu0 %1310 }
 0x399   : > { %v1367_v14 = vpack.c.bf16 %v1327_v13, %v1327_v13  ;;  %v1330_v63 = vmul.f32 %v1311_v25, %v2803_v4 }
 0x39a   : > { %v1309_v7 = vpop.permute.xlu1 %1308 }
 0x39b   : > { %1713 = vrot.lane.b32.xlu1 %v1692_v58, %s2496_s16  ;;  %v1329_v9 = vmul.f32 %v1309_v7, %v2794_v59  ;;  %v1370_v28 = vpack.c.bf16 %v1330_v63, %v1330_v63 }
 0x39d   : > { %v1369_v27 = vpack.c.bf16 %v1329_v9, %v1329_v9 }
 0x39e   : > { %v1317_v61 = vpop.permute.xlu1 %1316 }
 0x39f   : > { %v1333_v56 = vmul.f32 %v1317_v61, %v2806_v8  ;;  %v1315_v8 = vpop.permute.xlu0 %1314 }
 0x3a0   : > { %v1332_v18 = vmul.f32 %v1315_v8, %v2800_v1 }
 0x3a1   : > { %v1373_v16 = vpack.c.bf16 %v1333_v56, %v1333_v56 }
 0x3a2   : > { %v1313_v15 = vpop.permute.xlu1 %1312 }
 0x3a3   : > { %v1331_v19 = vmul.f32 %v1313_v15, %v2809_v11  ;;  %v1372_v11 = vpack.c.bf16 %v1332_v18, %v1332_v18 }
 0x3a5   : > { %v1371_v20 = vpack.c.bf16 %v1331_v19, %v1331_v19 }
 0x3a7   : > { %1374 = vxpose.xlu0.c.b16.start.end [1/1] (short) (narrow) %v1366_v0, 16 }
 0x3b0   : > { %1715 = vrot.lane.b32.xlu0 %v1693_v3, %s2496_s16  ;;  %v2848_v3 = vsub.s32 %v1570_v38, %v2597_v5 }
 0x3b4   : > { %1711 = vrot.lane.b32.xlu0 %v1691_v10, %s2496_s16 }
 0x3be   : > { %1390 = vxpose.xlu1.c.b16.start.end [1/1] (short) (narrow) %v1367_v14, 16 }
 0x3c2   : > { %1486 = vxpose.xlu1.c.b16.start.end [1/1] (short) (narrow) %v1373_v16, 16 }
 0x3c6   : > { %1454 = vxpose.xlu1.c.b16.start.end [1/1] (short) (narrow) %v1371_v20, 16 }
 0x3d2   : > { %1406 = vxpose.xlu0.c.b16.start.end [1/1] (short) (narrow) %v1368_v26, 16 }
 0x3d6   : > { %1422 = vxpose.xlu0.c.b16.start.end [1/1] (short) (narrow) %v1369_v27, 16 }
 0x3da   : > { %1438 = vxpose.xlu0.c.b16.start.end [1/1] (short) (narrow) %v1370_v28, 16 }
 0x3de   : > { %1470 = vxpose.xlu0.c.b16.start.end [1/1] (short) (narrow) %v1372_v11, 16 }
 0x3f7   : > { %v1708_v30 = vpop.permute.xlu0 %1707 }
 0x3f8   : > { %1759 = vxpose.xlu0.c.b16.start.end [1/1] (short) (narrow) %v1708_v30, 16 }
 0x3fb   : > { %v1710_v31 = vpop.permute.xlu1 %1709  ;;  %v1704_v54 = vpop.permute.xlu0 %1703 }
 0x3fc   : > { %1775 = vxpose.xlu1.c.b16.start.end [1/1] (short) (narrow) %v1710_v31, 16  ;;  %1727 = vxpose.xlu0.c.b16.start.end [1/1] (short) (narrow) %v1704_v54, 16 }
 0x3ff   : > { %v1706_v32 = vpop.permute.xlu1 %1705 }
 0x400   : > { %1743 = vxpose.xlu1.c.b16.start.end [1/1] (short) (narrow) %v1706_v32, 16 }
 0x409   : > { %v1718_v59 = vpop.permute.xlu1 %1717  ;;  %v1382_v4 = vpop.trf.xlu0 }
 0x40a   : > { %v1506_v46 = vshrl.u32 %v1382_v4, 16 }
 0x40d   : > { %v1714_v33 = vpop.permute.xlu1 %1713 }
 0x40e   : > { %1807 = vxpose.xlu1.c.b16.start.end [1/1] (short) (narrow) %v1714_v33, 16 }
 0x412   : > { %1839 = vxpose.xlu1.c.b16.start.end [1/1] (short) (narrow) %v1718_v59, 16  ;;  %v2500_v59 = vmov 0  }
 0x420   : > { %v1398_v1 = vpop.trf.xlu1 }
 0x421   : > { %v1504_v50 = vpack.i.b16 %v1398_v1, %v1382_v4  ;;  %v1507_v51 = vshrl.u32 %v1398_v1, 16 }
 0x422   : > { %v1716_v34 = vpop.permute.xlu0 %1715 }
 0x423   : > { %v1508_v2 = vpack.i.b16 %v1507_v51, %v1506_v46 }
 0x424   : > { %v1494_v36 = vpop.trf.xlu1 }
 0x425   : > { %v1531_v39 = vshrl.u32 %v1494_v36, 16 }
 0x426   : > { %v1712_v35 = vpop.permute.xlu0 %1711 }
 0x427   : > { %1791 = vxpose.xlu0.c.b16.start.end [1/1] (short) (narrow) %v1712_v35, 16 }
 0x428   : > { %v1462_v41 = vpop.trf.xlu1 }
 0x429   : > { %v1523_v23 = vshrl.u32 %v1462_v41, 16 }
 0x42b   : > { %1823 = vxpose.xlu0.c.b16.start.end [1/1] (short) (narrow) %v1716_v34, 16 }
 0x434   : > { %v1414_v24 = vpop.trf.xlu0 }
 0x435   : > { %v1514_v48 = vshrl.u32 %v1414_v24, 16 }
 0x438   : > { %v1430_v17 = vpop.trf.xlu0 }
 0x439   : > { %v1515_v49 = vshrl.u32 %v1430_v17, 16  ;;  %v1512_v12 = vpack.i.b16 %v1430_v17, %v1414_v24 }
 0x43b   : > { %v1516_v62 = vpack.i.b16 %v1515_v49, %v1514_v48 }
 0x43c   : > { %v1446_v45 = vpop.trf.xlu0 }
 0x43d   : > { %v1520_v29 = vpack.i.b16 %v1462_v41, %v1446_v45  ;;  %v1522_v47 = vshrl.u32 %v1446_v45, 16 }
 0x43f   : > { %v1524_v57 = vpack.i.b16 %v1523_v23, %v1522_v47  ;;  %v1534_v58 = vcombine.low %v1504_v50, %v1520_v29  ;;  %v1535_v60 = vcombine.high %v1504_v50, %v1520_v29 }
 0x440   : > { %v1478_v55 = vpop.trf.xlu0 }
 0x441   : > { %v1528_v0 = vpack.i.b16 %v1494_v36, %v1478_v55  ;;  %v1530_v52 = vshrl.u32 %v1478_v55, 16  ;;  %v1542_v61 = vrot.slane %v1534_v58, %v2845_v53  ;;  %v1549_v13 = vrot.slane %v1535_v60, %v2845_v53 }
 0x442   : > { %v1602_v14 = vcombine.low %v1508_v2, %v1524_v57  ;;  %v1603_v56 = vcombine.high %v1508_v2, %v1524_v57 }
 0x443   : > { %v1532_v6 = vpack.i.b16 %v1531_v39, %v1530_v52  ;;  %v1550_v7 = vcombine.low %v1512_v12, %v1528_v0  ;;  %v1551_v10 = vcombine.high %v1512_v12, %v1528_v0 }
 0x444   : > { %v1610_v26 = vrot.slane %v1602_v14, %v2845_v53  ;;  %v1617_v9 = vrot.slane %v1603_v56, %v2845_v53 }
 0x445   : > { %v1558_v15 = vrot.slane %v1550_v7, %v2845_v53  ;;  %v1565_v16 = vrot.slane %v1551_v10, %v2845_v53  ;;  %v1618_v19 = vcombine.low %v1516_v62, %v1532_v6  ;;  %v1619_v20 = vcombine.high %v1516_v62, %v1532_v6 }
 0x447   : > { %v1566_v5 = vcombine.low %v1542_v61, %v1558_v15  ;;  %v1567_v21 = vcombine.high %v1542_v61, %v1558_v15  ;;  %v1582_v22 = vcombine.low %v1549_v13, %v1565_v16  ;;  %v1583_v25 = vcombine.high %v1549_v13, %v1565_v16 }
 0x448   : > { %v1626_v63 = vrot.slane %v1618_v19, %v2845_v53  ;;  %v1633_v27 = vrot.slane %v1619_v20, %v2845_v53 }
 0x449   : > { %v1574_v8 = vrot.slane %v1566_v5, %v2848_v3  ;;  %v1581_v28 = vrot.slane %v1567_v21, %v2848_v3  ;;  %v1590_v18 = vrot.slane %v1582_v22, %v2848_v3  ;;  %v1597_v11 = vrot.slane %v1583_v25, %v2848_v3 }
 0x44a   : > { %v1634_v30 = vcombine.low %v1610_v26, %v1626_v63  ;;  %v1635_v31 = vcombine.high %v1610_v26, %v1626_v63  ;;  %v1650_v54 = vcombine.low %v1617_v9, %v1633_v27  ;;  %v1651_v32 = vcombine.high %v1617_v9, %v1633_v27 }
 0x44b   : > { %v1598_v33 = vcombine.high %v1574_v8, %v2500_v59  ;;  %v1599_v4 = vcombine.high %v1581_v28, %v2500_v59  ;;  %v1600_v34 = vcombine.high %v1590_v18, %v2500_v59  ;;  %v1601_v35 = vcombine.high %v1597_v11, %v2500_v59  ;;  %1671 = vst.msk [vmem:[%s2860_s29] sm:$0xf] %vm1670_vm3, %v1574_v8 }
 0x44c   : > { %1675 = vst.msk [vmem:[%s2860_s29 + $0x10] sm:$0xf] %vm1670_vm3, %v1581_v28  ;;  %1679 = vst.msk [vmem:[%s2860_s29 + $0x20] sm:$0xf] %vm1670_vm3, %v1590_v18  ;;  %v1642_v1 = vrot.slane %v1634_v30, %v2848_v3  ;;  %v1649_v24 = vrot.slane %v1635_v31, %v2848_v3  ;;  %v1658_v36 = vrot.slane %v1650_v54, %v2848_v3 }
 0x44d   : > { %1683 = vst.msk [vmem:[%s2860_s29 + $0x30] sm:$0xf] %vm1670_vm3, %v1597_v11  ;;  %v1665_v37 = vrot.slane %v1651_v32, %v2848_v3  ;;  %1673 = vst.msk [vmem:[%s2860_s29 + $0x8] sm:$0xf] %vm1670_vm3, %v1598_v33 }
 0x44e   : > { %1677 = vst.msk [vmem:[%s2860_s29 + $0x18] sm:$0xf] %vm1670_vm3, %v1599_v4  ;;  %1681 = vst.msk [vmem:[%s2860_s29 + $0x28] sm:$0xf] %vm1670_vm3, %v1600_v34  ;;  %v1666_v40 = vcombine.high %v1642_v1, %v2500_v59  ;;  %v1667_v17 = vcombine.high %v1649_v24, %v2500_v59  ;;  %v1668_v41 = vcombine.high %v1658_v36, %v2500_v59 }
 0x44f   : > { %1685 = vst.msk [vmem:[%s2860_s29 + $0x38] sm:$0xf] %vm1670_vm3, %v1601_v35  ;;  %v1669_v42 = vcombine.high %v1665_v37, %v2500_v59  ;;  %1672 = vst.msk [vmem:[%s2860_s29 + $0x4] sm:$0xf] %vm1670_vm3, %v1642_v1 }
 0x450   : > { %1676 = vst.msk [vmem:[%s2860_s29 + $0x14] sm:$0xf] %vm1670_vm3, %v1649_v24  ;;  %1680 = vst.msk [vmem:[%s2860_s29 + $0x24] sm:$0xf] %vm1670_vm3, %v1658_v36 }
 0x451   : > { %1684 = vst.msk [vmem:[%s2860_s29 + $0x34] sm:$0xf] %vm1670_vm3, %v1665_v37  ;;  %1674 = vst.msk [vmem:[%s2860_s29 + $0xc] sm:$0xf] %vm1670_vm3, %v1666_v40 }
 0x452   : > { %1678 = vst.msk [vmem:[%s2860_s29 + $0x1c] sm:$0xf] %vm1670_vm3, %v1667_v17  ;;  %1682 = vst.msk [vmem:[%s2860_s29 + $0x2c] sm:$0xf] %vm1670_vm3, %v1668_v41 }
 0x453   : > { %1686 = vst.msk [vmem:[%s2860_s29 + $0x3c] sm:$0xf] %vm1670_vm3, %v1669_v42 }
 0x45a   : > { %v1767_v44 = vpop.trf.xlu0 }
 0x45b   : > { %v1867_v46 = vshrl.u32 %v1767_v44, 16 }
 0x45e   : > { %v1783_v43 = vpop.trf.xlu1  ;;  %v1735_v23 = vpop.trf.xlu0 }
 0x45f   : > { %v1859_v12 = vshrl.u32 %v1735_v23, 16  ;;  %v1868_v55 = vshrl.u32 %v1783_v43, 16  ;;  %v1865_v52 = vpack.i.b16 %v1783_v43, %v1767_v44 }
 0x461   : > { %v1869_v10 = vpack.i.b16 %v1868_v55, %v1867_v46 }
 0x462   : > { %v1751_v45 = vpop.trf.xlu1 }
 0x463   : > { %v1860_v38 = vshrl.u32 %v1751_v45, 16  ;;  %v1857_v39 = vpack.i.b16 %v1751_v45, %v1735_v23 }
 0x465   : > { %v1861_v7 = vpack.i.b16 %v1860_v38, %v1859_v12 }
 0x470   : > { %v1815_v29 = vpop.trf.xlu1 }
 0x471   : > { %v1876_v48 = vshrl.u32 %v1815_v29, 16 }
 0x474   : > { %v1847_v51 = vpop.trf.xlu1 }
 0x475   : > { %v1884_v57 = vshrl.u32 %v1847_v51, 16 }
 0x489   : > { %v1799_v47 = vpop.trf.xlu0 }
 0x48a   : > { %v1873_v49 = vpack.i.b16 %v1815_v29, %v1799_v47  ;;  %v1875_v50 = vshrl.u32 %v1799_v47, 16 }
 0x48c   : > { %v1877_v60 = vpack.i.b16 %v1876_v48, %v1875_v50  ;;  %v1887_v62 = vcombine.low %v1857_v39, %v1873_v49  ;;  %v1888_v0 = vcombine.high %v1857_v39, %v1873_v49 }
 0x48d   : > { %v1831_v58 = vpop.trf.xlu0 }
 0x48e   : > { %v1881_v2 = vpack.i.b16 %v1847_v51, %v1831_v58  ;;  %v1883_v6 = vshrl.u32 %v1831_v58, 16  ;;  %v1895_v56 = vrot.slane %v1887_v62, %v2845_v53  ;;  %v1902_v15 = vrot.slane %v1888_v0, %v2845_v53 }
 0x48f   : > { %v1955_v16 = vcombine.low %v1861_v7, %v1877_v60  ;;  %v1956_v19 = vcombine.high %v1861_v7, %v1877_v60 }
 0x490   : > { %v1885_v61 = vpack.i.b16 %v1884_v57, %v1883_v6  ;;  %v1903_v13 = vcombine.low %v1865_v52, %v1881_v2  ;;  %v1904_v14 = vcombine.high %v1865_v52, %v1881_v2 }
 0x491   : > { %v1963_v27 = vrot.slane %v1955_v16, %v2845_v53  ;;  %v1970_v8 = vrot.slane %v1956_v19, %v2845_v53 }
 0x492   : > { %v1911_v20 = vrot.slane %v1903_v13, %v2845_v53  ;;  %v1918_v5 = vrot.slane %v1904_v14, %v2845_v53  ;;  %v1971_v21 = vcombine.low %v1869_v10, %v1885_v61  ;;  %v1972_v22 = vcombine.high %v1869_v10, %v1885_v61 }
 0x494   : > { %v1919_v25 = vcombine.low %v1895_v56, %v1911_v20  ;;  %v1920_v26 = vcombine.high %v1895_v56, %v1911_v20  ;;  %v1935_v9 = vcombine.low %v1902_v15, %v1918_v5  ;;  %v1936_v63 = vcombine.high %v1902_v15, %v1918_v5 }
 0x495   : > { %v1979_v28 = vrot.slane %v1971_v21, %v2845_v53  ;;  %v1986_v18 = vrot.slane %v1972_v22, %v2845_v53 }
 0x496   : > { %v1927_v11 = vrot.slane %v1919_v25, %v2848_v3  ;;  %v1934_v30 = vrot.slane %v1920_v26, %v2848_v3  ;;  %v1943_v31 = vrot.slane %v1935_v9, %v2848_v3  ;;  %v1950_v54 = vrot.slane %v1936_v63, %v2848_v3 }
 0x497   : > { %v1987_v32 = vcombine.low %v1963_v27, %v1979_v28  ;;  %v1988_v33 = vcombine.high %v1963_v27, %v1979_v28  ;;  %v2003_v4 = vcombine.low %v1970_v8, %v1986_v18  ;;  %v2004_v34 = vcombine.high %v1970_v8, %v1986_v18 }
 0x498   : > { %v1951_v35 = vcombine.high %v1927_v11, %v2500_v59  ;;  %v1952_v53 = vcombine.high %v1934_v30, %v2500_v59  ;;  %v1953_v1 = vcombine.high %v1943_v31, %v2500_v59  ;;  %v1954_v24 = vcombine.high %v1950_v54, %v2500_v59  ;;  %2023 = vst.msk [vmem:[%s2923_s15] sm:$0xf] %vm1670_vm3, %v1927_v11 }
 0x499   : > { %2027 = vst.msk [vmem:[%s2923_s15 + $0x10] sm:$0xf] %vm1670_vm3, %v1934_v30  ;;  %2031 = vst.msk [vmem:[%s2923_s15 + $0x20] sm:$0xf] %vm1670_vm3, %v1943_v31  ;;  %v1995_v36 = vrot.slane %v1987_v32, %v2848_v3  ;;  %v2002_v37 = vrot.slane %v1988_v33, %v2848_v3  ;;  %v2011_v40 = vrot.slane %v2003_v4, %v2848_v3 }
 0x49a   : > { %2035 = vst.msk [vmem:[%s2923_s15 + $0x30] sm:$0xf] %vm1670_vm3, %v1950_v54  ;;  %v2018_v17 = vrot.slane %v2004_v34, %v2848_v3  ;;  %2025 = vst.msk [vmem:[%s2923_s15 + $0x8] sm:$0xf] %vm1670_vm3, %v1951_v35 }
 0x49b   : > { %2029 = vst.msk [vmem:[%s2923_s15 + $0x18] sm:$0xf] %vm1670_vm3, %v1952_v53  ;;  %2033 = vst.msk [vmem:[%s2923_s15 + $0x28] sm:$0xf] %vm1670_vm3, %v1953_v1  ;;  %v2019_v41 = vcombine.high %v1995_v36, %v2500_v59  ;;  %v2020_v42 = vcombine.high %v2002_v37, %v2500_v59  ;;  %v2021_v43 = vcombine.high %v2011_v40, %v2500_v59 }
 0x49c   : > { %2037 = vst.msk [vmem:[%s2923_s15 + $0x38] sm:$0xf] %vm1670_vm3, %v1954_v24  ;;  %v2022_v44 = vcombine.high %v2018_v17, %v2500_v59  ;;  %2024 = vst.msk [vmem:[%s2923_s15 + $0x4] sm:$0xf] %vm1670_vm3, %v1995_v36 }
 0x49d   : > { %2028 = vst.msk [vmem:[%s2923_s15 + $0x14] sm:$0xf] %vm1670_vm3, %v2002_v37  ;;  %2032 = vst.msk [vmem:[%s2923_s15 + $0x24] sm:$0xf] %vm1670_vm3, %v2011_v40 }
 0x49e   : > { %2036 = vst.msk [vmem:[%s2923_s15 + $0x34] sm:$0xf] %vm1670_vm3, %v2018_v17  ;;  %2026 = vst.msk [vmem:[%s2923_s15 + $0xc] sm:$0xf] %vm1670_vm3, %v2019_v41 }
 0x49f   : > { %2030 = vst.msk [vmem:[%s2923_s15 + $0x1c] sm:$0xf] %vm1670_vm3, %v2020_v42  ;;  %2034 = vst.msk [vmem:[%s2923_s15 + $0x2c] sm:$0xf] %vm1670_vm3, %v2021_v43 }
 0x4a0   : > { %2038 = vst.msk [vmem:[%s2923_s15 + $0x3c] sm:$0xf] %vm1670_vm3, %v2022_v44 }
 0x4a1 PF: > { %s24_s27 = sadd.s32 1, %s2493_s27   ;;  %s3000_s25 = smov %s2489_s26 }
 0x4a2   : > { %p21_p5 = scmp.ge.s32.totalorder %s24_s27, 4   ;;  %s3001_s26 = smov %s3003_s28 }
 0x4a4   :  { %23 = sbr.rel (!%p21_p5) target bundleno = 2 (0x2), region = 130 }

// kernel: graph_module.8
= control target key start
LH: loop header
LB: loop body
LE: loop exit
PB: predicated region body
PF: predicated region fallthrough
CT: control target
= control target key end

     0   :  { %s4284_s27 = smov 0   ;;  %s4286_s28 = smov 0   ;;  %s5025_s0 = inlined_call_operand.vmem [shape: f32[2,8,32], index: 0, kind: input, shape index: {}]   ;;  %s5026_s1 = inlined_call_operand.vmem [shape: bf16[2,8,512], index: 1, kind: input, shape index: {}]   ;;  %s5027_s2 = inlined_call_operand.vmem [shape: bf16[2,8,8,16], index: 2, kind: input, shape index: {}]   ;;  %s5028_s3 = inlined_call_operand.vmem [shape: f32[1,32], index: 3, kind: input, shape index: {}]   ;;  %s5029_s4 = inlined_call_operand.vmem [shape: f32[1,32], index: 4, kind: input, shape index: {}]   ;;  %s5030_s5 = inlined_call_operand.vmem [shape: f32[1,16], index: 5, kind: input, shape index: {}]   ;;  %s5031_s6 = inlined_call_operand.vmem [shape: f32[1,16], index: 6, kind: input, shape index: {}]   ;;  %s5032_s7 = inlined_call_operand.vmem [shape: bf16[32,512], index: 7, kind: input, shape index: {}]   ;;  %s5033_s8 = inlined_call_operand.vmem [shape: f32[1,256], index: 8, kind: input, shape index: {}]   ;;  %s5034_s9 = inlined_call_operand.vmem [shape: bf16[16,8], index: 9, kind: input, shape index: {}]   ;;  %s5035_s10 = inlined_call_operand.vmem [shape: bf16[256,32], index: 10, kind: input, shape index: {}]   ;;  %s5036_s11 = inlined_call_operand.vmem [shape: f32[1,32], index: 11, kind: input, shape index: {}]   ;;  %s5037_s12 = inlined_call_operand.vmem [shape: f32[1,32], index: 12, kind: input, shape index: {}]   ;;  %s5038_s13 = inlined_call_operand.vmem [shape: f32[1,32], index: 13, kind: input, shape index: {}]   ;;  %s5039_s14 = inlined_call_operand.vmem [shape: bf16[32,64], index: 14, kind: input, shape index: {}]   ;;  %s5040_s15 = inlined_call_operand.vmem [shape: f32[1,64], index: 15, kind: input, shape index: {}]   ;;  %s5041_s16 = inlined_call_operand.vmem [shape: bf16[64,32], index: 16, kind: input, shape index: {}]   ;;  %s5042_s17 = inlined_call_operand.vmem [shape: f32[1,32], index: 17, kind: input, shape index: {}]   ;;  %s5043_s18 = inlined_call_operand.vmem [shape: f32[2,8,32], index: 18, kind: output, shape index: {}]  }
   0x1   :  { %5047 = sst [smem:[#allocation5_spill]] %s5025_s0  ;;  %s4288_s29 = smov 0  }
   0x2   :  { %5048 = sst [smem:[#allocation6_spill]] %s5026_s1 }
   0x3   :  { %5049 = sst [smem:[#allocation7_spill]] %s5027_s2 }
   0x4 LB: > { %5050 = sst [smem:[#allocation2_spill]] %s4163_s28  ;;  %s40_s30 = sadd.s32 1, %s4163_s28  ;;  %s4167_s29 = sphi %s4288_s29, %s28_s29   ;;  %s4163_s28 = sphi %s4286_s28, %s5059_s28   ;;  %s4159_s27 = sphi %s4284_s27, %s5058_s27  }
   0x5   : > { %5051 = sst [smem:[#allocation3_spill]] %s4167_s29  ;;  %p3693_p0 = scmp.ge.s32.totalorder %s4167_s29, 1 }
   0x6   : > { %p42_p1 = scmp.ge.s32.totalorder %s40_s30, 2  ;;  %p557_p2 = scmp.lt.s32.totalorder %s4167_s29, 3 }
   0x8   : > { %s5061_s30 = smov (%p42_p1, %s40_s30), 0  ;;  %p558_p3 = pnand %p3693_p0, %p557_p2 }
   0x9   : > { %5052 = sst [smem:[#allocation4_spill]] %s5061_s30  ;;  %p629_p4 = scmp.lt.s32.totalorder (!%p558_p3), %s4159_s27, 1 }
   0xa   : > { %561 = sbr.rel (%p558_p3) target bundleno = 2459 (0x99b), region = 92  ;;  %s5053_s21 = sld [smem:[#allocation5_spill]] (!%p558_p3) }
   0xb   : > { %s5054_s24 = sld [smem:[#allocation7_spill]] (!%p558_p3)  ;;  %s4169_s2 = smov (!%p558_p3), 64  }
   0xc   : > { %s5055_s20 = sld [smem:[#allocation6_spill]] (!%p558_p3)  ;;  %s4172_s23 = smov (!%p558_p3), 32  }
   0xd   : > { %s4180_s1 = smov (!%p558_p3), 24   ;;  %s4182_s30 = smov (!%p558_p3), 56  }
   0xe   : > { %s4184_s28 = smov (!%p558_p3), 120   ;;  %s4185_s29 = smov (!%p558_p3), 104  }
   0xf   : > { %s5063_s27 = smov (!%p629_p4, %s4159_s27), 1  ;;  %vm672_vm0 = vcmask 261120   ;;  %vm712_vm1 = vcmask 130048   ;;  %v4049_v47 = vld [vmem:[%s5032_s7 + $0x24] ss:$16 sps:$4 sm:$0xff]   ;;  %v4170_v56 = vmov 0  }
  0x10   : > { %s5044_s0 = sshll.u32 %s5063_s27, 3  ;;  %s3786_s19 = sshll.u32 %s5063_s27, 5  ;;  %v4051_v48 = vld [vmem:[%s5032_s7 + $0x2c] ss:$16 sps:$4 sm:$0xff]   ;;  %v4053_v49 = vld [vmem:[%s5032_s7 + $0x20] ss:$16 sps:$4 sm:$0xff]   ;;  %917 = vmatprep.subr.bf16.mxu0 %v4049_v47  ;;  %937 = vmatprep.mubr.bf16.mxu0 %v4170_v56 }
  0x11   : > { %s4311_s22 = scalar_lea.vmem %s5053_s21, %s5044_s0  ;;  %s649_s25 = scalar_lea.vmem %s5054_s24, %s3786_s19  ;;  %v4054_v50 = vld [vmem:[%s5032_s7 + $0x28] ss:$16 sps:$4 sm:$0xff]   ;;  %958 = vmatprep.subr.bf16.mxu1 %v4051_v48  ;;  %918 = vmatpush1.bf16.msra.mxu0 %v4053_v49  ;;  %v4055_v52 = vld [vmem:[%s5032_s7 + $0x4] ss:$16 sps:$4 sm:$0xff]   ;;  %v4057_v53 = vld [vmem:[%s5032_s7 + $0xc] ss:$16 sps:$4 sm:$0xff]  }
  0x12   : > { %v659_v0 = vld [vmem:[%s4311_s22] sm:$0xff]  ;;  %v3809_v2 = vld [vmem:[%s649_s25 + $0x18] sm:$0xff]   ;;  %v4318_v3 = vld [vmem:[%s649_s25 + $0x10] sm:$0xff]   ;;  %s3785_s26 = sshll.u32 %s5063_s27, 4  ;;  %959 = vmatpush1.bf16.msra.mxu1 %v4054_v50  ;;  %919 = vmatprep.subr.bf16.mxu0 %v4055_v52  ;;  %v4171_v57 = vmov 0.0   ;;  %s4173_s24 = smov 96  }
  0x13   : > { %v673_v1 = vsel %vm672_vm0, %v659_v0, 0.0  ;;  %v4320_v4 = vld [vmem:[%s649_s25 + $0x8] sm:$0xff]   ;;  %v3805_v5 = vunpack.c.l.bf16 %v3809_v2  ;;  %v3806_v6 = vunpack.c.h.bf16 %v3809_v2  ;;  %v3802_v7 = vunpack.c.h.bf16 %v4318_v3  ;;  %v4328_v13 = vld [vmem:[%s649_s25] sm:$0xff]   ;;  %s4375_s21 = scalar_lea.vmem %s5055_s20, %s3785_s26  ;;  %960 = vmatprep.subr.bf16.mxu1 %v4057_v53  ;;  %978 = vmatprep.mubr.bf16.mxu1 %v4170_v56  ;;  %s4177_s25 = smov 48  }
  0x14   : > { %674 = vadd.xlane.f32.xlu0 %v673_v1  ;;  %v3798_v8 = vunpack.c.h.bf16 %v4320_v4  ;;  %v3794_v14 = vunpack.c.h.bf16 %v4328_v13  ;;  %v3801_v21 = vunpack.c.l.bf16 %v4318_v3  ;;  %v3797_v27 = vunpack.c.l.bf16 %v4320_v4  ;;  %v4390_v51 = vld [vmem:[%s4375_s21] sm:$0xff]  ;;  %v4060_v55 = vld [vmem:[%s5032_s7 + $0x8] ss:$16 sps:$4 sm:$0xff]   ;;  %s4178_s26 = smov 8   ;;  %s4179_s19 = smov 16  }
  0x15   : > { %v731_v9 = vsel %vm712_vm1, %v3805_v5, 0.0  ;;  %v734_v10 = vsel %vm712_vm1, %v3806_v6, 0.0  ;;  %v728_v11 = vsel %vm712_vm1, %v3802_v7, 0.0  ;;  %v3793_v34 = vunpack.c.l.bf16 %v4328_v13  ;;  %v4059_v54 = vld [vmem:[%s5032_s7] ss:$16 sps:$4 sm:$0xff]   ;;  %s4181_s20 = smov 40  }
  0x16   : > { %732 = vadd.xlane.f32.xlu1 %v731_v9  ;;  %v722_v12 = vsel %vm712_vm1, %v3798_v8, 0.0  ;;  %v716_v15 = vsel %vm712_vm1, %v3794_v14, 0.0  ;;  %v725_v26 = vsel %vm712_vm1, %v3801_v21, 0.0  ;;  %v719_v33 = vsel %vm712_vm1, %v3797_v27, 0.0  ;;  %920 = vmatpush1.bf16.msra.mxu0 %v4059_v54  ;;  %v4061_v63 = vld [vmem:[%s5034_s9] sm:$0xff]   ;;  %s4183_s0 = smov 112  }
  0x17   : > { %v713_v40 = vsel %vm712_vm1, %v3793_v34, 0.0  ;;  %961 = vmatpush1.bf16.msra.mxu1 %v4060_v55  ;;  %3877 = vmatprep.subr.bf16.mxu0 %v4171_v57  ;;  %vm4174_vm2 = vmmov 0   ;;  %v4176_v50 = vmov 1934713408   ;;  %v1736_v55 = vcombine.high %v4171_v57, %v4171_v57 }
  0x18   : > { %3889 = vmatprep.subr.bf16.mxu1 %v4171_v57  ;;  %v1100_v52 = vunpack.c.l.s4 %v4176_v50  ;;  %vm1819_vm3 = vcmask 64512   ;;  %vm1822_vm4 = vcmask 195584   ;;  %vm1825_vm5 = vcmask 326656  }
  0x19   : > { %vm1827_vm6 = vcmask 392192   ;;  %vm1829_vm7 = vcmask 457728   ;;  %vm2553_vm8 = vcmask 1043456   ;;  %vm3216_vm9 = vcmask 523264  }
  0x1a   : > { %735 = vadd.xlane.f32.xlu1 %v734_v10  ;;  %v1101_v54 = vunpack.c.0.s8 %v1100_v52  ;;  %vm3218_vm10 = vcmask 785408  }
  0x1e   : > { %729 = vadd.xlane.f32.xlu1 %v728_v11 }
  0x22   : > { %723 = vadd.xlane.f32.xlu1 %v722_v12 }
  0x26   : > { %717 = vadd.xlane.f32.xlu1 %v716_v15 }
  0x9d   : > { %v675_v16 = vpop.xlane.xlu0 %674 }
  0x9e   : > { %v677_v17 = vmul.f32 0.03125, %v675_v16 }
  0x9f   : > { %v733_v19 = vpop.xlane.xlu1 %732 }
  0xa0   : > { %v4334_v18 = vsub.f32 %v659_v0, %v677_v17  ;;  %v744_v25 = vmul.f32 0.0625, %v733_v19 }
  0xa2   : > { %v679_v20 = vmul.f32 %v4334_v18, %v4334_v18  ;;  %v4348_v32 = vsub.f32 %v3805_v5, %v744_v25  ;;  %v3700_v25 = vld [vmem:[%s5028_s3] ss:$0 sm:$0xff] }
  0xa3   : > { %v736_v22 = vpop.xlane.xlu1 %735 }
  0xa4   : > { %v680_v23 = vsel %vm672_vm0, %v679_v20, 0.0  ;;  %v745_v24 = vmul.f32 0.0625, %v736_v22  ;;  %v760_v41 = vmul.f32 %v4348_v32, %v4348_v32 }
  0xa5   : > { %681 = vadd.xlane.f32.xlu0 %v680_v23 }
  0xa6   : > { %v4344_v28 = vsub.f32 %v3806_v6, %v745_v24  ;;  %v780_v45 = vsel %vm712_vm1, %v760_v41, 0.0 }
  0xa7   : > { %v730_v29 = vpop.xlane.xlu1 %729 }
  0xa8   : > { %v743_v30 = vmul.f32 0.0625, %v730_v29  ;;  %v761_v31 = vmul.f32 %v4344_v28, %v4344_v28  ;;  %v3701_v29 = vld [vmem:[%s5029_s4] ss:$0 sm:$0xff] }
  0xa9   : > { %726 = vadd.xlane.f32.xlu0 %v725_v26 }
  0xaa   : > { %v4354_v35 = vsub.f32 %v3802_v7, %v743_v30  ;;  %v783_v36 = vsel %vm712_vm1, %v761_v31, 0.0 }
  0xab   : > { %v724_v37 = vpop.xlane.xlu1 %723  ;;  %784 = vadd.xlane.f32.xlu1 %v783_v36 }
  0xac   : > { %v741_v38 = vmul.f32 0.0625, %v724_v37  ;;  %v759_v39 = vmul.f32 %v4354_v35, %v4354_v35 }
  0xad   : > { %720 = vadd.xlane.f32.xlu0 %v719_v33 }
  0xae   : > { %v4364_v42 = vsub.f32 %v3798_v8, %v741_v38  ;;  %v777_v43 = vsel %vm712_vm1, %v759_v39, 0.0 }
  0xaf   : > { %778 = vadd.xlane.f32.xlu1 %v777_v43  ;;  %v718_v58 = vpop.xlane.xlu1 %717 }
  0xb0   : > { %v757_v44 = vmul.f32 %v4364_v42, %v4364_v42  ;;  %v739_v59 = vmul.f32 0.0625, %v718_v58 }
  0xb1   : > { %714 = vadd.xlane.f32.xlu0 %v713_v40  ;;  %v4463_v40 = vld [vmem:[%s5031_s6] ss:$0 sm:$0xff] }
  0xb2   : > { %v771_v46 = vsel %vm712_vm1, %v757_v44, 0.0  ;;  %v4412_v60 = vsub.f32 %v3794_v14, %v739_v59 }
  0xb3   : > { %772 = vadd.xlane.f32.xlu1 %v771_v46  ;;  %v4175_v46 = vmov 1983009808  }
  0xb4   : > { %v755_v61 = vmul.f32 %v4412_v60, %v4412_v60  ;;  %v1036_v47 = vunpack.c.l.s4 %v4175_v46 }
  0xb5   : > { %781 = vadd.xlane.f32.xlu0 %v780_v45  ;;  %v989_v45 = vlaneseq }
  0xb6   : > { %v765_v62 = vsel %vm712_vm1, %v755_v61, 0.0  ;;  %v1037_v49 = vunpack.c.0.s8 %v1036_v47 }
  0xb7   : > { %v4476_v48 = vshrl.u32 %v989_v45, 7 }
  0xb9   : > { %v4479_v53 = vsub.s32 %v1037_v49, %v4476_v48  ;;  %v4485_v61 = vsub.s32 %v1101_v54, %v4476_v48 }
  0xbb   : > { %v1750_v58 = vrot.slane %v1736_v55, %v4479_v53 }
  0xc4   : > { %1320 = vrot.lane.b32.xlu1 %v4390_v51, %s4169_s2 }
  0xe8   : > { %766 = vadd.xlane.f32.xlu1 %v765_v62  ;;  %v1767_v62 = vcombine.low %v1750_v58, %v1750_v58 }
  0xf9   : > { %1324 = vrot.lane.b32.xlu1 %v4390_v51, %s4172_s23 }
 0x11c   : > { %1837 = vxpose.xlu1.c.b16.start.end [1/1] (short) (narrow) %v4061_v63, 16  ;;  %v1768_v63 = vcombine.high %v1750_v58, %v1750_v58 }
 0x12e   : > { %v682_v0 = vpop.xlane.xlu0 %681 }
 0x12f   : > { %v683_v1 = vmul.f32 0.03125, %v682_v0  ;;  %v4488_v0 = vrot.slane %v1767_v62, %v4485_v61 }
 0x131   : > { %v684_v2 = vadd.f32 1e-05, %v683_v1  ;;  %v4491_v1 = vrot.slane %v1768_v63, %v4485_v61 }
 0x132   : > { %v727_v5 = vpop.xlane.xlu0 %726 }
 0x133   : > { %4084 = vrsqrt.f32 %v684_v2  ;;  %v742_v6 = vmul.f32 0.0625, %v727_v5  ;;  %v1787_v2 = vcombine.low %v4488_v0, %v4488_v0 }
 0x134   : > { %v785_v8 = vpop.xlane.xlu1 %784 }
 0x135   : > { %v4424_v7 = vsub.f32 %v3801_v21, %v742_v6  ;;  %v793_v9 = vmul.f32 0.0625, %v785_v8  ;;  %1804 = vrot.lane.b32.xlu1 %v1787_v2, %s4172_s23  ;;  %v1789_v6 = vcombine.low %v4491_v1, %v4491_v1 }
 0x136   : > { %v721_v10 = vpop.xlane.xlu0 %720 }
 0x137   : > { %v740_v11 = vmul.f32 0.0625, %v721_v10  ;;  %v758_v12 = vmul.f32 %v4424_v7, %v4424_v7  ;;  %v801_v14 = vadd.f32 1e-05, %v793_v9 }
 0x138   : > { %v779_v59 = vpop.xlane.xlu1 %778 }
 0x139   : > { %v4430_v15 = vsub.f32 %v3797_v27, %v740_v11  ;;  %v774_v16 = vsel %vm712_vm1, %v758_v12, 0.0  ;;  %4086 = vrsqrt.f32 %v801_v14  ;;  %1812 = vrot.lane.b32.xlu1 %v1789_v6, %s4177_s25  ;;  %v791_v9 = vmul.f32 0.0625, %v779_v59  ;;  %s4186_s25 = smov 80  }
 0x13a   : > { %775 = vadd.xlane.f32.xlu0 %v774_v16  ;;  %v715_v17 = vpop.xlane.xlu0 %714  ;;  %v1314_v14 = vrot.slane %v4390_v51, 4 }
 0x13b   : > { %v738_v19 = vmul.f32 0.0625, %v715_v17  ;;  %v756_v3 = vmul.f32 %v4430_v15, %v4430_v15  ;;  %v799_v10 = vadd.f32 1e-05, %v791_v9 }
 0x13c   : > { %v773_v5 = vpop.xlane.xlu1 %772 }
 0x13d   : > { %v4437_v20 = vsub.f32 %v3793_v34, %v738_v19  ;;  %v768_v21 = vsel %vm712_vm1, %v756_v3, 0.0  ;;  %v789_v11 = vmul.f32 0.0625, %v773_v5 }
 0x13e   : > { %769 = vadd.xlane.f32.xlu0 %v768_v21  ;;  %v782_v22 = vpop.xlane.xlu0 %781  ;;  %v1331_v21 = vcombine.low %v4390_v51, %v1314_v14 }
 0x13f   : > { %v792_v4 = vmul.f32 0.0625, %v782_v22  ;;  %v754_v23 = vmul.f32 %v4437_v20, %v4437_v20  ;;  %v797_v17 = vadd.f32 1e-05, %v789_v11 }
 0x140   : > { %v4085_v24 = vpop.eup %4084  ;;  %v1321_v8 = vpop.permute.xlu1 %1320 }
 0x141   : > { %v800_v26 = vadd.f32 1e-05, %v792_v4  ;;  %v762_v27 = vsel %vm712_vm1, %v754_v23, 0.0  ;;  %v686_v13 = vmul.f32 %v4085_v24, %v4334_v18  ;;  %v4456_v18 = vld [vmem:[%s5030_s5] ss:$0 sm:$0xff]  ;;  %v1322_v16 = vrot.slane %v1321_v8, 4 }
 0x142   : > { %763 = vadd.xlane.f32.xlu0 %v762_v27  ;;  %v1338_v27 = vrot.slane %v1331_v21, %v4479_v53 }
 0x143   : > { %4088 = vrsqrt.f32 %v800_v26  ;;  %v693_v30 = vmul.f32 %v3700_v25, %v686_v13  ;;  %v1339_v22 = vcombine.low %v1321_v8, %v1322_v16 }
 0x144   : > { %4090 = vrsqrt.f32 %v799_v10 }
 0x145   : > { %v700_v31 = vadd.f32 %v3701_v29, %v693_v30  ;;  %4092 = vrsqrt.f32 %v797_v17  ;;  %v1346_v13 = vrot.slane %v1339_v22, %v4479_v53 }
 0x146   : > { %v4087_v34 = vpop.eup %4086 }
 0x147   : > { %v701_v33 = vpack.c.bf16 %v700_v31, %v700_v31  ;;  %v817_v36 = vmul.f32 %v4087_v34, %v4344_v28  ;;  %v1347_v34 = vcombine.low %v1338_v27, %v1346_v13 }
 0x149   : > { %3712 = vmatmul.mubr.msk.bf16.vlgmr.msra.gmra.mxu0 %vm672_vm0, %v701_v33  ;;  %3713 = vmatmul.mubr.msk.bf16.vlgmr.msra.gmra.mxu1 %vm672_vm0, %v701_v33  ;;  %v831_v39 = vmul.f32 %v4456_v18, %v817_v36  ;;  %v1348_v36 = vcombine.high %v1338_v27, %v1346_v13 }
 0x14a   : > { %3885 = vmatprep.mubr.msk.bf16.mxu0 %vm4174_vm2, %v4171_v57  ;;  %3891 = vmatprep.mubr.msk.bf16.mxu1 %vm4174_vm2, %v4171_v57 }
 0x14b   : > { %v845_v28 = vadd.f32 %v4463_v40, %v831_v39 }
 0x150   : > { %v4089_v37 = vpop.eup %4088 }
 0x151   : > { %v816_v38 = vmul.f32 %v4089_v37, %v4348_v32  ;;  %v4091_v37 = vpop.eup %4090 }
 0x152   : > { %v4093_v45 = vpop.eup %4092 }
 0x153   : > { %v830_v41 = vmul.f32 %v4456_v18, %v816_v38  ;;  %v813_v58 = vmul.f32 %v4093_v45, %v4364_v42 }
 0x155   : > { %v844_v43 = vadd.f32 %v4463_v40, %v830_v41  ;;  %v827_v42 = vmul.f32 %v4456_v18, %v813_v58 }
 0x157   : > { %v3790_v44 = vpack.c.bf16 %v845_v28, %v844_v43  ;;  %v1355_v43 = vrot.slane %v1347_v34, %v4485_v61 }
 0x158   : > { %1316 = vrot.lane.b32.xlu0 %v4390_v51, %s4173_s24 }
 0x159   : > { %v1886_v32 = vsel %vm712_vm1, %v3790_v44, 0  ;;  %v1362_v44 = vrot.slane %v1348_v36, %v4485_v61  ;;  %v1363_v49 = vcombine.high %v1355_v43, %v4170_v56  ;;  %v1403_v2 = vshrl.u32 %v1355_v43, 16 }
 0x15a   : > { %3878 = vmatpush3.bf16.xpose.msra.mxu0 %v1886_v32  ;;  %v815_v32 = vmul.f32 %v4091_v37, %v4354_v35 }
 0x15b   : > { %3879 = vmatprep.subr.bf16.mxu0 %v4171_v57  ;;  %v1364_v54 = vcombine.high %v1362_v44, %v4170_v56  ;;  %v1419_v5 = vshrl.u32 %v1362_v44, 16  ;;  %v1411_v6 = vshrl.u32 %v1363_v49, 16 }
 0x15c   : > { %v829_v55 = vmul.f32 %v4456_v18, %v815_v32 }
 0x15e   : > { %v843_v14 = vadd.f32 %v4463_v40, %v829_v55 }
 0x171   : > { %v767_v12 = vpop.xlane.xlu1 %766 }
 0x172   : > { %v787_v19 = vmul.f32 0.0625, %v767_v12  ;;  %v1427_v12 = vshrl.u32 %v1364_v54, 16 }
 0x174   : > { %v795_v23 = vadd.f32 1e-05, %v787_v19 }
 0x175   : > { %v1325_v26 = vpop.permute.xlu1 %1324 }
 0x176   : > { %v1326_v31 = vrot.slane %v1325_v26, 4 }
 0x178   : > { %v1373_v39 = vcombine.low %v1325_v26, %v1326_v31 }
 0x17a   : > { %v1380_v46 = vrot.slane %v1373_v39, %v4479_v53 }
 0x1c3   : > { %v776_v3 = vpop.xlane.xlu0 %775 }
 0x1c4   : > { %v790_v4 = vmul.f32 0.0625, %v776_v3 }
 0x1c6   : > { %v798_v24 = vadd.f32 1e-05, %v790_v4 }
 0x1c7   : > { %v770_v25 = vpop.xlane.xlu0 %769 }
 0x1c8   : > { %4094 = vrsqrt.f32 %v798_v24  ;;  %v788_v29 = vmul.f32 0.0625, %v770_v25 }
 0x1c9   : > { %4096 = vrsqrt.f32 %v795_v23 }
 0x1ca   : > { %v796_v30 = vadd.f32 1e-05, %v788_v29 }
 0x1cb   : > { %v764_v33 = vpop.xlane.xlu0 %763 }
 0x1cc   : > { %4098 = vrsqrt.f32 %v796_v30  ;;  %v786_v51 = vmul.f32 0.0625, %v764_v33 }
 0x1ce   : > { %v794_v38 = vadd.f32 1e-05, %v786_v51 }
 0x1cf   : > { %v1317_v41 = vpop.permute.xlu0 %1316 }
 0x1d0   : > { %4100 = vrsqrt.f32 %v794_v38  ;;  %v1318_v28 = vrot.slane %v1317_v41, 4 }
 0x1d2   : > { %v1365_v47 = vcombine.low %v1317_v41, %v1318_v28 }
 0x1d4   : > { %v1372_v50 = vrot.slane %v1365_v47, %v4479_v53 }
 0x1d5   : > { %v4095_v52 = vpop.eup %4094 }
 0x1d6   : > { %v4097_v59 = vpop.eup %4096  ;;  %v1381_v62 = vcombine.low %v1372_v50, %v1380_v46  ;;  %v1382_v63 = vcombine.high %v1372_v50, %v1380_v46  ;;  %v814_v35 = vmul.f32 %v4095_v52, %v4424_v7 }
 0x1d7   : > { %v811_v16 = vmul.f32 %v4097_v59, %v4412_v60 }
 0x1d8   : > { %v1389_v8 = vrot.slane %v1381_v62, %v4485_v61  ;;  %v1396_v9 = vrot.slane %v1382_v63, %v4485_v61  ;;  %v828_v10 = vmul.f32 %v4456_v18, %v814_v35 }
 0x1d9   : > { %v4099_v11 = vpop.eup %4098 }
 0x1da   : > { %v1397_v17 = vcombine.high %v1389_v8, %v4170_v56  ;;  %v1398_v7 = vcombine.high %v1396_v9, %v4170_v56  ;;  %v1401_v19 = vpack.i.b16 %v1389_v8, %v1355_v43  ;;  %v1404_v3 = vshrl.u32 %v1389_v8, 16 }
 0x1db   : > { %v1417_v21 = vpack.i.b16 %v1396_v9, %v1362_v44  ;;  %v1420_v22 = vshrl.u32 %v1396_v9, 16  ;;  %v842_v4 = vadd.f32 %v4463_v40, %v828_v10  ;;  %v812_v23 = vmul.f32 %v4099_v11, %v4430_v15 }
 0x1dc   : > { %v1405_v24 = vpack.i.b16 %v1404_v3, %v1403_v2  ;;  %v1409_v25 = vpack.i.b16 %v1397_v17, %v1363_v49  ;;  %v1412_v26 = vshrl.u32 %v1397_v17, 16  ;;  %v1425_v27 = vpack.i.b16 %v1398_v7, %v1364_v54 }
 0x1dd   : > { %v4101_v13 = vpop.eup %4100  ;;  %v1421_v29 = vpack.i.b16 %v1420_v22, %v1419_v5  ;;  %v1428_v30 = vshrl.u32 %v1398_v7, 16  ;;  %v1431_v60 = vcombine.low %v1401_v19, %v1417_v21  ;;  %v3789_v31 = vpack.c.bf16 %v843_v14, %v842_v4 }
 0x1de   : > { %v1413_v33 = vpack.i.b16 %v1412_v26, %v1411_v6  ;;  %v826_v34 = vmul.f32 %v4456_v18, %v812_v23  ;;  %v1439_v51 = vcombine.low %v1409_v25, %v1425_v27  ;;  %v810_v36 = vmul.f32 %v4101_v13, %v4437_v20  ;;  %v1845_v27 = vpop.trf.xlu1 }
 0x1df   : > { %v1429_v37 = vpack.i.b16 %v1428_v30, %v1427_v12  ;;  %v1883_v38 = vsel %vm712_vm1, %v3789_v31, 0  ;;  %v1465_v39 = vcombine.low %v1405_v24, %v1421_v29  ;;  %v1438_v41 = vrot.slane %v1431_v60, %v4479_v53 }
 0x1e0   : > { %3880 = vmatpush3.bf16.xpose.msra.mxu0 %v1883_v38  ;;  %v840_v15 = vadd.f32 %v4463_v40, %v826_v34  ;;  %v1446_v43 = vrot.slane %v1439_v51, %v4479_v53  ;;  %v824_v28 = vmul.f32 %v4456_v18, %v810_v36  ;;  %v841_v44 = vadd.f32 %v4463_v40, %v827_v42 }
 0x1e1   : > { %3881 = vmatprep.subr.bf16.mxu0 %v4171_v57  ;;  %v1473_v32 = vcombine.low %v1413_v33, %v1429_v37  ;;  %v825_v20 = vmul.f32 %v4456_v18, %v811_v16  ;;  %v1472_v49 = vrot.slane %v1465_v39, %v4479_v53  ;;  %v1735_v51 = vcombine.low %v4171_v57, %v4171_v57 }
 0x1e2   : > { %v1447_v45 = vcombine.low %v1438_v41, %v1446_v43  ;;  %v1448_v46 = vcombine.high %v1438_v41, %v1446_v43  ;;  %v3788_v47 = vpack.c.bf16 %v841_v44, %v840_v15  ;;  %v838_v54 = vadd.f32 %v4463_v40, %v824_v28 }
 0x1e3   : > { %v1480_v50 = vrot.slane %v1473_v32, %v4479_v53  ;;  %v839_v62 = vadd.f32 %v4463_v40, %v825_v20  ;;  %v1743_v38 = vrot.slane %v1735_v51, %v4479_v53  ;;  %v1790_v20 = vcombine.high %v4491_v1, %v4491_v1 }
 0x1e4   : > { %v1455_v52 = vrot.slane %v1447_v45, %v4485_v61  ;;  %v1462_v55 = vrot.slane %v1448_v46, %v4485_v61  ;;  %v1880_v18 = vsel %vm712_vm1, %v3788_v47, 0  ;;  %v1788_v45 = vcombine.high %v4488_v0, %v4488_v0 }
 0x1e5   : > { %v1481_v58 = vcombine.low %v1472_v49, %v1480_v50  ;;  %v1482_v59 = vcombine.high %v1472_v49, %v1480_v50  ;;  %v3787_v6 = vpack.c.bf16 %v839_v62, %v838_v54  ;;  %v1751_v39 = vcombine.low %v1743_v38, %v1743_v38 }
 0x1e6   : > { %v4539_v63 = vcombine.high %v1455_v52, %v4170_v56  ;;  %v4545_v5 = vcombine.high %v1462_v55, %v4170_v56  ;;  %v1502_v9 = vshrl.u32 %v1455_v52, 16  ;;  %v1514_v14 = vshrl.u32 %v1462_v55, 16 }
 0x1e7   : > { %v1489_v35 = vrot.slane %v1481_v58, %v4485_v61  ;;  %v1496_v2 = vrot.slane %v1482_v59, %v4485_v61  ;;  %v1877_v25 = vsel %vm712_vm1, %v3787_v6, 0  ;;  %v4596_v15 = vrot.slane %v1751_v39, %v4485_v61 }
 0x1e8   : > { %3882 = vmatpush3.bf16.xpose.msra.mxu0 %v1880_v18  ;;  %v1508_v12 = vshrl.u32 %v4539_v63, 16  ;;  %v1520_v19 = vshrl.u32 %v4545_v5, 16  ;;  %v1752_v41 = vcombine.high %v1743_v38, %v1743_v38 }
 0x1e9   : > { %v1501_v8 = vpack.i.b16 %v1489_v35, %v1455_v52  ;;  %3883 = vmatprep.subr.bf16.mxu0 %v4171_v57  ;;  %v1503_v10 = vshrl.u32 %v1489_v35, 16  ;;  %v4549_v40 = vcombine.high %v1489_v35, %v4170_v56  ;;  %v4552_v11 = vcombine.high %v1496_v2, %v4170_v56 }
 0x1ea   : > { %v1515_v42 = vshrl.u32 %v1496_v2, 16  ;;  %v1513_v26 = vpack.i.b16 %v1496_v2, %v1462_v55  ;;  %v1784_v43 = vcombine.high %v4596_v15, %v4596_v15  ;;  %v1766_v28 = vrot.slane %v1752_v41, %v4485_v61 }
 0x1eb   : > { %v2090_v16 = vsel %vm672_vm0, %v1501_v8, 0  ;;  %v4556_v17 = vpack.i.b16 %v1503_v10, %v1502_v9  ;;  %v1507_v7 = vpack.i.b16 %v4549_v40, %v4539_v63  ;;  %v1519_v3 = vpack.i.b16 %v4552_v11, %v4545_v5 }
 0x1ec   : > { %3890 = vmatpush3.bf16.xpose.msra.mxu1 %v2090_v16  ;;  %v1509_v21 = vshrl.u32 %v4549_v40, 16  ;;  %v4564_v22 = vpack.i.b16 %v1515_v42, %v1514_v14  ;;  %v1521_v4 = vshrl.u32 %v4552_v11, 16  ;;  %v2274_v13 = vsel %vm672_vm0, %v1513_v26, 0  ;;  %v1805_v11 = vpop.permute.xlu1 %1804 }
 0x1ed   : > { %3895 = vmatprep.subr.bf16.mxu1 %v4171_v57  ;;  %v1785_v44 = vcombine.low %v1766_v28, %v1766_v28  ;;  %v1786_v32 = vcombine.high %v1766_v28, %v1766_v28  ;;  %v2366_v63 = vsel %vm672_vm0, %v1519_v3, 0 }
 0x1ee   : > { %v4568_v23 = vpack.i.b16 %v1509_v21, %v1508_v12  ;;  %v4570_v24 = vpack.i.b16 %v1521_v4, %v1520_v19 }
 0x1f0   : > { %3884 = vmatpush3.bf16.xpose.msra.mxu0 %v1877_v25 }
 0x1f1   : > { %3913 = vmatprep.subr.bf16.mxu0 %v4171_v57 }
 0x1f7   : > { %3886 = vmatmul.mubr.msk.bf16.vlgmr.msra.gmra.mxu0 %vm712_vm1, %v1845_v27 }
 0x1f8   : > { %3914 = vmatpush3.bf16.xpose.msra.mxu0 %v2274_v13  ;;  %3915 = vmatprep.mubr.msk.bf16.mxu0 %vm4174_vm2, %v4171_v57 }
 0x1f9   : > { %3925 = vmatprep.subr.bf16.mxu0 %v4171_v57 }
 0x209   : > { %v939_v29 = vpop.f32.mrf.mxu0  ;;  %v4579_v30 = vpop.f32.mrf.mxu1 }
 0x20a   : > { %1014 = vrot.lane.b32.xlu0 %v939_v29, %s4173_s24 }
 0x20b   : > { %v4582_v60 = vpop.f32.mrf.mxu0  ;;  %v4584_v31 = vpop.f32.mrf.mxu1 }
 0x20d   : > { %v943_v33 = vpop.f32.mrf.mxu0  ;;  %v984_v34 = vpop.f32.mrf.mxu1 }
 0x20e   : > { %1017 = vrot.lane.b32.xlu0 %v939_v29, %s4169_s2 }
 0x20f   : > { %v944_v36 = vpop.f32.mrf.mxu0  ;;  %v985_v37 = vpop.f32.mrf.mxu1 }
 0x212   : > { %1020 = vrot.lane.b32.xlu0 %v939_v29, %s4172_s23 }
 0x216   : > { %1024 = vrot.lane.b32.xlu0 %v4582_v60, %s4173_s24 }
 0x21a   : > { %1027 = vrot.lane.b32.xlu0 %v4582_v60, %s4169_s2 }
 0x21e   : > { %1030 = vrot.lane.b32.xlu0 %v4582_v60, %s4172_s23 }
 0x222   : > { %1792 = vrot.lane.b32.xlu0 %v1784_v43, %s4178_s26  ;;  %s4187_s26 = smov 88  }
 0x226   : > { %1796 = vrot.lane.b32.xlu0 %v1785_v44, %s4179_s19  ;;  %s4188_s19 = smov 72  }
 0x22a   : > { %1800 = vrot.lane.b32.xlu0 %v1786_v32, %s4180_s1 }
 0x22e   : > { %1808 = vrot.lane.b32.xlu0 %v1788_v45, %s4181_s20 }
 0x232   : > { %1816 = vrot.lane.b32.xlu0 %v1790_v20, %s4182_s30 }
 0x27c   : > { %v1015_v46 = vpop.permute.xlu0 %1014 }
 0x280   : > { %v1018_v47 = vpop.permute.xlu0 %1017 }
 0x281   : > { %v1033_v49 = vcombine.low %v939_v29, %v1018_v47  ;;  %v1034_v50 = vcombine.high %v939_v29, %v1018_v47 }
 0x283   : > { %v1041_v58 = vrot.slane %v1033_v49, %v4479_v53  ;;  %v1048_v59 = vrot.slane %v1034_v50, %v4479_v53 }
 0x284   : > { %v1021_v52 = vpop.permute.xlu0 %1020 }
 0x285   : > { %v1049_v54 = vcombine.low %v1015_v46, %v1021_v52  ;;  %v1050_v55 = vcombine.high %v1015_v46, %v1021_v52 }
 0x287   : > { %v1057_v0 = vrot.slane %v1049_v54, %v4479_v53  ;;  %v1064_v62 = vrot.slane %v1050_v55, %v4479_v53  ;;  %v2136_v55 = vsel %vm672_vm0, %v4556_v17, 0 }
 0x288   : > { %v1025_v18 = vpop.permute.xlu0 %1024 }
 0x289   : > { %v1097_v35 = vcombine.low %v1041_v58, %v1057_v0  ;;  %v1098_v1 = vcombine.high %v1041_v58, %v1057_v0  ;;  %v1113_v2 = vcombine.low %v1048_v59, %v1064_v62  ;;  %v1114_v6 = vcombine.high %v1048_v59, %v1064_v62 }
 0x28b   : > { %v1105_v8 = vrot.slane %v1097_v35, %v4485_v61  ;;  %v1112_v9 = vrot.slane %v1098_v1, %v4485_v61  ;;  %v1121_v10 = vrot.slane %v1113_v2, %v4485_v61  ;;  %v1128_v12 = vrot.slane %v1114_v6, %v4485_v61 }
 0x28c   : > { %v1028_v14 = vpop.permute.xlu0 %1027 }
 0x28d   : > { %v3716_v42 = vcombine.low %v1105_v8, %v1112_v9  ;;  %v3718_v16 = vcombine.high %v1105_v8, %v1112_v9  ;;  %v3720_v19 = vcombine.low %v1121_v10, %v1128_v12  ;;  %v3722_v21 = vcombine.high %v1121_v10, %v1128_v12 }
 0x28e   : > { %v1065_v13 = vcombine.low %v4582_v60, %v1028_v14  ;;  %v1066_v29 = vcombine.high %v4582_v60, %v1028_v14  ;;  %v1783_v14 = vcombine.low %v4596_v15, %v4596_v15  ;;  %v2182_v15 = vsel %vm672_vm0, %v1507_v7, 0 }
 0x28f   : > { %v1177_v4 = vrot.slane %v3716_v42, %v4479_v53  ;;  %v1193_v25 = vrot.slane %v3718_v16, %v4479_v53  ;;  %v1209_v26 = vrot.slane %v3720_v19, %v4479_v53  ;;  %v1225_v27 = vrot.slane %v3722_v21, %v4479_v53 }
 0x290   : > { %v1031_v33 = vpop.permute.xlu0 %1030  ;;  %v1073_v41 = vrot.slane %v1065_v13, %v4479_v53  ;;  %v1080_v43 = vrot.slane %v1066_v29, %v4479_v53 }
 0x291   : > { %v1233_v34 = vcombine.low %v1177_v4, %v1193_v25  ;;  %v1265_v51 = vcombine.low %v1209_v26, %v1225_v27  ;;  %v1081_v36 = vcombine.low %v1025_v18, %v1031_v33  ;;  %v1082_v37 = vcombine.high %v1025_v18, %v1031_v33 }
 0x292   : > { %v1234_v35 = vcombine.high %v1177_v4, %v1193_v25  ;;  %v1266_v1 = vcombine.high %v1209_v26, %v1225_v27 }
 0x293   : > { %v1241_v38 = vrot.slane %v1233_v34, %v4485_v61  ;;  %v1273_v39 = vrot.slane %v1265_v51, %v4485_v61  ;;  %v1089_v28 = vrot.slane %v1081_v36, %v4479_v53  ;;  %v1096_v44 = vrot.slane %v1082_v37, %v4479_v53 }
 0x294   : > { %v1793_v18 = vpop.permute.xlu0 %1792  ;;  %v1248_v16 = vrot.slane %v1234_v35, %v4485_v61  ;;  %v1280_v19 = vrot.slane %v1266_v1, %v4485_v61 }
 0x295   : > { %v1297_v32 = vcombine.low %v1241_v38, %v1273_v39  ;;  %v1129_v45 = vcombine.low %v1073_v41, %v1089_v28  ;;  %v1130_v60 = vcombine.high %v1073_v41, %v1089_v28  ;;  %v1145_v20 = vcombine.low %v1080_v43, %v1096_v44 }
 0x296   : > { %v1146_v46 = vcombine.high %v1080_v43, %v1096_v44  ;;  %v1298_v2 = vcombine.high %v1241_v38, %v1273_v39  ;;  %v1820_v29 = vsel %vm1819_vm3, %v1783_v14, %v1793_v18  ;;  %v1299_v33 = vcombine.low %v1248_v16, %v1280_v19 }
 0x297   : > { %v1305_v47 = vpack.c.bf16 %v1297_v32, %v1297_v32  ;;  %v1137_v49 = vrot.slane %v1129_v45, %v4485_v61  ;;  %v1144_v50 = vrot.slane %v1130_v60, %v4485_v61  ;;  %v1153_v52 = vrot.slane %v1145_v20, %v4485_v61 }
 0x298   : > { %v1160_v54 = vrot.slane %v1146_v46, %v4485_v61  ;;  %v1306_v42 = vpack.c.bf16 %v1298_v2, %v1298_v2  ;;  %v1797_v27 = vpop.permute.xlu0 %1796  ;;  %v1307_v37 = vpack.c.bf16 %v1299_v33, %v1299_v33  ;;  %v2228_v39 = vsel %vm672_vm0, %v4568_v23, 0  ;;  %v1813_v23 = vpop.permute.xlu1 %1812 }
 0x299   : > { %3892 = vmatmul.mubr.msk.bf16.vlgmr.msra.gmra.mxu1 %vm672_vm0, %v1305_v47  ;;  %v3717_v58 = vcombine.low %v1137_v49, %v1144_v50  ;;  %v3719_v59 = vcombine.high %v1137_v49, %v1144_v50  ;;  %v1821_v40 = vsel %vm712_vm1, %v1820_v29, %v1797_v27  ;;  %v1300_v3 = vcombine.high %v1248_v16, %v1280_v19 }
 0x29a   : > { %v3721_v0 = vcombine.low %v1153_v52, %v1160_v54  ;;  %v3723_v62 = vcombine.high %v1153_v52, %v1160_v54  ;;  %3896 = vmatpush3.bf16.xpose.msra.mxu1 %v2136_v55  ;;  %3897 = vmatprep.mubr.msk.bf16.mxu1 %vm4174_vm2, %v4171_v57  ;;  %v2320_v45 = vsel %vm672_vm0, %v4564_v22, 0  ;;  %v2412_v54 = vsel %vm672_vm0, %v4570_v24, 0 }
 0x29b   : > { %3901 = vmatprep.subr.bf16.mxu1 %v4171_v57  ;;  %v1184_v6 = vrot.slane %v3717_v58, %v4479_v53  ;;  %v1200_v8 = vrot.slane %v3719_v59, %v4479_v53  ;;  %v1308_v44 = vpack.c.bf16 %v1300_v3, %v1300_v3 }
 0x29c   : > { %v1216_v17 = vrot.slane %v3721_v0, %v4479_v53  ;;  %v1232_v9 = vrot.slane %v3723_v62, %v4479_v53  ;;  %v1801_v7 = vpop.permute.xlu0 %1800 }
 0x29d   : > { %v1249_v10 = vcombine.low %v1184_v6, %v1200_v8  ;;  %v1250_v21 = vcombine.high %v1184_v6, %v1200_v8  ;;  %v1823_v5 = vsel %vm1822_vm4, %v1821_v40, %v1801_v7 }
 0x29e   : > { %v1281_v12 = vcombine.low %v1216_v17, %v1232_v9  ;;  %v1282_v4 = vcombine.high %v1216_v17, %v1232_v9  ;;  %v1824_v43 = vsel %vm672_vm0, %v1823_v5, %v1805_v11 }
 0x29f   : > { %v1257_v25 = vrot.slane %v1249_v10, %v4485_v61  ;;  %v1264_v51 = vrot.slane %v1250_v21, %v4485_v61 }
 0x2a0   : > { %v1289_v26 = vrot.slane %v1281_v12, %v4485_v61  ;;  %v1296_v36 = vrot.slane %v1282_v4, %v4485_v61  ;;  %v1809_v28 = vpop.permute.xlu0 %1808 }
 0x2a1   : > { %3898 = vmatmul.mubr.msk.bf16.vlgmr.msra.gmra.mxu1 %vm672_vm0, %v1306_v42  ;;  %v1826_v32 = vsel %vm1825_vm5, %v1824_v43, %v1809_v28 }
 0x2a2   : > { %3902 = vmatpush3.bf16.xpose.msra.mxu1 %v2182_v15  ;;  %v1301_v13 = vcombine.low %v1257_v25, %v1289_v26  ;;  %3903 = vmatprep.mubr.msk.bf16.mxu1 %vm4174_vm2, %v4171_v57  ;;  %v1303_v38 = vcombine.low %v1264_v51, %v1296_v36  ;;  %v1828_v60 = vsel %vm1827_vm6, %v1826_v32, %v1813_v23 }
 0x2a3   : > { %3907 = vmatprep.subr.bf16.mxu1 %v4171_v57  ;;  %v1302_v46 = vcombine.high %v1257_v25, %v1289_v26  ;;  %v1304_v55 = vcombine.high %v1264_v51, %v1296_v36 }
 0x2a4   : > { %v1309_v34 = vpack.c.bf16 %v1301_v13, %v1301_v13  ;;  %v1311_v41 = vpack.c.bf16 %v1303_v38, %v1303_v38  ;;  %v1817_v20 = vpop.permute.xlu0 %1816 }
 0x2a5   : > { %v1830_v47 = vsel %vm1829_vm7, %v1828_v60, %v1817_v20  ;;  %v1310_v50 = vpack.c.bf16 %v1302_v46, %v1302_v46  ;;  %v1312_v0 = vpack.c.bf16 %v1304_v55, %v1304_v55 }
 0x2a6   : > { %3916 = vmatmul.mubr.msk.bf16.vlgmr.msra.gmra.mxu0 %vm672_vm0, %v1309_v34 }
 0x2a7   : > { %3926 = vmatpush3.bf16.xpose.msra.mxu0 %v2366_v63  ;;  %3927 = vmatprep.mubr.msk.bf16.mxu0 %vm4174_vm2, %v4171_v57 }
 0x2a8   : > { %3937 = vmatprep.subr.bf16.mxu0 %v4171_v57 }
 0x2a9   : > { %3904 = vmatmul.mubr.msk.bf16.vlgmr.msra.gmra.mxu1 %vm672_vm0, %v1307_v37 }
 0x2aa   : > { %3908 = vmatpush3.bf16.xpose.msra.mxu1 %v2228_v39  ;;  %3909 = vmatprep.mubr.msk.bf16.mxu1 %vm4174_vm2, %v4171_v57 }
 0x2ab   : > { %3919 = vmatprep.subr.bf16.mxu1 %v4171_v57 }
 0x2ae   : > { %3928 = vmatmul.mubr.msk.bf16.vlgmr.msra.gmra.mxu0 %vm672_vm0, %v1311_v41 }
 0x2af   : > { %3939 = vmatprep.mubr.msk.bf16.mxu0 %vm4174_vm2, %v4171_v57 }
 0x2b1   : > { %3910 = vmatmul.mubr.msk.bf16.vlgmr.msra.gmra.mxu1 %vm672_vm0, %v1308_v44 }
 0x2b2   : > { %3920 = vmatpush3.bf16.xpose.msra.mxu1 %v2320_v45  ;;  %3921 = vmatprep.mubr.msk.bf16.mxu1 %vm4174_vm2, %v4171_v57 }
 0x2b3   : > { %3931 = vmatprep.subr.bf16.mxu1 %v4171_v57 }
 0x2b7   : > { %v1922_v49 = vpop.f32.mrf.mxu0 }
 0x2b8   : > { %v1923_v52 = vadd.f32 %v1922_v49, %v1830_v47 }
 0x2b9   : > { %3922 = vmatmul.mubr.msk.bf16.vlgmr.msra.gmra.mxu1 %vm672_vm0, %v1310_v50  ;;  %v3887_v22 = vpop.f32.mrf.mxu0 }
 0x2ba   : > { %3932 = vmatpush3.bf16.xpose.msra.mxu1 %v2412_v54  ;;  %1932 = vrot.lane.b32.xlu0 %v1923_v52, %s4183_s0 }
 0x2bb   : > { %1929 = vrot.lane.b32.xlu1 %v1923_v52, %s4184_s28  ;;  %3933 = vmatprep.mubr.msk.bf16.mxu1 %vm4174_vm2, %v4171_v57  ;;  %v1925_v58 = vpop.f32.mrf.mxu0 }
 0x2bc   : > { %3943 = vmatprep.subr.bf16.mxu1 %v4171_v57 }
 0x2bd   : > { %v3888_v59 = vpop.f32.mrf.mxu0 }
 0x2be   : > { %1938 = vrot.lane.b32.xlu0 %v1923_v52, %s4173_s24 }
 0x2bf   : > { %1935 = vrot.lane.b32.xlu1 %v1923_v52, %s4185_s29 }
 0x2c1   : > { %3934 = vmatmul.mubr.msk.bf16.vlgmr.msra.gmra.mxu1 %vm672_vm0, %v1312_v0 }
 0x2c2   : > { %1944 = vrot.lane.b32.xlu0 %v1923_v52, %s4186_s25  ;;  %3945 = vmatprep.mubr.msk.bf16.mxu1 %vm4174_vm2, %v4171_v57 }
 0x2c3   : > { %1941 = vrot.lane.b32.xlu1 %v1923_v52, %s4187_s26  ;;  %s5056_s26 = sshll.u32 %s5063_s27, 3 }
 0x2c4   : > { %s657_s1 = scalar_lea.vmem %s5043_s18, %s5056_s26 }
 0x2c7   : > { %1947 = vrot.lane.b32.xlu1 %v1923_v52, %s4188_s19 }
 0x32c   : > { %v1933_v18 = vpop.permute.xlu0 %1932 }
 0x32d   : > { %v1930_v24 = vpop.permute.xlu1 %1929  ;;  %v1950_v10 = vcombine.low %v1923_v52, %v1933_v18  ;;  %v1951_v29 = vcombine.high %v1923_v52, %v1933_v18 }
 0x32f   : > { %v1958_v16 = vrot.slane %v1950_v10, %v4479_v53  ;;  %v1965_v37 = vrot.slane %v1951_v29, %v4479_v53 }
 0x330   : > { %v1939_v35 = vpop.permute.xlu0 %1938 }
 0x331   : > { %v1936_v62 = vpop.permute.xlu1 %1935 }
 0x332   : > { %v1966_v9 = vcombine.low %v1930_v24, %v1936_v62  ;;  %v1967_v15 = vcombine.high %v1930_v24, %v1936_v62 }
 0x334   : > { %v1945_v2 = vpop.permute.xlu0 %1944  ;;  %v1974_v42 = vrot.slane %v1966_v9, %v4479_v53  ;;  %v1981_v63 = vrot.slane %v1967_v15, %v4479_v53 }
 0x335   : > { %v1942_v1 = vpop.permute.xlu1 %1941  ;;  %v1982_v8 = vcombine.low %v1939_v35, %v1945_v2  ;;  %v1983_v25 = vcombine.high %v1939_v35, %v1945_v2 }
 0x336   : > { %v2014_v21 = vcombine.low %v1958_v16, %v1974_v42  ;;  %v2030_v5 = vcombine.low %v1965_v37, %v1981_v63  ;;  %v2015_v44 = vcombine.high %v1958_v16, %v1974_v42  ;;  %v2031_v54 = vcombine.high %v1965_v37, %v1981_v63 }
 0x337   : > { %v1990_v12 = vrot.slane %v1982_v8, %v4479_v53  ;;  %v1997_v33 = vrot.slane %v1983_v25, %v4479_v53 }
 0x338   : > { %v2022_v27 = vrot.slane %v2014_v21, %v4485_v61  ;;  %v2038_v45 = vrot.slane %v2030_v5, %v4485_v61  ;;  %v2029_v52 = vrot.slane %v2015_v44, %v4485_v61  ;;  %v2045_v2 = vrot.slane %v2031_v54, %v4485_v61 }
 0x339   : > { %v1948_v6 = vpop.permute.xlu1 %1947 }
 0x33a   : > { %v1998_v17 = vcombine.low %v1942_v1, %v1948_v6  ;;  %v1999_v26 = vcombine.high %v1942_v1, %v1948_v6 }
 0x33c   : > { %v2006_v14 = vrot.slane %v1998_v17, %v4479_v53  ;;  %v2013_v34 = vrot.slane %v1999_v26, %v4479_v53 }
 0x33e   : > { %v2046_v19 = vcombine.low %v1990_v12, %v2006_v14  ;;  %v2062_v38 = vcombine.low %v1997_v33, %v2013_v34  ;;  %v2047_v3 = vcombine.high %v1990_v12, %v2006_v14  ;;  %v2063_v46 = vcombine.high %v1997_v33, %v2013_v34 }
 0x340   : > { %v2054_v4 = vrot.slane %v2046_v19, %v4485_v61  ;;  %v2070_v28 = vrot.slane %v2062_v38, %v4485_v61  ;;  %v2061_v20 = vrot.slane %v2047_v3, %v4485_v61  ;;  %v2077_v62 = vrot.slane %v2063_v46, %v4485_v61 }
 0x342   : > { %v2078_v13 = vcombine.low %v2022_v27, %v2054_v4  ;;  %v2079_v41 = vcombine.high %v2022_v27, %v2054_v4  ;;  %v2082_v49 = vcombine.low %v2038_v45, %v2070_v28  ;;  %v2080_v59 = vcombine.low %v2029_v52, %v2061_v20 }
 0x343   : > { %v2084_v9 = vcombine.low %v2045_v2, %v2077_v62  ;;  %v2081_v16 = vcombine.high %v2029_v52, %v2061_v20  ;;  %v2083_v33 = vcombine.high %v2038_v45, %v2070_v28  ;;  %v2085_v38 = vcombine.high %v2045_v2, %v2077_v62 }
 0x359   : > { %v2126_v51 = vpop.f32.mrf.mxu1 }
 0x35a   : > { %v4701_v36 = vadd.f32 %v2126_v51, %v2078_v13 }
 0x35b   : > { %v3893_v40 = vpop.f32.mrf.mxu1 }
 0x35c   : > { %v2454_v7 = vsel %vm1819_vm3, %v4701_v36, -inf }
 0x35d   : > { %v2129_v39 = vpop.f32.mrf.mxu1  ;;  %2455 = vmax.xlane.f32.xlu0 %v2454_v7 }
 0x35e   : > { %v4726_v39 = vld [vmem:[%s4375_s21 + $0x8] sm:$0xff] }
 0x35f   : > { %v3894_v11 = vpop.f32.mrf.mxu1 }
 0x361   : > { %v2172_v43 = vpop.f32.mrf.mxu1 }
 0x362   : > { %v4708_v32 = vadd.f32 %v2172_v43, %v2079_v41 }
 0x363   : > { %v3899_v23 = vpop.f32.mrf.mxu1 }
 0x364   : > { %v2457_v60 = vsel %vm1819_vm3, %v4708_v32, -inf }
 0x365   : > { %v2175_v47 = vpop.f32.mrf.mxu1  ;;  %2458 = vmax.xlane.f32.xlu1 %v2457_v60 }
 0x366   : > { %v2310_v50 = vpop.f32.mrf.mxu0 }
 0x367   : > { %v4715_v22 = vadd.f32 %v2310_v50, %v2082_v49  ;;  %v3900_v55 = vpop.f32.mrf.mxu1 }
 0x368   : > { %v3917_v58 = vpop.f32.mrf.mxu0 }
 0x369   : > { %v2218_v0 = vpop.f32.mrf.mxu1  ;;  %v2466_v24 = vsel %vm1819_vm3, %v4715_v22, -inf }
 0x36a   : > { %v2219_v18 = vadd.f32 %v2218_v0, %v2080_v59  ;;  %v2313_v35 = vpop.f32.mrf.mxu0  ;;  %2467 = vmax.xlane.f32.xlu1 %v2466_v24 }
 0x36b   : > { %v3905_v1 = vpop.f32.mrf.mxu1 }
 0x36c   : > { %v3918_v6 = vpop.f32.mrf.mxu0  ;;  %v2460_v8 = vsel %vm1819_vm3, %v2219_v18, -inf }
 0x36d   : > { %v2221_v17 = vpop.f32.mrf.mxu1  ;;  %2461 = vmax.xlane.f32.xlu0 %v2460_v8 }
 0x36e   : > { %v2402_v10 = vpop.f32.mrf.mxu0 }
 0x36f   : > { %v2403_v12 = vadd.f32 %v2402_v10, %v2084_v9  ;;  %v3906_v14 = vpop.f32.mrf.mxu1 }
 0x370   : > { %v3929_v42 = vpop.f32.mrf.mxu0 }
 0x371   : > { %v2264_v19 = vpop.f32.mrf.mxu1  ;;  %v2472_v21 = vsel %vm1819_vm3, %v2403_v12, -inf }
 0x372   : > { %v2265_v4 = vadd.f32 %v2264_v19, %v2081_v16  ;;  %v2405_v25 = vpop.f32.mrf.mxu0  ;;  %2473 = vmax.xlane.f32.xlu1 %v2472_v21 }
 0x373   : > { %v3911_v26 = vpop.f32.mrf.mxu1 }
 0x374   : > { %v3930_v27 = vpop.f32.mrf.mxu0  ;;  %v2463_v15 = vsel %vm1819_vm3, %v2265_v4, -inf  ;;  %v1524_v26 = vrot.slane %v4726_v39, 4 }
 0x375   : > { %v2267_v13 = vpop.f32.mrf.mxu1  ;;  %2464 = vmax.xlane.f32.xlu0 %v2463_v15 }
 0x377   : > { %v3912_v29 = vpop.f32.mrf.mxu1 }
 0x379   : > { %v2356_v34 = vpop.f32.mrf.mxu1 }
 0x37a   : > { %v2357_v51 = vadd.f32 %v2356_v34, %v2083_v33 }
 0x37b   : > { %v3923_v63 = vpop.f32.mrf.mxu1 }
 0x37c   : > { %v2469_v40 = vsel %vm1819_vm3, %v2357_v51, -inf }
 0x37d   : > { %v2359_v7 = vpop.f32.mrf.mxu1  ;;  %2470 = vmax.xlane.f32.xlu0 %v2469_v40  ;;  %v1541_v40 = vcombine.low %v4726_v39, %v1524_v26 }
 0x37f   : > { %v3924_v37 = vpop.f32.mrf.mxu1 }
 0x381   : > { %v2448_v5 = vpop.f32.mrf.mxu1 }
 0x382   : > { %v4728_v11 = vadd.f32 %v2448_v5, %v2085_v38 }
 0x383   : > { %v3935_v3 = vpop.f32.mrf.mxu1  ;;  %1526 = vrot.lane.b32.xlu1 %v4726_v39, %s4173_s24 }
 0x384   : > { %v2475_v41 = vsel %vm1819_vm3, %v4728_v11, -inf }
 0x385   : > { %v2451_v43 = vpop.f32.mrf.mxu1  ;;  %2476 = vmax.xlane.f32.xlu0 %v2475_v41 }
 0x387   : > { %v3936_v28 = vpop.f32.mrf.mxu1  ;;  %1534 = vrot.lane.b32.xlu1 %v4726_v39, %s4172_s23 }
 0x39b   : > { %1530 = vrot.lane.b32.xlu0 %v4726_v39, %s4169_s2 }
 0x3e6   : > { %v2456_v44 = vpop.xlane.xlu0 %2455 }
 0x3e7   : > { %v2478_v23 = vsub.f32 %v4701_v36, %v2456_v44 }
 0x3e9   : > { %v2486_v45 = vmul.f32 1.442695, %v2478_v23 }
 0x3eb   : > { %4102 = vpow2.f32 %v2486_v45 }
 0x3ee   : > { %v2459_v60 = vpop.xlane.xlu1 %2458 }
 0x3ef   : > { %v2479_v20 = vsub.f32 %v4708_v32, %v2459_v60 }
 0x3f1   : > { %v2488_v46 = vmul.f32 1.442695, %v2479_v20 }
 0x3f3   : > { %4104 = vpow2.f32 %v2488_v46  ;;  %v2468_v47 = vpop.xlane.xlu1 %2467 }
 0x3f4   : > { %v2482_v49 = vsub.f32 %v4715_v22, %v2468_v47 }
 0x3f6   : > { %v2462_v50 = vpop.xlane.xlu0 %2461  ;;  %v2494_v55 = vmul.f32 1.442695, %v2482_v49 }
 0x3f7   : > { %v2480_v52 = vsub.f32 %v2219_v18, %v2462_v50 }
 0x3f8   : > { %v4741_v54 = vpop.eup %4102 }
 0x3f9   : > { %v2490_v58 = vmul.f32 1.442695, %v2480_v52  ;;  %v2502_v59 = vsel %vm1819_vm3, %v4741_v54, 0.0 }
 0x3fa   : > { %2503 = vadd.xlane.f32.xlu1 %v2502_v59 }
 0x3fb   : > { %4106 = vpow2.f32 %v2490_v58  ;;  %v2474_v36 = vpop.xlane.xlu1 %2473 }
 0x3fc   : > { %v2484_v0 = vsub.f32 %v2403_v12, %v2474_v36  ;;  %4108 = vpow2.f32 %v2494_v55 }
 0x3fe   : > { %v2498_v32 = vmul.f32 1.442695, %v2484_v0  ;;  %v2465_v24 = vpop.xlane.xlu0 %2464 }
 0x3ff   : > { %v2481_v62 = vsub.f32 %v2265_v4, %v2465_v24  ;;  %v1527_v35 = vpop.permute.xlu1 %1526 }
 0x400   : > { %v4745_v1 = vpop.eup %4104  ;;  %4110 = vpow2.f32 %v2498_v32  ;;  %v1528_v6 = vrot.slane %v1527_v35, 4 }
 0x401   : > { %v2492_v22 = vmul.f32 1.442695, %v2481_v62  ;;  %v2505_v18 = vsel %vm1819_vm3, %v4745_v1, 0.0 }
 0x402   : > { %2506 = vadd.xlane.f32.xlu0 %v2505_v18  ;;  %v1575_v12 = vcombine.low %v1527_v35, %v1528_v6 }
 0x403   : > { %4112 = vpow2.f32 %v2492_v22  ;;  %v1535_v2 = vpop.permute.xlu1 %1534 }
 0x404   : > { %v1536_v8 = vrot.slane %v1535_v2, 4  ;;  %v1582_v21 = vrot.slane %v1575_v12, %v4479_v53 }
 0x406   : > { %v2471_v17 = vpop.xlane.xlu0 %2470  ;;  %v1583_v14 = vcombine.low %v1535_v2, %v1536_v8 }
 0x407   : > { %v2483_v9 = vsub.f32 %v2357_v51, %v2471_v17 }
 0x408   : > { %v4749_v10 = vpop.eup %4106  ;;  %v1590_v4 = vrot.slane %v1583_v14, %v4479_v53 }
 0x409   : > { %v2496_v42 = vmul.f32 1.442695, %v2483_v9  ;;  %v2508_v16 = vsel %vm1819_vm3, %v4749_v10, 0.0  ;;  %v4753_v19 = vpop.eup %4108 }
 0x40a   : > { %2509 = vadd.xlane.f32.xlu0 %v2508_v16  ;;  %v2514_v25 = vsel %vm1819_vm3, %v4753_v19, 0.0  ;;  %v1591_v33 = vcombine.low %v1582_v21, %v1590_v4  ;;  %v1592_v7 = vcombine.high %v1582_v21, %v1590_v4 }
 0x40b   : > { %4114 = vpow2.f32 %v2496_v42 }
 0x40c   : > { %v1599_v5 = vrot.slane %v1591_v33, %v4485_v61  ;;  %v1606_v41 = vrot.slane %v1592_v7, %v4485_v61 }
 0x40d   : > { %v4760_v27 = vpop.eup %4110 }
 0x40e   : > { %2515 = vadd.xlane.f32.xlu0 %v2514_v25  ;;  %v2477_v15 = vpop.xlane.xlu0 %2476  ;;  %v2520_v51 = vsel %vm1819_vm3, %v4760_v27, 0.0  ;;  %v1607_v44 = vcombine.high %v1599_v5, %v4170_v56  ;;  %v1608_v60 = vcombine.high %v1606_v41, %v4170_v56  ;;  %v1614_v20 = vshrl.u32 %v1599_v5, 16 }
 0x40f   : > { %v2485_v13 = vsub.f32 %v4728_v11, %v2477_v15  ;;  %v1548_v11 = vrot.slane %v1541_v40, %v4479_v53  ;;  %v1630_v50 = vshrl.u32 %v1606_v41, 16 }
 0x410   : > { %v4763_v29 = vpop.eup %4112  ;;  %v1622_v49 = vshrl.u32 %v1607_v44, 16  ;;  %v1638_v36 = vshrl.u32 %v1608_v60, 16 }
 0x411   : > { %v2500_v34 = vmul.f32 1.442695, %v2485_v13  ;;  %v2511_v63 = vsel %vm1819_vm3, %v4763_v29, 0.0 }
 0x412   : > { %2521 = vadd.xlane.f32.xlu0 %v2520_v51  ;;  %2512 = vadd.xlane.f32.xlu1 %v2511_v63  ;;  %v1531_v37 = vpop.permute.xlu0 %1530 }
 0x413   : > { %4116 = vpow2.f32 %v2500_v34  ;;  %v1532_v38 = vrot.slane %v1531_v37, 4 }
 0x415   : > { %v1549_v3 = vcombine.low %v1531_v37, %v1532_v38 }
 0x417   : > { %v1556_v43 = vrot.slane %v1549_v3, %v4479_v53 }
 0x418   : > { %v4774_v28 = vpop.eup %4114 }
 0x419   : > { %v2517_v39 = vsel %vm1819_vm3, %v4774_v28, 0.0  ;;  %v1557_v23 = vcombine.low %v1548_v11, %v1556_v43  ;;  %v1558_v45 = vcombine.high %v1548_v11, %v1556_v43 }
 0x41a   : > { %2518 = vadd.xlane.f32.xlu1 %v2517_v39 }
 0x41b   : > { %v1565_v46 = vrot.slane %v1557_v23, %v4485_v61  ;;  %v1572_v47 = vrot.slane %v1558_v45, %v4485_v61 }
 0x41d   : > { %v1573_v52 = vcombine.high %v1565_v46, %v4170_v56  ;;  %v1574_v55 = vcombine.high %v1572_v47, %v4170_v56  ;;  %v1611_v58 = vpack.i.b16 %v1599_v5, %v1565_v46  ;;  %v1613_v59 = vshrl.u32 %v1565_v46, 16 }
 0x41e   : > { %v1627_v0 = vpack.i.b16 %v1606_v41, %v1572_v47  ;;  %v1629_v32 = vshrl.u32 %v1572_v47, 16 }
 0x41f   : > { %v1615_v24 = vpack.i.b16 %v1614_v20, %v1613_v59  ;;  %v1619_v62 = vpack.i.b16 %v1607_v44, %v1573_v52  ;;  %v1621_v35 = vshrl.u32 %v1573_v52, 16  ;;  %v1635_v22 = vpack.i.b16 %v1608_v60, %v1574_v55 }
 0x420   : > { %v4784_v18 = vpop.eup %4116  ;;  %v1631_v2 = vpack.i.b16 %v1630_v50, %v1629_v32  ;;  %v1637_v6 = vshrl.u32 %v1574_v55, 16  ;;  %v1641_v8 = vcombine.low %v1611_v58, %v1627_v0 }
 0x421   : > { %v2523_v17 = vsel %vm1819_vm3, %v4784_v18, 0.0  ;;  %v1623_v9 = vpack.i.b16 %v1622_v49, %v1621_v35  ;;  %v1649_v12 = vcombine.low %v1619_v62, %v1635_v22 }
 0x422   : > { %2524 = vadd.xlane.f32.xlu1 %v2523_v17  ;;  %v1639_v14 = vpack.i.b16 %v1638_v36, %v1637_v6  ;;  %v1648_v42 = vrot.slane %v1641_v8, %v4479_v53  ;;  %v1675_v16 = vcombine.low %v1615_v24, %v1631_v2 }
 0x423   : > { %v1656_v21 = vrot.slane %v1649_v12, %v4479_v53 }
 0x424   : > { %v1682_v4 = vrot.slane %v1675_v16, %v4479_v53  ;;  %v1683_v25 = vcombine.low %v1623_v9, %v1639_v14 }
 0x425   : > { %v1657_v26 = vcombine.low %v1648_v42, %v1656_v21  ;;  %v1658_v15 = vcombine.high %v1648_v42, %v1656_v21 }
 0x426   : > { %v1690_v13 = vrot.slane %v1683_v25, %v4479_v53 }
 0x427   : > { %v1665_v33 = vrot.slane %v1657_v26, %v4485_v61  ;;  %v1672_v34 = vrot.slane %v1658_v15, %v4485_v61 }
 0x428   : > { %v1691_v51 = vcombine.low %v1682_v4, %v1690_v13  ;;  %v1692_v63 = vcombine.high %v1682_v4, %v1690_v13 }
 0x429   : > { %v1673_v40 = vcombine.high %v1665_v33, %v4170_v56  ;;  %v1674_v7 = vcombine.high %v1672_v34, %v4170_v56  ;;  %v1712_v38 = vshrl.u32 %v1665_v33, 16  ;;  %v1724_v3 = vshrl.u32 %v1672_v34, 16 }
 0x42a   : > { %v1699_v37 = vrot.slane %v1691_v51, %v4485_v61  ;;  %v1706_v5 = vrot.slane %v1692_v63, %v4485_v61 }
 0x42b   : > { %v1718_v11 = vshrl.u32 %v1673_v40, 16  ;;  %v1730_v60 = vshrl.u32 %v1674_v7, 16 }
 0x42c   : > { %v1711_v41 = vpack.i.b16 %v1699_v37, %v1665_v33  ;;  %v1713_v43 = vshrl.u32 %v1699_v37, 16  ;;  %v1707_v44 = vcombine.high %v1699_v37, %v4170_v56  ;;  %v1723_v39 = vpack.i.b16 %v1706_v5, %v1672_v34 }
 0x42d   : > { %v1725_v23 = vshrl.u32 %v1706_v5, 16  ;;  %v1708_v45 = vcombine.high %v1706_v5, %v4170_v56 }
 0x42e   : > { %v2555_v20 = vsel %vm2553_vm8, %v1711_v41, 0  ;;  %v1714_v46 = vpack.i.b16 %v1713_v43, %v1712_v38  ;;  %v1717_v47 = vpack.i.b16 %v1707_v44, %v1673_v40  ;;  %v1719_v49 = vshrl.u32 %v1707_v44, 16  ;;  %v4064_v41 = vld [vmem:[%s5035_s10 + $0x70] sm:$0xff]  }
 0x42f   : > { %3938 = vmatpush3.bf16.msra.mxu0 %v2555_v20  ;;  %v2739_v50 = vsel %vm2553_vm8, %v1723_v39, 0  ;;  %v1726_v52 = vpack.i.b16 %v1725_v23, %v1724_v3  ;;  %v1729_v55 = vpack.i.b16 %v1708_v45, %v1674_v7  ;;  %v1731_v58 = vshrl.u32 %v1708_v45, 16  ;;  %v4063_v3 = vld [vmem:[%s5035_s10 + $0x38] sm:$0xff]  }
 0x430   : > { %v2601_v59 = vsel %vm2553_vm8, %v1714_v46, 0  ;;  %3949 = vmatprep.subr.bf16.mxu0 %v4171_v57  ;;  %v2647_v36 = vsel %vm2553_vm8, %v1717_v47, 0  ;;  %v1720_v0 = vpack.i.b16 %v1719_v49, %v1718_v11 }
 0x431   : > { %3944 = vmatpush3.bf16.msra.mxu1 %v2601_v59  ;;  %v2785_v56 = vsel %vm2553_vm8, %v1726_v52, 0  ;;  %v2831_v32 = vsel %vm2553_vm8, %v1729_v55, 0  ;;  %v1732_v24 = vpack.i.b16 %v1731_v58, %v1730_v60 }
 0x432   : > { %3955 = vmatprep.subr.bf16.mxu1 %v4171_v57  ;;  %v2693_v62 = vsel %vm2553_vm8, %v1720_v0, 0 }
 0x433   : > { %v2877_v35 = vsel %vm2553_vm8, %v1732_v24, 0 }
 0x483   : > { %v2504_v22 = vpop.xlane.xlu1 %2503 }
 0x484   : > { %4118 = vrcp.f32 %v2504_v22 }
 0x48b   : > { %v2507_v2 = vpop.xlane.xlu0 %2506 }
 0x48c   : > { %4120 = vrcp.f32 %v2507_v2 }
 0x491   : > { %v4119_v6 = vpop.eup %4118 }
 0x492   : > { %v2534_v8 = vmul.f32 %v4119_v6, %v4741_v54 }
 0x493   : > { %v2510_v17 = vpop.xlane.xlu0 %2509 }
 0x494   : > { %4122 = vrcp.f32 %v2510_v17  ;;  %v2542_v9 = vpack.c.bf16 %v2534_v8, %v2534_v8 }
 0x496   : > { %3940 = vmatmul.mubr.msk.bf16.vlgmr.msra.gmra.mxu0 %vm1819_vm3, %v2542_v9 }
 0x497   : > { %3950 = vmatpush3.bf16.msra.mxu0 %v2647_v36  ;;  %v2516_v12 = vpop.xlane.xlu0 %2515  ;;  %3951 = vmatprep.mubr.msk.bf16.mxu0 %vm4174_vm2, %v4171_v57 }
 0x498   : > { %4124 = vrcp.f32 %v2516_v12  ;;  %3961 = vmatprep.subr.bf16.mxu0 %v4171_v57 }
 0x499   : > { %v4121_v14 = vpop.eup %4120 }
 0x49a   : > { %v2535_v42 = vmul.f32 %v4121_v14, %v4745_v1 }
 0x49b   : > { %v2513_v16 = vpop.xlane.xlu1 %2512  ;;  %v2522_v54 = vpop.xlane.xlu0 %2521 }
 0x49c   : > { %4126 = vrcp.f32 %v2513_v16  ;;  %v2543_v21 = vpack.c.bf16 %v2535_v42, %v2535_v42  ;;  %v4065_v16 = vld [vmem:[%s5035_s10 + $0x30] sm:$0xff]  }
 0x49d   : > { %4128 = vrcp.f32 %v2522_v54 }
 0x49e   : > { %3946 = vmatmul.mubr.msk.bf16.vlgmr.msra.gmra.mxu1 %vm1819_vm3, %v2543_v21 }
 0x49f   : > { %3956 = vmatpush3.bf16.msra.mxu1 %v2693_v62  ;;  %3957 = vmatprep.mubr.msk.bf16.mxu1 %vm4174_vm2, %v4171_v57 }
 0x4a0   : > { %3967 = vmatprep.subr.bf16.mxu1 %v4171_v57 }
 0x4a1   : > { %v4123_v4 = vpop.eup %4122 }
 0x4a2   : > { %v2536_v25 = vmul.f32 %v4123_v4, %v4749_v10 }
 0x4a3   : > { %v2519_v26 = vpop.xlane.xlu1 %2518 }
 0x4a4   : > { %4130 = vrcp.f32 %v2519_v26  ;;  %v2544_v15 = vpack.c.bf16 %v2536_v25, %v2536_v25  ;;  %v4066_v26 = vld [vmem:[%s5035_s10 + $0x68] sm:$0xff]  }
 0x4a5   : > { %v4125_v1 = vpop.eup %4124 }
 0x4a6   : > { %3952 = vmatmul.mubr.msk.bf16.vlgmr.msra.gmra.mxu0 %vm1819_vm3, %v2544_v15  ;;  %v2538_v13 = vmul.f32 %v4125_v1, %v4753_v19 }
 0x4a7   : > { %3962 = vmatpush3.bf16.msra.mxu0 %v2739_v50  ;;  %3963 = vmatprep.mubr.msk.bf16.mxu0 %vm4174_vm2, %v4171_v57 }
 0x4a8   : > { %3973 = vmatprep.subr.bf16.mxu0 %v4171_v57  ;;  %v2546_v63 = vpack.c.bf16 %v2538_v13, %v2538_v13  ;;  %v4067_v13 = vld [vmem:[%s5035_s10 + $0x28] sm:$0xff]  }
 0x4a9   : > { %v4127_v33 = vpop.eup %4126 }
 0x4aa   : > { %v2537_v34 = vmul.f32 %v4127_v33, %v4763_v29  ;;  %v4129_v40 = vpop.eup %4128 }
 0x4ab   : > { %v2525_v51 = vpop.xlane.xlu1 %2524  ;;  %v2540_v19 = vmul.f32 %v4129_v40, %v4760_v27 }
 0x4ac   : > { %4132 = vrcp.f32 %v2525_v51  ;;  %v2545_v10 = vpack.c.bf16 %v2537_v34, %v2537_v34 }
 0x4ad   : > { %v2548_v38 = vpack.c.bf16 %v2540_v19, %v2540_v19 }
 0x4ae   : > { %3958 = vmatmul.mubr.msk.bf16.vlgmr.msra.gmra.mxu1 %vm1819_vm3, %v2545_v10  ;;  %3964 = vmatmul.mubr.msk.bf16.vlgmr.msra.gmra.mxu0 %vm1819_vm3, %v2546_v63  ;;  %v4068_v63 = vld [vmem:[%s5035_s10 + $0x60] sm:$0xff]  }
 0x4af   : > { %3968 = vmatpush3.bf16.msra.mxu1 %v2785_v56  ;;  %3974 = vmatpush3.bf16.msra.mxu0 %v2831_v32 }
 0x4b0   : > { %3969 = vmatprep.mubr.msk.bf16.mxu1 %vm4174_vm2, %v4171_v57  ;;  %3975 = vmatprep.mubr.msk.bf16.mxu0 %vm4174_vm2, %v4171_v57 }
 0x4b1   : > { %v4131_v29 = vpop.eup %4130  ;;  %3979 = vmatprep.subr.bf16.mxu1 %v4171_v57 }
 0x4b2   : > { %v2539_v7 = vmul.f32 %v4131_v29, %v4774_v28  ;;  %v4062_v28 = vld [vmem:[%s5035_s10 + $0x78] sm:$0xff]  }
 0x4b3   : > { %3847 = vmatprep.subr.bf16.mxu0 %v4062_v28 }
 0x4b4   : > { %v2547_v37 = vpack.c.bf16 %v2539_v7, %v2539_v7 }
 0x4b6   : > { %3970 = vmatmul.mubr.msk.bf16.vlgmr.msra.gmra.mxu1 %vm1819_vm3, %v2547_v37  ;;  %3976 = vmatmul.mubr.msk.bf16.vlgmr.msra.gmra.mxu0 %vm1819_vm3, %v2548_v38 }
 0x4b7   : > { %3980 = vmatpush3.bf16.msra.mxu1 %v2877_v35  ;;  %3981 = vmatprep.mubr.msk.bf16.mxu1 %vm4174_vm2, %v4171_v57 }
 0x4b8   : > { %3985 = vmatprep.subr.bf16.mxu1 %v4171_v57  ;;  %3848 = vmatpush3.bf16.msra.mxu0 %v4063_v3 }
 0x4b9   : > { %v4133_v5 = vpop.eup %4132  ;;  %3849 = vmatprep.subr.bf16.mxu0 %v4064_v41 }
 0x4ba   : > { %v2541_v27 = vmul.f32 %v4133_v5, %v4784_v18 }
 0x4bc   : > { %v2549_v11 = vpack.c.bf16 %v2541_v27, %v2541_v27  ;;  %3850 = vmatpush3.bf16.msra.mxu0 %v4065_v16 }
 0x4bd   : > { %3851 = vmatprep.subr.bf16.mxu0 %v4066_v26 }
 0x4be   : > { %3982 = vmatmul.mubr.msk.bf16.vlgmr.msra.gmra.mxu1 %vm1819_vm3, %v2549_v11  ;;  %v4069_v11 = vld [vmem:[%s5035_s10 + $0x20] sm:$0xff]  }
 0x4bf   : > { %3989 = vmatprep.mubr.msk.bf16.mxu1 %vm4174_vm2, %v4171_v57 }
 0x4c0   : > { %3852 = vmatpush3.bf16.msra.mxu0 %v4067_v13 }
 0x4c1   : > { %3853 = vmatprep.subr.bf16.mxu0 %v4068_v63 }
 0x4c4   : > { %3854 = vmatpush3.bf16.msra.mxu0 %v4069_v11 }
 0x556   : > { %v2591_v18 = vpop.f32.mrf.mxu0 }
 0x558   : > { %v3941_v43 = vpop.f32.mrf.mxu0 }
 0x559   : > { %v4070_v43 = vld [vmem:[%s5035_s10 + $0x58] sm:$0xff]  }
 0x55a   : > { %v2594_v44 = vpop.f32.mrf.mxu0  ;;  %3855 = vmatprep.subr.bf16.mxu0 %v4070_v43  ;;  %v995_v43 = vsub.s32 1, %v4476_v48 }
 0x55c   : > { %v3942_v39 = vpop.f32.mrf.mxu0 }
 0x55e   : > { %v2637_v23 = vpop.f32.mrf.mxu1 }
 0x560   : > { %v3947_v45 = vpop.f32.mrf.mxu1 }
 0x562   : > { %v2640_v60 = vpop.f32.mrf.mxu1 }
 0x564   : > { %v3948_v20 = vpop.f32.mrf.mxu1 }
 0x566   : > { %v2683_v46 = vpop.f32.mrf.mxu0 }
 0x567   : > { %v2919_v52 = vcombine.low %v2591_v18, %v2683_v46  ;;  %v2920_v55 = vcombine.high %v2591_v18, %v2683_v46 }
 0x568   : > { %v3953_v47 = vpop.f32.mrf.mxu0 }
 0x569   : > { %v2927_v24 = vrot.slane %v2919_v52, %v4479_v53  ;;  %v2934_v62 = vrot.slane %v2920_v55, %v4479_v53 }
 0x56a   : > { %v2686_v49 = vpop.f32.mrf.mxu0 }
 0x56c   : > { %v3954_v50 = vpop.f32.mrf.mxu0 }
 0x56d   : > { %v4071_v50 = vld [vmem:[%s5035_s10 + $0x18] sm:$0xff]  }
 0x56e   : > { %v2729_v58 = vpop.f32.mrf.mxu1  ;;  %v4854_v59 = vpop.f32.mrf.mxu0  ;;  %3856 = vmatpush3.bf16.msra.mxu0 %v4071_v50 }
 0x56f   : > { %v2935_v36 = vcombine.low %v2637_v23, %v2729_v58  ;;  %v2936_v0 = vcombine.high %v2637_v23, %v2729_v58 }
 0x570   : > { %v3959_v56 = vpop.f32.mrf.mxu1  ;;  %v3965_v32 = vpop.f32.mrf.mxu0 }
 0x571   : > { %v2943_v35 = vrot.slane %v2935_v36, %v4479_v53  ;;  %v2950_v22 = vrot.slane %v2936_v0, %v4479_v53  ;;  %v4072_v36 = vld [vmem:[%s5035_s10 + $0x50] sm:$0xff]  }
 0x572   : > { %v2732_v2 = vpop.f32.mrf.mxu1  ;;  %v2778_v6 = vpop.f32.mrf.mxu0  ;;  %3857 = vmatprep.subr.bf16.mxu0 %v4072_v36 }
 0x573   : > { %v2983_v8 = vcombine.low %v2927_v24, %v2943_v35  ;;  %v2984_v17 = vcombine.high %v2927_v24, %v2943_v35  ;;  %v2999_v9 = vcombine.low %v2934_v62, %v2950_v22  ;;  %v3000_v12 = vcombine.high %v2934_v62, %v2950_v22  ;;  %v4073_v2 = vld [vmem:[%s5035_s10 + $0x10] sm:$0xff]  }
 0x574   : > { %v3960_v14 = vpop.f32.mrf.mxu1  ;;  %v3966_v42 = vpop.f32.mrf.mxu0  ;;  %3858 = vmatpush3.bf16.msra.mxu0 %v4073_v2 }
 0x575   : > { %v2991_v21 = vrot.slane %v2983_v8, %v4485_v61  ;;  %v2998_v54 = vrot.slane %v2984_v17, %v4485_v61  ;;  %v3007_v4 = vrot.slane %v2999_v9, %v4485_v61  ;;  %v3014_v25 = vrot.slane %v3000_v12, %v4485_v61  ;;  %v4074_v14 = vld [vmem:[%s5035_s10 + $0x48] sm:$0xff]  }
 0x576   : > { %v2821_v15 = vpop.f32.mrf.mxu1  ;;  %v2867_v1 = vpop.f32.mrf.mxu0  ;;  %3859 = vmatprep.subr.bf16.mxu0 %v4074_v14 }
 0x577   : > { %v3746_v33 = vcombine.low %v2991_v21, %v2998_v54  ;;  %v3748_v34 = vcombine.high %v2991_v21, %v2998_v54  ;;  %v3750_v51 = vcombine.low %v3007_v4, %v3014_v25  ;;  %v3752_v10 = vcombine.high %v3007_v4, %v3014_v25  ;;  %v4075_v4 = vld [vmem:[%s5035_s10 + $0x8] sm:$0xff]  }
 0x578   : > { %v3971_v40 = vpop.f32.mrf.mxu1  ;;  %v3977_v19 = vpop.f32.mrf.mxu0  ;;  %v2951_v44 = vcombine.low %v4854_v59, %v2867_v1  ;;  %v2952_v39 = vcombine.high %v4854_v59, %v2867_v1  ;;  %3860 = vmatpush3.bf16.msra.mxu0 %v4075_v4 }
 0x579   : > { %v3063_v29 = vrot.slane %v3746_v33, %v4479_v53  ;;  %v3079_v7 = vrot.slane %v3748_v34, %v4479_v53  ;;  %v3095_v37 = vrot.slane %v3750_v51, %v4479_v53  ;;  %v3111_v38 = vrot.slane %v3752_v10, %v4479_v53 }
 0x57a   : > { %v2824_v5 = vpop.f32.mrf.mxu1  ;;  %v2870_v27 = vpop.f32.mrf.mxu0  ;;  %v2959_v0 = vrot.slane %v2951_v44, %v4479_v53  ;;  %v2966_v24 = vrot.slane %v2952_v39, %v4479_v53 }
 0x57b   : > { %v3120_v28 = vcombine.high %v3063_v29, %v3079_v7  ;;  %v3152_v3 = vcombine.high %v3095_v37, %v3111_v38  ;;  %v3119_v41 = vcombine.low %v3063_v29, %v3079_v7  ;;  %v3151_v18 = vcombine.low %v3095_v37, %v3111_v38  ;;  %v4076_v29 = vld [vmem:[%s5035_s10 + $0x40] sm:$0xff]  }
 0x57c   : > { %v3972_v23 = vpop.f32.mrf.mxu1  ;;  %v3978_v45 = vpop.f32.mrf.mxu0  ;;  %v4077_v7 = vld [vmem:[%s5035_s10] sm:$0xff]   ;;  %3861 = vmatprep.subr.bf16.mxu0 %v4076_v29 }
 0x57d   : > { %v4889_v60 = vrot.slane %v3120_v28, %v4485_v61  ;;  %v4892_v20 = vrot.slane %v3152_v3, %v4485_v61  ;;  %v4895_v46 = vrot.slane %v3119_v41, %v4485_v61  ;;  %v4898_v47 = vrot.slane %v3151_v18, %v4485_v61  ;;  %3862 = vmatpush3.bf16.msra.mxu0 %v4077_v7  ;;  %v3771_v29 = vld [vmem:[%s5037_s12] ss:$0 sm:$0xff] }
 0x57e   : > { %v2913_v49 = vpop.f32.mrf.mxu1  ;;  %v991_v18 = vsub.s32 0, %v4476_v48 }
 0x57f   : > { %v2967_v52 = vcombine.low %v2821_v15, %v2913_v49  ;;  %v2968_v55 = vcombine.high %v2821_v15, %v2913_v49  ;;  %v3185_v58 = vcombine.low %v4889_v60, %v4892_v20  ;;  %v3184_v59 = vcombine.high %v4895_v46, %v4898_v47 }
 0x580   : > { %v3983_v56 = vpop.f32.mrf.mxu1  ;;  %v3183_v32 = vcombine.low %v4895_v46, %v4898_v47  ;;  %v3186_v41 = vcombine.high %v4889_v60, %v4892_v20 }
 0x581   : > { %v2975_v62 = vrot.slane %v2967_v52, %v4479_v53  ;;  %v2982_v35 = vrot.slane %v2968_v55, %v4479_v53  ;;  %3196 = vrot.lane.b32.xlu0 %v3185_v58, %s4169_s2  ;;  %3192 = vrot.lane.b32.xlu1 %v3184_v59, %s4172_s23 }
 0x582   : > { %v2916_v22 = vpop.f32.mrf.mxu1 }
 0x583   : > { %v3015_v6 = vcombine.low %v2959_v0, %v2975_v62  ;;  %v3016_v8 = vcombine.high %v2959_v0, %v2975_v62  ;;  %v3031_v17 = vcombine.low %v2966_v24, %v2982_v35  ;;  %v3032_v9 = vcombine.high %v2966_v24, %v2982_v35 }
 0x584   : > { %v3984_v12 = vpop.f32.mrf.mxu1 }
 0x585   : > { %v3023_v42 = vrot.slane %v3015_v6, %v4485_v61  ;;  %v3030_v16 = vrot.slane %v3016_v8, %v4485_v61  ;;  %v3039_v21 = vrot.slane %v3031_v17, %v4485_v61  ;;  %v3046_v54 = vrot.slane %v3032_v9, %v4485_v61  ;;  %v3754_v9 = vld [vmem:[%s5036_s11] ss:$0 sm:$0xff] }
 0x587   : > { %v3747_v25 = vcombine.low %v3023_v42, %v3030_v16  ;;  %v3749_v26 = vcombine.high %v3023_v42, %v3030_v16  ;;  %v3751_v15 = vcombine.low %v3039_v21, %v3046_v54  ;;  %v3753_v1 = vcombine.high %v3039_v21, %v3046_v54  ;;  %v4144_v54 = vld [vmem:[%s4311_s22] sm:$0xff] }
 0x589   : > { %v3070_v13 = vrot.slane %v3747_v25, %v4479_v53  ;;  %v3086_v33 = vrot.slane %v3749_v26, %v4479_v53  ;;  %v3102_v34 = vrot.slane %v3751_v15, %v4479_v53  ;;  %v3118_v51 = vrot.slane %v3753_v1, %v4479_v53 }
 0x58b   : > { %v3136_v10 = vcombine.high %v3070_v13, %v3086_v33  ;;  %v3168_v63 = vcombine.high %v3102_v34, %v3118_v51  ;;  %v3135_v40 = vcombine.low %v3070_v13, %v3086_v33  ;;  %v3167_v19 = vcombine.low %v3102_v34, %v3118_v51  ;;  %v4078_v34 = vld [vmem:[%s5039_s14 + $0x8] sm:$0xff]   ;;  %v4079_v51 = vld [vmem:[%s5039_s14] sm:$0xff]  }
 0x58c   : > { %3986 = vmatpush3.bf16.msra.mxu1 %v4078_v34 }
 0x58d   : > { %v3150_v37 = vrot.slane %v3136_v10, %v4485_v61  ;;  %v3182_v38 = vrot.slane %v3168_v63, %v4485_v61  ;;  %v3143_v5 = vrot.slane %v3135_v40, %v4485_v61  ;;  %v3175_v53 = vrot.slane %v3167_v19, %v4485_v61  ;;  %v987_v61 = vld [vmem:[%s5033_s8] sm:$0x3]  ;;  %3987 = vmatprep.subr.bf16.mxu1 %v4171_v57 }
 0x58e   : > { %v992_v44 = vrot.slane %v987_v61, %v991_v18  ;;  %v996_v39 = vrot.slane %v987_v61, %v995_v43 }
 0x58f   : > { %v3189_v27 = vcombine.low %v3150_v37, %v3182_v38  ;;  %v3188_v11 = vcombine.high %v3143_v5, %v3175_v53  ;;  %v3187_v28 = vcombine.low %v3143_v5, %v3175_v53  ;;  %v3190_v3 = vcombine.high %v3150_v37, %v3182_v38  ;;  %v3772_v37 = vld [vmem:[%s5038_s13] ss:$0 sm:$0xff]  ;;  %v4080_v53 = vld [vmem:[%s5041_s16 + $0x18] sm:$0xff]  }
 0x590   : > { %v999_v23 = vadd.f32 %v992_v44, %v4579_v30  ;;  %v1000_v45 = vadd.f32 %v996_v39, %v4584_v31  ;;  %3988 = vmatpush3.bf16.msra.mxu1 %v4079_v51 }
 0x591   : > { %3208 = vrot.lane.b32.xlu1 %v3189_v27, %s4169_s2  ;;  %3204 = vrot.lane.b32.xlu0 %v3188_v11, %s4172_s23  ;;  %v4081_v11 = vld [vmem:[%s5041_s16 + $0x10] sm:$0xff]  }
 0x592   : > { %v3714_v49 = vmul.f32 -1.442695, %v999_v23  ;;  %v3715_v60 = vmul.f32 -1.442695, %v1000_v45  ;;  %3993 = vmatprep.subr.bf16.mxu1 %v4171_v57 }
 0x594   : > { %4134 = vpow2.f32 %v3714_v49 }
 0x595   : > { %3212 = vrot.lane.b32.xlu1 %v3190_v3, %s4173_s24  ;;  %3200 = vrot.lane.b32.xlu0 %v3186_v41, %s4173_s24  ;;  %4136 = vpow2.f32 %v3715_v60  ;;  %v4083_v3 = vld [vmem:[%s5041_s16] sm:$0xff]  }
 0x596   : > { %v3773_v41 = vld [vmem:[%s5040_s15] ss:$0 sm:$0xff] }
 0x5a1   : > { %v4135_v20 = vpop.eup %4134 }
 0x5a2   : > { %v4137_v50 = vpop.eup %4136  ;;  %v1007_v52 = vadd.f32 1.0, %v4135_v20 }
 0x5a3   : > { %v1008_v55 = vadd.f32 1.0, %v4137_v50 }
 0x5a4   : > { %4138 = vrcp.f32 %v1007_v52 }
 0x5a5   : > { %4140 = vrcp.f32 %v1008_v55 }
 0x5b1   : > { %v4139_v0 = vpop.eup %4138 }
 0x5b2   : > { %v4141_v22 = vpop.eup %4140 }
 0x5f3   : > { %v3193_v58 = vpop.permute.xlu1 %3192  ;;  %v3197_v59 = vpop.permute.xlu0 %3196 }
 0x5f4   : > { %v3215_v30 = vsel %vm672_vm0, %v3183_v32, %v3193_v58 }
 0x5f5   : > { %v3217_v56 = vsel %vm3216_vm9, %v3215_v30, %v3197_v59 }
 0x603   : > { %v3209_v36 = vpop.permute.xlu1 %3208  ;;  %v3205_v48 = vpop.permute.xlu0 %3204 }
 0x604   : > { %v3220_v31 = vsel %vm672_vm0, %v3187_v28, %v3205_v48  ;;  %v4082_v28 = vld [vmem:[%s5041_s16 + $0x8] sm:$0xff]  }
 0x605   : > { %v3221_v62 = vsel %vm3216_vm9, %v3220_v31, %v3209_v36 }
 0x607   : > { %v3213_v24 = vpop.permute.xlu1 %3212  ;;  %v3201_v35 = vpop.permute.xlu0 %3200 }
 0x608   : > { %v3222_v2 = vsel %vm3218_vm10, %v3221_v62, %v3213_v24  ;;  %v3219_v6 = vsel %vm3218_vm10, %v3217_v56, %v3201_v35 }
 0x609   : > { %v3224_v8 = vmul.f32 %v4141_v22, %v3222_v2  ;;  %v3223_v17 = vmul.f32 %v4139_v0, %v3219_v6 }
 0x60b   : > { %v3226_v46 = vpack.c.bf16 %v3224_v8, %v3224_v8  ;;  %v3225_v47 = vpack.c.bf16 %v3223_v17, %v3223_v17 }
 0x60d   : > { %3394 = vmatprep.mubr.bf16.mxu0 %v3226_v46 }
 0x60e   : > { %3395 = vmatmul.mubr.bf16.vlgmr.msra.gmra.mxu0 %v3225_v47 }
 0x6ce   : > { %v3863_v32 = vpop.f32.mrf.mxu0 }
 0x6d0   : > { %v3864_v12 = vpop.f32.mrf.mxu0 }
 0x6d1   : > { %v3865_v14 = vadd.f32 %v3864_v12, %v3863_v32 }
 0x6d2   : > { %v3866_v42 = vpop.f32.mrf.mxu0 }
 0x6d3   : > { %v3397_v16 = vadd.f32 %v3865_v14, %v3754_v9 }
 0x6d4   : > { %v3867_v21 = vpop.f32.mrf.mxu0 }
 0x6d5   : > { %v3402_v4 = vadd.f32 %v4144_v54, %v3397_v16 }
 0x6d7   : > { %v3405_v25 = vsel %vm672_vm0, %v3402_v4, 0.0 }
 0x6d8   : > { %3406 = vadd.xlane.f32.xlu1 %v3405_v25 }
 0x761   : > { %v3407_v26 = vpop.xlane.xlu1 %3406 }
 0x762   : > { %v3408_v15 = vmul.f32 0.03125, %v3407_v26 }
 0x764   : > { %v3409_v1 = vsub.f32 %v3402_v4, %v3408_v15 }
 0x766   : > { %v3410_v13 = vmul.f32 %v3409_v1, %v3409_v1 }
 0x768   : > { %v3411_v33 = vsel %vm672_vm0, %v3410_v13, 0.0 }
 0x769   : > { %3412 = vadd.xlane.f32.xlu0 %v3411_v33 }
 0x7f2   : > { %v3413_v10 = vpop.xlane.xlu0 %3412 }
 0x7f3   : > { %v3414_v63 = vmul.f32 0.03125, %v3413_v10 }
 0x7f5   : > { %v3415_v40 = vadd.f32 1e-05, %v3414_v63 }
 0x7f7   : > { %4142 = vrsqrt.f32 %v3415_v40 }
 0x804   : > { %v4143_v19 = vpop.eup %4142 }
 0x805   : > { %v3417_v7 = vmul.f32 %v4143_v19, %v3409_v1 }
 0x807   : > { %v3424_v38 = vmul.f32 %v3771_v29, %v3417_v7 }
 0x809   : > { %v3431_v5 = vadd.f32 %v3772_v37, %v3424_v38 }
 0x80b   : > { %v3432_v27 = vpack.c.bf16 %v3431_v5, %v3431_v5 }
 0x80d   : > { %3990 = vmatmul.mubr.msk.bf16.vlgmr.msra.gmra.mxu1 %vm672_vm0, %v3432_v27 }
 0x80e   : > { %3994 = vmatpush3.bf16.msra.mxu1 %v4080_v53  ;;  %4001 = vmatprep.mubr.msk.bf16.mxu1 %vm4174_vm2, %v4171_v57 }
 0x80f   : > { %3995 = vmatprep.subr.bf16.mxu1 %v4171_v57 }
 0x812   : > { %3996 = vmatpush3.bf16.msra.mxu1 %v4081_v11 }
 0x813   : > { %3997 = vmatprep.subr.bf16.mxu1 %v4171_v57 }
 0x816   : > { %3998 = vmatpush3.bf16.msra.mxu1 %v4082_v28 }
 0x817   : > { %3999 = vmatprep.subr.bf16.mxu1 %v4171_v57  ;;  %v3777_v57 = vld [vmem:[%s5042_s17] ss:$0 sm:$0xff] }
 0x81a   : > { %4000 = vmatpush3.bf16.msra.mxu1 %v4083_v3 }
 0x8cd   : > { %v3493_v18 = vpop.f32.mrf.mxu1 }
 0x8ce   : > { %v3494_v61 = vadd.f32 %v3773_v41, %v3493_v18 }
 0x8cf   : > { %v3991_v43 = vpop.f32.mrf.mxu1 }
 0x8d0   : > { %v3499_v44 = vmax.f32 %v3494_v61, 0.0 }
 0x8d1   : > { %v3496_v39 = vpop.f32.mrf.mxu1 }
 0x8d2   : > { %v3500_v23 = vpack.c.bf16 %v3499_v44, %v3499_v44 }
 0x8d3   : > { %v3992_v45 = vpop.f32.mrf.mxu1 }
 0x8d4   : > { %4002 = vmatmul.mubr.msk.bf16.vlgmr.msra.gmra.mxu1 %vm3216_vm9, %v3500_v23 }
 0x994   : > { %v3577_v49 = vpop.f32.mrf.mxu1 }
 0x995   : > { %v3578_v60 = vadd.f32 %v3777_v57, %v3577_v49 }
 0x996   : > { %v4003_v20 = vpop.f32.mrf.mxu1 }
 0x997   : > { %v3583_v50 = vadd.f32 %v3578_v60, %v3402_v4 }
 0x998   : > { %v3580_v52 = vpop.f32.mrf.mxu1 }
 0x999   : > { %3584 = vst.msk [vmem:[%s657_s1] sm:$0xff] %vm672_vm0, %v3583_v50 }
 0x99a   : > { %v4004_v55 = vpop.f32.mrf.mxu1 }
 0x99b PF: > { %s5057_s20 = sld [smem:[#allocation3_spill]] }
 0x99c   : > { %s5058_s27 = sld [smem:[#allocation2_spill]] }
 0x99d   : > { %s5059_s28 = sld [smem:[#allocation4_spill]] }
 0x9a1   : > { %s28_s29 = sadd.s32 1, %s5057_s20  }
 0x9a2   : > { %p25_p5 = scmp.ge.s32.totalorder %s28_s29, 4  }
 0x9a4   :  { %27 = sbr.rel (!%p25_p5) target bundleno = 4 (0x4), region = 128 }

// kernel: graph_module.11
= control target key start
LH: loop header
LB: loop body
LE: loop exit
PB: predicated region body
PF: predicated region fallthrough
CT: control target
= control target key end

     0   :  { %s4641_s24 = smov 0   ;;  %s4643_s25 = smov 0   ;;  %s5351_s0 = inlined_call_operand.vmem [shape: bf16[2,16,8,8], index: 0, kind: input, shape index: {}]   ;;  %s5352_s1 = inlined_call_operand.vmem [shape: bf16[2,16,8,8], index: 1, kind: input, shape index: {}]   ;;  %s5353_s2 = inlined_call_operand.vmem [shape: bf16[2,8,8,16], index: 2, kind: input, shape index: {}]   ;;  %s5354_s3 = inlined_call_operand.vmem [shape: f32[1,16], index: 3, kind: input, shape index: {}]   ;;  %s5355_s4 = inlined_call_operand.vmem [shape: f32[1,16], index: 4, kind: input, shape index: {}]   ;;  %s5356_s5 = inlined_call_operand.vmem [shape: bf16[16,16], index: 5, kind: input, shape index: {}]   ;;  %s5357_s6 = inlined_call_operand.vmem [shape: f32[1,16], index: 6, kind: input, shape index: {}]   ;;  %s5358_s7 = inlined_call_operand.vmem [shape: f32[1,16], index: 7, kind: input, shape index: {}]   ;;  %s5359_s8 = inlined_call_operand.vmem [shape: f32[1,16], index: 8, kind: input, shape index: {}]   ;;  %s5360_s9 = inlined_call_operand.vmem [shape: bf16[16,16], index: 9, kind: input, shape index: {}]   ;;  %s5361_s10 = inlined_call_operand.vmem [shape: f32[1,16], index: 10, kind: input, shape index: {}]   ;;  %s5362_s11 = inlined_call_operand.vmem [shape: f32[1,16], index: 11, kind: input, shape index: {}]   ;;  %s5363_s12 = inlined_call_operand.vmem [shape: f32[1,16], index: 12, kind: input, shape index: {}]   ;;  %s5364_s13 = inlined_call_operand.vmem [shape: bf16[16,32], index: 13, kind: input, shape index: {}]   ;;  %s5365_s14 = inlined_call_operand.vmem [shape: f32[1,32], index: 14, kind: input, shape index: {}]   ;;  %s5366_s15 = inlined_call_operand.vmem [shape: bf16[32,16], index: 15, kind: input, shape index: {}]   ;;  %s5367_s16 = inlined_call_operand.vmem [shape: f32[1,16], index: 16, kind: input, shape index: {}]   ;;  %s5368_s17 = inlined_call_operand.vmem [shape: bf16[2,8,8,16], index: 17, kind: output, shape index: {}]  }
   0x1   :  { %5369 = sst [smem:[#allocation3_spill]] %s5351_s0  ;;  %s4645_s26 = smov 0  }
   0x2   :  { %5370 = sst [smem:[#allocation4_spill]] %s5352_s1 }
   0x3 LB: > { %s46_s27 = sadd.s32 1, %s4541_s25  ;;  %p4111_p0 = scmp.ge.s32.totalorder %s4545_s26, 1  ;;  %s4545_s26 = sphi %s4645_s26, %s27_s26   ;;  %s4541_s25 = sphi %s4643_s25, %s5374_s25   ;;  %s4537_s24 = sphi %s4641_s24, %s5373_s24  }
   0x4   : > { %p48_p1 = scmp.ge.s32.totalorder %s46_s27, 2  ;;  %p550_p2 = scmp.lt.s32.totalorder %s4545_s26, 3 }
   0x6   : > { %s5376_s27 = smov (%p48_p1, %s46_s27), 0  ;;  %p551_p3 = pnand %p4111_p0, %p550_p2 }
   0x7   : > { %p629_p4 = scmp.lt.s32.totalorder (!%p551_p3), %s4537_s24, 1  ;;  %s5371_s30 = sld [smem:[#allocation4_spill]] (!%p551_p3) }
   0x8   : > { %554 = sbr.rel (%p551_p3) target bundleno = 1744 (0x6d0), region = 88  ;;  %s5372_s20 = sld [smem:[#allocation3_spill]] (!%p551_p3) }
   0xd   : > { %v4547_v0 = vmov 0.0   ;;  %vm673_vm0 = vcmask 64512   ;;  %s5378_s24 = smov (!%p629_p4, %s4537_s24), 1  ;;  %vm4548_vm1 = vmmov 0   ;;  %vm758_vm2 = vcmask 1043456  }
   0xe   : > { %4285 = vmatprep.subr.bf16.mxu0 %v4547_v0  ;;  %4291 = vmatprep.subr.bf16.mxu1 %v4547_v0  ;;  %674 = vst.msk [vmem:[#allocation2] sm:$0xff] %vm673_vm0, %v4547_v0  ;;  %675 = vst.msk [vmem:[#allocation2 + $0x8] sm:$0xff] %vm673_vm0, %v4547_v0  ;;  %s4193_s28 = sshll.u32 %s5378_s24, 6  ;;  %s4195_s22 = sshll.u32 %s5378_s24, 5  ;;  %vm1809_vm3 = vcmask 130048   ;;  %vm3872_vm4 = vcmask 261120  }
   0xf   : > { %4287 = vmatprep.mubr.msk.bf16.mxu0 %vm4548_vm1, %v4547_v0  ;;  %676 = vst.msk [vmem:[#allocation2 + $0x10] sm:$0xff] %vm673_vm0, %v4547_v0  ;;  %677 = vst.msk [vmem:[#allocation2 + $0x18] sm:$0xff] %vm673_vm0, %v4547_v0  ;;  %4293 = vmatprep.mubr.msk.bf16.mxu1 %vm4548_vm1, %v4547_v0  ;;  %s4703_s18 = scalar_lea.vmem %s5371_s30, %s4193_s28  ;;  %s4712_s21 = scalar_lea.vmem %s5372_s20, %s4193_s28  ;;  %vm3966_vm5 = vcmask 125952  }
  0x10   : > { %678 = vst.msk [vmem:[#allocation2 + $0x20] sm:$0xff] %vm673_vm0, %v4547_v0  ;;  %679 = vst.msk [vmem:[#allocation2 + $0x28] sm:$0xff] %vm673_vm0, %v4547_v0  ;;  %v724_v1 = vld [vmem:[%s4703_s18 + $0x8] sm:$0xf]  ;;  %v722_v2 = vld [vmem:[%s4703_s18] sm:$0xf]  ;;  %s656_s29 = scalar_lea.vmem %s5353_s2, %s4195_s22 }
  0x11   : > { %680 = vst.msk [vmem:[#allocation2 + $0x30] sm:$0xff] %vm673_vm0, %v4547_v0  ;;  %681 = vst.msk [vmem:[#allocation2 + $0x38] sm:$0xff] %vm673_vm0, %v4547_v0  ;;  %864 = vxpose.xlu1.c.b16.start.end [1/1] (short) (narrow) %v724_v1, 16  ;;  %738 = vxpose.xlu0.c.b16.start.end [1/1] (short) (narrow) %v722_v2, 16  ;;  %v725_v3 = vld [vmem:[%s4703_s18 + $0xc] sm:$0xf] }
  0x12   : > { %682 = vst.msk [vmem:[#allocation2 + $0x40] sm:$0xff] %vm673_vm0, %v4547_v0  ;;  %683 = vst.msk [vmem:[#allocation2 + $0x48] sm:$0xff] %vm673_vm0, %v4547_v0  ;;  %v723_v4 = vld [vmem:[%s4703_s18 + $0x4] sm:$0xf]  ;;  %v727_v5 = vld [vmem:[%s4703_s18 + $0x14] sm:$0xf] }
  0x13   : > { %684 = vst.msk [vmem:[#allocation2 + $0x50] sm:$0xff] %vm673_vm0, %v4547_v0  ;;  %685 = vst.msk [vmem:[#allocation2 + $0x58] sm:$0xff] %vm673_vm0, %v4547_v0  ;;  %v726_v6 = vld [vmem:[%s4703_s18 + $0x10] sm:$0xf]  ;;  %v706_v7 = vld [vmem:[%s4712_s21] sm:$0xf] }
  0x14   : > { %686 = vst.msk [vmem:[#allocation2 + $0x60] sm:$0xff] %vm673_vm0, %v4547_v0  ;;  %687 = vst.msk [vmem:[#allocation2 + $0x68] sm:$0xff] %vm673_vm0, %v4547_v0  ;;  %v707_v8 = vld [vmem:[%s4712_s21 + $0x4] sm:$0xf]  ;;  %v708_v9 = vld [vmem:[%s4712_s21 + $0x8] sm:$0xf] }
  0x15   : > { %688 = vst.msk [vmem:[#allocation2 + $0x70] sm:$0xff] %vm673_vm0, %v4547_v0  ;;  %689 = vst.msk [vmem:[#allocation2 + $0x78] sm:$0xff] %vm673_vm0, %v4547_v0  ;;  %926 = vxpose.xlu1.c.b16.start.end [1/1] (short) (narrow) %v725_v3, 16  ;;  %802 = vxpose.xlu0.c.b16.start.end [1/1] (short) (narrow) %v723_v4, 16  ;;  %v709_v10 = vld [vmem:[%s4712_s21 + $0xc] sm:$0xf] }
  0x16   : > { %v729_v11 = vld [vmem:[%s4703_s18 + $0x1c] sm:$0xf]  ;;  %v728_v12 = vld [vmem:[%s4703_s18 + $0x18] sm:$0xf]  ;;  %v760_v13 = vsel %vm758_vm2, %v706_v7, 0  ;;  %v822_v14 = vsel %vm758_vm2, %v707_v8, 0 }
  0x17   : > { %v4725_v15 = vsel %vm758_vm2, %v708_v9, 0  ;;  %v4728_v16 = vsel %vm758_vm2, %v709_v10, 0  ;;  %v710_v17 = vld [vmem:[%s4712_s21 + $0x10] sm:$0xf]  ;;  %4286 = vmatpush3.bf16.msra.mxu0 %v760_v13  ;;  %4292 = vmatpush3.bf16.msra.mxu1 %v822_v14  ;;  %v711_v19 = vld [vmem:[%s4712_s21 + $0x14] sm:$0xf] }
  0x18   : > { %v4732_v18 = vsel %vm758_vm2, %v710_v17, 0  ;;  %v712_v20 = vld [vmem:[%s4712_s21 + $0x18] sm:$0xf]  ;;  %v731_v21 = vld [vmem:[%s4703_s18 + $0x24] sm:$0xf]  ;;  %4297 = vmatprep.subr.bf16.mxu0 %v4547_v0  ;;  %4303 = vmatprep.subr.bf16.mxu1 %v4547_v0  ;;  %v4741_v23 = vsel %vm758_vm2, %v711_v19, 0 }
  0x19   : > { %1050 = vxpose.xlu1.c.b16.start.end [1/1] (short) (narrow) %v727_v5, 16  ;;  %988 = vxpose.xlu0.c.b16.start.end [1/1] (short) (narrow) %v726_v6, 16  ;;  %v730_v22 = vld [vmem:[%s4703_s18 + $0x20] sm:$0xf]  ;;  %v4744_v24 = vsel %vm758_vm2, %v712_v20, 0  ;;  %v4229_v46 = vld [vmem:[%s656_s29 + $0x8] sm:$0xff]  }
  0x1a   : > { %v713_v25 = vld [vmem:[%s4712_s21 + $0x1c] sm:$0xf]  ;;  %v714_v26 = vld [vmem:[%s4712_s21 + $0x20] sm:$0xf]  ;;  %v715_v29 = vld [vmem:[%s4712_s21 + $0x24] sm:$0xf]  ;;  %v4792_v49 = vunpack.c.h.bf16 %v4229_v46  ;;  %v4794_v50 = vunpack.c.l.bf16 %v4229_v46 }
  0x1b   : > { %v4749_v27 = vsel %vm758_vm2, %v713_v25, 0  ;;  %v4752_v28 = vsel %vm758_vm2, %v714_v26, 0  ;;  %v4756_v30 = vsel %vm758_vm2, %v715_v29, 0  ;;  %v716_v31 = vld [vmem:[%s4712_s21 + $0x28] sm:$0xf]  ;;  %v4214_v43 = vld [vmem:[%s656_s29] sm:$0xff]  }
  0x1c   : > { %v717_v32 = vld [vmem:[%s4712_s21 + $0x2c] sm:$0xf]  ;;  %v4761_v33 = vsel %vm758_vm2, %v716_v31, 0  ;;  %v718_v35 = vld [vmem:[%s4712_s21 + $0x30] sm:$0xf]  ;;  %v4784_v44 = vunpack.c.h.bf16 %v4214_v43  ;;  %v4786_v45 = vunpack.c.l.bf16 %v4214_v43  ;;  %v1819_v52 = vsel %vm1809_vm3, %v4792_v49, 0.0 }
  0x1d   : > { %1174 = vxpose.xlu1.c.b16.start.end [1/1] (short) (narrow) %v729_v11, 16  ;;  %1112 = vxpose.xlu0.c.b16.start.end [1/1] (short) (narrow) %v728_v12, 16  ;;  %v4764_v34 = vsel %vm758_vm2, %v717_v32, 0  ;;  %v719_v36 = vld [vmem:[%s4712_s21 + $0x34] sm:$0xf]  ;;  %v4769_v37 = vsel %vm758_vm2, %v718_v35, 0 }
  0x1e   : > { %v4772_v38 = vsel %vm758_vm2, %v719_v36, 0  ;;  %v733_v39 = vld [vmem:[%s4703_s18 + $0x2c] sm:$0xf]  ;;  %v732_v40 = vld [vmem:[%s4703_s18 + $0x28] sm:$0xf]  ;;  %v1813_v47 = vsel %vm1809_vm3, %v4784_v44, 0.0 }
  0x1f   : > { %v735_v41 = vld [vmem:[%s4703_s18 + $0x34] sm:$0xf]  ;;  %v734_v42 = vld [vmem:[%s4703_s18 + $0x30] sm:$0xf]  ;;  %v1810_v48 = vsel %vm1809_vm3, %v4786_v45, 0.0  ;;  %v1816_v53 = vsel %vm1809_vm3, %v4794_v50, 0.0 }
  0x20   : > { %v4230_v51 = vld [vmem:[%s656_s29 + $0x10] sm:$0xff]   ;;  %v4231_v56 = vld [vmem:[%s656_s29 + $0x18] sm:$0xff]  }
  0x21   : > { %1298 = vxpose.xlu1.c.b16.start.end [1/1] (short) (narrow) %v731_v21, 16  ;;  %1236 = vxpose.xlu0.c.b16.start.end [1/1] (short) (narrow) %v730_v22, 16  ;;  %v4800_v54 = vunpack.c.h.bf16 %v4230_v51  ;;  %v4802_v55 = vunpack.c.l.bf16 %v4230_v51  ;;  %v4808_v59 = vunpack.c.h.bf16 %v4231_v56  ;;  %v4810_v60 = vunpack.c.l.bf16 %v4231_v56  ;;  %v720_v63 = vld [vmem:[%s4712_s21 + $0x38] sm:$0xf]  ;;  %v721_v2 = vld [vmem:[%s4712_s21 + $0x3c] sm:$0xf] }
  0x22   : > { %v4818_v1 = vsel %vm758_vm2, %v720_v63, 0  ;;  %v4822_v3 = vsel %vm758_vm2, %v721_v2, 0  ;;  %v737_v4 = vld [vmem:[%s4703_s18 + $0x3c] sm:$0xf]  ;;  %v736_v5 = vld [vmem:[%s4703_s18 + $0x38] sm:$0xf]  ;;  %s5317_s18 = scalar_lea.vmem %s5368_s17, %s4195_s22 }
  0x23   : > { %v1825_v57 = vsel %vm1809_vm3, %v4800_v54, 0.0  ;;  %v1822_v58 = vsel %vm1809_vm3, %v4802_v55, 0.0  ;;  %v1831_v61 = vsel %vm1809_vm3, %v4808_v59, 0.0  ;;  %v1828_v62 = vsel %vm1809_vm3, %v4810_v60, 0.0 }
  0x25   : > { %1422 = vxpose.xlu1.c.b16.start.end [1/1] (short) (narrow) %v733_v39, 16  ;;  %1360 = vxpose.xlu0.c.b16.start.end [1/1] (short) (narrow) %v732_v40, 16 }
  0x29   : > { %1546 = vxpose.xlu1.c.b16.start.end [1/1] (short) (narrow) %v735_v41, 16  ;;  %1484 = vxpose.xlu0.c.b16.start.end [1/1] (short) (narrow) %v734_v42, 16 }
  0x36   : > { %1814 = vadd.xlane.f32.xlu1 %v1813_v47  ;;  %1811 = vadd.xlane.f32.xlu0 %v1810_v48 }
  0x3a   : > { %1820 = vadd.xlane.f32.xlu1 %v1819_v52  ;;  %1817 = vadd.xlane.f32.xlu0 %v1816_v53 }
  0x3e   : > { %1826 = vadd.xlane.f32.xlu1 %v1825_v57  ;;  %1823 = vadd.xlane.f32.xlu0 %v1822_v58 }
  0x42   : > { %1832 = vadd.xlane.f32.xlu1 %v1831_v61  ;;  %1829 = vadd.xlane.f32.xlu0 %v1828_v62 }
  0x6f   : > { %1670 = vxpose.xlu1.c.b16.start.end [1/1] (short) (narrow) %v737_v4, 16  ;;  %1608 = vxpose.xlu0.c.b16.start.end [1/1] (short) (narrow) %v736_v5, 16 }
  0x73   : > { %v746_v6 = vpop.trf.xlu0  ;;  %v872_v8 = vpop.trf.xlu1 }
  0x74   : > { %4288 = vmatmul.mubr.msk.bf16.vlgmr.msra.gmra.mxu0 %vm673_vm0, %v746_v6  ;;  %v4452_v6 = vld [vmem:[%s5356_s5] sm:$0xff]  }
  0x75   : > { %4298 = vmatpush3.bf16.msra.mxu0 %v4725_v15  ;;  %4299 = vmatprep.mubr.msk.bf16.mxu0 %vm4548_vm1, %v4547_v0 }
  0x76   : > { %4309 = vmatprep.subr.bf16.mxu0 %v4547_v0 }
  0x77   : > { %v810_v7 = vpop.trf.xlu0  ;;  %v934_v9 = vpop.trf.xlu1 }
  0x78   : > { %4294 = vmatmul.mubr.msk.bf16.vlgmr.msra.gmra.mxu1 %vm673_vm0, %v810_v7  ;;  %v690_v7 = vld [vmem:[#allocation2] sm:$0xff] }
  0x79   : > { %4304 = vmatpush3.bf16.msra.mxu1 %v4728_v16  ;;  %4305 = vmatprep.mubr.msk.bf16.mxu1 %vm4548_vm1, %v4547_v0 }
  0x7a   : > { %4315 = vmatprep.subr.bf16.mxu1 %v4547_v0 }
  0x7b   : > { %v996_v10 = vpop.trf.xlu0  ;;  %v1058_v11 = vpop.trf.xlu1 }
  0x7c   : > { %4300 = vmatmul.mubr.msk.bf16.vlgmr.msra.gmra.mxu0 %vm673_vm0, %v872_v8 }
  0x7d   : > { %4310 = vmatpush3.bf16.msra.mxu0 %v4732_v18  ;;  %4311 = vmatprep.mubr.msk.bf16.mxu0 %vm4548_vm1, %v4547_v0 }
  0x7e   : > { %4321 = vmatprep.subr.bf16.mxu0 %v4547_v0 }
  0x7f   : > { %v1120_v12 = vpop.trf.xlu0  ;;  %v1182_v13 = vpop.trf.xlu1 }
  0x80   : > { %4306 = vmatmul.mubr.msk.bf16.vlgmr.msra.gmra.mxu1 %vm673_vm0, %v934_v9 }
  0x81   : > { %4316 = vmatpush3.bf16.msra.mxu1 %v4741_v23  ;;  %4317 = vmatprep.mubr.msk.bf16.mxu1 %vm4548_vm1, %v4547_v0 }
  0x82   : > { %4327 = vmatprep.subr.bf16.mxu1 %v4547_v0 }
  0x83   : > { %v1244_v14 = vpop.trf.xlu0  ;;  %v1306_v15 = vpop.trf.xlu1 }
  0x84   : > { %4312 = vmatmul.mubr.msk.bf16.vlgmr.msra.gmra.mxu0 %vm673_vm0, %v996_v10 }
  0x85   : > { %4322 = vmatpush3.bf16.msra.mxu0 %v4744_v24  ;;  %4323 = vmatprep.mubr.msk.bf16.mxu0 %vm4548_vm1, %v4547_v0 }
  0x86   : > { %4333 = vmatprep.subr.bf16.mxu0 %v4547_v0 }
  0x87   : > { %v1368_v16 = vpop.trf.xlu0  ;;  %v1430_v17 = vpop.trf.xlu1 }
  0x88   : > { %4318 = vmatmul.mubr.msk.bf16.vlgmr.msra.gmra.mxu1 %vm673_vm0, %v1058_v11  ;;  %v691_v11 = vld [vmem:[#allocation2 + $0x8] sm:$0xff] }
  0x89   : > { %4328 = vmatpush3.bf16.msra.mxu1 %v4749_v27  ;;  %4329 = vmatprep.mubr.msk.bf16.mxu1 %vm4548_vm1, %v4547_v0 }
  0x8a   : > { %4339 = vmatprep.subr.bf16.mxu1 %v4547_v0 }
  0x8b   : > { %v1492_v18 = vpop.trf.xlu0  ;;  %v1554_v19 = vpop.trf.xlu1 }
  0x8c   : > { %4324 = vmatmul.mubr.msk.bf16.vlgmr.msra.gmra.mxu0 %vm673_vm0, %v1120_v12 }
  0x8d   : > { %4334 = vmatpush3.bf16.msra.mxu0 %v4752_v28  ;;  %4335 = vmatprep.mubr.msk.bf16.mxu0 %vm4548_vm1, %v4547_v0 }
  0x8e   : > { %4345 = vmatprep.subr.bf16.mxu0 %v4547_v0 }
  0x90   : > { %4330 = vmatmul.mubr.msk.bf16.vlgmr.msra.gmra.mxu1 %vm673_vm0, %v1182_v13 }
  0x91   : > { %4340 = vmatpush3.bf16.msra.mxu1 %v4756_v30  ;;  %4341 = vmatprep.mubr.msk.bf16.mxu1 %vm4548_vm1, %v4547_v0 }
  0x92   : > { %4351 = vmatprep.subr.bf16.mxu1 %v4547_v0 }
  0x94   : > { %4336 = vmatmul.mubr.msk.bf16.vlgmr.msra.gmra.mxu0 %vm673_vm0, %v1244_v14 }
  0x95   : > { %4346 = vmatpush3.bf16.msra.mxu0 %v4761_v33  ;;  %4347 = vmatprep.mubr.msk.bf16.mxu0 %vm4548_vm1, %v4547_v0 }
  0x96   : > { %4357 = vmatprep.subr.bf16.mxu0 %v4547_v0 }
  0x98   : > { %4342 = vmatmul.mubr.msk.bf16.vlgmr.msra.gmra.mxu1 %vm673_vm0, %v1306_v15 }
  0x99   : > { %4352 = vmatpush3.bf16.msra.mxu1 %v4764_v34  ;;  %4353 = vmatprep.mubr.msk.bf16.mxu1 %vm4548_vm1, %v4547_v0 }
  0x9a   : > { %4363 = vmatprep.subr.bf16.mxu1 %v4547_v0 }
  0x9c   : > { %4348 = vmatmul.mubr.msk.bf16.vlgmr.msra.gmra.mxu0 %vm673_vm0, %v1368_v16 }
  0x9d   : > { %4358 = vmatpush3.bf16.msra.mxu0 %v4769_v37  ;;  %4359 = vmatprep.mubr.msk.bf16.mxu0 %vm4548_vm1, %v4547_v0 }
  0x9e   : > { %4369 = vmatprep.subr.bf16.mxu0 %v4547_v0 }
  0xa0   : > { %4354 = vmatmul.mubr.msk.bf16.vlgmr.msra.gmra.mxu1 %vm673_vm0, %v1430_v17  ;;  %v692_v17 = vld [vmem:[#allocation2 + $0x10] sm:$0xff] }
  0xa1   : > { %4364 = vmatpush3.bf16.msra.mxu1 %v4772_v38  ;;  %4365 = vmatprep.mubr.msk.bf16.mxu1 %vm4548_vm1, %v4547_v0 }
  0xa2   : > { %4375 = vmatprep.subr.bf16.mxu1 %v4547_v0 }
  0xa4   : > { %4360 = vmatmul.mubr.msk.bf16.vlgmr.msra.gmra.mxu0 %vm673_vm0, %v1492_v18 }
  0xa5   : > { %4370 = vmatpush3.bf16.msra.mxu0 %v4818_v1  ;;  %4371 = vmatprep.mubr.msk.bf16.mxu0 %vm4548_vm1, %v4547_v0 }
  0xa6   : > { %4381 = vmatprep.subr.bf16.mxu0 %v4452_v6 }
  0xa8   : > { %4366 = vmatmul.mubr.msk.bf16.vlgmr.msra.gmra.mxu1 %vm673_vm0, %v1554_v19 }
  0xa9   : > { %4376 = vmatpush3.bf16.msra.mxu1 %v4822_v3  ;;  %4377 = vmatprep.mubr.msk.bf16.mxu1 %vm4548_vm1, %v4547_v0 }
  0xbf   : > { %v1815_v20 = vpop.xlane.xlu1 %1814  ;;  %v1812_v21 = vpop.xlane.xlu0 %1811 }
  0xc0   : > { %v1836_v22 = vmul.f32 0.0625, %v1815_v20  ;;  %v1835_v23 = vmul.f32 0.0625, %v1812_v21 }
  0xc2   : > { %v4895_v24 = vsub.f32 %v4784_v44, %v1836_v22  ;;  %v4898_v25 = vsub.f32 %v4786_v45, %v1835_v23  ;;  %v693_v23 = vld [vmem:[#allocation2 + $0x18] sm:$0xff] }
  0xc3   : > { %v1821_v26 = vpop.xlane.xlu1 %1820  ;;  %v1818_v27 = vpop.xlane.xlu0 %1817 }
  0xc4   : > { %v1838_v28 = vmul.f32 0.0625, %v1821_v26  ;;  %v1837_v29 = vmul.f32 0.0625, %v1818_v27  ;;  %v1852_v30 = vmul.f32 %v4895_v24, %v4895_v24  ;;  %v1851_v0 = vmul.f32 %v4898_v25, %v4898_v25 }
  0xc6   : > { %v4905_v31 = vsub.f32 %v4792_v49, %v1838_v28  ;;  %v4908_v32 = vsub.f32 %v4794_v50, %v1837_v29  ;;  %v1862_v33 = vsel %vm1809_vm3, %v1852_v30, 0.0  ;;  %v1859_v34 = vsel %vm1809_vm3, %v1851_v0, 0.0  ;;  %v694_v0 = vld [vmem:[#allocation2 + $0x20] sm:$0xff] }
  0xc7   : > { %1863 = vadd.xlane.f32.xlu1 %v1862_v33  ;;  %v1827_v35 = vpop.xlane.xlu1 %1826  ;;  %1860 = vadd.xlane.f32.xlu0 %v1859_v34  ;;  %v1824_v36 = vpop.xlane.xlu0 %1823 }
  0xc8   : > { %v1840_v37 = vmul.f32 0.0625, %v1827_v35  ;;  %v1839_v38 = vmul.f32 0.0625, %v1824_v36  ;;  %v1854_v39 = vmul.f32 %v4905_v31, %v4905_v31  ;;  %v1853_v40 = vmul.f32 %v4908_v32, %v4908_v32 }
  0xca   : > { %v4917_v41 = vsub.f32 %v4800_v54, %v1840_v37  ;;  %v4920_v42 = vsub.f32 %v4802_v55, %v1839_v38  ;;  %v1868_v43 = vsel %vm1809_vm3, %v1854_v39, 0.0  ;;  %v1865_v46 = vsel %vm1809_vm3, %v1853_v40, 0.0  ;;  %v695_v38 = vld [vmem:[#allocation2 + $0x28] sm:$0xff] }
  0xcb   : > { %1869 = vadd.xlane.f32.xlu1 %v1868_v43  ;;  %v1833_v47 = vpop.xlane.xlu1 %1832  ;;  %1866 = vadd.xlane.f32.xlu0 %v1865_v46  ;;  %v1830_v48 = vpop.xlane.xlu0 %1829 }
  0xcc   : > { %v1842_v51 = vmul.f32 0.0625, %v1833_v47  ;;  %v1841_v52 = vmul.f32 0.0625, %v1830_v48  ;;  %v1856_v53 = vmul.f32 %v4917_v41, %v4917_v41  ;;  %v1855_v56 = vmul.f32 %v4920_v42, %v4920_v42  ;;  %v696_v48 = vld [vmem:[#allocation2 + $0x30] sm:$0xff] }
  0xce   : > { %v4929_v57 = vsub.f32 %v4808_v59, %v1842_v51  ;;  %v4932_v58 = vsub.f32 %v4810_v60, %v1841_v52  ;;  %v1874_v61 = vsel %vm1809_vm3, %v1856_v53, 0.0  ;;  %v1871_v62 = vsel %vm1809_vm3, %v1855_v56, 0.0 }
  0xcf   : > { %1875 = vadd.xlane.f32.xlu1 %v1874_v61  ;;  %1872 = vadd.xlane.f32.xlu0 %v1871_v62  ;;  %v697_v62 = vld [vmem:[#allocation2 + $0x38] sm:$0xff] }
  0xd0   : > { %v1858_v63 = vmul.f32 %v4929_v57, %v4929_v57  ;;  %v1857_v1 = vmul.f32 %v4932_v58, %v4932_v58 }
  0xd1   : > { %v1678_v2 = vpop.trf.xlu1  ;;  %v1616_v3 = vpop.trf.xlu0 }
  0xd2   : > { %4372 = vmatmul.mubr.msk.bf16.vlgmr.msra.gmra.mxu0 %vm673_vm0, %v1616_v3  ;;  %4378 = vmatmul.mubr.msk.bf16.vlgmr.msra.gmra.mxu1 %vm673_vm0, %v1678_v2  ;;  %v1880_v4 = vsel %vm1809_vm3, %v1858_v63, 0.0  ;;  %v1877_v5 = vsel %vm1809_vm3, %v1857_v1, 0.0 }
  0xd3   : > { %1881 = vadd.xlane.f32.xlu1 %v1880_v4  ;;  %1878 = vadd.xlane.f32.xlu0 %v1877_v5 }
  0xd4   : > { %4382 = vmatpush3.bf16.msra.mxu0 %v4452_v6 }
 0x134   : > { %v796_v8 = vpop.f32.mrf.mxu0 }
 0x135   : > { %v1732_v9 = vadd.f32 %v796_v8, %v690_v7 }
 0x136   : > { %v4289_v10 = vpop.f32.mrf.mxu0 }
 0x137   : > { %1748 = vst.msk [vmem:[#allocation2] sm:$0xff] %vm673_vm0, %v1732_v9 }
 0x138   : > { %v858_v12 = vpop.f32.mrf.mxu1  ;;  %v799_v13 = vpop.f32.mrf.mxu0 }
 0x139   : > { %v1733_v14 = vadd.f32 %v858_v12, %v691_v11  ;;  %v698_v11 = vld [vmem:[#allocation2 + $0x40] sm:$0xff] }
 0x13a   : > { %v4295_v15 = vpop.f32.mrf.mxu1  ;;  %v4290_v16 = vpop.f32.mrf.mxu0 }
 0x13b   : > { %1749 = vst.msk [vmem:[#allocation2 + $0x8] sm:$0xff] %vm673_vm0, %v1733_v14 }
 0x13c   : > { %v861_v18 = vpop.f32.mrf.mxu1  ;;  %v920_v19 = vpop.f32.mrf.mxu0 }
 0x13d   : > { %v1734_v20 = vadd.f32 %v920_v19, %v692_v17 }
 0x13e   : > { %v4296_v21 = vpop.f32.mrf.mxu1  ;;  %v4301_v22 = vpop.f32.mrf.mxu0 }
 0x13f   : > { %1750 = vst.msk [vmem:[#allocation2 + $0x10] sm:$0xff] %vm673_vm0, %v1734_v20 }
 0x140   : > { %v982_v26 = vpop.f32.mrf.mxu1  ;;  %v923_v27 = vpop.f32.mrf.mxu0 }
 0x141   : > { %v1735_v28 = vadd.f32 %v982_v26, %v693_v23  ;;  %v699_v23 = vld [vmem:[#allocation2 + $0x48] sm:$0xff] }
 0x142   : > { %v4307_v29 = vpop.f32.mrf.mxu1  ;;  %v4302_v30 = vpop.f32.mrf.mxu0 }
 0x143   : > { %1751 = vst.msk [vmem:[#allocation2 + $0x18] sm:$0xff] %vm673_vm0, %v1735_v28 }
 0x144   : > { %v985_v33 = vpop.f32.mrf.mxu1  ;;  %v1044_v34 = vpop.f32.mrf.mxu0 }
 0x145   : > { %v1736_v35 = vadd.f32 %v1044_v34, %v694_v0 }
 0x146   : > { %v4308_v36 = vpop.f32.mrf.mxu1  ;;  %v4313_v37 = vpop.f32.mrf.mxu0 }
 0x147   : > { %1752 = vst.msk [vmem:[#allocation2 + $0x20] sm:$0xff] %vm673_vm0, %v1736_v35 }
 0x148   : > { %v1106_v39 = vpop.f32.mrf.mxu1  ;;  %v1047_v40 = vpop.f32.mrf.mxu0 }
 0x149   : > { %v1737_v43 = vadd.f32 %v1106_v39, %v695_v38  ;;  %v700_v38 = vld [vmem:[#allocation2 + $0x50] sm:$0xff] }
 0x14a   : > { %v4319_v46 = vpop.f32.mrf.mxu1  ;;  %v4314_v47 = vpop.f32.mrf.mxu0 }
 0x14b   : > { %1753 = vst.msk [vmem:[#allocation2 + $0x28] sm:$0xff] %vm673_vm0, %v1737_v43 }
 0x14c   : > { %v1109_v51 = vpop.f32.mrf.mxu1  ;;  %v1168_v52 = vpop.f32.mrf.mxu0 }
 0x14d   : > { %v1738_v53 = vadd.f32 %v1168_v52, %v696_v48 }
 0x14e   : > { %v4320_v56 = vpop.f32.mrf.mxu1  ;;  %v4325_v61 = vpop.f32.mrf.mxu0 }
 0x14f   : > { %1754 = vst.msk [vmem:[#allocation2 + $0x30] sm:$0xff] %vm673_vm0, %v1738_v53 }
 0x150   : > { %v1864_v63 = vpop.xlane.xlu1 %1863  ;;  %v1861_v1 = vpop.xlane.xlu0 %1860 }
 0x151   : > { %v1884_v2 = vmul.f32 0.0625, %v1864_v63  ;;  %v1883_v3 = vmul.f32 0.0625, %v1861_v1  ;;  %v1230_v4 = vpop.f32.mrf.mxu1  ;;  %v1171_v5 = vpop.f32.mrf.mxu0 }
 0x152   : > { %v1739_v6 = vadd.f32 %v1230_v4, %v697_v62  ;;  %v701_v62 = vld [vmem:[#allocation2 + $0x58] sm:$0xff]  ;;  %v4961_v4 = vld [vmem:[%s5354_s3] ss:$0 sm:$0xff] }
 0x153   : > { %v1892_v7 = vadd.f32 1e-05, %v1884_v2  ;;  %v1891_v8 = vadd.f32 1e-05, %v1883_v3  ;;  %v4331_v9 = vpop.f32.mrf.mxu1  ;;  %v4326_v10 = vpop.f32.mrf.mxu0 }
 0x154   : > { %v1870_v12 = vpop.xlane.xlu1 %1869  ;;  %v1867_v13 = vpop.xlane.xlu0 %1866  ;;  %1755 = vst.msk [vmem:[#allocation2 + $0x38] sm:$0xff] %vm673_vm0, %v1739_v6  ;;  %v702_v9 = vld [vmem:[#allocation2 + $0x60] sm:$0xff] }
 0x155   : > { %4457 = vrsqrt.f32 %v1892_v7  ;;  %v1886_v14 = vmul.f32 0.0625, %v1870_v12  ;;  %v1885_v15 = vmul.f32 0.0625, %v1867_v13  ;;  %v1233_v16 = vpop.f32.mrf.mxu1  ;;  %v1292_v17 = vpop.f32.mrf.mxu0  ;;  %v4137_v10 = vld [vmem:[%s5355_s4] ss:$0 sm:$0xff] }
 0x156   : > { %4459 = vrsqrt.f32 %v1891_v8  ;;  %v1740_v18 = vadd.f32 %v1292_v17, %v698_v11 }
 0x157   : > { %v1894_v19 = vadd.f32 1e-05, %v1886_v14  ;;  %v1893_v20 = vadd.f32 1e-05, %v1885_v15  ;;  %v4332_v21 = vpop.f32.mrf.mxu1  ;;  %v4337_v22 = vpop.f32.mrf.mxu0 }
 0x158   : > { %v1876_v26 = vpop.xlane.xlu1 %1875  ;;  %v1873_v27 = vpop.xlane.xlu0 %1872  ;;  %1756 = vst.msk [vmem:[#allocation2 + $0x40] sm:$0xff] %vm673_vm0, %v1740_v18  ;;  %v4971_v18 = vld [vmem:[#allocation2] sm:$0xff] }
 0x159   : > { %4461 = vrsqrt.f32 %v1894_v19  ;;  %v1888_v28 = vmul.f32 0.0625, %v1876_v26  ;;  %v1887_v29 = vmul.f32 0.0625, %v1873_v27  ;;  %v1354_v30 = vpop.f32.mrf.mxu1  ;;  %v1295_v0 = vpop.f32.mrf.mxu0 }
 0x15a   : > { %4463 = vrsqrt.f32 %v1893_v20  ;;  %v1741_v33 = vadd.f32 %v1354_v30, %v699_v23  ;;  %v703_v23 = vld [vmem:[#allocation2 + $0x68] sm:$0xff]  ;;  %v2108_v0 = vsel %vm673_vm0, %v4971_v18, 0.0 }
 0x15b   : > { %v1896_v34 = vadd.f32 1e-05, %v1888_v28  ;;  %v1895_v35 = vadd.f32 1e-05, %v1887_v29  ;;  %v4343_v36 = vpop.f32.mrf.mxu1  ;;  %v4338_v37 = vpop.f32.mrf.mxu0 }
 0x15c   : > { %v1882_v39 = vpop.xlane.xlu1 %1881  ;;  %v1879_v40 = vpop.xlane.xlu0 %1878  ;;  %1757 = vst.msk [vmem:[#allocation2 + $0x48] sm:$0xff] %vm673_vm0, %v1741_v33  ;;  %v4984_v37 = vld [vmem:[#allocation2 + $0x10] sm:$0xff] }
 0x15d   : > { %4465 = vrsqrt.f32 %v1896_v34  ;;  %v1890_v43 = vmul.f32 0.0625, %v1882_v39  ;;  %v1889_v46 = vmul.f32 0.0625, %v1879_v40  ;;  %v1357_v47 = vpop.f32.mrf.mxu1  ;;  %v1416_v48 = vpop.f32.mrf.mxu0 }
 0x15e   : > { %4467 = vrsqrt.f32 %v1895_v35  ;;  %v1742_v51 = vadd.f32 %v1416_v48, %v700_v38 }
 0x15f   : > { %v1898_v52 = vadd.f32 1e-05, %v1890_v43  ;;  %v1897_v53 = vadd.f32 1e-05, %v1889_v46  ;;  %v4344_v56 = vpop.f32.mrf.mxu1  ;;  %v4349_v61 = vpop.f32.mrf.mxu0 }
 0x160   : > { %1758 = vst.msk [vmem:[#allocation2 + $0x50] sm:$0xff] %vm673_vm0, %v1742_v51 }
 0x161   : > { %4469 = vrsqrt.f32 %v1898_v52  ;;  %v1478_v63 = vpop.f32.mrf.mxu1  ;;  %v1419_v1 = vpop.f32.mrf.mxu0 }
 0x162   : > { %v4458_v2 = vpop.eup %4457  ;;  %4471 = vrsqrt.f32 %v1897_v53  ;;  %v1743_v3 = vadd.f32 %v1478_v63, %v701_v62  ;;  %v2111_v53 = vsel %vm673_vm0, %v4984_v37, 0.0  ;;  %v4994_v62 = vld [vmem:[#allocation2 + $0x18] sm:$0xff] }
 0x163   : > { %v4460_v5 = vpop.eup %4459  ;;  %v4355_v6 = vpop.f32.mrf.mxu1  ;;  %v1908_v7 = vmul.f32 %v4458_v2, %v4895_v24  ;;  %v4973_v24 = vld [vmem:[#allocation2 + $0x8] sm:$0xff] }
 0x164   : > { %v4350_v8 = vpop.f32.mrf.mxu0  ;;  %1759 = vst.msk [vmem:[#allocation2 + $0x58] sm:$0xff] %vm673_vm0, %v1743_v3  ;;  %v1907_v11 = vmul.f32 %v4460_v5, %v4898_v25  ;;  %v2109_v33 = vsel %vm673_vm0, %v4973_v24, 0.0 }
 0x165   : > { %v1922_v12 = vmul.f32 %v4961_v4, %v1908_v7  ;;  %v1481_v13 = vpop.f32.mrf.mxu1  ;;  %v2110_v48 = vadd.f32 %v2109_v33, %v2108_v0  ;;  %v2113_v8 = vsel %vm673_vm0, %v4994_v62, 0.0 }
 0x166   : > { %v1540_v14 = vpop.f32.mrf.mxu0  ;;  %v4462_v15 = vpop.eup %4461  ;;  %v1921_v16 = vmul.f32 %v4961_v4, %v1907_v11 }
 0x167   : > { %v1744_v17 = vadd.f32 %v1540_v14, %v702_v9  ;;  %v4464_v19 = vpop.eup %4463  ;;  %v1910_v20 = vmul.f32 %v4462_v15, %v4905_v31  ;;  %v1936_v21 = vadd.f32 %v4137_v10, %v1922_v12  ;;  %v4356_v22 = vpop.f32.mrf.mxu1  ;;  %v2112_v6 = vadd.f32 %v2111_v53, %v2110_v48  ;;  %v5003_v12 = vld [vmem:[#allocation2 + $0x20] sm:$0xff]  ;;  %v5014_v0 = vld [vmem:[#allocation2 + $0x50] sm:$0xff] }
 0x168   : > { %v4361_v26 = vpop.f32.mrf.mxu0  ;;  %v1909_v25 = vmul.f32 %v4464_v19, %v4908_v32  ;;  %v1935_v27 = vadd.f32 %v4137_v10, %v1921_v16  ;;  %v2115_v15 = vsel %vm673_vm0, %v5003_v12, 0.0  ;;  %v1788_v16 = vld [vmem:[#allocation2 + $0x28] sm:$0xff]  ;;  %v1790_v22 = vld [vmem:[#allocation2 + $0x38] sm:$0xff] }
 0x169   : > { %1760 = vst.msk [vmem:[#allocation2 + $0x60] sm:$0xff] %vm673_vm0, %v1744_v17  ;;  %v1924_v28 = vmul.f32 %v4961_v4, %v1910_v20  ;;  %v1602_v29 = vpop.f32.mrf.mxu1  ;;  %v2114_v14 = vadd.f32 %v2113_v8, %v2112_v6  ;;  %v2117_v19 = vsel %vm673_vm0, %v1788_v16, 0.0  ;;  %v1789_v20 = vld [vmem:[#allocation2 + $0x30] sm:$0xff]  ;;  %v2121_v26 = vsel %vm673_vm0, %v1790_v22, 0.0 }
 0x16a   : > { %v1543_v30 = vpop.f32.mrf.mxu0  ;;  %v4466_v31 = vpop.eup %4465  ;;  %v4197_v34 = vpack.c.bf16 %v1936_v21, %v1935_v27  ;;  %v1923_v35 = vmul.f32 %v4961_v4, %v1909_v25  ;;  %v1745_v36 = vadd.f32 %v1602_v29, %v703_v23 }
 0x16b   : > { %v4468_v32 = vpop.eup %4467  ;;  %v1938_v38 = vadd.f32 %v4137_v10, %v1924_v28  ;;  %v1912_v39 = vmul.f32 %v4466_v31, %v4917_v41  ;;  %v4367_v40 = vpop.f32.mrf.mxu1  ;;  %v2116_v17 = vadd.f32 %v2115_v15, %v2114_v14  ;;  %v1792_v28 = vld [vmem:[#allocation2 + $0x48] sm:$0xff]  ;;  %v2127_v31 = vsel %vm673_vm0, %v5014_v0, 0.0 }
 0x16c   : > { %v4362_v43 = vpop.f32.mrf.mxu0  ;;  %4383 = vmatprep.mubr.msk.bf16.mxu0 %vm1809_vm3, %v4197_v34  ;;  %v1937_v46 = vadd.f32 %v4137_v10, %v1923_v35  ;;  %1761 = vst.msk [vmem:[#allocation2 + $0x68] sm:$0xff] %vm673_vm0, %v1745_v36  ;;  %v1911_v47 = vmul.f32 %v4468_v32, %v4920_v42  ;;  %v2125_v30 = vsel %vm673_vm0, %v1792_v28, 0.0  ;;  %v5018_v34 = vld [vmem:[#allocation2 + $0x58] sm:$0xff]  ;;  %v704_v35 = vld [vmem:[#allocation2 + $0x70] sm:$0xff] }
 0x16d   : > { %v1926_v51 = vmul.f32 %v4961_v4, %v1912_v39  ;;  %v1605_v52 = vpop.f32.mrf.mxu1  ;;  %v2118_v21 = vadd.f32 %v2117_v19, %v2116_v17  ;;  %v705_v36 = vld [vmem:[#allocation2 + $0x78] sm:$0xff] }
 0x16e   : > { %v4470_v56 = vpop.eup %4469  ;;  %v4198_v61 = vpack.c.bf16 %v1938_v38, %v1937_v46  ;;  %v1925_v41 = vmul.f32 %v4961_v4, %v1911_v47  ;;  %v2129_v38 = vsel %vm673_vm0, %v5018_v34, 0.0 }
 0x16f   : > { %v4472_v63 = vpop.eup %4471  ;;  %v1940_v1 = vadd.f32 %v4137_v10, %v1926_v51  ;;  %v1914_v2 = vmul.f32 %v4470_v56, %v4929_v57  ;;  %v4368_v3 = vpop.f32.mrf.mxu1 }
 0x170   : > { %4384 = vmatmul.mubr.msk.bf16.vlgmr.msra.gmra.mxu0 %vm1809_vm3, %v4198_v61  ;;  %v1939_v42 = vadd.f32 %v4137_v10, %v1925_v41  ;;  %v1913_v5 = vmul.f32 %v4472_v63, %v4932_v58  ;;  %v1795_v43 = vld [vmem:[#allocation2 + $0x60] sm:$0xff] }
 0x171   : > { %v1928_v7 = vmul.f32 %v4961_v4, %v1914_v2  ;;  %v2131_v53 = vsel %vm673_vm0, %v1795_v43, 0.0 }
 0x172   : > { %v4199_v9 = vpack.c.bf16 %v1940_v1, %v1939_v42  ;;  %v1927_v11 = vmul.f32 %v4961_v4, %v1913_v5  ;;  %v2119_v4 = vsel %vm673_vm0, %v1789_v20, 0.0 }
 0x173   : > { %v1942_v13 = vadd.f32 %v4137_v10, %v1928_v7  ;;  %v2120_v23 = vadd.f32 %v2119_v4, %v2118_v21  ;;  %v1796_v41 = vld [vmem:[#allocation2 + $0x68] sm:$0xff] }
 0x174   : > { %4387 = vmatprep.mubr.msk.bf16.mxu0 %vm1809_vm3, %v4199_v9  ;;  %v1941_v57 = vadd.f32 %v4137_v10, %v1927_v11  ;;  %v1791_v10 = vld [vmem:[#allocation2 + $0x40] sm:$0xff]  ;;  %v2133_v3 = vsel %vm673_vm0, %v1796_v41, 0.0 }
 0x175   : > { %v2122_v25 = vadd.f32 %v2121_v26, %v2120_v23  ;;  %v2123_v27 = vsel %vm673_vm0, %v1791_v10, 0.0 }
 0x176   : > { %v4200_v58 = vpack.c.bf16 %v1942_v13, %v1941_v57 }
 0x177   : > { %v2124_v29 = vadd.f32 %v2123_v27, %v2122_v25 }
 0x178   : > { %4388 = vmatmul.mubr.msk.bf16.gmra.mxu0 %vm1809_vm3, %v4200_v58 }
 0x179   : > { %v2126_v33 = vadd.f32 %v2125_v30, %v2124_v29 }
 0x17b   : > { %v2128_v32 = vadd.f32 %v2127_v31, %v2126_v33 }
 0x17d   : > { %v2130_v52 = vadd.f32 %v2129_v38, %v2128_v32 }
 0x17f   : > { %v2132_v2 = vadd.f32 %v2131_v53, %v2130_v52 }
 0x181   : > { %v2134_v6 = vadd.f32 %v2133_v3, %v2132_v2 }
 0x192   : > { %v1664_v39 = vpop.f32.mrf.mxu0  ;;  %v1726_v40 = vpop.f32.mrf.mxu1 }
 0x193   : > { %v1746_v46 = vadd.f32 %v1664_v39, %v704_v35  ;;  %v1747_v47 = vadd.f32 %v1726_v40, %v705_v36 }
 0x194   : > { %v4373_v48 = vpop.f32.mrf.mxu0  ;;  %v4379_v51 = vpop.f32.mrf.mxu1 }
 0x195   : > { %1762 = vst.msk [vmem:[#allocation2 + $0x70] sm:$0xff] %vm673_vm0, %v1746_v46  ;;  %1763 = vst.msk [vmem:[#allocation2 + $0x78] sm:$0xff] %vm673_vm0, %v1747_v47 }
 0x196   : > { %v1667_v56 = vpop.f32.mrf.mxu0  ;;  %v1729_v61 = vpop.f32.mrf.mxu1 }
 0x198   : > { %v4374_v63 = vpop.f32.mrf.mxu0  ;;  %v4380_v1 = vpop.f32.mrf.mxu1 }
 0x19c   : > { %v1798_v42 = vld [vmem:[#allocation2 + $0x78] sm:$0xff]  ;;  %v1797_v5 = vld [vmem:[#allocation2 + $0x70] sm:$0xff] }
 0x19d   : > { %v2135_v7 = vsel %vm673_vm0, %v1797_v5, 0.0  ;;  %v2137_v8 = vsel %vm673_vm0, %v1798_v42, 0.0 }
 0x19e   : > { %v2136_v9 = vadd.f32 %v2135_v7, %v2134_v6 }
 0x1a0   : > { %v2138_v11 = vadd.f32 %v2137_v8, %v2136_v9 }
 0x1a2   : > { %v2139_v13 = vmul.f32 0.0625, %v2138_v11 }
 0x1a4   : > { %v5029_v57 = vsub.f32 %v4971_v18, %v2139_v13  ;;  %v5032_v14 = vsub.f32 %v4973_v24, %v2139_v13  ;;  %v5035_v15 = vsub.f32 %v4984_v37, %v2139_v13  ;;  %v5038_v58 = vsub.f32 %v4994_v62, %v2139_v13 }
 0x1a5   : > { %v5045_v21 = vsub.f32 %v5003_v12, %v2139_v13  ;;  %v5049_v24 = vsub.f32 %v1788_v16, %v2139_v13  ;;  %v2146_v26 = vsub.f32 %v1789_v20, %v2139_v13  ;;  %v5058_v29 = vsub.f32 %v1790_v22, %v2139_v13 }
 0x1a6   : > { %v2156_v17 = vmul.f32 %v5029_v57, %v5029_v57  ;;  %v2157_v19 = vmul.f32 %v5032_v14, %v5032_v14  ;;  %v2158_v18 = vmul.f32 %v5035_v15, %v5035_v15  ;;  %v2159_v37 = vmul.f32 %v5038_v58, %v5038_v58 }
 0x1a7   : > { %v2160_v25 = vmul.f32 %v5045_v21, %v5045_v21  ;;  %v2161_v16 = vmul.f32 %v5049_v24, %v5049_v24  ;;  %v2148_v31 = vsub.f32 %v1791_v10, %v2139_v13  ;;  %v2162_v35 = vmul.f32 %v2146_v26, %v2146_v26 }
 0x1a8   : > { %v2172_v62 = vsel %vm673_vm0, %v2156_v17, 0.0  ;;  %v2173_v4 = vsel %vm673_vm0, %v2157_v19, 0.0  ;;  %v2175_v12 = vsel %vm673_vm0, %v2158_v18, 0.0  ;;  %v2177_v30 = vsel %vm673_vm0, %v2159_v37, 0.0 }
 0x1a9   : > { %v2174_v23 = vadd.f32 %v2173_v4, %v2172_v62  ;;  %v2179_v36 = vsel %vm673_vm0, %v2160_v25, 0.0  ;;  %v5064_v20 = vsub.f32 %v1792_v28, %v2139_v13  ;;  %v2163_v38 = vmul.f32 %v5058_v29, %v5058_v29 }
 0x1aa   : > { %v2181_v39 = vsel %vm673_vm0, %v2161_v16, 0.0  ;;  %v2150_v40 = vsub.f32 %v5014_v0, %v2139_v13  ;;  %v2164_v46 = vmul.f32 %v2148_v31, %v2148_v31  ;;  %v2183_v47 = vsel %vm673_vm0, %v2162_v35, 0.0 }
 0x1ab   : > { %v2176_v27 = vadd.f32 %v2175_v12, %v2174_v23  ;;  %v2151_v10 = vsub.f32 %v5018_v34, %v2139_v13  ;;  %v2165_v51 = vmul.f32 %v5064_v20, %v5064_v20  ;;  %v2185_v28 = vsel %vm673_vm0, %v2163_v38, 0.0 }
 0x1ac   : > { %v2152_v53 = vsub.f32 %v1795_v43, %v2139_v13  ;;  %v2166_v56 = vmul.f32 %v2150_v40, %v2150_v40  ;;  %v2187_v61 = vsel %vm673_vm0, %v2164_v46, 0.0  ;;  %v2153_v1 = vsub.f32 %v1796_v41, %v2139_v13 }
 0x1ad   : > { %v2178_v33 = vadd.f32 %v2177_v30, %v2176_v27  ;;  %v2167_v2 = vmul.f32 %v2151_v10, %v2151_v10  ;;  %v2189_v0 = vsel %vm673_vm0, %v2165_v51, 0.0  ;;  %v2154_v6 = vsub.f32 %v1797_v5, %v2139_v13 }
 0x1ae   : > { %v2168_v7 = vmul.f32 %v2152_v53, %v2152_v53  ;;  %v2191_v34 = vsel %vm673_vm0, %v2166_v56, 0.0  ;;  %v2155_v9 = vsub.f32 %v1798_v42, %v2139_v13  ;;  %v2169_v11 = vmul.f32 %v2153_v1, %v2153_v1 }
 0x1af   : > { %v2180_v32 = vadd.f32 %v2179_v36, %v2178_v33  ;;  %v2193_v17 = vsel %vm673_vm0, %v2167_v2, 0.0  ;;  %v2170_v43 = vmul.f32 %v2154_v6, %v2154_v6  ;;  %v4550_v56 = vmov 1934713408  }
 0x1b0   : > { %v2195_v18 = vsel %vm673_vm0, %v2168_v7, 0.0  ;;  %v2171_v62 = vmul.f32 %v2155_v9, %v2155_v9  ;;  %v2197_v41 = vsel %vm673_vm0, %v2169_v11, 0.0 }
 0x1b1   : > { %v2182_v22 = vadd.f32 %v2181_v39, %v2180_v32  ;;  %v2199_v23 = vsel %vm673_vm0, %v2170_v43, 0.0 }
 0x1b2   : > { %v2201_v25 = vsel %vm673_vm0, %v2171_v62, 0.0 }
 0x1b3   : > { %v2184_v48 = vadd.f32 %v2183_v47, %v2182_v22  ;;  %v4549_v47 = vmov 1983009808  }
 0x1b5   : > { %v2186_v52 = vadd.f32 %v2185_v28, %v2184_v48  ;;  %v2739_v48 = vlaneseq }
 0x1b7   : > { %v2188_v63 = vadd.f32 %v2187_v61, %v2186_v52  ;;  %v2740_v52 = vshrl.u32 %v2739_v48, 7  ;;  %v2801_v61 = vunpack.c.l.s4 %v4550_v56 }
 0x1b9   : > { %v2190_v3 = vadd.f32 %v2189_v0, %v2188_v63  ;;  %v2802_v7 = vunpack.c.0.s8 %v2801_v61 }
 0x1bb   : > { %v2192_v8 = vadd.f32 %v2191_v34, %v2190_v3 }
 0x1bd   : > { %v2194_v19 = vadd.f32 %v2193_v17, %v2192_v8 }
 0x1bf   : > { %v2196_v37 = vadd.f32 %v2195_v18, %v2194_v19  ;;  %v5113_v18 = vsub.s32 %v2802_v7, %v2740_v52 }
 0x1c1   : > { %v2198_v4 = vadd.f32 %v2197_v41, %v2196_v37 }
 0x1c3   : > { %v2200_v5 = vadd.f32 %v2199_v23, %v2198_v4 }
 0x1c5   : > { %v2202_v12 = vadd.f32 %v2201_v25, %v2200_v5 }
 0x1c7   : > { %v2203_v27 = vmul.f32 0.0625, %v2202_v12 }
 0x1c9   : > { %v2204_v42 = vadd.f32 1e-05, %v2203_v27 }
 0x1cb   : > { %4473 = vrsqrt.f32 %v2204_v42 }
 0x1d8   : > { %v4474_v13 = vpop.eup %4473 }
 0x1d9   : > { %v2207_v16 = vmul.f32 %v4474_v13, %v5032_v14  ;;  %v2206_v30 = vmul.f32 %v4474_v13, %v5029_v57  ;;  %v2210_v33 = vmul.f32 %v4474_v13, %v5045_v21  ;;  %v2208_v35 = vmul.f32 %v4474_v13, %v5035_v15 }
 0x1da   : > { %v2212_v36 = vmul.f32 %v4474_v13, %v2146_v26  ;;  %v2209_v32 = vmul.f32 %v4474_v13, %v5038_v58  ;;  %v2214_v38 = vmul.f32 %v4474_v13, %v2148_v31  ;;  %v2211_v39 = vmul.f32 %v4474_v13, %v5049_v24 }
 0x1db   : > { %2254 = vxpose.xlu1.b32.start.end [1/1] (short) (narrow) %v2207_v16, 8  ;;  %2222 = vxpose.xlu0.b32.start.end [1/1] (short) (narrow) %v2206_v30, 8  ;;  %v2216_v14 = vmul.f32 %v4474_v13, %v2150_v40  ;;  %v2213_v57 = vmul.f32 %v4474_v13, %v5058_v29  ;;  %v2218_v21 = vmul.f32 %v4474_v13, %v2152_v53 }
 0x1dc   : > { %v2215_v15 = vmul.f32 %v4474_v13, %v5064_v20  ;;  %v2220_v26 = vmul.f32 %v4474_v13, %v2154_v6  ;;  %v2217_v22 = vmul.f32 %v4474_v13, %v2151_v10  ;;  %v2219_v58 = vmul.f32 %v4474_v13, %v2153_v1 }
 0x1dd   : > { %v2221_v31 = vmul.f32 %v4474_v13, %v2155_v9  ;;  %v2737_v20 = vunpack.c.l.s4 %v4549_v47 }
 0x1df   : > { %2350 = vxpose.xlu1.b32.start.end [1/1] (short) (narrow) %v2210_v33, 8  ;;  %2286 = vxpose.xlu0.b32.start.end [1/1] (short) (narrow) %v2208_v35, 8  ;;  %v2738_v10 = vunpack.c.0.s8 %v2737_v20 }
 0x1e1   : > { %v5102_v2 = vsub.s32 %v2738_v10, %v2740_v52 }
 0x1e3   : > { %2414 = vxpose.xlu1.b32.start.end [1/1] (short) (narrow) %v2212_v36, 8  ;;  %2318 = vxpose.xlu0.b32.start.end [1/1] (short) (narrow) %v2209_v32, 8 }
 0x1e7   : > { %2478 = vxpose.xlu1.b32.start.end [1/1] (short) (narrow) %v2214_v38, 8  ;;  %2382 = vxpose.xlu0.b32.start.end [1/1] (short) (narrow) %v2211_v39, 8 }
 0x1eb   : > { %2542 = vxpose.xlu1.b32.start.end [1/1] (short) (narrow) %v2216_v14, 8  ;;  %2446 = vxpose.xlu0.b32.start.end [1/1] (short) (narrow) %v2213_v57, 8 }
 0x1ef   : > { %2606 = vxpose.xlu1.b32.start.end [1/1] (short) (narrow) %v2218_v21, 8  ;;  %2510 = vxpose.xlu0.b32.start.end [1/1] (short) (narrow) %v2215_v15, 8 }
 0x1f3   : > { %2670 = vxpose.xlu1.b32.start.end [1/1] (short) (narrow) %v2220_v26, 8  ;;  %2574 = vxpose.xlu0.b32.start.end [1/1] (short) (narrow) %v2217_v22, 8 }
 0x1f7   : > { %2638 = vxpose.xlu0.b32.start.end [1/1] (short) (narrow) %v2219_v58, 8 }
 0x1fb   : > { %2702 = vxpose.xlu0.b32.start.end [1/1] (short) (narrow) %v2221_v31, 8 }
 0x257   : > { %v5091_v24 = vpop.trf.xlu0  ;;  %v5093_v40 = vpop.trf.xlu1 }
 0x25b   : > { %v5095_v29 = vpop.trf.xlu0  ;;  %v5097_v46 = vpop.trf.xlu1 }
 0x25c   : > { %v2734_v0 = vcombine.low %v5091_v24, %v5095_v29  ;;  %v2735_v20 = vcombine.high %v5091_v24, %v5095_v29 }
 0x25e   : > { %v2742_v9 = vrot.slane %v2734_v0, %v5102_v2  ;;  %v2749_v24 = vrot.slane %v2735_v20, %v5102_v2 }
 0x25f   : > { %v2334_v51 = vpop.trf.xlu0  ;;  %v2430_v28 = vpop.trf.xlu1 }
 0x260   : > { %v2750_v53 = vcombine.low %v5093_v40, %v2334_v51  ;;  %v2766_v6 = vcombine.low %v5097_v46, %v2430_v28  ;;  %v2751_v26 = vcombine.high %v5093_v40, %v2334_v51  ;;  %v2767_v22 = vcombine.high %v5097_v46, %v2430_v28 }
 0x262   : > { %v2758_v3 = vrot.slane %v2750_v53, %v5102_v2  ;;  %v2774_v17 = vrot.slane %v2766_v6, %v5102_v2  ;;  %v2765_v40 = vrot.slane %v2751_v26, %v5102_v2  ;;  %v2781_v46 = vrot.slane %v2767_v22, %v5102_v2  ;;  %v4453_v26 = vld [vmem:[%s5360_s9] sm:$0xff]   ;;  %v4385_v22 = vpop.f32.mrf.mxu0 }
 0x263   : > { %v2398_v63 = vpop.trf.xlu0  ;;  %v5100_v1 = vpop.trf.xlu1  ;;  %4391 = vmatprep.subr.bf16.mxu1 %v4453_v26 }
 0x264   : > { %v2798_v43 = vcombine.low %v2742_v9, %v2758_v3  ;;  %v2799_v58 = vcombine.high %v2742_v9, %v2758_v3  ;;  %4392 = vmatpush3.bf16.msra.mxu1 %v4453_v26 }
 0x266   : > { %v2806_v4 = vrot.slane %v2798_v43, %v5113_v18  ;;  %v2813_v51 = vrot.slane %v2799_v58, %v5113_v18  ;;  %v2029_v58 = vpop.f32.mrf.mxu0 }
 0x267   : > { %v2462_v34 = vpop.trf.xlu0  ;;  %v5108_v8 = vpop.trf.xlu1 }
 0x268   : > { %v2782_v11 = vcombine.low %v2398_v63, %v2462_v34  ;;  %v2870_v16 = vcombine.low %v5100_v1, %v5108_v8  ;;  %v2783_v57 = vcombine.high %v2398_v63, %v2462_v34  ;;  %v2871_v29 = vcombine.high %v5100_v1, %v5108_v8 }
 0x26a   : > { %v2790_v19 = vrot.slane %v2782_v11, %v5102_v2  ;;  %v2878_v36 = vrot.slane %v2870_v16, %v5102_v2  ;;  %v2797_v48 = vrot.slane %v2783_v57, %v5102_v2  ;;  %v2814_v11 = vcombine.low %v2749_v24, %v2765_v40 }
 0x26b   : > { %v2526_v37 = vpop.trf.xlu0  ;;  %v2622_v41 = vpop.trf.xlu1 }
 0x26c   : > { %v2830_v62 = vcombine.low %v2774_v17, %v2790_v19  ;;  %v2831_v21 = vcombine.high %v2774_v17, %v2790_v19  ;;  %v2846_v3 = vcombine.low %v2781_v46, %v2797_v48 }
 0x26e   : > { %v2838_v23 = vrot.slane %v2830_v62, %v5113_v18  ;;  %v2845_v10 = vrot.slane %v2831_v21, %v5113_v18 }
 0x26f   : > { %v2590_v5 = vpop.trf.xlu0  ;;  %v2686_v42 = vpop.trf.xlu1 }
 0x270   : > { %v2863_v25 = vcombine.high %v2806_v4, %v2838_v23  ;;  %v2862_v12 = vcombine.low %v2806_v4, %v2838_v23  ;;  %v2886_v27 = vcombine.low %v2526_v37, %v2590_v5  ;;  %v2902_v33 = vcombine.low %v2622_v41, %v2686_v42 }
 0x271   : > { %v2887_v28 = vcombine.high %v2526_v37, %v2590_v5  ;;  %v2903_v0 = vcombine.high %v2622_v41, %v2686_v42  ;;  %v2865_v7 = vcombine.high %v2813_v51, %v2845_v10  ;;  %v2864_v34 = vcombine.low %v2813_v51, %v2845_v10  ;;  %v4138_v10 = vld [vmem:[%s5357_s6] ss:$0 sm:$0xff] }
 0x272   : > { %3038 = vxpose.xlu0.b32.start [1/2] (short) (narrow) %v2863_v25, 8  ;;  %3006 = vxpose.xlu1.b32.start [1/2] (short) (narrow) %v2862_v12, 8  ;;  %v2894_v30 = vrot.slane %v2886_v27, %v5102_v2  ;;  %v2910_v39 = vrot.slane %v2902_v33, %v5102_v2  ;;  %v2885_v37 = vrot.slane %v2871_v29, %v5102_v2 }
 0x273   : > { %v2654_v13 = vpop.trf.xlu0  ;;  %v2901_v17 = vrot.slane %v2887_v28, %v5102_v2  ;;  %v2917_v19 = vrot.slane %v2903_v0, %v5102_v2  ;;  %v2854_v41 = vrot.slane %v2846_v3, %v5113_v18  ;;  %v2822_v23 = vrot.slane %v2814_v11, %v5113_v18 }
 0x274   : > { %v2934_v38 = vcombine.low %v2878_v36, %v2894_v30  ;;  %v2935_v63 = vcombine.high %v2878_v36, %v2894_v30  ;;  %v2847_v27 = vcombine.high %v2781_v46, %v2797_v48 }
 0x275   : > { %v2950_v4 = vcombine.low %v2885_v37, %v2901_v17  ;;  %v2867_v5 = vcombine.high %v2822_v23, %v2854_v41  ;;  %v2866_v25 = vcombine.low %v2822_v23, %v2854_v41  ;;  %v2951_v36 = vcombine.high %v2885_v37, %v2901_v17 }
 0x276   : > { %v2942_v31 = vrot.slane %v2934_v38, %v5113_v18  ;;  %v2949_v43 = vrot.slane %v2935_v63, %v5113_v18 }
 0x277   : > { %v2718_v35 = vpop.trf.xlu0  ;;  %v2958_v42 = vrot.slane %v2950_v4, %v5113_v18  ;;  %v2965_v57 = vrot.slane %v2951_v36, %v5113_v18 }
 0x278   : > { %v2918_v32 = vcombine.low %v2654_v13, %v2718_v35  ;;  %v2919_v52 = vcombine.high %v2654_v13, %v2718_v35  ;;  %v2815_v13 = vcombine.high %v2749_v24, %v2765_v40  ;;  %v2861_v35 = vrot.slane %v2847_v27, %v5113_v18 }
 0x27a   : > { %v2926_v14 = vrot.slane %v2918_v32, %v5102_v2  ;;  %v2933_v6 = vrot.slane %v2919_v52, %v5102_v2  ;;  %v2829_v32 = vrot.slane %v2815_v13, %v5113_v18 }
 0x27c   : > { %v2966_v15 = vcombine.low %v2910_v39, %v2926_v14  ;;  %v2967_v53 = vcombine.high %v2910_v39, %v2926_v14  ;;  %v2982_v62 = vcombine.low %v2917_v19, %v2933_v6  ;;  %v2983_v16 = vcombine.high %v2917_v19, %v2933_v6 }
 0x27d   : > { %v2869_v38 = vcombine.high %v2829_v32, %v2861_v35  ;;  %v2868_v39 = vcombine.low %v2829_v32, %v2861_v35 }
 0x27e   : > { %v2974_v47 = vrot.slane %v2966_v15, %v5113_v18  ;;  %v2981_v9 = vrot.slane %v2967_v53, %v5113_v18  ;;  %v2990_v12 = vrot.slane %v2982_v62, %v5113_v18  ;;  %v2997_v14 = vrot.slane %v2983_v16, %v5113_v18 }
 0x27f   : > { %v2038_v53 = vadd.f32 %v4385_v22, %v4138_v10 }
 0x280   : > { %v2999_v56 = vcombine.high %v2942_v31, %v2974_v47  ;;  %v2998_v61 = vcombine.low %v2942_v31, %v2974_v47  ;;  %v3001_v1 = vcombine.high %v2949_v43, %v2981_v9  ;;  %v3000_v8 = vcombine.low %v2949_v43, %v2981_v9  ;;  %v4386_v31 = vpop.f32.mrf.mxu0 }
 0x281   : > { %v3003_v30 = vcombine.high %v2958_v42, %v2990_v12  ;;  %v3002_v33 = vcombine.low %v2958_v42, %v2990_v12  ;;  %v3005_v21 = vcombine.high %v2965_v57, %v2997_v14  ;;  %v3004_v15 = vcombine.low %v2965_v57, %v2997_v14 }
 0x282   : > { %3039 = vxpose.xlu0.b32.end [2/2] (short) (narrow) %v2999_v56, 8  ;;  %3007 = vxpose.xlu1.b32.end [2/2] (short) (narrow) %v2998_v61, 8  ;;  %v2032_v47 = vpop.f32.mrf.mxu0  ;;  %v2030_v56 = vadd.f32 %v4138_v10, %v2029_v58  ;;  %v2041_v61 = vadd.f32 %v4386_v31, %v4138_v10  ;;  %v4150_v51 = vmul.f32 -1.442695, %v2038_v53 }
 0x283   : > { %v2033_v40 = vadd.f32 %v4138_v10, %v2032_v47 }
 0x284   : > { %v4389_v20 = vpop.f32.mrf.mxu0  ;;  %v4148_v63 = vmul.f32 -1.442695, %v2030_v56  ;;  %v4151_v0 = vmul.f32 -1.442695, %v2041_v61  ;;  %4475 = vpow2.f32 %v4150_v51 }
 0x285   : > { %v4149_v29 = vmul.f32 -1.442695, %v2033_v40  ;;  %v2054_v6 = vadd.f32 %v4389_v20, %v4138_v10 }
 0x286   : > { %3102 = vxpose.xlu0.b32.start [1/2] (short) (narrow) %v2865_v7, 8  ;;  %3070 = vxpose.xlu1.b32.start [1/2] (short) (narrow) %v2864_v34, 8  ;;  %v2045_v48 = vpop.f32.mrf.mxu0  ;;  %4477 = vpow2.f32 %v4148_v63 }
 0x287   : > { %v2046_v28 = vadd.f32 %v4138_v10, %v2045_v48  ;;  %4479 = vpow2.f32 %v4151_v0  ;;  %v4154_v9 = vmul.f32 -1.442695, %v2054_v6 }
 0x288   : > { %v4390_v52 = vpop.f32.mrf.mxu0  ;;  %4481 = vpow2.f32 %v4149_v29 }
 0x289   : > { %v4152_v3 = vmul.f32 -1.442695, %v2046_v28  ;;  %v2057_v34 = vadd.f32 %v4390_v52, %v4138_v10 }
 0x28a   : > { %3103 = vxpose.xlu0.b32.end [2/2] (short) (narrow) %v3001_v1, 8  ;;  %3071 = vxpose.xlu1.b32.end [2/2] (short) (narrow) %v3000_v8, 8  ;;  %v2048_v46 = vpop.f32.mrf.mxu0 }
 0x28b   : > { %v2049_v24 = vadd.f32 %v4138_v10, %v2048_v46  ;;  %4483 = vpow2.f32 %v4152_v3  ;;  %v4155_v11 = vmul.f32 -1.442695, %v2057_v34 }
 0x28d   : > { %v4153_v7 = vmul.f32 -1.442695, %v2049_v24 }
 0x28e   : > { %3166 = vxpose.xlu0.b32.start [1/2] (short) (narrow) %v2867_v5, 8  ;;  %3134 = vxpose.xlu1.b32.start [1/2] (short) (narrow) %v2866_v25, 8 }
 0x28f   : > { %4485 = vpow2.f32 %v4153_v7 }
 0x290   : > { %4487 = vpow2.f32 %v4154_v9 }
 0x291   : > { %4489 = vpow2.f32 %v4155_v11  ;;  %v4476_v43 = vpop.eup %4475 }
 0x292   : > { %3167 = vxpose.xlu0.b32.end [2/2] (short) (narrow) %v3003_v30, 8  ;;  %3135 = vxpose.xlu1.b32.end [2/2] (short) (narrow) %v3002_v33, 8  ;;  %v2086_v4 = vadd.f32 1.0, %v4476_v43 }
 0x293   : > { %v4478_v37 = vpop.eup %4477 }
 0x294   : > { %v4480_v8 = vpop.eup %4479  ;;  %v2084_v5 = vadd.f32 1.0, %v4478_v37  ;;  %4491 = vrcp.f32 %v2086_v4  ;;  %v4157_v4 = vld [vmem:[%s5359_s8] ss:$0 sm:$0xff] }
 0x295   : > { %v4482_v41 = vpop.eup %4481  ;;  %v2087_v25 = vadd.f32 1.0, %v4480_v8 }
 0x296   : > { %3230 = vxpose.xlu0.b32.start [1/2] (short) (narrow) %v2869_v38, 8  ;;  %3198 = vxpose.xlu1.b32.start [1/2] (short) (narrow) %v2868_v39, 8  ;;  %v2085_v30 = vadd.f32 1.0, %v4482_v41  ;;  %4493 = vrcp.f32 %v2084_v5 }
 0x297   : > { %4495 = vrcp.f32 %v2087_v25 }
 0x298   : > { %v4484_v23 = vpop.eup %4483  ;;  %4497 = vrcp.f32 %v2085_v30 }
 0x299   : > { %v2088_v33 = vadd.f32 1.0, %v4484_v23 }
 0x29a   : > { %3231 = vxpose.xlu0.b32.end [2/2] (short) (narrow) %v3005_v21, 8  ;;  %3199 = vxpose.xlu1.b32.end [2/2] (short) (narrow) %v3004_v15, 8 }
 0x29b   : > { %4499 = vrcp.f32 %v2088_v33 }
 0x29c   : > { %v4486_v16 = vpop.eup %4485 }
 0x29d   : > { %v2089_v32 = vadd.f32 1.0, %v4486_v16  ;;  %v4488_v14 = vpop.eup %4487 }
 0x29e   : > { %v4490_v22 = vpop.eup %4489  ;;  %v2090_v48 = vadd.f32 1.0, %v4488_v14 }
 0x29f   : > { %4501 = vrcp.f32 %v2089_v32  ;;  %v2091_v46 = vadd.f32 1.0, %v4490_v22 }
 0x2a0   : > { %4503 = vrcp.f32 %v2090_v48 }
 0x2a1   : > { %4505 = vrcp.f32 %v2091_v46  ;;  %v4492_v43 = vpop.eup %4491 }
 0x2a3   : > { %v4494_v41 = vpop.eup %4493 }
 0x2fa   : > { %v3054_v17 = vpop.trf.xlu0  ;;  %v3022_v19 = vpop.trf.xlu1 }
 0x302   : > { %v3118_v62 = vpop.trf.xlu0  ;;  %v3086_v1 = vpop.trf.xlu1 }
 0x303   : > { %v3278_v12 = vcombine.low %v3054_v17, %v3118_v62  ;;  %v3262_v27 = vcombine.low %v3022_v19, %v3086_v1  ;;  %v3279_v35 = vcombine.high %v3054_v17, %v3118_v62  ;;  %v3263_v36 = vcombine.high %v3022_v19, %v3086_v1  ;;  %v4156_v19 = vld [vmem:[%s5358_s7] ss:$0 sm:$0xff] }
 0x305   : > { %v3286_v38 = vrot.slane %v3278_v12, %v5102_v2  ;;  %v3270_v39 = vrot.slane %v3262_v27, %v5102_v2  ;;  %v3293_v57 = vrot.slane %v3279_v35, %v5102_v2  ;;  %v3277_v21 = vrot.slane %v3263_v36, %v5102_v2  ;;  %v4496_v27 = vpop.eup %4495 }
 0x306   : > { %v4498_v30 = vpop.eup %4497 }
 0x307   : > { %v3326_v10 = vcombine.low %v3270_v39, %v3286_v38  ;;  %v3327_v52 = vcombine.high %v3270_v39, %v3286_v38  ;;  %v3342_v51 = vcombine.low %v3277_v21, %v3293_v57  ;;  %v3343_v28 = vcombine.high %v3277_v21, %v3293_v57  ;;  %v4500_v36 = vpop.eup %4499 }
 0x308   : > { %v4502_v22 = vpop.eup %4501 }
 0x309   : > { %v3334_v3 = vrot.slane %v3326_v10, %v5113_v18  ;;  %v3341_v6 = vrot.slane %v3327_v52, %v5113_v18  ;;  %v3350_v11 = vrot.slane %v3342_v51, %v5113_v18  ;;  %v3357_v17 = vrot.slane %v3343_v28, %v5113_v18 }
 0x30a   : > { %v3182_v42 = vpop.trf.xlu0  ;;  %v3150_v13 = vpop.trf.xlu1 }
 0x312   : > { %v3246_v15 = vpop.trf.xlu0  ;;  %v3214_v26 = vpop.trf.xlu1 }
 0x313   : > { %v3310_v58 = vcombine.low %v3182_v42, %v3246_v15  ;;  %v3311_v31 = vcombine.high %v3182_v42, %v3246_v15  ;;  %v3294_v47 = vcombine.low %v3150_v13, %v3214_v26  ;;  %v3295_v20 = vcombine.high %v3150_v13, %v3214_v26 }
 0x315   : > { %v3318_v53 = vrot.slane %v3310_v58, %v5102_v2  ;;  %v3325_v56 = vrot.slane %v3311_v31, %v5102_v2  ;;  %v3302_v61 = vrot.slane %v3294_v47, %v5102_v2  ;;  %v3309_v40 = vrot.slane %v3295_v20, %v5102_v2 }
 0x317   : > { %v3358_v63 = vcombine.low %v3302_v61, %v3318_v53  ;;  %v3359_v0 = vcombine.high %v3302_v61, %v3318_v53  ;;  %v3374_v24 = vcombine.low %v3309_v40, %v3325_v56  ;;  %v3375_v29 = vcombine.high %v3309_v40, %v3325_v56  ;;  %v4504_v40 = vpop.eup %4503 }
 0x318   : > { %v4506_v51 = vpop.eup %4505 }
 0x319   : > { %v3366_v7 = vrot.slane %v3358_v63, %v5113_v18  ;;  %v3373_v34 = vrot.slane %v3359_v0, %v5113_v18  ;;  %v3382_v9 = vrot.slane %v3374_v24, %v5113_v18  ;;  %v3389_v2 = vrot.slane %v3375_v29, %v5113_v18  ;;  %v4158_v29 = vld [vmem:[%s5361_s10] ss:$0 sm:$0xff] }
 0x31b   : > { %v3390_v37 = vcombine.low %v3334_v3, %v3366_v7  ;;  %v3391_v62 = vcombine.high %v3334_v3, %v3366_v7  ;;  %v3392_v1 = vcombine.low %v3341_v6, %v3373_v34  ;;  %v3393_v8 = vcombine.high %v3341_v6, %v3373_v34 }
 0x31c   : > { %v3394_v23 = vcombine.low %v3350_v11, %v3382_v9  ;;  %v3395_v5 = vcombine.high %v3350_v11, %v3382_v9  ;;  %v3396_v25 = vcombine.low %v3357_v17, %v3389_v2  ;;  %v3397_v12 = vcombine.high %v3357_v17, %v3389_v2 }
 0x31d   : > { %v3404_v18 = vmul.f32 %v4156_v19, %v3390_v37  ;;  %v3405_v42 = vmul.f32 %v4156_v19, %v3391_v62  ;;  %v3406_v13 = vmul.f32 %v4156_v19, %v3392_v1  ;;  %v3407_v16 = vmul.f32 %v4156_v19, %v3393_v8 }
 0x31e   : > { %v3408_v33 = vmul.f32 %v4156_v19, %v3394_v23  ;;  %v3409_v35 = vmul.f32 %v4156_v19, %v3395_v5  ;;  %v3410_v57 = vmul.f32 %v4156_v19, %v3396_v25  ;;  %v3411_v21 = vmul.f32 %v4156_v19, %v3397_v12 }
 0x31f   : > { %v3420_v32 = vadd.f32 %v4157_v4, %v3406_v13  ;;  %v3421_v38 = vadd.f32 %v4157_v4, %v3407_v16  ;;  %v3418_v39 = vadd.f32 %v4157_v4, %v3404_v18  ;;  %v3419_v14 = vadd.f32 %v4157_v4, %v3405_v42 }
 0x320   : > { %v3422_v15 = vadd.f32 %v4157_v4, %v3408_v33  ;;  %v3423_v26 = vadd.f32 %v4157_v4, %v3409_v35  ;;  %v3424_v56 = vadd.f32 %v4157_v4, %v3410_v57  ;;  %v3425_v61 = vadd.f32 %v4157_v4, %v3411_v21 }
 0x321   : > { %v3426_v58 = vmul.f32 %v4494_v41, %v3418_v39  ;;  %v3427_v31 = vmul.f32 %v4498_v30, %v3419_v14  ;;  %v3428_v47 = vmul.f32 %v4492_v43, %v3420_v32  ;;  %v3429_v20 = vmul.f32 %v4496_v27, %v3421_v38 }
 0x322   : > { %v3430_v48 = vmul.f32 %v4500_v36, %v3422_v15  ;;  %v3431_v10 = vmul.f32 %v4502_v22, %v3423_v26  ;;  %v3432_v28 = vmul.f32 %v4504_v40, %v3424_v56  ;;  %v3433_v63 = vmul.f32 %v4506_v51, %v3425_v61 }
 0x323   : > { %v4201_v52 = vpack.c.bf16 %v3427_v31, %v3426_v58  ;;  %v4202_v53 = vpack.c.bf16 %v3429_v20, %v3428_v47 }
 0x324   : > { %v4203_v46 = vpack.c.bf16 %v3431_v10, %v3430_v48  ;;  %v4204_v0 = vpack.c.bf16 %v3433_v63, %v3432_v28 }
 0x325   : > { %4393 = vmatprep.mubr.msk.bf16.mxu1 %vm1809_vm3, %v4201_v52 }
 0x326   : > { %4394 = vmatmul.mubr.msk.bf16.vlgmr.msra.gmra.mxu1 %vm1809_vm3, %v4202_v53 }
 0x327   : > { %4397 = vmatprep.mubr.msk.bf16.mxu1 %vm1809_vm3, %v4203_v46 }
 0x32e   : > { %4398 = vmatmul.mubr.msk.bf16.gmra.mxu1 %vm1809_vm3, %v4204_v0 }
 0x3e6   : > { %v4395_v24 = vpop.f32.mrf.mxu1 }
 0x3e7   : > { %v3529_v6 = vadd.f32 %v4395_v24, %v4158_v29 }
 0x3e8   : > { %v3520_v3 = vpop.f32.mrf.mxu1 }
 0x3e9   : > { %v3521_v7 = vadd.f32 %v4158_v29, %v3520_v3  ;;  %v5190_v17 = vadd.f32 %v4794_v50, %v3529_v6 }
 0x3ea   : > { %v4396_v34 = vpop.f32.mrf.mxu1 }
 0x3eb   : > { %v5187_v9 = vadd.f32 %v4786_v45, %v3521_v7  ;;  %v3532_v2 = vadd.f32 %v4396_v34, %v4158_v29  ;;  %v3567_v50 = vsel %vm1809_vm3, %v5190_v17, 0.0 }
 0x3ec   : > { %v3523_v11 = vpop.f32.mrf.mxu1 }
 0x3ed   : > { %v3524_v19 = vadd.f32 %v4158_v29, %v3523_v11  ;;  %v3561_v43 = vsel %vm1809_vm3, %v5187_v9, 0.0  ;;  %v5198_v1 = vadd.f32 %v4792_v49, %v3532_v2 }
 0x3ee   : > { %v4399_v37 = vpop.f32.mrf.mxu1  ;;  %3562 = vadd.xlane.f32.xlu1 %v3561_v43  ;;  %v4454_v43 = vld [vmem:[%s5364_s13] sm:$0xff]  }
 0x3ef   : > { %v5195_v62 = vadd.f32 %v4784_v44, %v3524_v19  ;;  %v3545_v45 = vadd.f32 %v4399_v37, %v4158_v29  ;;  %v3570_v49 = vsel %vm1809_vm3, %v5198_v1, 0.0  ;;  %4401 = vmatprep.subr.bf16.mxu0 %v4454_v43  ;;  %v4455_v37 = vld [vmem:[%s5366_s15 + $0x8] sm:$0xff]  }
 0x3f0   : > { %v3536_v8 = vpop.f32.mrf.mxu1  ;;  %4402 = vmatpush3.bf16.msra.mxu0 %v4454_v43  ;;  %4411 = vmatprep.subr.bf16.mxu1 %v4455_v37 }
 0x3f1   : > { %v3537_v41 = vadd.f32 %v4158_v29, %v3536_v8  ;;  %v3564_v4 = vsel %vm1809_vm3, %v5195_v62, 0.0  ;;  %v5210_v25 = vadd.f32 %v4810_v60, %v3545_v45  ;;  %4412 = vmatpush3.bf16.msra.mxu1 %v4455_v37 }
 0x3f2   : > { %v4400_v23 = vpop.f32.mrf.mxu1  ;;  %3565 = vadd.xlane.f32.xlu0 %v3564_v4  ;;  %3568 = vadd.xlane.f32.xlu1 %v3567_v50 }
 0x3f3   : > { %v5205_v5 = vadd.f32 %v4802_v55, %v3537_v41  ;;  %v3548_v12 = vadd.f32 %v4400_v23, %v4158_v29  ;;  %v3579_v13 = vsel %vm1809_vm3, %v5210_v25, 0.0 }
 0x3f4   : > { %v3539_v44 = vpop.f32.mrf.mxu1 }
 0x3f5   : > { %v3540_v27 = vadd.f32 %v4158_v29, %v3539_v44  ;;  %v3573_v18 = vsel %vm1809_vm3, %v5205_v5, 0.0  ;;  %v5218_v55 = vadd.f32 %v4808_v59, %v3548_v12 }
 0x3f6   : > { %3574 = vadd.xlane.f32.xlu0 %v3573_v18  ;;  %3571 = vadd.xlane.f32.xlu1 %v3570_v49 }
 0x3f7   : > { %v5215_v42 = vadd.f32 %v4800_v54, %v3540_v27  ;;  %v3582_v16 = vsel %vm1809_vm3, %v5218_v55, 0.0 }
 0x3f9   : > { %v3576_v60 = vsel %vm1809_vm3, %v5215_v42, 0.0 }
 0x3fa   : > { %3580 = vadd.xlane.f32.xlu0 %v3579_v13  ;;  %3577 = vadd.xlane.f32.xlu1 %v3576_v60 }
 0x3fe   : > { %3583 = vadd.xlane.f32.xlu1 %v3582_v16 }
 0x477   : > { %v3563_v30 = vpop.xlane.xlu1 %3562 }
 0x478   : > { %v3585_v33 = vmul.f32 0.0625, %v3563_v30 }
 0x47a   : > { %v5227_v54 = vsub.f32 %v5187_v9, %v3585_v33 }
 0x47b   : > { %v3566_v35 = vpop.xlane.xlu0 %3565  ;;  %v3569_v59 = vpop.xlane.xlu1 %3568 }
 0x47c   : > { %v3586_v36 = vmul.f32 0.0625, %v3566_v35  ;;  %v3587_v32 = vmul.f32 0.0625, %v3569_v59  ;;  %v3601_v38 = vmul.f32 %v5227_v54, %v5227_v54 }
 0x47e   : > { %v5232_v39 = vsub.f32 %v5195_v62, %v3586_v36  ;;  %v5235_v14 = vsub.f32 %v5190_v17, %v3587_v32  ;;  %v3609_v57 = vsel %vm1809_vm3, %v3601_v38, 0.0 }
 0x47f   : > { %v3575_v21 = vpop.xlane.xlu0 %3574  ;;  %3610 = vadd.xlane.f32.xlu0 %v3609_v57  ;;  %v3572_v15 = vpop.xlane.xlu1 %3571 }
 0x480   : > { %v3589_v26 = vmul.f32 0.0625, %v3575_v21  ;;  %v3588_v22 = vmul.f32 0.0625, %v3572_v15  ;;  %v3602_v58 = vmul.f32 %v5232_v39, %v5232_v39  ;;  %v3603_v31 = vmul.f32 %v5235_v14, %v5235_v14 }
 0x482   : > { %v5243_v47 = vsub.f32 %v5205_v5, %v3589_v26  ;;  %v5246_v20 = vsub.f32 %v5198_v1, %v3588_v22  ;;  %v3612_v48 = vsel %vm1809_vm3, %v3602_v58, 0.0  ;;  %v3615_v10 = vsel %vm1809_vm3, %v3603_v31, 0.0  ;;  %v4168_v58 = vld [vmem:[%s5362_s11] ss:$0 sm:$0xff] }
 0x483   : > { %v3581_v52 = vpop.xlane.xlu0 %3580  ;;  %3613 = vadd.xlane.f32.xlu1 %v3612_v48  ;;  %3616 = vadd.xlane.f32.xlu0 %v3615_v10  ;;  %v3578_v53 = vpop.xlane.xlu1 %3577 }
 0x484   : > { %v3591_v56 = vmul.f32 0.0625, %v3581_v52  ;;  %v3590_v61 = vmul.f32 0.0625, %v3578_v53  ;;  %v3605_v40 = vmul.f32 %v5243_v47, %v5243_v47  ;;  %v3604_v46 = vmul.f32 %v5246_v20, %v5246_v20  ;;  %v4169_v53 = vld [vmem:[%s5363_s12] ss:$0 sm:$0xff] }
 0x486   : > { %v5255_v51 = vsub.f32 %v5210_v25, %v3591_v56  ;;  %v5258_v28 = vsub.f32 %v5215_v42, %v3590_v61  ;;  %v3621_v63 = vsel %vm1809_vm3, %v3605_v40, 0.0  ;;  %v3618_v0 = vsel %vm1809_vm3, %v3604_v46, 0.0 }
 0x487   : > { %3622 = vadd.xlane.f32.xlu0 %v3621_v63  ;;  %3619 = vadd.xlane.f32.xlu1 %v3618_v0  ;;  %v3584_v24 = vpop.xlane.xlu1 %3583 }
 0x488   : > { %v3592_v29 = vmul.f32 0.0625, %v3584_v24  ;;  %v3607_v3 = vmul.f32 %v5255_v51, %v5255_v51  ;;  %v3606_v6 = vmul.f32 %v5258_v28, %v5258_v28 }
 0x48a   : > { %v5267_v7 = vsub.f32 %v5218_v55, %v3592_v29  ;;  %v3627_v34 = vsel %vm1809_vm3, %v3607_v3, 0.0  ;;  %v3624_v2 = vsel %vm1809_vm3, %v3606_v6, 0.0 }
 0x48b   : > { %3628 = vadd.xlane.f32.xlu0 %v3627_v34  ;;  %3625 = vadd.xlane.f32.xlu1 %v3624_v2 }
 0x48c   : > { %v3608_v11 = vmul.f32 %v5267_v7, %v5267_v7 }
 0x48e   : > { %v3630_v19 = vsel %vm1809_vm3, %v3608_v11, 0.0 }
 0x48f   : > { %3631 = vadd.xlane.f32.xlu1 %v3630_v19 }
 0x508   : > { %v3611_v8 = vpop.xlane.xlu0 %3610 }
 0x509   : > { %v3633_v45 = vmul.f32 0.0625, %v3611_v8 }
 0x50b   : > { %v3641_v41 = vadd.f32 1e-05, %v3633_v45 }
 0x50c   : > { %v3617_v4 = vpop.xlane.xlu0 %3616  ;;  %v3614_v50 = vpop.xlane.xlu1 %3613 }
 0x50d   : > { %4507 = vrsqrt.f32 %v3641_v41  ;;  %v3635_v23 = vmul.f32 0.0625, %v3617_v4  ;;  %v3634_v44 = vmul.f32 0.0625, %v3614_v50 }
 0x50f   : > { %v3643_v49 = vadd.f32 1e-05, %v3635_v23  ;;  %v3642_v12 = vadd.f32 1e-05, %v3634_v44 }
 0x510   : > { %v3623_v27 = vpop.xlane.xlu0 %3622  ;;  %v3620_v18 = vpop.xlane.xlu1 %3619 }
 0x511   : > { %4509 = vrsqrt.f32 %v3643_v49  ;;  %v3637_v13 = vmul.f32 0.0625, %v3623_v27  ;;  %v3636_v60 = vmul.f32 0.0625, %v3620_v18  ;;  %v4170_v27 = vld [vmem:[%s5365_s14] ss:$0 sm:$0xff] }
 0x512   : > { %4511 = vrsqrt.f32 %v3642_v12 }
 0x513   : > { %v3645_v16 = vadd.f32 1e-05, %v3637_v13  ;;  %v3644_v30 = vadd.f32 1e-05, %v3636_v60 }
 0x514   : > { %v3629_v33 = vpop.xlane.xlu0 %3628  ;;  %v3626_v35 = vpop.xlane.xlu1 %3625 }
 0x515   : > { %4513 = vrsqrt.f32 %v3645_v16  ;;  %v3639_v59 = vmul.f32 0.0625, %v3629_v33  ;;  %v3638_v36 = vmul.f32 0.0625, %v3626_v35 }
 0x516   : > { %4515 = vrsqrt.f32 %v3644_v30 }
 0x517   : > { %v3647_v32 = vadd.f32 1e-05, %v3639_v59  ;;  %v3646_v38 = vadd.f32 1e-05, %v3638_v36 }
 0x518   : > { %v3632_v57 = vpop.xlane.xlu1 %3631 }
 0x519   : > { %4517 = vrsqrt.f32 %v3647_v32  ;;  %v3640_v21 = vmul.f32 0.0625, %v3632_v57 }
 0x51a   : > { %v4508_v15 = vpop.eup %4507  ;;  %4519 = vrsqrt.f32 %v3646_v38 }
 0x51b   : > { %v3648_v26 = vadd.f32 1e-05, %v3640_v21  ;;  %v3657_v22 = vmul.f32 %v4508_v15, %v5227_v54 }
 0x51d   : > { %4521 = vrsqrt.f32 %v3648_v26  ;;  %v3671_v10 = vmul.f32 %v4168_v58, %v3657_v22 }
 0x51e   : > { %v4510_v31 = vpop.eup %4509 }
 0x51f   : > { %v4512_v48 = vpop.eup %4511  ;;  %v3659_v52 = vmul.f32 %v4510_v31, %v5235_v14  ;;  %v3685_v54 = vadd.f32 %v4169_v53, %v3671_v10 }
 0x520   : > { %v3658_v56 = vmul.f32 %v4512_v48, %v5232_v39 }
 0x521   : > { %v3673_v63 = vmul.f32 %v4168_v58, %v3659_v52 }
 0x522   : > { %v4514_v61 = vpop.eup %4513  ;;  %v3672_v40 = vmul.f32 %v4168_v58, %v3658_v56 }
 0x523   : > { %v4516_v46 = vpop.eup %4515  ;;  %v3661_v29 = vmul.f32 %v4514_v61, %v5243_v47  ;;  %v3687_v11 = vadd.f32 %v4169_v53, %v3673_v63 }
 0x524   : > { %v3660_v0 = vmul.f32 %v4516_v46, %v5246_v20  ;;  %v3686_v24 = vadd.f32 %v4169_v53, %v3672_v40 }
 0x525   : > { %v3675_v43 = vmul.f32 %v4168_v58, %v3661_v29 }
 0x526   : > { %v4518_v3 = vpop.eup %4517  ;;  %v3674_v6 = vmul.f32 %v4168_v58, %v3660_v0  ;;  %v4205_v34 = vpack.c.bf16 %v3686_v24, %v3685_v54  ;;  %v4180_v54 = vld [vmem:[%s5367_s16] ss:$0 sm:$0xff] }
 0x527   : > { %v4520_v14 = vpop.eup %4519  ;;  %v3663_v2 = vmul.f32 %v4518_v3, %v5255_v51  ;;  %v3689_v47 = vadd.f32 %v4169_v53, %v3675_v43 }
 0x528   : > { %4403 = vmatprep.mubr.msk.bf16.mxu0 %vm1809_vm3, %v4205_v34  ;;  %v3688_v39 = vadd.f32 %v4169_v53, %v3674_v6  ;;  %v3662_v19 = vmul.f32 %v4520_v14, %v5258_v28  ;;  %v4456_v28 = vld [vmem:[%s5366_s15] sm:$0xff]  }
 0x529   : > { %v3677_v41 = vmul.f32 %v4168_v58, %v3663_v2  ;;  %4413 = vmatprep.subr.bf16.mxu1 %v4456_v28 }
 0x52a   : > { %v4522_v37 = vpop.eup %4521  ;;  %v4206_v8 = vpack.c.bf16 %v3688_v39, %v3687_v11  ;;  %v3676_v45 = vmul.f32 %v4168_v58, %v3662_v19  ;;  %4414 = vmatpush3.bf16.msra.mxu1 %v4456_v28 }
 0x52b   : > { %v3664_v20 = vmul.f32 %v4522_v37, %v5267_v7  ;;  %v3691_v51 = vadd.f32 %v4169_v53, %v3677_v41 }
 0x52c   : > { %4404 = vmatmul.mubr.msk.bf16.vlgmr.msra.gmra.mxu0 %vm1809_vm3, %v4206_v8  ;;  %v3690_v4 = vadd.f32 %v4169_v53, %v3676_v45 }
 0x52d   : > { %v3678_v50 = vmul.f32 %v4168_v58, %v3664_v20 }
 0x52e   : > { %v4207_v23 = vpack.c.bf16 %v3690_v4, %v3689_v47 }
 0x52f   : > { %v3692_v44 = vadd.f32 %v4169_v53, %v3678_v50 }
 0x530   : > { %4407 = vmatprep.mubr.msk.bf16.mxu0 %vm1809_vm3, %v4207_v23 }
 0x531   : > { %v4208_v49 = vpack.c.bf16 %v3692_v44, %v3691_v51 }
 0x534   : > { %4408 = vmatmul.mubr.msk.bf16.gmra.mxu0 %vm1809_vm3, %v4208_v49 }
 0x5ec   : > { %v4405_v7 = vpop.f32.mrf.mxu0 }
 0x5ed   : > { %v3791_v16 = vadd.f32 %v4405_v7, %v4170_v27 }
 0x5ee   : > { %v3782_v12 = vpop.f32.mrf.mxu0 }
 0x5ef   : > { %v3783_v13 = vadd.f32 %v4170_v27, %v3782_v12  ;;  %v3815_v38 = vmax.f32 %v3791_v16, 0.0 }
 0x5f0   : > { %v4406_v18 = vpop.f32.mrf.mxu0 }
 0x5f1   : > { %v3794_v60 = vadd.f32 %v4406_v18, %v4170_v27  ;;  %v3813_v36 = vmax.f32 %v3783_v13, 0.0 }
 0x5f2   : > { %v3785_v30 = vpop.f32.mrf.mxu0 }
 0x5f3   : > { %v3786_v33 = vadd.f32 %v4170_v27, %v3785_v30  ;;  %v3816_v35 = vmax.f32 %v3794_v60, 0.0 }
 0x5f4   : > { %v4409_v59 = vpop.f32.mrf.mxu0 }
 0x5f5   : > { %v3814_v32 = vmax.f32 %v3786_v33, 0.0  ;;  %v4210_v15 = vpack.c.bf16 %v3816_v35, %v3815_v38  ;;  %v3807_v31 = vadd.f32 %v4409_v59, %v4170_v27 }
 0x5f6   : > { %v3798_v57 = vpop.f32.mrf.mxu0 }
 0x5f7   : > { %v4209_v21 = vpack.c.bf16 %v3814_v32, %v3813_v36  ;;  %v3799_v22 = vadd.f32 %v4170_v27, %v3798_v57  ;;  %v3819_v61 = vmax.f32 %v3807_v31, 0.0 }
 0x5f8   : > { %v4410_v26 = vpop.f32.mrf.mxu0 }
 0x5f9   : > { %v3810_v58 = vadd.f32 %v4410_v26, %v4170_v27  ;;  %4415 = vmatprep.mubr.msk.bf16.mxu1 %vm3872_vm4, %v4209_v21  ;;  %v3817_v53 = vmax.f32 %v3799_v22, 0.0 }
 0x5fa   : > { %v3801_v48 = vpop.f32.mrf.mxu0  ;;  %4416 = vmatmul.mubr.msk.bf16.vlgmr.msra.gmra.mxu1 %vm3872_vm4, %v4210_v15 }
 0x5fb   : > { %v3802_v10 = vadd.f32 %v4170_v27, %v3801_v48  ;;  %v3820_v52 = vmax.f32 %v3810_v58, 0.0 }
 0x5fd   : > { %v3818_v56 = vmax.f32 %v3802_v10, 0.0  ;;  %v4212_v46 = vpack.c.bf16 %v3820_v52, %v3819_v61 }
 0x5ff   : > { %v4211_v40 = vpack.c.bf16 %v3818_v56, %v3817_v53 }
 0x601   : > { %4419 = vmatprep.mubr.msk.bf16.mxu1 %vm3872_vm4, %v4211_v40 }
 0x602   : > { %4420 = vmatmul.mubr.msk.bf16.gmra.mxu1 %vm3872_vm4, %v4212_v46 }
 0x6ba   : > { %v4417_v63 = vpop.f32.mrf.mxu1 }
 0x6bb   : > { %v3928_v0 = vadd.f32 %v4417_v63, %v4180_v54 }
 0x6bc   : > { %v3919_v24 = vpop.f32.mrf.mxu1 }
 0x6bd   : > { %v3952_v29 = vadd.f32 %v3928_v0, %v5190_v17  ;;  %v3920_v3 = vadd.f32 %v4180_v54, %v3919_v24 }
 0x6be   : > { %v4418_v6 = vpop.f32.mrf.mxu1 }
 0x6bf   : > { %v3960_v34 = vpack.c.bf16 %v3952_v29, %v3952_v29  ;;  %v3950_v14 = vadd.f32 %v3920_v3, %v5187_v9  ;;  %v3931_v2 = vadd.f32 %v4418_v6, %v4180_v54 }
 0x6c0   : > { %v3922_v11 = vpop.f32.mrf.mxu1 }
 0x6c1   : > { %3969 = vst.msk [vmem:[%s5317_s18 + $0x8] sm:$0xf] %vm3966_vm5, %v3960_v34  ;;  %v3958_v17 = vpack.c.bf16 %v3950_v14, %v3950_v14  ;;  %v3953_v39 = vadd.f32 %v3931_v2, %v5198_v1  ;;  %v3923_v19 = vadd.f32 %v4180_v54, %v3922_v11 }
 0x6c2   : > { %v4421_v43 = vpop.f32.mrf.mxu1 }
 0x6c3   : > { %3967 = vst.msk [vmem:[%s5317_s18] sm:$0xf] %vm3966_vm5, %v3958_v17  ;;  %v3961_v37 = vpack.c.bf16 %v3953_v39, %v3953_v39  ;;  %v3951_v8 = vadd.f32 %v3923_v19, %v5195_v62  ;;  %v3944_v45 = vadd.f32 %v4421_v43, %v4180_v54 }
 0x6c4   : > { %v3935_v20 = vpop.f32.mrf.mxu1 }
 0x6c5   : > { %3970 = vst.msk [vmem:[%s5317_s18 + $0xc] sm:$0xf] %vm3966_vm5, %v3961_v37  ;;  %v3959_v9 = vpack.c.bf16 %v3951_v8, %v3951_v8  ;;  %v3956_v41 = vadd.f32 %v3944_v45, %v5210_v25  ;;  %v3936_v47 = vadd.f32 %v4180_v54, %v3935_v20 }
 0x6c6   : > { %v4422_v1 = vpop.f32.mrf.mxu1 }
 0x6c7   : > { %3968 = vst.msk [vmem:[%s5317_s18 + $0x4] sm:$0xf] %vm3966_vm5, %v3959_v9  ;;  %v3964_v4 = vpack.c.bf16 %v3956_v41, %v3956_v41  ;;  %v3954_v50 = vadd.f32 %v3936_v47, %v5205_v5  ;;  %v3947_v23 = vadd.f32 %v4422_v1, %v4180_v54 }
 0x6c8   : > { %v3938_v51 = vpop.f32.mrf.mxu1 }
 0x6c9   : > { %3973 = vst.msk [vmem:[%s5317_s18 + $0x18] sm:$0xf] %vm3966_vm5, %v3964_v4  ;;  %v3962_v62 = vpack.c.bf16 %v3954_v50, %v3954_v50  ;;  %v3957_v44 = vadd.f32 %v3947_v23, %v5218_v55  ;;  %v3939_v49 = vadd.f32 %v4180_v54, %v3938_v51 }
 0x6cb   : > { %3971 = vst.msk [vmem:[%s5317_s18 + $0x10] sm:$0xf] %vm3966_vm5, %v3962_v62  ;;  %v3965_v28 = vpack.c.bf16 %v3957_v44, %v3957_v44  ;;  %v3955_v25 = vadd.f32 %v3939_v49, %v5215_v42 }
 0x6cd   : > { %3974 = vst.msk [vmem:[%s5317_s18 + $0x1c] sm:$0xf] %vm3966_vm5, %v3965_v28  ;;  %v3963_v7 = vpack.c.bf16 %v3955_v25, %v3955_v25 }
 0x6cf   : > { %3972 = vst.msk [vmem:[%s5317_s18 + $0x14] sm:$0xf] %vm3966_vm5, %v3963_v7 }
 0x6d0 PF: > { %s27_s26 = sadd.s32 1, %s4545_s26   ;;  %s5373_s24 = smov %s4541_s25 }
 0x6d1   : > { %p24_p5 = scmp.ge.s32.totalorder %s27_s26, 4   ;;  %s5374_s25 = smov %s5376_s27 }
 0x6d3   :  { %26 = sbr.rel (!%p24_p5) target bundleno = 3 (0x3), region = 132 }

// kernel: graph_module.10
= control target key start
LH: loop header
LB: loop body
LE: loop exit
PB: predicated region body
PF: predicated region fallthrough
CT: control target
= control target key end

     0   :  { %s5183_s24 = smov 0   ;;  %s5185_s25 = smov 0   ;;  %s6084_s0 = inlined_call_operand.vmem [shape: bf16[2,16,8,8], index: 0, kind: input, shape index: {}]   ;;  %s6085_s1 = inlined_call_operand.vmem [shape: bf16[2,16,8,8], index: 1, kind: input, shape index: {}]   ;;  %s6086_s2 = inlined_call_operand.vmem [shape: bf16[2,8,8,16], index: 2, kind: input, shape index: {}]   ;;  %s6087_s3 = inlined_call_operand.vmem [shape: f32[1,16], index: 3, kind: input, shape index: {}]   ;;  %s6088_s4 = inlined_call_operand.vmem [shape: f32[1,16], index: 4, kind: input, shape index: {}]   ;;  %s6089_s5 = inlined_call_operand.vmem [shape: bf16[16,16], index: 5, kind: input, shape index: {}]   ;;  %s6090_s6 = inlined_call_operand.vmem [shape: f32[1,16], index: 6, kind: input, shape index: {}]   ;;  %s6091_s7 = inlined_call_operand.vmem [shape: f32[1,16], index: 7, kind: input, shape index: {}]   ;;  %s6092_s8 = inlined_call_operand.vmem [shape: f32[1,16], index: 8, kind: input, shape index: {}]   ;;  %s6093_s9 = inlined_call_operand.vmem [shape: bf16[16,16], index: 9, kind: input, shape index: {}]   ;;  %s6094_s10 = inlined_call_operand.vmem [shape: f32[1,16], index: 10, kind: input, shape index: {}]   ;;  %s6095_s11 = inlined_call_operand.vmem [shape: f32[1,16], index: 11, kind: input, shape index: {}]   ;;  %s6096_s12 = inlined_call_operand.vmem [shape: f32[1,16], index: 12, kind: input, shape index: {}]   ;;  %s6097_s13 = inlined_call_operand.vmem [shape: bf16[16,48], index: 13, kind: input, shape index: {}]   ;;  %s6098_s14 = inlined_call_operand.vmem [shape: f32[1,48], index: 14, kind: input, shape index: {}]   ;;  %s6099_s15 = inlined_call_operand.vmem [shape: bf16[2,8,8,16], index: 15, kind: output, shape index: {0}]   ;;  %s6100_s16 = inlined_call_operand.vmem [shape: bf16[2,16,8,8], index: 16, kind: output, shape index: {1}]   ;;  %s6101_s17 = inlined_call_operand.vmem [shape: bf16[2,16,8,8], index: 17, kind: output, shape index: {2}]  }
   0x1   :  { %6102 = sst [smem:[#allocation3_spill]] %s6084_s0  ;;  %s5187_s26 = smov 0  }
   0x2   :  { %6103 = sst [smem:[#allocation4_spill]] %s6085_s1 }
   0x3 LB: > { %s47_s27 = sadd.s32 1, %s5080_s25  ;;  %p4637_p0 = scmp.ge.s32.totalorder %s5084_s26, 1  ;;  %s5084_s26 = sphi %s5187_s26, %s28_s26   ;;  %s5080_s25 = sphi %s5185_s25, %s6107_s25   ;;  %s5076_s24 = sphi %s5183_s24, %s6106_s24  }
   0x4   : > { %p49_p1 = scmp.ge.s32.totalorder %s47_s27, 2  ;;  %p559_p2 = scmp.lt.s32.totalorder %s5084_s26, 3 }
   0x6   : > { %s6109_s27 = smov (%p49_p1, %s47_s27), 0  ;;  %p560_p3 = pnand %p4637_p0, %p559_p2 }
   0x7   : > { %p654_p4 = scmp.lt.s32.totalorder (!%p560_p3), %s5076_s24, 1  ;;  %s6104_s18 = sld [smem:[#allocation4_spill]] (!%p560_p3) }
   0x8   : > { %563 = sbr.rel (%p560_p3) target bundleno = 1832 (0x728), region = 80  ;;  %s6105_s0 = sld [smem:[#allocation3_spill]] (!%p560_p3) }
   0xd   : > { %vm714_vm0 = vcmask 64512   ;;  %v5086_v0 = vmov 0.0   ;;  %vm5087_vm1 = vmmov 0   ;;  %s6111_s24 = smov (!%p654_p4, %s5076_s24), 1  ;;  %vm1593_vm2 = vcmask 130048  }
   0xe   : > { %4804 = vmatprep.subr.bf16.mxu1 %v5086_v0  ;;  %715 = vst.msk [vmem:[#allocation2] sm:$0xff] %vm714_vm0, %v5086_v0  ;;  %716 = vst.msk [vmem:[#allocation2 + $0x8] sm:$0xff] %vm714_vm0, %v5086_v0  ;;  %4806 = vmatprep.mubr.msk.bf16.mxu1 %vm5087_vm1, %v5086_v0  ;;  %s5248_s28 = sshll.u32 %s6111_s24, 6  ;;  %s4722_s29 = sshll.u32 %s6111_s24, 5  ;;  %vm3351_vm3 = vcmask 125952   ;;  %vm4038_vm4 = vcmask 60416  }
   0xf   : > { %717 = vst.msk [vmem:[#allocation2 + $0x10] sm:$0xff] %vm714_vm0, %v5086_v0  ;;  %718 = vst.msk [vmem:[#allocation2 + $0x18] sm:$0xff] %vm714_vm0, %v5086_v0  ;;  %4816 = vmatprep.subr.bf16.mxu0 %v5086_v0  ;;  %4818 = vmatprep.mubr.msk.bf16.mxu0 %vm5087_vm1, %v5086_v0  ;;  %s5255_s19 = scalar_lea.vmem %s6104_s18, %s5248_s28  ;;  %s681_s21 = scalar_lea.vmem %s6086_s2, %s4722_s29 }
  0x10   : > { %719 = vst.msk [vmem:[#allocation2 + $0x20] sm:$0xff] %vm714_vm0, %v5086_v0  ;;  %720 = vst.msk [vmem:[#allocation2 + $0x28] sm:$0xff] %vm714_vm0, %v5086_v0  ;;  %v763_v1 = vld [vmem:[%s5255_s19] sm:$0xf]  ;;  %v765_v2 = vld [vmem:[%s5255_s19 + $0x8] sm:$0xf]  ;;  %s5276_s30 = scalar_lea.vmem %s6105_s0, %s5248_s28  ;;  %s5788_s18 = scalar_lea.vmem %s6099_s15, %s4722_s29 }
  0x11   : > { %721 = vst.msk [vmem:[#allocation2 + $0x30] sm:$0xff] %vm714_vm0, %v5086_v0  ;;  %722 = vst.msk [vmem:[#allocation2 + $0x38] sm:$0xff] %vm714_vm0, %v5086_v0  ;;  %v784_v3 = vsel %vm714_vm0, %v763_v1, 0  ;;  %v4739_v4 = vld [vmem:[%s681_s21] sm:$0xff]   ;;  %v4754_v5 = vld [vmem:[%s681_s21 + $0x8] sm:$0xff]   ;;  %v876_v6 = vsel %vm714_vm0, %v765_v2, 0  ;;  %s5959_s29 = scalar_lea.vmem %s6100_s16, %s5248_s28  ;;  %s6021_s20 = scalar_lea.vmem %s6101_s17, %s5248_s28 }
  0x12   : > { %723 = vst.msk [vmem:[#allocation2 + $0x40] sm:$0xff] %vm714_vm0, %v5086_v0  ;;  %724 = vst.msk [vmem:[#allocation2 + $0x48] sm:$0xff] %vm714_vm0, %v5086_v0  ;;  %4805 = vmatpush3.bf16.xpose.msra.mxu1 %v784_v3  ;;  %v5266_v7 = vunpack.c.l.bf16 %v4739_v4  ;;  %v5268_v8 = vunpack.c.l.bf16 %v4754_v5  ;;  %v5270_v9 = vunpack.c.h.bf16 %v4739_v4  ;;  %4817 = vmatpush3.bf16.xpose.msra.mxu0 %v876_v6  ;;  %v5279_v10 = vunpack.c.h.bf16 %v4754_v5  ;;  %v4755_v11 = vld [vmem:[%s681_s21 + $0x10] sm:$0xff]   ;;  %v764_v14 = vld [vmem:[%s5255_s19 + $0x4] sm:$0xf]  ;;  %s5090_s0 = smov 112  }
  0x13   : > { %725 = vst.msk [vmem:[#allocation2 + $0x50] sm:$0xff] %vm714_vm0, %v5086_v0  ;;  %726 = vst.msk [vmem:[#allocation2 + $0x58] sm:$0xff] %vm714_vm0, %v5086_v0  ;;  %4810 = vmatprep.subr.bf16.mxu1 %v5086_v0  ;;  %4828 = vmatprep.subr.bf16.mxu0 %v5086_v0  ;;  %v747_v16 = vld [vmem:[%s5276_s30] sm:$0xf]  ;;  %v5290_v17 = vunpack.c.l.bf16 %v4755_v11  ;;  %v830_v18 = vsel %vm714_vm0, %v764_v14, 0  ;;  %v5295_v20 = vunpack.c.h.bf16 %v4755_v11  ;;  %v4756_v21 = vld [vmem:[%s681_s21 + $0x18] sm:$0xff]  }
  0x14   : > { %727 = vst.msk [vmem:[#allocation2 + $0x60] sm:$0xff] %vm714_vm0, %v5086_v0  ;;  %728 = vst.msk [vmem:[#allocation2 + $0x68] sm:$0xff] %vm714_vm0, %v5086_v0  ;;  %v1594_v12 = vsel %vm1593_vm2, %v5266_v7, 0.0  ;;  %v1600_v13 = vsel %vm1593_vm2, %v5268_v8, 0.0  ;;  %v1597_v15 = vsel %vm1593_vm2, %v5270_v9, 0.0  ;;  %v1603_v19 = vsel %vm1593_vm2, %v5279_v10, 0.0 }
  0x15   : > { %729 = vst.msk [vmem:[#allocation2 + $0x70] sm:$0xff] %vm714_vm0, %v5086_v0  ;;  %730 = vst.msk [vmem:[#allocation2 + $0x78] sm:$0xff] %vm714_vm0, %v5086_v0  ;;  %1595 = vadd.xlane.f32.xlu0 %v1594_v12  ;;  %1601 = vadd.xlane.f32.xlu1 %v1600_v13  ;;  %v767_v22 = vld [vmem:[%s5255_s19 + $0x10] sm:$0xf]  ;;  %v749_v23 = vld [vmem:[%s5276_s30 + $0x8] sm:$0xf]  ;;  %v5302_v25 = vunpack.c.l.bf16 %v4756_v21  ;;  %v5310_v28 = vunpack.c.h.bf16 %v4756_v21 }
  0x16   : > { %v1606_v24 = vsel %vm1593_vm2, %v5290_v17, 0.0  ;;  %v968_v26 = vsel %vm714_vm0, %v767_v22, 0  ;;  %v1609_v27 = vsel %vm1593_vm2, %v5295_v20, 0.0  ;;  %v766_v29 = vld [vmem:[%s5255_s19 + $0xc] sm:$0xf] }
  0x17   : > { %v1612_v30 = vsel %vm1593_vm2, %v5302_v25, 0.0  ;;  %v748_v31 = vld [vmem:[%s5276_s30 + $0x4] sm:$0xf]  ;;  %v922_v32 = vsel %vm714_vm0, %v766_v29, 0  ;;  %v1615_v33 = vsel %vm1593_vm2, %v5310_v28, 0.0 }
  0x18   : > { %v769_v34 = vld [vmem:[%s5255_s19 + $0x18] sm:$0xf]  ;;  %v751_v35 = vld [vmem:[%s5276_s30 + $0x10] sm:$0xf]  ;;  %v768_v37 = vld [vmem:[%s5255_s19 + $0x14] sm:$0xf] }
  0x19   : > { %1598 = vadd.xlane.f32.xlu0 %v1597_v15  ;;  %4807 = vmatmul.mubr.msk.bf16.vlgmr.msra.gmra.mxu1 %vm714_vm0, %v747_v16  ;;  %v1060_v36 = vsel %vm714_vm0, %v769_v34, 0  ;;  %v750_v38 = vld [vmem:[%s5276_s30 + $0xc] sm:$0xf]  ;;  %v1014_v39 = vsel %vm714_vm0, %v768_v37, 0  ;;  %v771_v40 = vld [vmem:[%s5255_s19 + $0x20] sm:$0xf] }
  0x1a   : > { %4811 = vmatpush3.bf16.xpose.msra.mxu1 %v830_v18  ;;  %1604 = vadd.xlane.f32.xlu1 %v1603_v19  ;;  %v753_v41 = vld [vmem:[%s5276_s30 + $0x18] sm:$0xf]  ;;  %v1152_v42 = vsel %vm714_vm0, %v771_v40, 0  ;;  %v770_v43 = vld [vmem:[%s5255_s19 + $0x1c] sm:$0xf] }
  0x1b   : > { %4812 = vmatprep.mubr.msk.bf16.mxu1 %vm5087_vm1, %v5086_v0  ;;  %4822 = vmatprep.subr.bf16.mxu1 %v5086_v0  ;;  %v752_v44 = vld [vmem:[%s5276_s30 + $0x14] sm:$0xf]  ;;  %v1106_v45 = vsel %vm714_vm0, %v770_v43, 0  ;;  %v773_v46 = vld [vmem:[%s5255_s19 + $0x28] sm:$0xf] }
  0x1c   : > { %4819 = vmatmul.mubr.msk.bf16.vlgmr.msra.gmra.mxu0 %vm714_vm0, %v749_v23  ;;  %v755_v47 = vld [vmem:[%s5276_s30 + $0x20] sm:$0xf]  ;;  %v1244_v48 = vsel %vm714_vm0, %v773_v46, 0  ;;  %v772_v49 = vld [vmem:[%s5255_s19 + $0x24] sm:$0xf] }
  0x1d   : > { %1607 = vadd.xlane.f32.xlu0 %v1606_v24  ;;  %4829 = vmatpush3.bf16.xpose.msra.mxu0 %v968_v26  ;;  %v754_v50 = vld [vmem:[%s5276_s30 + $0x1c] sm:$0xf]  ;;  %v1198_v51 = vsel %vm714_vm0, %v772_v49, 0  ;;  %v775_v52 = vld [vmem:[%s5255_s19 + $0x30] sm:$0xf] }
  0x1e   : > { %1610 = vadd.xlane.f32.xlu1 %v1609_v27  ;;  %4830 = vmatprep.mubr.msk.bf16.mxu0 %vm5087_vm1, %v5086_v0  ;;  %v757_v53 = vld [vmem:[%s5276_s30 + $0x28] sm:$0xf]  ;;  %v1336_v54 = vsel %vm714_vm0, %v775_v52, 0  ;;  %v774_v55 = vld [vmem:[%s5255_s19 + $0x2c] sm:$0xf] }
  0x1f   : > { %4840 = vmatprep.subr.bf16.mxu0 %v5086_v0  ;;  %v756_v56 = vld [vmem:[%s5276_s30 + $0x24] sm:$0xf]  ;;  %v1290_v57 = vsel %vm714_vm0, %v774_v55, 0  ;;  %v777_v58 = vld [vmem:[%s5255_s19 + $0x38] sm:$0xf] }
  0x20   : > { %v759_v59 = vld [vmem:[%s5276_s30 + $0x30] sm:$0xf]  ;;  %v1428_v60 = vsel %vm714_vm0, %v777_v58, 0  ;;  %v776_v61 = vld [vmem:[%s5255_s19 + $0x34] sm:$0xf] }
  0x21   : > { %1613 = vadd.xlane.f32.xlu0 %v1612_v30  ;;  %4813 = vmatmul.mubr.msk.bf16.vlgmr.msra.gmra.mxu1 %vm714_vm0, %v748_v31  ;;  %v758_v62 = vld [vmem:[%s5276_s30 + $0x2c] sm:$0xf]  ;;  %v1382_v63 = vsel %vm714_vm0, %v776_v61, 0  ;;  %v761_v1 = vld [vmem:[%s5276_s30 + $0x38] sm:$0xf] }
  0x22   : > { %4823 = vmatpush3.bf16.xpose.msra.mxu1 %v922_v32  ;;  %1616 = vadd.xlane.f32.xlu1 %v1615_v33  ;;  %v778_v2 = vld [vmem:[%s5255_s19 + $0x3c] sm:$0xf]  ;;  %v760_v3 = vld [vmem:[%s5276_s30 + $0x34] sm:$0xf] }
  0x23   : > { %4824 = vmatprep.mubr.msk.bf16.mxu1 %vm5087_vm1, %v5086_v0  ;;  %4834 = vmatprep.subr.bf16.mxu1 %v5086_v0  ;;  %v1474_v4 = vsel %vm714_vm0, %v778_v2, 0  ;;  %v762_v5 = vld [vmem:[%s5276_s30 + $0x3c] sm:$0xf]  ;;  %s5091_s30 = smov 96  }
  0x24   : > { %4831 = vmatmul.mubr.msk.bf16.vlgmr.msra.gmra.mxu0 %vm714_vm0, %v751_v35 }
  0x25   : > { %4841 = vmatpush3.bf16.xpose.msra.mxu0 %v1060_v36  ;;  %4842 = vmatprep.mubr.msk.bf16.mxu0 %vm5087_vm1, %v5086_v0 }
  0x26   : > { %4852 = vmatprep.subr.bf16.mxu0 %v5086_v0 }
  0x29   : > { %4825 = vmatmul.mubr.msk.bf16.vlgmr.msra.gmra.mxu1 %vm714_vm0, %v750_v38 }
  0x2a   : > { %4835 = vmatpush3.bf16.xpose.msra.mxu1 %v1014_v39  ;;  %4836 = vmatprep.mubr.msk.bf16.mxu1 %vm5087_vm1, %v5086_v0 }
  0x2b   : > { %4846 = vmatprep.subr.bf16.mxu1 %v5086_v0 }
  0x2c   : > { %4843 = vmatmul.mubr.msk.bf16.vlgmr.msra.gmra.mxu0 %vm714_vm0, %v753_v41 }
  0x2d   : > { %4853 = vmatpush3.bf16.xpose.msra.mxu0 %v1152_v42  ;;  %4854 = vmatprep.mubr.msk.bf16.mxu0 %vm5087_vm1, %v5086_v0 }
  0x2e   : > { %4864 = vmatprep.subr.bf16.mxu0 %v5086_v0 }
  0x31   : > { %4837 = vmatmul.mubr.msk.bf16.vlgmr.msra.gmra.mxu1 %vm714_vm0, %v752_v44 }
  0x32   : > { %4847 = vmatpush3.bf16.xpose.msra.mxu1 %v1106_v45  ;;  %4848 = vmatprep.mubr.msk.bf16.mxu1 %vm5087_vm1, %v5086_v0 }
  0x33   : > { %4858 = vmatprep.subr.bf16.mxu1 %v5086_v0 }
  0x34   : > { %4855 = vmatmul.mubr.msk.bf16.vlgmr.msra.gmra.mxu0 %vm714_vm0, %v755_v47 }
  0x35   : > { %4865 = vmatpush3.bf16.xpose.msra.mxu0 %v1244_v48  ;;  %4866 = vmatprep.mubr.msk.bf16.mxu0 %vm5087_vm1, %v5086_v0 }
  0x36   : > { %4876 = vmatprep.subr.bf16.mxu0 %v5086_v0 }
  0x39   : > { %4849 = vmatmul.mubr.msk.bf16.vlgmr.msra.gmra.mxu1 %vm714_vm0, %v754_v50 }
  0x3a   : > { %4859 = vmatpush3.bf16.xpose.msra.mxu1 %v1198_v51  ;;  %4860 = vmatprep.mubr.msk.bf16.mxu1 %vm5087_vm1, %v5086_v0 }
  0x3b   : > { %4870 = vmatprep.subr.bf16.mxu1 %v5086_v0 }
  0x3c   : > { %4867 = vmatmul.mubr.msk.bf16.vlgmr.msra.gmra.mxu0 %vm714_vm0, %v757_v53  ;;  %v4961_v53 = vld [vmem:[%s6089_s5] sm:$0xff]  }
  0x3d   : > { %4877 = vmatpush3.bf16.xpose.msra.mxu0 %v1336_v54  ;;  %4878 = vmatprep.mubr.msk.bf16.mxu0 %vm5087_vm1, %v5086_v0  ;;  %v731_v54 = vld [vmem:[#allocation2] sm:$0xff] }
  0x3e   : > { %4888 = vmatprep.subr.bf16.mxu0 %v5086_v0 }
  0x41   : > { %4861 = vmatmul.mubr.msk.bf16.vlgmr.msra.gmra.mxu1 %vm714_vm0, %v756_v56 }
  0x42   : > { %4871 = vmatpush3.bf16.xpose.msra.mxu1 %v1290_v57  ;;  %4872 = vmatprep.mubr.msk.bf16.mxu1 %vm5087_vm1, %v5086_v0  ;;  %v733_v57 = vld [vmem:[#allocation2 + $0x10] sm:$0xff] }
  0x43   : > { %4882 = vmatprep.subr.bf16.mxu1 %v5086_v0 }
  0x44   : > { %4879 = vmatmul.mubr.msk.bf16.vlgmr.msra.gmra.mxu0 %vm714_vm0, %v759_v59 }
  0x45   : > { %4889 = vmatpush3.bf16.xpose.msra.mxu0 %v1428_v60  ;;  %4890 = vmatprep.mubr.msk.bf16.mxu0 %vm5087_vm1, %v5086_v0 }
  0x46   : > { %4900 = vmatprep.subr.bf16.mxu0 %v4961_v53 }
  0x49   : > { %4873 = vmatmul.mubr.msk.bf16.vlgmr.msra.gmra.mxu1 %vm714_vm0, %v758_v62 }
  0x4a   : > { %4883 = vmatpush3.bf16.xpose.msra.mxu1 %v1382_v63  ;;  %4884 = vmatprep.mubr.msk.bf16.mxu1 %vm5087_vm1, %v5086_v0 }
  0x4b   : > { %4894 = vmatprep.subr.bf16.mxu1 %v5086_v0 }
  0x4c   : > { %4891 = vmatmul.mubr.msk.bf16.vlgmr.msra.gmra.mxu0 %vm714_vm0, %v761_v1  ;;  %v732_v1 = vld [vmem:[#allocation2 + $0x8] sm:$0xff] }
  0x4d   : > { %4901 = vmatpush3.bf16.msra.mxu0 %v4961_v53  ;;  %v738_v53 = vld [vmem:[#allocation2 + $0x38] sm:$0xff] }
  0x51   : > { %4885 = vmatmul.mubr.msk.bf16.vlgmr.msra.gmra.mxu1 %vm714_vm0, %v760_v3 }
  0x52   : > { %4895 = vmatpush3.bf16.xpose.msra.mxu1 %v1474_v4  ;;  %4896 = vmatprep.mubr.msk.bf16.mxu1 %vm5087_vm1, %v5086_v0 }
  0x59   : > { %4897 = vmatmul.mubr.msk.bf16.vlgmr.msra.gmra.mxu1 %vm714_vm0, %v762_v5 }
  0x9e   : > { %v1596_v6 = vpop.xlane.xlu0 %1595  ;;  %v1602_v11 = vpop.xlane.xlu1 %1601 }
  0x9f   : > { %v1619_v12 = vmul.f32 0.0625, %v1596_v6  ;;  %v1621_v13 = vmul.f32 0.0625, %v1602_v11  ;;  %v735_v6 = vld [vmem:[#allocation2 + $0x20] sm:$0xff] }
  0xa1   : > { %v5407_v14 = vsub.f32 %v5266_v7, %v1619_v12  ;;  %v5410_v15 = vsub.f32 %v5268_v8, %v1621_v13 }
  0xa2   : > { %v1599_v16 = vpop.xlane.xlu0 %1598 }
  0xa3   : > { %v1620_v18 = vmul.f32 0.0625, %v1599_v16  ;;  %v1605_v19 = vpop.xlane.xlu1 %1604  ;;  %v1635_v21 = vmul.f32 %v5407_v14, %v5407_v14  ;;  %v1637_v0 = vmul.f32 %v5410_v15, %v5410_v15 }
  0xa4   : > { %v1622_v22 = vmul.f32 0.0625, %v1605_v19 }
  0xa5   : > { %v5417_v23 = vsub.f32 %v5270_v9, %v1620_v18  ;;  %v1643_v24 = vsel %vm1593_vm2, %v1635_v21, 0.0  ;;  %v1649_v31 = vsel %vm1593_vm2, %v1637_v0, 0.0  ;;  %v734_v21 = vld [vmem:[#allocation2 + $0x18] sm:$0xff] }
  0xa6   : > { %v5421_v26 = vsub.f32 %v5279_v10, %v1622_v22  ;;  %1644 = vadd.xlane.f32.xlu0 %v1643_v24  ;;  %v1608_v27 = vpop.xlane.xlu0 %1607 }
  0xa7   : > { %v1623_v29 = vmul.f32 0.0625, %v1608_v27  ;;  %v1611_v30 = vpop.xlane.xlu1 %1610  ;;  %v1636_v32 = vmul.f32 %v5417_v23, %v5417_v23 }
  0xa8   : > { %v1624_v33 = vmul.f32 0.0625, %v1611_v30  ;;  %v1638_v34 = vmul.f32 %v5421_v26, %v5421_v26 }
  0xa9   : > { %v5429_v35 = vsub.f32 %v5290_v17, %v1623_v29  ;;  %v1646_v36 = vsel %vm1593_vm2, %v1636_v32, 0.0  ;;  %v737_v29 = vld [vmem:[#allocation2 + $0x30] sm:$0xff] }
  0xaa   : > { %v5433_v37 = vsub.f32 %v5295_v20, %v1624_v33  ;;  %1650 = vadd.xlane.f32.xlu0 %v1649_v31  ;;  %1647 = vadd.xlane.f32.xlu1 %v1646_v36  ;;  %v1614_v38 = vpop.xlane.xlu0 %1613  ;;  %v1652_v41 = vsel %vm1593_vm2, %v1638_v34, 0.0 }
  0xab   : > { %v1625_v39 = vmul.f32 0.0625, %v1614_v38  ;;  %v1617_v40 = vpop.xlane.xlu1 %1616  ;;  %v1639_v42 = vmul.f32 %v5429_v35, %v5429_v35  ;;  %v736_v38 = vld [vmem:[#allocation2 + $0x28] sm:$0xff] }
  0xac   : > { %v1626_v43 = vmul.f32 0.0625, %v1617_v40  ;;  %v1640_v44 = vmul.f32 %v5433_v37, %v5433_v37 }
  0xad   : > { %v5441_v45 = vsub.f32 %v5302_v25, %v1625_v39  ;;  %v1655_v46 = vsel %vm1593_vm2, %v1639_v42, 0.0 }
  0xae   : > { %v5445_v47 = vsub.f32 %v5310_v28, %v1626_v43  ;;  %1653 = vadd.xlane.f32.xlu1 %v1652_v41  ;;  %1656 = vadd.xlane.f32.xlu0 %v1655_v46  ;;  %v1658_v48 = vsel %vm1593_vm2, %v1640_v44, 0.0  ;;  %v739_v43 = vld [vmem:[#allocation2 + $0x40] sm:$0xff] }
  0xaf   : > { %v1641_v49 = vmul.f32 %v5441_v45, %v5441_v45 }
  0xb0   : > { %v1642_v50 = vmul.f32 %v5445_v47, %v5445_v47 }
  0xb1   : > { %v1661_v51 = vsel %vm1593_vm2, %v1641_v49, 0.0 }
  0xb2   : > { %1659 = vadd.xlane.f32.xlu1 %v1658_v48  ;;  %1662 = vadd.xlane.f32.xlu0 %v1661_v51  ;;  %v1664_v52 = vsel %vm1593_vm2, %v1642_v50, 0.0 }
  0xb6   : > { %1665 = vadd.xlane.f32.xlu1 %v1664_v52 }
  0xd9   : > { %v820_v55 = vpop.f32.mrf.mxu1 }
  0xda   : > { %v1516_v56 = vadd.f32 %v820_v55, %v731_v54 }
  0xdb   : > { %v4808_v58 = vpop.f32.mrf.mxu1 }
  0xdc   : > { %1532 = vst.msk [vmem:[#allocation2] sm:$0xff] %vm714_vm0, %v1516_v56  ;;  %v912_v59 = vpop.f32.mrf.mxu0 }
  0xdd   : > { %v823_v60 = vpop.f32.mrf.mxu1  ;;  %v1518_v61 = vadd.f32 %v912_v59, %v733_v57 }
  0xde   : > { %v4820_v62 = vpop.f32.mrf.mxu0 }
  0xdf   : > { %v4809_v63 = vpop.f32.mrf.mxu1  ;;  %1534 = vst.msk [vmem:[#allocation2 + $0x10] sm:$0xff] %vm714_vm0, %v1518_v61  ;;  %v741_v61 = vld [vmem:[#allocation2 + $0x50] sm:$0xff] }
  0xe0   : > { %v915_v2 = vpop.f32.mrf.mxu0 }
  0xe1   : > { %v866_v3 = vpop.f32.mrf.mxu1 }
  0xe2   : > { %v1517_v4 = vadd.f32 %v866_v3, %v732_v1  ;;  %v4821_v5 = vpop.f32.mrf.mxu0 }
  0xe3   : > { %v4814_v11 = vpop.f32.mrf.mxu1  ;;  %v5467_v54 = vld [vmem:[#allocation2] sm:$0xff] }
  0xe4   : > { %1533 = vst.msk [vmem:[#allocation2 + $0x8] sm:$0xff] %vm714_vm0, %v1517_v4  ;;  %v1004_v12 = vpop.f32.mrf.mxu0  ;;  %v1892_v62 = vsel %vm714_vm0, %v5467_v54, 0.0 }
  0xe5   : > { %v869_v13 = vpop.f32.mrf.mxu1  ;;  %v1520_v16 = vadd.f32 %v1004_v12, %v735_v6 }
  0xe6   : > { %v4832_v18 = vpop.f32.mrf.mxu0  ;;  %v5471_v58 = vld [vmem:[#allocation2 + $0x10] sm:$0xff] }
  0xe7   : > { %v4815_v19 = vpop.f32.mrf.mxu1  ;;  %1536 = vst.msk [vmem:[#allocation2 + $0x20] sm:$0xff] %vm714_vm0, %v1520_v16  ;;  %v1895_v4 = vsel %vm714_vm0, %v5471_v58, 0.0  ;;  %v740_v16 = vld [vmem:[#allocation2 + $0x48] sm:$0xff] }
  0xe8   : > { %v1007_v0 = vpop.f32.mrf.mxu0 }
  0xe9   : > { %v958_v22 = vpop.f32.mrf.mxu1 }
  0xea   : > { %v1519_v24 = vadd.f32 %v958_v22, %v734_v21  ;;  %v4833_v27 = vpop.f32.mrf.mxu0 }
  0xeb   : > { %v4826_v30 = vpop.f32.mrf.mxu1  ;;  %v5464_v50 = vld [vmem:[#allocation2 + $0x8] sm:$0xff] }
  0xec   : > { %1535 = vst.msk [vmem:[#allocation2 + $0x18] sm:$0xff] %vm714_vm0, %v1519_v24  ;;  %v1096_v31 = vpop.f32.mrf.mxu0  ;;  %v1893_v56 = vsel %vm714_vm0, %v5464_v50, 0.0  ;;  %v743_v30 = vld [vmem:[#allocation2 + $0x60] sm:$0xff] }
  0xed   : > { %v961_v32 = vpop.f32.mrf.mxu1  ;;  %v1522_v33 = vadd.f32 %v1096_v31, %v737_v29  ;;  %v1894_v2 = vadd.f32 %v1893_v56, %v1892_v62 }
  0xee   : > { %v4844_v34 = vpop.f32.mrf.mxu0  ;;  %v5483_v18 = vld [vmem:[#allocation2 + $0x20] sm:$0xff] }
  0xef   : > { %v4827_v36 = vpop.f32.mrf.mxu1  ;;  %1538 = vst.msk [vmem:[#allocation2 + $0x30] sm:$0xff] %vm714_vm0, %v1522_v33  ;;  %v1896_v19 = vadd.f32 %v1895_v4, %v1894_v2  ;;  %v1899_v31 = vsel %vm714_vm0, %v5483_v18, 0.0 }
  0xf0   : > { %v1099_v39 = vpop.f32.mrf.mxu0 }
  0xf1   : > { %v1050_v40 = vpop.f32.mrf.mxu1 }
  0xf2   : > { %v1521_v41 = vadd.f32 %v1050_v40, %v736_v38  ;;  %v4845_v42 = vpop.f32.mrf.mxu0 }
  0xf3   : > { %v4838_v44 = vpop.f32.mrf.mxu1  ;;  %v5475_v1 = vld [vmem:[#allocation2 + $0x18] sm:$0xff] }
  0xf4   : > { %1537 = vst.msk [vmem:[#allocation2 + $0x28] sm:$0xff] %vm714_vm0, %v1521_v41  ;;  %v1188_v46 = vpop.f32.mrf.mxu0  ;;  %v1897_v12 = vsel %vm714_vm0, %v5475_v1, 0.0 }
  0xf5   : > { %v1053_v48 = vpop.f32.mrf.mxu1  ;;  %v1524_v49 = vadd.f32 %v1188_v46, %v739_v43  ;;  %v1898_v24 = vadd.f32 %v1897_v12, %v1896_v19  ;;  %v742_v43 = vld [vmem:[#allocation2 + $0x58] sm:$0xff] }
  0xf6   : > { %v4856_v51 = vpop.f32.mrf.mxu0  ;;  %v5492_v39 = vld [vmem:[#allocation2 + $0x30] sm:$0xff] }
  0xf7   : > { %v4839_v52 = vpop.f32.mrf.mxu1  ;;  %1540 = vst.msk [vmem:[#allocation2 + $0x40] sm:$0xff] %vm714_vm0, %v1524_v49  ;;  %v1900_v40 = vadd.f32 %v1899_v31, %v1898_v24  ;;  %v1903_v49 = vsel %vm714_vm0, %v5492_v39, 0.0 }
  0xf8   : > { %v1191_v55 = vpop.f32.mrf.mxu0 }
  0xf9   : > { %v1142_v57 = vpop.f32.mrf.mxu1  ;;  %v745_v55 = vld [vmem:[#allocation2 + $0x70] sm:$0xff] }
  0xfa   : > { %v1523_v59 = vadd.f32 %v1142_v57, %v738_v53  ;;  %v4857_v60 = vpop.f32.mrf.mxu0 }
  0xfb   : > { %v4850_v63 = vpop.f32.mrf.mxu1  ;;  %v5485_v22 = vld [vmem:[#allocation2 + $0x28] sm:$0xff] }
  0xfc   : > { %1539 = vst.msk [vmem:[#allocation2 + $0x38] sm:$0xff] %vm714_vm0, %v1523_v59  ;;  %v1280_v3 = vpop.f32.mrf.mxu0  ;;  %v1901_v34 = vsel %vm714_vm0, %v5485_v22, 0.0 }
  0xfd   : > { %v1145_v5 = vpop.f32.mrf.mxu1  ;;  %v1526_v6 = vadd.f32 %v1280_v3, %v741_v61  ;;  %v1902_v46 = vadd.f32 %v1901_v34, %v1900_v40 }
  0xfe   : > { %v4868_v11 = vpop.f32.mrf.mxu0  ;;  %v5501_v59 = vld [vmem:[#allocation2 + $0x40] sm:$0xff] }
  0xff   : > { %v4851_v13 = vpop.f32.mrf.mxu1  ;;  %1542 = vst.msk [vmem:[#allocation2 + $0x50] sm:$0xff] %vm714_vm0, %v1526_v6  ;;  %v1904_v60 = vadd.f32 %v1903_v49, %v1902_v46  ;;  %v1907_v5 = vsel %vm714_vm0, %v5501_v59, 0.0  ;;  %v744_v11 = vld [vmem:[#allocation2 + $0x68] sm:$0xff] }
 0x100   : > { %v1283_v21 = vpop.f32.mrf.mxu0 }
 0x101   : > { %v1234_v0 = vpop.f32.mrf.mxu1 }
 0x102   : > { %v1525_v27 = vadd.f32 %v1234_v0, %v740_v16  ;;  %v4869_v29 = vpop.f32.mrf.mxu0 }
 0x103   : > { %v4862_v32 = vpop.f32.mrf.mxu1  ;;  %v5495_v44 = vld [vmem:[#allocation2 + $0x38] sm:$0xff] }
 0x104   : > { %1541 = vst.msk [vmem:[#allocation2 + $0x48] sm:$0xff] %vm714_vm0, %v1525_v27  ;;  %v1372_v33 = vpop.f32.mrf.mxu0  ;;  %v1905_v56 = vsel %vm714_vm0, %v5495_v44, 0.0 }
 0x105   : > { %v1237_v36 = vpop.f32.mrf.mxu1  ;;  %v1528_v38 = vadd.f32 %v1372_v33, %v743_v30  ;;  %v1906_v3 = vadd.f32 %v1905_v56, %v1904_v60 }
 0x106   : > { %v4880_v41 = vpop.f32.mrf.mxu0  ;;  %v5511_v19 = vld [vmem:[#allocation2 + $0x50] sm:$0xff]  ;;  %v746_v36 = vld [vmem:[#allocation2 + $0x78] sm:$0xff] }
 0x107   : > { %v4863_v42 = vpop.f32.mrf.mxu1  ;;  %1544 = vst.msk [vmem:[#allocation2 + $0x60] sm:$0xff] %vm714_vm0, %v1528_v38  ;;  %v1908_v21 = vadd.f32 %v1907_v5, %v1906_v3  ;;  %v1911_v31 = vsel %vm714_vm0, %v5511_v19, 0.0 }
 0x108   : > { %v1375_v48 = vpop.f32.mrf.mxu0 }
 0x109   : > { %v1326_v51 = vpop.f32.mrf.mxu1 }
 0x10a   : > { %v1527_v52 = vadd.f32 %v1326_v51, %v742_v43  ;;  %v4881_v53 = vpop.f32.mrf.mxu0 }
 0x10b   : > { %v4874_v57 = vpop.f32.mrf.mxu1  ;;  %v5504_v2 = vld [vmem:[#allocation2 + $0x48] sm:$0xff] }
 0x10c   : > { %1543 = vst.msk [vmem:[#allocation2 + $0x58] sm:$0xff] %vm714_vm0, %v1527_v52  ;;  %v1464_v61 = vpop.f32.mrf.mxu0  ;;  %v1909_v13 = vsel %vm714_vm0, %v5504_v2, 0.0 }
 0x10d   : > { %v1329_v62 = vpop.f32.mrf.mxu1  ;;  %v1530_v63 = vadd.f32 %v1464_v61, %v745_v55  ;;  %v1910_v30 = vadd.f32 %v1909_v13, %v1908_v21 }
 0x10e   : > { %v4892_v4 = vpop.f32.mrf.mxu0  ;;  %v5520_v38 = vld [vmem:[#allocation2 + $0x60] sm:$0xff] }
 0x10f   : > { %v4875_v6 = vpop.f32.mrf.mxu1  ;;  %1546 = vst.msk [vmem:[#allocation2 + $0x70] sm:$0xff] %vm714_vm0, %v1530_v63  ;;  %v1912_v40 = vadd.f32 %v1911_v31, %v1910_v30  ;;  %v1915_v46 = vsel %vm714_vm0, %v5520_v38, 0.0 }
 0x110   : > { %v1467_v12 = vpop.f32.mrf.mxu0 }
 0x111   : > { %v1418_v16 = vpop.f32.mrf.mxu1 }
 0x112   : > { %v1529_v0 = vadd.f32 %v1418_v16, %v744_v11  ;;  %v4893_v24 = vpop.f32.mrf.mxu0 }
 0x113   : > { %v4886_v27 = vpop.f32.mrf.mxu1  ;;  %v5513_v29 = vld [vmem:[#allocation2 + $0x58] sm:$0xff] }
 0x114   : > { %1545 = vst.msk [vmem:[#allocation2 + $0x68] sm:$0xff] %vm714_vm0, %v1529_v0  ;;  %v1913_v33 = vsel %vm714_vm0, %v5513_v29, 0.0 }
 0x115   : > { %v1421_v32 = vpop.f32.mrf.mxu1  ;;  %v1914_v42 = vadd.f32 %v1913_v33, %v1912_v40 }
 0x116   : > { %v5529_v53 = vld [vmem:[#allocation2 + $0x70] sm:$0xff] }
 0x117   : > { %v4887_v34 = vpop.f32.mrf.mxu1  ;;  %v1916_v55 = vadd.f32 %v1915_v46, %v1914_v42  ;;  %v1919_v60 = vsel %vm714_vm0, %v5529_v53, 0.0 }
 0x119   : > { %v1510_v41 = vpop.f32.mrf.mxu1 }
 0x11a   : > { %v1531_v43 = vadd.f32 %v1510_v41, %v746_v36 }
 0x11b   : > { %v4898_v48 = vpop.f32.mrf.mxu1  ;;  %v5524_v49 = vld [vmem:[#allocation2 + $0x68] sm:$0xff] }
 0x11c   : > { %1547 = vst.msk [vmem:[#allocation2 + $0x78] sm:$0xff] %vm714_vm0, %v1531_v43  ;;  %v1917_v51 = vsel %vm714_vm0, %v5524_v49, 0.0 }
 0x11d   : > { %v1513_v52 = vpop.f32.mrf.mxu1  ;;  %v1918_v57 = vadd.f32 %v1917_v51, %v1916_v55 }
 0x11f   : > { %v4899_v56 = vpop.f32.mrf.mxu1  ;;  %v1920_v62 = vadd.f32 %v1919_v60, %v1918_v57 }
 0x123   : > { %v5533_v61 = vld [vmem:[#allocation2 + $0x78] sm:$0xff] }
 0x124   : > { %v1921_v63 = vsel %vm714_vm0, %v5533_v61, 0.0 }
 0x125   : > { %v1922_v3 = vadd.f32 %v1921_v63, %v1920_v62 }
 0x127   : > { %v5537_v4 = vmul.f32 0.0625, %v1922_v3 }
 0x129   : > { %v5541_v5 = vsub.f32 %v5467_v54, %v5537_v4  ;;  %v5545_v6 = vsub.f32 %v5464_v50, %v5537_v4  ;;  %v5549_v11 = vsub.f32 %v5471_v58, %v5537_v4  ;;  %v5553_v12 = vsub.f32 %v5475_v1, %v5537_v4 }
 0x12a   : > { %v5561_v21 = vsub.f32 %v5483_v18, %v5537_v4  ;;  %v5567_v0 = vsub.f32 %v5485_v22, %v5537_v4  ;;  %v5575_v33 = vsub.f32 %v5492_v39, %v5537_v4  ;;  %v5582_v42 = vsub.f32 %v5495_v44, %v5537_v4 }
 0x12b   : > { %v1940_v13 = vmul.f32 %v5541_v5, %v5541_v5  ;;  %v1941_v16 = vmul.f32 %v5545_v6, %v5545_v6  ;;  %v1942_v50 = vmul.f32 %v5549_v11, %v5549_v11  ;;  %v1943_v1 = vmul.f32 %v5553_v12, %v5553_v12 }
 0x12c   : > { %v1944_v34 = vmul.f32 %v5561_v21, %v5561_v21  ;;  %v1945_v43 = vmul.f32 %v5567_v0, %v5567_v0  ;;  %v5589_v56 = vsub.f32 %v5501_v59, %v5537_v4  ;;  %v1946_v57 = vmul.f32 %v5575_v33, %v5575_v33 }
 0x12d   : > { %v1956_v24 = vsel %vm714_vm0, %v1940_v13, 0.0  ;;  %v1957_v27 = vsel %vm714_vm0, %v1941_v16, 0.0  ;;  %v1959_v22 = vsel %vm714_vm0, %v1942_v50, 0.0  ;;  %v1961_v46 = vsel %vm714_vm0, %v1943_v1, 0.0 }
 0x12e   : > { %v1958_v31 = vadd.f32 %v1957_v27, %v1956_v24  ;;  %v1963_v44 = vsel %vm714_vm0, %v1944_v34, 0.0  ;;  %v5596_v3 = vsub.f32 %v5504_v2, %v5537_v4  ;;  %v1947_v13 = vmul.f32 %v5582_v42, %v5582_v42 }
 0x12f   : > { %v1645_v54 = vpop.xlane.xlu0 %1644  ;;  %v1965_v59 = vsel %vm714_vm0, %v1945_v43, 0.0  ;;  %v5603_v24 = vsub.f32 %v5511_v19, %v5537_v4  ;;  %v1948_v27 = vmul.f32 %v5589_v56, %v5589_v56  ;;  %v1967_v2 = vsel %vm714_vm0, %v1946_v57, 0.0 }
 0x130   : > { %v1667_v58 = vmul.f32 0.0625, %v1645_v54  ;;  %v1960_v41 = vadd.f32 %v1959_v22, %v1958_v31  ;;  %v1949_v34 = vmul.f32 %v5596_v3, %v5596_v3  ;;  %v1969_v19 = vsel %vm714_vm0, %v1947_v13, 0.0 }
 0x131   : > { %v5617_v43 = vsub.f32 %v5520_v38, %v5537_v4 }
 0x132   : > { %v1675_v30 = vadd.f32 1e-05, %v1667_v58  ;;  %v1962_v51 = vadd.f32 %v1961_v46, %v1960_v41  ;;  %v1950_v46 = vmul.f32 %v5603_v24, %v5603_v24  ;;  %v1973_v38 = vsel %vm714_vm0, %v1949_v34, 0.0 }
 0x133   : > { %v1648_v32 = vpop.xlane.xlu1 %1647  ;;  %v1651_v18 = vpop.xlane.xlu0 %1650 }
 0x134   : > { %4964 = vrsqrt.f32 %v1675_v30  ;;  %v1668_v36 = vmul.f32 0.0625, %v1648_v32  ;;  %v1669_v40 = vmul.f32 0.0625, %v1651_v18  ;;  %v1964_v63 = vadd.f32 %v1963_v44, %v1962_v51  ;;  %v4666_v44 = vld [vmem:[%s6087_s3] ss:$0 sm:$0xff] }
 0x135   : > { %v5610_v18 = vsub.f32 %v5513_v29, %v5537_v4  ;;  %v1975_v13 = vsel %vm714_vm0, %v1950_v46, 0.0 }
 0x136   : > { %v1676_v39 = vadd.f32 1e-05, %v1668_v36  ;;  %v1677_v48 = vadd.f32 1e-05, %v1669_v40  ;;  %v1966_v50 = vadd.f32 %v1965_v59, %v1964_v63  ;;  %v5635_v63 = vsub.f32 %v5529_v53, %v5537_v4 }
 0x137   : > { %v1654_v52 = vpop.xlane.xlu1 %1653  ;;  %v1657_v55 = vpop.xlane.xlu0 %1656 }
 0x138   : > { %4966 = vrsqrt.f32 %v1676_v39  ;;  %v1670_v60 = vmul.f32 0.0625, %v1654_v52  ;;  %v1671_v62 = vmul.f32 0.0625, %v1657_v55  ;;  %v1968_v32 = vadd.f32 %v1967_v2, %v1966_v50 }
 0x139   : > { %4968 = vrsqrt.f32 %v1677_v48  ;;  %v1971_v39 = vsel %vm714_vm0, %v1948_v27, 0.0  ;;  %v5624_v52 = vsub.f32 %v5524_v49, %v5537_v4  ;;  %v1951_v55 = vmul.f32 %v5610_v18, %v5610_v18 }
 0x13a   : > { %v1678_v16 = vadd.f32 1e-05, %v1670_v60  ;;  %v1679_v54 = vadd.f32 1e-05, %v1671_v62  ;;  %v1970_v40 = vadd.f32 %v1969_v19, %v1968_v32  ;;  %v1952_v49 = vmul.f32 %v5617_v43, %v5617_v43 }
 0x13b   : > { %v1660_v58 = vpop.xlane.xlu1 %1659  ;;  %v1663_v1 = vpop.xlane.xlu0 %1662  ;;  %v5642_v50 = vsub.f32 %v5533_v61, %v5537_v4 }
 0x13c   : > { %4970 = vrsqrt.f32 %v1678_v16  ;;  %v1672_v30 = vmul.f32 0.0625, %v1660_v58  ;;  %v1673_v31 = vmul.f32 0.0625, %v1663_v1  ;;  %v1972_v48 = vadd.f32 %v1971_v39, %v1970_v40  ;;  %v4667_v1 = vld [vmem:[%s6088_s4] ss:$0 sm:$0xff] }
 0x13d   : > { %4972 = vrsqrt.f32 %v1679_v54  ;;  %v1977_v58 = vsel %vm714_vm0, %v1951_v55, 0.0  ;;  %v1979_v61 = vsel %vm714_vm0, %v1952_v49, 0.0 }
 0x13e   : > { %v1680_v22 = vadd.f32 1e-05, %v1672_v30  ;;  %v1681_v36 = vadd.f32 1e-05, %v1673_v31  ;;  %v1974_v62 = vadd.f32 %v1973_v38, %v1972_v48  ;;  %v1954_v31 = vmul.f32 %v5635_v63, %v5635_v63 }
 0x13f   : > { %v1666_v41 = vpop.xlane.xlu1 %1665 }
 0x140   : > { %4974 = vrsqrt.f32 %v1680_v22  ;;  %v1674_v29 = vmul.f32 0.0625, %v1666_v41  ;;  %v1976_v59 = vadd.f32 %v1975_v13, %v1974_v62  ;;  %v1955_v22 = vmul.f32 %v5642_v50, %v5642_v50 }
 0x141   : > { %v4965_v51 = vpop.eup %4964  ;;  %4976 = vrsqrt.f32 %v1681_v36 }
 0x142   : > { %v1682_v57 = vadd.f32 1e-05, %v1674_v29  ;;  %v1691_v60 = vmul.f32 %v4965_v51, %v5407_v14  ;;  %v1953_v14 = vmul.f32 %v5624_v52, %v5624_v52  ;;  %v1978_v2 = vadd.f32 %v1977_v58, %v1976_v59 }
 0x143   : > { %v1983_v29 = vsel %vm714_vm0, %v1954_v31, 0.0 }
 0x144   : > { %4978 = vrsqrt.f32 %v1682_v57  ;;  %v1705_v54 = vmul.f32 %v4666_v44, %v1691_v60  ;;  %v1980_v32 = vadd.f32 %v1979_v61, %v1978_v2  ;;  %v1981_v36 = vsel %vm714_vm0, %v1953_v14, 0.0 }
 0x145   : > { %v4967_v16 = vpop.eup %4966  ;;  %v1985_v60 = vsel %vm714_vm0, %v1955_v22, 0.0 }
 0x146   : > { %v4969_v53 = vpop.eup %4968  ;;  %v1692_v27 = vmul.f32 %v4967_v16, %v5417_v23  ;;  %v1719_v19 = vadd.f32 %v4667_v1, %v1705_v54 }
 0x147   : > { %v1693_v30 = vmul.f32 %v4969_v53, %v5410_v15  ;;  %v1982_v15 = vadd.f32 %v1981_v36, %v1980_v32 }
 0x148   : > { %v1706_v4 = vmul.f32 %v4666_v44, %v1692_v27 }
 0x149   : > { %v4971_v34 = vpop.eup %4970  ;;  %v1707_v46 = vmul.f32 %v4666_v44, %v1693_v30  ;;  %v1984_v55 = vadd.f32 %v1983_v29, %v1982_v15 }
 0x14a   : > { %v4973_v40 = vpop.eup %4972  ;;  %v1694_v23 = vmul.f32 %v4971_v34, %v5421_v26  ;;  %v1720_v41 = vadd.f32 %v4667_v1, %v1706_v4 }
 0x14b   : > { %v1695_v39 = vmul.f32 %v4973_v40, %v5429_v35  ;;  %v1721_v49 = vadd.f32 %v4667_v1, %v1707_v46  ;;  %v1986_v59 = vadd.f32 %v1985_v60, %v1984_v55  ;;  %v2523_v46 = vlaneseq }
 0x14c   : > { %v4726_v48 = vpack.c.bf16 %v1720_v41, %v1719_v19  ;;  %v1708_v51 = vmul.f32 %v4666_v44, %v1694_v23  ;;  %v5088_v41 = vmov 1983009808  }
 0x14d   : > { %v4975_v38 = vpop.eup %4974  ;;  %v1709_v57 = vmul.f32 %v4666_v44, %v1695_v39  ;;  %v1987_v14 = vmul.f32 0.0625, %v1986_v59  ;;  %v2524_v29 = vshrl.u32 %v2523_v46, 7 }
 0x14e   : > { %v4977_v62 = vpop.eup %4976  ;;  %4902 = vmatprep.mubr.msk.bf16.mxu0 %vm1593_vm2, %v4726_v48  ;;  %v1722_v13 = vadd.f32 %v4667_v1, %v1708_v51  ;;  %v1696_v26 = vmul.f32 %v4975_v38, %v5433_v37  ;;  %v5089_v48 = vmov 1934713408  }
 0x14f   : > { %v1697_v16 = vmul.f32 %v4977_v62, %v5441_v45  ;;  %v1723_v53 = vadd.f32 %v4667_v1, %v1709_v57  ;;  %v1988_v31 = vadd.f32 1e-05, %v1987_v14 }
 0x150   : > { %v4727_v35 = vpack.c.bf16 %v1722_v13, %v1721_v49  ;;  %v1710_v54 = vmul.f32 %v4666_v44, %v1696_v26 }
 0x151   : > { %v4979_v58 = vpop.eup %4978  ;;  %v1711_v30 = vmul.f32 %v4666_v44, %v1697_v16  ;;  %4980 = vrsqrt.f32 %v1988_v31 }
 0x152   : > { %4903 = vmatmul.mubr.msk.bf16.vlgmr.msra.gmra.mxu0 %vm1593_vm2, %v4727_v35  ;;  %v1724_v27 = vadd.f32 %v4667_v1, %v1710_v54  ;;  %v1698_v2 = vmul.f32 %v4979_v58, %v5445_v47 }
 0x153   : > { %v1725_v37 = vadd.f32 %v4667_v1, %v1711_v30 }
 0x154   : > { %v4728_v61 = vpack.c.bf16 %v1724_v27, %v1723_v53  ;;  %v1712_v4 = vmul.f32 %v4666_v44, %v1698_v2 }
 0x156   : > { %4906 = vmatprep.mubr.msk.bf16.mxu0 %vm1593_vm2, %v4728_v61  ;;  %v1726_v32 = vadd.f32 %v4667_v1, %v1712_v4 }
 0x158   : > { %v4729_v45 = vpack.c.bf16 %v1726_v32, %v1725_v37 }
 0x15a   : > { %4907 = vmatmul.mubr.msk.bf16.gmra.mxu0 %vm1593_vm2, %v4729_v45 }
 0x15e   : > { %v4981_v34 = vpop.eup %4980 }
 0x15f   : > { %v1991_v19 = vmul.f32 %v4981_v34, %v5545_v6  ;;  %v1990_v22 = vmul.f32 %v4981_v34, %v5541_v5  ;;  %v1994_v47 = vmul.f32 %v4981_v34, %v5561_v21  ;;  %v1992_v36 = vmul.f32 %v4981_v34, %v5549_v11 }
 0x160   : > { %v1996_v44 = vmul.f32 %v4981_v34, %v5575_v33  ;;  %v1993_v1 = vmul.f32 %v4981_v34, %v5553_v12  ;;  %v1998_v40 = vmul.f32 %v4981_v34, %v5589_v56  ;;  %v1995_v6 = vmul.f32 %v4981_v34, %v5567_v0 }
 0x161   : > { %2038 = vxpose.xlu1.b32.start.end [1/1] (short) (narrow) %v1991_v19, 8  ;;  %2006 = vxpose.xlu0.b32.start.end [1/1] (short) (narrow) %v1990_v22, 8  ;;  %v2000_v5 = vmul.f32 %v4981_v34, %v5603_v24  ;;  %v1997_v21 = vmul.f32 %v4981_v34, %v5582_v42  ;;  %v2002_v11 = vmul.f32 %v4981_v34, %v5617_v43 }
 0x162   : > { %v1999_v33 = vmul.f32 %v4981_v34, %v5596_v3  ;;  %v2004_v12 = vmul.f32 %v4981_v34, %v5635_v63  ;;  %v2001_v56 = vmul.f32 %v4981_v34, %v5610_v18  ;;  %v2003_v0 = vmul.f32 %v4981_v34, %v5624_v52 }
 0x163   : > { %v2005_v24 = vmul.f32 %v4981_v34, %v5642_v50  ;;  %v2521_v63 = vunpack.c.l.s4 %v5088_v41  ;;  %v2585_v50 = vunpack.c.l.s4 %v5089_v48 }
 0x165   : > { %2134 = vxpose.xlu1.b32.start.end [1/1] (short) (narrow) %v1994_v47, 8  ;;  %2070 = vxpose.xlu0.b32.start.end [1/1] (short) (narrow) %v1992_v36, 8  ;;  %v2522_v39 = vunpack.c.0.s8 %v2521_v63  ;;  %v2586_v49 = vunpack.c.0.s8 %v2585_v50 }
 0x167   : > { %v5696_v38 = vsub.s32 %v2522_v39, %v2524_v29  ;;  %v5707_v58 = vsub.s32 %v2586_v49, %v2524_v29 }
 0x169   : > { %2198 = vxpose.xlu1.b32.start.end [1/1] (short) (narrow) %v1996_v44, 8  ;;  %2102 = vxpose.xlu0.b32.start.end [1/1] (short) (narrow) %v1993_v1, 8 }
 0x16d   : > { %2262 = vxpose.xlu1.b32.start.end [1/1] (short) (narrow) %v1998_v40, 8  ;;  %2166 = vxpose.xlu0.b32.start.end [1/1] (short) (narrow) %v1995_v6, 8 }
 0x171   : > { %2326 = vxpose.xlu1.b32.start.end [1/1] (short) (narrow) %v2000_v5, 8  ;;  %2230 = vxpose.xlu0.b32.start.end [1/1] (short) (narrow) %v1997_v21, 8 }
 0x175   : > { %2390 = vxpose.xlu1.b32.start.end [1/1] (short) (narrow) %v2002_v11, 8  ;;  %2294 = vxpose.xlu0.b32.start.end [1/1] (short) (narrow) %v1999_v33, 8 }
 0x179   : > { %2454 = vxpose.xlu1.b32.start.end [1/1] (short) (narrow) %v2004_v12, 8  ;;  %2358 = vxpose.xlu0.b32.start.end [1/1] (short) (narrow) %v2001_v56, 8 }
 0x17d   : > { %2422 = vxpose.xlu0.b32.start.end [1/1] (short) (narrow) %v2003_v0, 8 }
 0x181   : > { %2486 = vxpose.xlu0.b32.start.end [1/1] (short) (narrow) %v2005_v24, 8 }
 0x1dd   : > { %v5685_v42 = vpop.trf.xlu0  ;;  %v5687_v23 = vpop.trf.xlu1 }
 0x1e1   : > { %v5689_v43 = vpop.trf.xlu0  ;;  %v5691_v3 = vpop.trf.xlu1 }
 0x1e2   : > { %v2518_v57 = vcombine.low %v5685_v42, %v5689_v43  ;;  %v2519_v63 = vcombine.high %v5685_v42, %v5689_v43 }
 0x1e4   : > { %v2526_v59 = vrot.slane %v2518_v57, %v5696_v38  ;;  %v2533_v42 = vrot.slane %v2519_v63, %v5696_v38 }
 0x1e5   : > { %v2118_v18 = vpop.trf.xlu0  ;;  %v2214_v15 = vpop.trf.xlu1 }
 0x1e6   : > { %v2534_v52 = vcombine.low %v5687_v23, %v2118_v18  ;;  %v2550_v62 = vcombine.low %v5691_v3, %v2214_v15  ;;  %v2535_v12 = vcombine.high %v5687_v23, %v2118_v18  ;;  %v2551_v56 = vcombine.high %v5691_v3, %v2214_v15 }
 0x1e8   : > { %v2542_v60 = vrot.slane %v2534_v52, %v5696_v38  ;;  %v2558_v35 = vrot.slane %v2550_v62, %v5696_v38  ;;  %v2549_v23 = vrot.slane %v2535_v12, %v5696_v38  ;;  %v2565_v3 = vrot.slane %v2551_v56, %v5696_v38  ;;  %v4962_v12 = vld [vmem:[%s6093_s9] sm:$0xff]  }
 0x1e9   : > { %v2182_v51 = vpop.trf.xlu0  ;;  %v5694_v55 = vpop.trf.xlu1  ;;  %4910 = vmatprep.subr.bf16.mxu1 %v4962_v12 }
 0x1ea   : > { %v2582_v14 = vcombine.low %v2526_v59, %v2542_v60  ;;  %v2583_v0 = vcombine.high %v2526_v59, %v2542_v60  ;;  %4911 = vmatpush3.bf16.msra.mxu1 %v4962_v12 }
 0x1ec   : > { %v2590_v30 = vrot.slane %v2582_v14, %v5707_v58  ;;  %v2597_v18 = vrot.slane %v2583_v0, %v5707_v58 }
 0x1ed   : > { %v2246_v13 = vpop.trf.xlu0  ;;  %v5702_v26 = vpop.trf.xlu1 }
 0x1ee   : > { %v2566_v16 = vcombine.low %v2182_v51, %v2246_v13  ;;  %v2654_v19 = vcombine.low %v5694_v55, %v5702_v26  ;;  %v2567_v21 = vcombine.high %v2182_v51, %v2246_v13  ;;  %v2655_v43 = vcombine.high %v5694_v55, %v5702_v26 }
 0x1f0   : > { %v2574_v54 = vrot.slane %v2566_v16, %v5696_v38  ;;  %v2662_v44 = vrot.slane %v2654_v19, %v5696_v38  ;;  %v2581_v46 = vrot.slane %v2567_v21, %v5696_v38  ;;  %v2598_v16 = vcombine.low %v2533_v42, %v2549_v23 }
 0x1f1   : > { %v2310_v53 = vpop.trf.xlu0  ;;  %v2406_v2 = vpop.trf.xlu1 }
 0x1f2   : > { %v2614_v27 = vcombine.low %v2558_v35, %v2574_v54  ;;  %v2615_v11 = vcombine.high %v2558_v35, %v2574_v54  ;;  %v2630_v60 = vcombine.low %v2565_v3, %v2581_v46 }
 0x1f4   : > { %v2622_v31 = vrot.slane %v2614_v27, %v5707_v58  ;;  %v2629_v39 = vrot.slane %v2615_v11, %v5707_v58 }
 0x1f5   : > { %v2374_v61 = vpop.trf.xlu0  ;;  %v2470_v34 = vpop.trf.xlu1 }
 0x1f6   : > { %v2647_v4 = vcombine.high %v2590_v30, %v2622_v31  ;;  %v2646_v37 = vcombine.low %v2590_v30, %v2622_v31  ;;  %v2670_v32 = vcombine.low %v2310_v53, %v2374_v61  ;;  %v2686_v47 = vcombine.low %v2406_v2, %v2470_v34 }
 0x1f7   : > { %v2671_v15 = vcombine.high %v2310_v53, %v2374_v61  ;;  %v2687_v57 = vcombine.high %v2406_v2, %v2470_v34  ;;  %v2649_v49 = vcombine.high %v2597_v18, %v2629_v39  ;;  %v2648_v13 = vcombine.low %v2597_v18, %v2629_v39  ;;  %v4668_v39 = vld [vmem:[%s6090_s6] ss:$0 sm:$0xff] }
 0x1f8   : > { %2822 = vxpose.xlu0.b32.start [1/2] (short) (narrow) %v2647_v4, 8  ;;  %2790 = vxpose.xlu1.b32.start [1/2] (short) (narrow) %v2646_v37, 8  ;;  %v2678_v22 = vrot.slane %v2670_v32, %v5696_v38  ;;  %v2694_v6 = vrot.slane %v2686_v47, %v5696_v38  ;;  %v2669_v53 = vrot.slane %v2655_v43, %v5696_v38 }
 0x1f9   : > { %v2438_v45 = vpop.trf.xlu0  ;;  %v2685_v35 = vrot.slane %v2671_v15, %v5696_v38  ;;  %v2701_v54 = vrot.slane %v2687_v57, %v5696_v38  ;;  %v2638_v2 = vrot.slane %v2630_v60, %v5707_v58  ;;  %v2606_v31 = vrot.slane %v2598_v16, %v5707_v58 }
 0x1fa   : > { %v2718_v40 = vcombine.low %v2662_v44, %v2678_v22  ;;  %v2719_v51 = vcombine.high %v2662_v44, %v2678_v22  ;;  %v2631_v32 = vcombine.high %v2565_v3, %v2581_v46  ;;  %v2599_v34 = vcombine.high %v2533_v42, %v2549_v23 }
 0x1fb   : > { %v2734_v30 = vcombine.low %v2669_v53, %v2685_v35  ;;  %v2651_v61 = vcombine.high %v2606_v31, %v2638_v2  ;;  %v2650_v4 = vcombine.low %v2606_v31, %v2638_v2  ;;  %v2735_v44 = vcombine.high %v2669_v53, %v2685_v35 }
 0x1fc   : > { %v2726_v24 = vrot.slane %v2718_v40, %v5707_v58  ;;  %v2733_v14 = vrot.slane %v2719_v51, %v5707_v58 }
 0x1fd   : > { %v2502_v36 = vpop.trf.xlu0  ;;  %v2749_v21 = vrot.slane %v2735_v44, %v5707_v58 }
 0x1fe   : > { %v2702_v1 = vcombine.low %v2438_v45, %v2502_v36  ;;  %v2703_v29 = vcombine.high %v2438_v45, %v2502_v36  ;;  %v2742_v45 = vrot.slane %v2734_v30, %v5707_v58  ;;  %v2645_v36 = vrot.slane %v2631_v32, %v5707_v58 }
 0x200   : > { %v2710_v5 = vrot.slane %v2702_v1, %v5696_v38  ;;  %v2717_v62 = vrot.slane %v2703_v29, %v5696_v38  ;;  %v2613_v1 = vrot.slane %v2599_v34, %v5707_v58 }
 0x202   : > { %v2750_v33 = vcombine.low %v2694_v6, %v2710_v5  ;;  %v2751_v52 = vcombine.high %v2694_v6, %v2710_v5  ;;  %v2766_v27 = vcombine.low %v2701_v54, %v2717_v62  ;;  %v2767_v19 = vcombine.high %v2701_v54, %v2717_v62 }
 0x203   : > { %v2653_v40 = vcombine.high %v2613_v1, %v2645_v36  ;;  %v2652_v6 = vcombine.low %v2613_v1, %v2645_v36 }
 0x204   : > { %v2758_v41 = vrot.slane %v2750_v33, %v5707_v58  ;;  %v2765_v59 = vrot.slane %v2751_v52, %v5707_v58  ;;  %v2774_v37 = vrot.slane %v2766_v27, %v5707_v58  ;;  %v2781_v5 = vrot.slane %v2767_v19, %v5707_v58 }
 0x206   : > { %v2783_v48 = vcombine.high %v2726_v24, %v2758_v41  ;;  %v2782_v50 = vcombine.low %v2726_v24, %v2758_v41  ;;  %v2785_v55 = vcombine.high %v2733_v14, %v2765_v59  ;;  %v2784_v26 = vcombine.low %v2733_v14, %v2765_v59 }
 0x207   : > { %v2787_v22 = vcombine.high %v2742_v45, %v2774_v37  ;;  %v2786_v47 = vcombine.low %v2742_v45, %v2774_v37  ;;  %v2789_v11 = vcombine.high %v2749_v21, %v2781_v5  ;;  %v2788_v33 = vcombine.low %v2749_v21, %v2781_v5 }
 0x208   : > { %2823 = vxpose.xlu0.b32.end [2/2] (short) (narrow) %v2783_v48, 8  ;;  %2791 = vxpose.xlu1.b32.end [2/2] (short) (narrow) %v2782_v50, 8 }
 0x20c   : > { %2886 = vxpose.xlu0.b32.start [1/2] (short) (narrow) %v2649_v49, 8  ;;  %2854 = vxpose.xlu1.b32.start [1/2] (short) (narrow) %v2648_v13, 8 }
 0x210   : > { %2887 = vxpose.xlu0.b32.end [2/2] (short) (narrow) %v2785_v55, 8  ;;  %2855 = vxpose.xlu1.b32.end [2/2] (short) (narrow) %v2784_v26, 8 }
 0x212   : > { %v4904_v56 = vpop.f32.mrf.mxu0 }
 0x213   : > { %v1822_v52 = vadd.f32 %v4904_v56, %v4668_v39 }
 0x214   : > { %2950 = vxpose.xlu0.b32.start [1/2] (short) (narrow) %v2651_v61, 8  ;;  %2918 = vxpose.xlu1.b32.start [1/2] (short) (narrow) %v2650_v4, 8  ;;  %v1813_v0 = vpop.f32.mrf.mxu0 }
 0x215   : > { %v1814_v48 = vadd.f32 %v4668_v39, %v1813_v0  ;;  %v4680_v18 = vmul.f32 -1.442695, %v1822_v52 }
 0x216   : > { %v4905_v24 = vpop.f32.mrf.mxu0 }
 0x217   : > { %v1825_v50 = vadd.f32 %v4905_v24, %v4668_v39  ;;  %v4678_v51 = vmul.f32 -1.442695, %v1814_v48  ;;  %4982 = vpow2.f32 %v4680_v18 }
 0x218   : > { %2951 = vxpose.xlu0.b32.end [2/2] (short) (narrow) %v2787_v22, 8  ;;  %2919 = vxpose.xlu1.b32.end [2/2] (short) (narrow) %v2786_v47, 8  ;;  %v1816_v41 = vpop.f32.mrf.mxu0 }
 0x219   : > { %v1817_v23 = vadd.f32 %v4668_v39, %v1816_v41  ;;  %v4681_v57 = vmul.f32 -1.442695, %v1825_v50  ;;  %4984 = vpow2.f32 %v4678_v51 }
 0x21a   : > { %v4908_v63 = vpop.f32.mrf.mxu0 }
 0x21b   : > { %v4679_v43 = vmul.f32 -1.442695, %v1817_v23  ;;  %4986 = vpow2.f32 %v4681_v57  ;;  %v1838_v62 = vadd.f32 %v4908_v63, %v4668_v39 }
 0x21c   : > { %3014 = vxpose.xlu0.b32.start [1/2] (short) (narrow) %v2653_v40, 8  ;;  %2982 = vxpose.xlu1.b32.start [1/2] (short) (narrow) %v2652_v6, 8  ;;  %v1829_v46 = vpop.f32.mrf.mxu0 }
 0x21d   : > { %v1830_v15 = vadd.f32 %v4668_v39, %v1829_v46  ;;  %4988 = vpow2.f32 %v4679_v43  ;;  %v4684_v59 = vmul.f32 -1.442695, %v1838_v62 }
 0x21e   : > { %v4909_v29 = vpop.f32.mrf.mxu0 }
 0x21f   : > { %v4682_v60 = vmul.f32 -1.442695, %v1830_v15  ;;  %v1841_v13 = vadd.f32 %v4909_v29, %v4668_v39 }
 0x220   : > { %3015 = vxpose.xlu0.b32.end [2/2] (short) (narrow) %v2789_v11, 8  ;;  %2983 = vxpose.xlu1.b32.end [2/2] (short) (narrow) %v2788_v33, 8  ;;  %v1832_v3 = vpop.f32.mrf.mxu0 }
 0x221   : > { %v1833_v42 = vadd.f32 %v4668_v39, %v1832_v3  ;;  %4990 = vpow2.f32 %v4682_v60  ;;  %v4685_v16 = vmul.f32 -1.442695, %v1841_v13 }
 0x223   : > { %v4683_v49 = vmul.f32 -1.442695, %v1833_v42 }
 0x224   : > { %v4983_v14 = vpop.eup %4982 }
 0x225   : > { %4992 = vpow2.f32 %v4683_v49  ;;  %v1870_v30 = vadd.f32 1.0, %v4983_v14  ;;  %v4686_v14 = vld [vmem:[%s6091_s7] ss:$0 sm:$0xff] }
 0x226   : > { %4994 = vpow2.f32 %v4684_v59  ;;  %v4985_v53 = vpop.eup %4984 }
 0x227   : > { %4996 = vpow2.f32 %v4685_v16  ;;  %v1868_v61 = vadd.f32 1.0, %v4985_v53 }
 0x228   : > { %v4987_v26 = vpop.eup %4986  ;;  %4998 = vrcp.f32 %v1870_v30 }
 0x229   : > { %v1871_v4 = vadd.f32 1.0, %v4987_v26  ;;  %5000 = vrcp.f32 %v1868_v61 }
 0x22a   : > { %v4989_v2 = vpop.eup %4988 }
 0x22b   : > { %v1869_v22 = vadd.f32 1.0, %v4989_v2  ;;  %5002 = vrcp.f32 %v1871_v4 }
 0x22d   : > { %5004 = vrcp.f32 %v1869_v22 }
 0x22e   : > { %v4991_v31 = vpop.eup %4990 }
 0x22f   : > { %v1872_v47 = vadd.f32 1.0, %v4991_v31  ;;  %v4687_v31 = vld [vmem:[%s6092_s8] ss:$0 sm:$0xff] }
 0x231   : > { %5006 = vrcp.f32 %v1872_v47 }
 0x232   : > { %v4993_v19 = vpop.eup %4992 }
 0x233   : > { %v1873_v1 = vadd.f32 1.0, %v4993_v19  ;;  %v4995_v5 = vpop.eup %4994 }
 0x234   : > { %v4997_v56 = vpop.eup %4996  ;;  %v1874_v46 = vadd.f32 1.0, %v4995_v5 }
 0x235   : > { %5008 = vrcp.f32 %v1873_v1  ;;  %v1875_v3 = vadd.f32 1.0, %v4997_v56  ;;  %v4999_v53 = vpop.eup %4998 }
 0x236   : > { %5010 = vrcp.f32 %v1874_v46  ;;  %v5001_v30 = vpop.eup %5000 }
 0x237   : > { %5012 = vrcp.f32 %v1875_v3 }
 0x280   : > { %v2838_v35 = vpop.trf.xlu0  ;;  %v2806_v54 = vpop.trf.xlu1 }
 0x288   : > { %v2902_v27 = vpop.trf.xlu0  ;;  %v2870_v55 = vpop.trf.xlu1 }
 0x289   : > { %v3062_v37 = vcombine.low %v2838_v35, %v2902_v27  ;;  %v3046_v32 = vcombine.low %v2806_v54, %v2870_v55  ;;  %v3063_v36 = vcombine.high %v2838_v35, %v2902_v27  ;;  %v3047_v44 = vcombine.high %v2806_v54, %v2870_v55 }
 0x28b   : > { %v3070_v40 = vrot.slane %v3062_v37, %v5696_v38  ;;  %v3054_v6 = vrot.slane %v3046_v32, %v5696_v38  ;;  %v3077_v21 = vrot.slane %v3063_v36, %v5696_v38  ;;  %v3061_v11 = vrot.slane %v3047_v44, %v5696_v38 }
 0x28d   : > { %v3110_v39 = vcombine.low %v3054_v6, %v3070_v40  ;;  %v3111_v29 = vcombine.high %v3054_v6, %v3070_v40  ;;  %v3126_v18 = vcombine.low %v3061_v11, %v3077_v21  ;;  %v3127_v15 = vcombine.high %v3061_v11, %v3077_v21 }
 0x28f   : > { %v3118_v60 = vrot.slane %v3110_v39, %v5707_v58  ;;  %v3125_v62 = vrot.slane %v3111_v29, %v5707_v58  ;;  %v3134_v35 = vrot.slane %v3126_v18, %v5707_v58  ;;  %v3141_v54 = vrot.slane %v3127_v15, %v5707_v58 }
 0x290   : > { %v2966_v45 = vpop.trf.xlu0  ;;  %v2934_v34 = vpop.trf.xlu1 }
 0x298   : > { %v3030_v33 = vpop.trf.xlu0  ;;  %v2998_v12 = vpop.trf.xlu1 }
 0x299   : > { %v3094_v0 = vcombine.low %v2966_v45, %v3030_v33  ;;  %v3095_v24 = vcombine.high %v2966_v45, %v3030_v33  ;;  %v3078_v41 = vcombine.low %v2934_v34, %v2998_v12  ;;  %v3079_v63 = vcombine.high %v2934_v34, %v2998_v12  ;;  %v5003_v45 = vpop.eup %5002 }
 0x29a   : > { %v5005_v36 = vpop.eup %5004 }
 0x29b   : > { %v3102_v52 = vrot.slane %v3094_v0, %v5696_v38  ;;  %v3109_v48 = vrot.slane %v3095_v24, %v5696_v38  ;;  %v3086_v50 = vrot.slane %v3078_v41, %v5696_v38  ;;  %v3093_v23 = vrot.slane %v3079_v63, %v5696_v38  ;;  %v5007_v40 = vpop.eup %5006 }
 0x29c   : > { %v5009_v24 = vpop.eup %5008 }
 0x29d   : > { %v3142_v51 = vcombine.low %v3086_v50, %v3102_v52  ;;  %v3143_v57 = vcombine.high %v3086_v50, %v3102_v52  ;;  %v3158_v42 = vcombine.low %v3093_v23, %v3109_v48  ;;  %v3159_v43 = vcombine.high %v3093_v23, %v3109_v48  ;;  %v5011_v18 = vpop.eup %5010 }
 0x29f   : > { %v3150_v49 = vrot.slane %v3142_v51, %v5707_v58  ;;  %v3157_v13 = vrot.slane %v3143_v57, %v5707_v58  ;;  %v3166_v59 = vrot.slane %v3158_v42, %v5707_v58  ;;  %v3173_v16 = vrot.slane %v3159_v43, %v5707_v58  ;;  %v5013_v51 = vpop.eup %5012 }
 0x2a1   : > { %v3174_v27 = vcombine.low %v3118_v60, %v3150_v49  ;;  %v3175_v55 = vcombine.high %v3118_v60, %v3150_v49  ;;  %v3176_v26 = vcombine.low %v3125_v62, %v3157_v13  ;;  %v3177_v2 = vcombine.high %v3125_v62, %v3157_v13  ;;  %v4688_v60 = vld [vmem:[%s6094_s10] ss:$0 sm:$0xff] }
 0x2a2   : > { %v3178_v61 = vcombine.low %v3134_v35, %v3166_v59  ;;  %v3179_v4 = vcombine.high %v3134_v35, %v3166_v59  ;;  %v3180_v37 = vcombine.low %v3141_v54, %v3173_v16  ;;  %v3181_v32 = vcombine.high %v3141_v54, %v3173_v16 }
 0x2a3   : > { %v3188_v34 = vmul.f32 %v4686_v14, %v3174_v27  ;;  %v3189_v19 = vmul.f32 %v4686_v14, %v3175_v55  ;;  %v3190_v22 = vmul.f32 %v4686_v14, %v3176_v26  ;;  %v3191_v47 = vmul.f32 %v4686_v14, %v3177_v2 }
 0x2a4   : > { %v3192_v44 = vmul.f32 %v4686_v14, %v3178_v61  ;;  %v3193_v1 = vmul.f32 %v4686_v14, %v3179_v4  ;;  %v3194_v33 = vmul.f32 %v4686_v14, %v3180_v37  ;;  %v3195_v12 = vmul.f32 %v4686_v14, %v3181_v32 }
 0x2a5   : > { %v3204_v6 = vadd.f32 %v4687_v31, %v3190_v22  ;;  %v3205_v5 = vadd.f32 %v4687_v31, %v3191_v47  ;;  %v3202_v21 = vadd.f32 %v4687_v31, %v3188_v34  ;;  %v3203_v11 = vadd.f32 %v4687_v31, %v3189_v19 }
 0x2a6   : > { %v3206_v56 = vadd.f32 %v4687_v31, %v3192_v44  ;;  %v3207_v0 = vadd.f32 %v4687_v31, %v3193_v1  ;;  %v3208_v23 = vadd.f32 %v4687_v31, %v3194_v33  ;;  %v3209_v3 = vadd.f32 %v4687_v31, %v3195_v12 }
 0x2a7   : > { %v3210_v41 = vmul.f32 %v5001_v30, %v3202_v21  ;;  %v3211_v63 = vmul.f32 %v5005_v36, %v3203_v11  ;;  %v3212_v46 = vmul.f32 %v4999_v53, %v3204_v6  ;;  %v3213_v39 = vmul.f32 %v5003_v45, %v3205_v5 }
 0x2a8   : > { %v3214_v29 = vmul.f32 %v5007_v40, %v3206_v56  ;;  %v3215_v52 = vmul.f32 %v5009_v24, %v3207_v0  ;;  %v3216_v57 = vmul.f32 %v5011_v18, %v3208_v23  ;;  %v3217_v42 = vmul.f32 %v5013_v51, %v3209_v3 }
 0x2a9   : > { %v4730_v48 = vpack.c.bf16 %v3211_v63, %v3210_v41  ;;  %v4731_v50 = vpack.c.bf16 %v3213_v39, %v3212_v46 }
 0x2aa   : > { %v4732_v15 = vpack.c.bf16 %v3215_v52, %v3214_v29  ;;  %v4733_v43 = vpack.c.bf16 %v3217_v42, %v3216_v57 }
 0x2ab   : > { %4912 = vmatprep.mubr.msk.bf16.mxu1 %vm1593_vm2, %v4730_v48 }
 0x2ac   : > { %4913 = vmatmul.mubr.msk.bf16.vlgmr.msra.gmra.mxu1 %vm1593_vm2, %v4731_v50 }
 0x2ad   : > { %4916 = vmatprep.mubr.msk.bf16.mxu1 %vm1593_vm2, %v4732_v15 }
 0x2b4   : > { %4917 = vmatmul.mubr.msk.bf16.gmra.mxu1 %vm1593_vm2, %v4733_v43 }
 0x36c   : > { %v4914_v62 = vpop.f32.mrf.mxu1 }
 0x36d   : > { %v3313_v49 = vadd.f32 %v4914_v62, %v4688_v60 }
 0x36e   : > { %v3304_v13 = vpop.f32.mrf.mxu1 }
 0x36f   : > { %v5781_v59 = vadd.f32 %v5268_v8, %v3313_v49  ;;  %v3305_v16 = vadd.f32 %v4688_v60, %v3304_v13 }
 0x370   : > { %v4915_v35 = vpop.f32.mrf.mxu1 }
 0x371   : > { %v3345_v54 = vpack.c.bf16 %v5781_v59, %v5781_v59  ;;  %v3335_v14 = vadd.f32 %v5266_v7, %v3305_v16  ;;  %v3316_v53 = vadd.f32 %v4915_v35, %v4688_v60 }
 0x372   : > { %v3307_v8 = vpop.f32.mrf.mxu1 }
 0x373   : > { %3354 = vst.msk [vmem:[%s5788_s18 + $0x8] sm:$0xf] %vm3351_vm3, %v3345_v54  ;;  %v3343_v27 = vpack.c.bf16 %v3335_v14, %v3335_v14  ;;  %v5796_v55 = vadd.f32 %v5279_v10, %v3316_v53  ;;  %v3308_v26 = vadd.f32 %v4688_v60, %v3307_v8  ;;  %v3362_v2 = vsel %vm1593_vm2, %v3335_v14, 0.0 }
 0x374   : > { %v4918_v30 = vpop.f32.mrf.mxu1  ;;  %3363 = vadd.xlane.f32.xlu1 %v3362_v2  ;;  %v3368_v10 = vsel %vm1593_vm2, %v5781_v59, 0.0 }
 0x375   : > { %3352 = vst.msk [vmem:[%s5788_s18] sm:$0xf] %vm3351_vm3, %v3343_v27  ;;  %v3346_v7 = vpack.c.bf16 %v5796_v55, %v5796_v55  ;;  %v3336_v31 = vadd.f32 %v5270_v9, %v3308_v26  ;;  %v3329_v61 = vadd.f32 %v4918_v30, %v4688_v60  ;;  %v3371_v44 = vsel %vm1593_vm2, %v5796_v55, 0.0 }
 0x376   : > { %v3320_v4 = vpop.f32.mrf.mxu1 }
 0x377   : > { %3355 = vst.msk [vmem:[%s5788_s18 + $0xc] sm:$0xf] %vm3351_vm3, %v3346_v7  ;;  %v3344_v37 = vpack.c.bf16 %v3336_v31, %v3336_v31  ;;  %v3341_v32 = vadd.f32 %v5302_v25, %v3329_v61  ;;  %v3321_v45 = vadd.f32 %v4688_v60, %v3320_v4  ;;  %v3365_v34 = vsel %vm1593_vm2, %v3336_v31, 0.0  ;;  %v4963_v4 = vld [vmem:[%s6097_s13] sm:$0xff]  }
 0x378   : > { %v4919_v19 = vpop.f32.mrf.mxu1  ;;  %3366 = vadd.xlane.f32.xlu0 %v3365_v34  ;;  %3369 = vadd.xlane.f32.xlu1 %v3368_v10 }
 0x379   : > { %3353 = vst.msk [vmem:[%s5788_s18 + $0x4] sm:$0xf] %vm3351_vm3, %v3344_v37  ;;  %v3349_v9 = vpack.c.bf16 %v3341_v32, %v3341_v32  ;;  %v3339_v22 = vadd.f32 %v5290_v17, %v3321_v45  ;;  %v3332_v47 = vadd.f32 %v4919_v19, %v4688_v60  ;;  %v3380_v11 = vsel %vm1593_vm2, %v3341_v32, 0.0  ;;  %4920 = vmatprep.subr.bf16.mxu0 %v4963_v4 }
 0x37a   : > { %v3323_v36 = vpop.f32.mrf.mxu1  ;;  %4921 = vmatpush3.bf16.msra.mxu0 %v4963_v4 }
 0x37b   : > { %3358 = vst.msk [vmem:[%s5788_s18 + $0x18] sm:$0xf] %vm3351_vm3, %v3349_v9  ;;  %v3347_v25 = vpack.c.bf16 %v3339_v22, %v3339_v22  ;;  %v3342_v1 = vadd.f32 %v5310_v28, %v3332_v47  ;;  %v3324_v40 = vadd.f32 %v4688_v60, %v3323_v36  ;;  %v3374_v6 = vsel %vm1593_vm2, %v3339_v22, 0.0 }
 0x37c   : > { %3375 = vadd.xlane.f32.xlu0 %v3374_v6  ;;  %3372 = vadd.xlane.f32.xlu1 %v3371_v44 }
 0x37d   : > { %3356 = vst.msk [vmem:[%s5788_s18 + $0x10] sm:$0xf] %vm3351_vm3, %v3347_v25  ;;  %v3350_v5 = vpack.c.bf16 %v3342_v1, %v3342_v1  ;;  %v3340_v17 = vadd.f32 %v5295_v20, %v3324_v40  ;;  %v3383_v28 = vsel %vm1593_vm2, %v3342_v1, 0.0 }
 0x37f   : > { %3359 = vst.msk [vmem:[%s5788_s18 + $0x1c] sm:$0xf] %vm3351_vm3, %v3350_v5  ;;  %v3348_v21 = vpack.c.bf16 %v3340_v17, %v3340_v17  ;;  %v3377_v33 = vsel %vm1593_vm2, %v3340_v17, 0.0 }
 0x380   : > { %3381 = vadd.xlane.f32.xlu0 %v3380_v11  ;;  %3378 = vadd.xlane.f32.xlu1 %v3377_v33 }
 0x381   : > { %3357 = vst.msk [vmem:[%s5788_s18 + $0x14] sm:$0xf] %vm3351_vm3, %v3348_v21 }
 0x384   : > { %3384 = vadd.xlane.f32.xlu1 %v3383_v28 }
 0x3fd   : > { %v3364_v12 = vpop.xlane.xlu1 %3363 }
 0x3fe   : > { %v3386_v56 = vmul.f32 0.0625, %v3364_v12 }
 0x400   : > { %v5829_v0 = vsub.f32 %v3335_v14, %v3386_v56 }
 0x401   : > { %v3367_v24 = vpop.xlane.xlu0 %3366  ;;  %v3370_v20 = vpop.xlane.xlu1 %3369 }
 0x402   : > { %v3387_v41 = vmul.f32 0.0625, %v3367_v24  ;;  %v3388_v63 = vmul.f32 0.0625, %v3370_v20  ;;  %v3402_v46 = vmul.f32 %v5829_v0, %v5829_v0 }
 0x404   : > { %v5833_v39 = vsub.f32 %v3336_v31, %v3387_v41  ;;  %v5836_v29 = vsub.f32 %v5781_v59, %v3388_v63  ;;  %v3410_v52 = vsel %vm1593_vm2, %v3402_v46, 0.0  ;;  %v4698_v63 = vld [vmem:[%s6095_s11] ss:$0 sm:$0xff] }
 0x405   : > { %v3376_v48 = vpop.xlane.xlu0 %3375  ;;  %3411 = vadd.xlane.f32.xlu0 %v3410_v52  ;;  %v3373_v50 = vpop.xlane.xlu1 %3372 }
 0x406   : > { %v3390_v23 = vmul.f32 0.0625, %v3376_v48  ;;  %v3389_v3 = vmul.f32 0.0625, %v3373_v50  ;;  %v3403_v18 = vmul.f32 %v5833_v39, %v5833_v39  ;;  %v3404_v15 = vmul.f32 %v5836_v29, %v5836_v29 }
 0x408   : > { %v5843_v51 = vsub.f32 %v3339_v22, %v3390_v23  ;;  %v5846_v57 = vsub.f32 %v5796_v55, %v3389_v3  ;;  %v3413_v42 = vsel %vm1593_vm2, %v3403_v18, 0.0  ;;  %v3416_v43 = vsel %vm1593_vm2, %v3404_v15, 0.0  ;;  %v4699_v23 = vld [vmem:[%s6096_s12] ss:$0 sm:$0xff] }
 0x409   : > { %v3382_v60 = vpop.xlane.xlu0 %3381  ;;  %3414 = vadd.xlane.f32.xlu1 %v3413_v42  ;;  %3417 = vadd.xlane.f32.xlu0 %v3416_v43  ;;  %v3379_v62 = vpop.xlane.xlu1 %3378 }
 0x40a   : > { %v3392_v49 = vmul.f32 0.0625, %v3382_v60  ;;  %v3391_v13 = vmul.f32 0.0625, %v3379_v62  ;;  %v3406_v59 = vmul.f32 %v5843_v51, %v5843_v51  ;;  %v3405_v16 = vmul.f32 %v5846_v57, %v5846_v57 }
 0x40c   : > { %v5854_v35 = vsub.f32 %v3341_v32, %v3392_v49  ;;  %v5856_v54 = vsub.f32 %v3340_v17, %v3391_v13  ;;  %v3422_v14 = vsel %vm1593_vm2, %v3406_v59, 0.0  ;;  %v3419_v53 = vsel %vm1593_vm2, %v3405_v16, 0.0 }
 0x40d   : > { %3423 = vadd.xlane.f32.xlu0 %v3422_v14  ;;  %3420 = vadd.xlane.f32.xlu1 %v3419_v53  ;;  %v3385_v8 = vpop.xlane.xlu1 %3384 }
 0x40e   : > { %v3393_v27 = vmul.f32 0.0625, %v3385_v8  ;;  %v3408_v55 = vmul.f32 %v5854_v35, %v5854_v35  ;;  %v3407_v26 = vmul.f32 %v5856_v54, %v5856_v54 }
 0x410   : > { %v5864_v2 = vsub.f32 %v3342_v1, %v3393_v27  ;;  %v3428_v30 = vsel %vm1593_vm2, %v3408_v55, 0.0  ;;  %v3425_v7 = vsel %vm1593_vm2, %v3407_v26, 0.0 }
 0x411   : > { %3429 = vadd.xlane.f32.xlu0 %v3428_v30  ;;  %3426 = vadd.xlane.f32.xlu1 %v3425_v7 }
 0x412   : > { %v3409_v31 = vmul.f32 %v5864_v2, %v5864_v2 }
 0x414   : > { %v3431_v61 = vsel %vm1593_vm2, %v3409_v31, 0.0 }
 0x415   : > { %3432 = vadd.xlane.f32.xlu1 %v3431_v61 }
 0x48e   : > { %v3412_v10 = vpop.xlane.xlu0 %3411 }
 0x48f   : > { %v3434_v37 = vmul.f32 0.0625, %v3412_v10 }
 0x491   : > { %v3442_v32 = vadd.f32 1e-05, %v3434_v37 }
 0x492   : > { %v3418_v45 = vpop.xlane.xlu0 %3417  ;;  %v3415_v34 = vpop.xlane.xlu1 %3414 }
 0x493   : > { %5014 = vrsqrt.f32 %v3442_v32  ;;  %v3436_v19 = vmul.f32 0.0625, %v3418_v45  ;;  %v3435_v9 = vmul.f32 0.0625, %v3415_v34 }
 0x495   : > { %v3444_v22 = vadd.f32 1e-05, %v3436_v19  ;;  %v3443_v47 = vadd.f32 1e-05, %v3435_v9 }
 0x496   : > { %v3424_v36 = vpop.xlane.xlu0 %3423  ;;  %v3421_v44 = vpop.xlane.xlu1 %3420 }
 0x497   : > { %5016 = vrsqrt.f32 %v3444_v22  ;;  %v3438_v25 = vmul.f32 0.0625, %v3424_v36  ;;  %v3437_v1 = vmul.f32 0.0625, %v3421_v44 }
 0x498   : > { %5018 = vrsqrt.f32 %v3443_v47 }
 0x499   : > { %v3446_v40 = vadd.f32 1e-05, %v3438_v25  ;;  %v3445_v6 = vadd.f32 1e-05, %v3437_v1 }
 0x49a   : > { %v3430_v5 = vpop.xlane.xlu0 %3429  ;;  %v3427_v17 = vpop.xlane.xlu1 %3426 }
 0x49b   : > { %5020 = vrsqrt.f32 %v3446_v40  ;;  %v3440_v21 = vmul.f32 0.0625, %v3430_v5  ;;  %v3439_v11 = vmul.f32 0.0625, %v3427_v17 }
 0x49c   : > { %5022 = vrsqrt.f32 %v3445_v6 }
 0x49d   : > { %v3448_v33 = vadd.f32 1e-05, %v3440_v21  ;;  %v3447_v28 = vadd.f32 1e-05, %v3439_v11 }
 0x49e   : > { %v3433_v12 = vpop.xlane.xlu1 %3432 }
 0x49f   : > { %5024 = vrsqrt.f32 %v3448_v33  ;;  %v3441_v56 = vmul.f32 0.0625, %v3433_v12 }
 0x4a0   : > { %v5015_v24 = vpop.eup %5014  ;;  %5026 = vrsqrt.f32 %v3447_v28 }
 0x4a1   : > { %v3449_v20 = vadd.f32 1e-05, %v3441_v56  ;;  %v3458_v41 = vmul.f32 %v5015_v24, %v5829_v0 }
 0x4a3   : > { %5028 = vrsqrt.f32 %v3449_v20  ;;  %v3472_v48 = vmul.f32 %v4698_v63, %v3458_v41 }
 0x4a4   : > { %v5017_v46 = vpop.eup %5016 }
 0x4a5   : > { %v5019_v52 = vpop.eup %5018  ;;  %v3460_v50 = vmul.f32 %v5017_v46, %v5836_v29  ;;  %v3486_v0 = vadd.f32 %v4699_v23, %v3472_v48 }
 0x4a6   : > { %v3459_v3 = vmul.f32 %v5019_v52, %v5833_v39 }
 0x4a7   : > { %v3474_v43 = vmul.f32 %v4698_v63, %v3460_v50 }
 0x4a8   : > { %v5021_v18 = vpop.eup %5020  ;;  %v3473_v15 = vmul.f32 %v4698_v63, %v3459_v3 }
 0x4a9   : > { %v5023_v42 = vpop.eup %5022  ;;  %v3462_v49 = vmul.f32 %v5021_v18, %v5843_v51  ;;  %v3488_v53 = vadd.f32 %v4699_v23, %v3474_v43 }
 0x4aa   : > { %v3461_v60 = vmul.f32 %v5023_v42, %v5846_v57  ;;  %v3487_v62 = vadd.f32 %v4699_v23, %v3473_v15 }
 0x4ab   : > { %v3476_v27 = vmul.f32 %v4698_v63, %v3462_v49 }
 0x4ac   : > { %v5025_v13 = vpop.eup %5024  ;;  %v3475_v59 = vmul.f32 %v4698_v63, %v3461_v60  ;;  %v4734_v16 = vpack.c.bf16 %v3487_v62, %v3486_v0 }
 0x4ad   : > { %v5027_v29 = vpop.eup %5026  ;;  %v3464_v14 = vmul.f32 %v5025_v13, %v5854_v35  ;;  %v3490_v51 = vadd.f32 %v4699_v23, %v3476_v27 }
 0x4ae   : > { %4922 = vmatprep.mubr.msk.bf16.mxu0 %vm1593_vm2, %v4734_v16  ;;  %v3489_v39 = vadd.f32 %v4699_v23, %v3475_v59  ;;  %v3463_v8 = vmul.f32 %v5027_v29, %v5856_v54  ;;  %v4700_v54 = vld [vmem:[%s6098_s14] ss:$0 sm:$0xff] }
 0x4af   : > { %v3478_v7 = vmul.f32 %v4698_v63, %v3464_v14 }
 0x4b0   : > { %v5029_v55 = vpop.eup %5028  ;;  %v4735_v26 = vpack.c.bf16 %v3489_v39, %v3488_v53  ;;  %v3477_v30 = vmul.f32 %v4698_v63, %v3463_v8 }
 0x4b1   : > { %v3465_v57 = vmul.f32 %v5029_v55, %v5864_v2  ;;  %v3492_v35 = vadd.f32 %v4699_v23, %v3478_v7 }
 0x4b2   : > { %4923 = vmatmul.mubr.msk.bf16.vlgmr.msra.gmra.mxu0 %vm1593_vm2, %v4735_v26  ;;  %v3491_v31 = vadd.f32 %v4699_v23, %v3477_v30 }
 0x4b3   : > { %v3479_v61 = vmul.f32 %v4698_v63, %v3465_v57 }
 0x4b4   : > { %v4736_v4 = vpack.c.bf16 %v3491_v31, %v3490_v51 }
 0x4b5   : > { %v3493_v10 = vadd.f32 %v4699_v23, %v3479_v61 }
 0x4b6   : > { %4926 = vmatprep.mubr.msk.bf16.mxu0 %vm1593_vm2, %v4736_v4 }
 0x4b7   : > { %v4737_v37 = vpack.c.bf16 %v3493_v10, %v3492_v35 }
 0x4ba   : > { %4927 = vmatmul.mubr.msk.bf16.gmra.mxu0 %vm1593_vm2, %v4737_v37 }
 0x572   : > { %v4924_v32 = vpop.f32.mrf.mxu0 }
 0x573   : > { %v5895_v2 = vadd.f32 %v4924_v32, %v4700_v54 }
 0x574   : > { %v3583_v45 = vpop.f32.mrf.mxu0 }
 0x575   : > { %v4712_v34 = vmul.f32 -1.442695, %v5895_v2  ;;  %v5898_v19 = vadd.f32 %v4700_v54, %v3583_v45 }
 0x576   : > { %v4925_v9 = vpop.f32.mrf.mxu0 }
 0x577   : > { %5030 = vpow2.f32 %v4712_v34  ;;  %v4710_v22 = vmul.f32 -1.442695, %v5898_v19  ;;  %v5901_v47 = vadd.f32 %v4925_v9, %v4700_v54 }
 0x578   : > { %v3586_v36 = vpop.f32.mrf.mxu0 }
 0x579   : > { %5032 = vpow2.f32 %v4710_v22  ;;  %v4713_v44 = vmul.f32 -1.442695, %v5901_v47  ;;  %v5904_v25 = vadd.f32 %v4700_v54, %v3586_v36 }
 0x57a   : > { %v4928_v1 = vpop.f32.mrf.mxu0 }
 0x57b   : > { %5034 = vpow2.f32 %v4713_v44  ;;  %v4711_v40 = vmul.f32 -1.442695, %v5904_v25  ;;  %v5907_v6 = vadd.f32 %v4928_v1, %v4700_v54 }
 0x57c   : > { %v3599_v5 = vpop.f32.mrf.mxu0 }
 0x57d   : > { %5036 = vpow2.f32 %v4711_v40  ;;  %v4716_v17 = vmul.f32 -1.442695, %v5907_v6  ;;  %v5910_v21 = vadd.f32 %v4700_v54, %v3599_v5 }
 0x57e   : > { %v4929_v11 = vpop.f32.mrf.mxu0 }
 0x57f   : > { %5038 = vpow2.f32 %v4716_v17  ;;  %v4714_v33 = vmul.f32 -1.442695, %v5910_v21  ;;  %v5913_v28 = vadd.f32 %v4929_v11, %v4700_v54 }
 0x580   : > { %v3602_v12 = vpop.f32.mrf.mxu0 }
 0x581   : > { %5040 = vpow2.f32 %v4714_v33  ;;  %v4717_v56 = vmul.f32 -1.442695, %v5913_v28  ;;  %v5916_v24 = vadd.f32 %v4700_v54, %v3602_v12 }
 0x583   : > { %v4715_v20 = vmul.f32 -1.442695, %v5916_v24  ;;  %5042 = vpow2.f32 %v4717_v56 }
 0x584   : > { %v5031_v41 = vpop.eup %5030 }
 0x585   : > { %v3640_v63 = vadd.f32 1.0, %v5031_v41  ;;  %5044 = vpow2.f32 %v4715_v20 }
 0x586   : > { %v5033_v46 = vpop.eup %5032 }
 0x587   : > { %5046 = vrcp.f32 %v3640_v63  ;;  %v3638_v52 = vadd.f32 1.0, %v5033_v46 }
 0x588   : > { %v5035_v48 = vpop.eup %5034 }
 0x589   : > { %5048 = vrcp.f32 %v3638_v52  ;;  %v3641_v50 = vadd.f32 1.0, %v5035_v48 }
 0x58a   : > { %v5037_v23 = vpop.eup %5036 }
 0x58b   : > { %5050 = vrcp.f32 %v3641_v50  ;;  %v3639_v3 = vadd.f32 1.0, %v5037_v23 }
 0x58c   : > { %v5039_v18 = vpop.eup %5038 }
 0x58d   : > { %v3644_v15 = vadd.f32 1.0, %v5039_v18  ;;  %5052 = vrcp.f32 %v3639_v3 }
 0x58e   : > { %v5041_v42 = vpop.eup %5040 }
 0x58f   : > { %5054 = vrcp.f32 %v3644_v15  ;;  %v3642_v0 = vadd.f32 1.0, %v5041_v42 }
 0x590   : > { %v5043_v43 = vpop.eup %5042 }
 0x591   : > { %5056 = vrcp.f32 %v3642_v0  ;;  %v3645_v13 = vadd.f32 1.0, %v5043_v43 }
 0x592   : > { %v5045_v60 = vpop.eup %5044 }
 0x593   : > { %v3643_v62 = vadd.f32 1.0, %v5045_v60 }
 0x594   : > { %v5047_v49 = vpop.eup %5046 }
 0x595   : > { %5058 = vrcp.f32 %v3643_v62  ;;  %3706 = vrot.lane.b32.xlu1 %v5047_v49, %s5090_s0 }
 0x596   : > { %v5049_v59 = vpop.eup %5048  ;;  %5060 = vrcp.f32 %v3645_v13 }
 0x597   : > { %3702 = vrot.lane.b32.xlu0 %v5049_v59, %s5090_s0 }
 0x598   : > { %v5051_v16 = vpop.eup %5050 }
 0x599   : > { %3708 = vrot.lane.b32.xlu1 %v5051_v16, %s5090_s0 }
 0x59a   : > { %v5053_v29 = vpop.eup %5052 }
 0x59c   : > { %v5055_v14 = vpop.eup %5054 }
 0x59d   : > { %3704 = vrot.lane.b32.xlu1 %v5053_v29, %s5090_s0  ;;  %3714 = vrot.lane.b32.xlu0 %v5055_v14, %s5090_s0 }
 0x59e   : > { %v5057_v53 = vpop.eup %5056 }
 0x5a1   : > { %3710 = vrot.lane.b32.xlu0 %v5057_v53, %s5090_s0 }
 0x5a2   : > { %v5059_v39 = vpop.eup %5058 }
 0x5a3   : > { %3712 = vrot.lane.b32.xlu1 %v5059_v39, %s5090_s0  ;;  %v5061_v8 = vpop.eup %5060 }
 0x5a5   : > { %3670 = vrot.lane.b32.xlu0 %v5049_v59, %s5091_s30 }
 0x5a7   : > { %3716 = vrot.lane.b32.xlu1 %v5061_v8, %s5090_s0 }
 0x5a9   : > { %3674 = vrot.lane.b32.xlu0 %v5047_v49, %s5091_s30 }
 0x5ab   : > { %3672 = vrot.lane.b32.xlu1 %v5053_v29, %s5091_s30 }
 0x5ad   : > { %3678 = vrot.lane.b32.xlu0 %v5057_v53, %s5091_s30 }
 0x5af   : > { %3676 = vrot.lane.b32.xlu1 %v5051_v16, %s5091_s30 }
 0x5b1   : > { %3682 = vrot.lane.b32.xlu0 %v5055_v14, %s5091_s30 }
 0x5b3   : > { %3684 = vrot.lane.b32.xlu1 %v5061_v8, %s5091_s30 }
 0x5b7   : > { %3680 = vrot.lane.b32.xlu1 %v5059_v39, %s5091_s30 }
 0x607   : > { %v3707_v27 = vpop.permute.xlu1 %3706 }
 0x608   : > { %v3728_v55 = vmul.f32 %v3707_v27, %v5895_v2 }
 0x609   : > { %v3703_v26 = vpop.permute.xlu0 %3702 }
 0x60a   : > { %v4057_v30 = vpack.c.bf16 %v3728_v55, %v3728_v55  ;;  %v3726_v57 = vmul.f32 %v3703_v26, %v5898_v19 }
 0x60b   : > { %v3709_v7 = vpop.permute.xlu1 %3708 }
 0x60c   : > { %v3729_v51 = vmul.f32 %v3709_v7, %v5901_v47  ;;  %4075 = vrot.lane.b32.xlu0 %v4057_v30, %s5090_s0  ;;  %v4055_v31 = vpack.c.bf16 %v3726_v57, %v3726_v57 }
 0x60e   : > { %v4058_v61 = vpack.c.bf16 %v3729_v51, %v3729_v51 }
 0x60f   : > { %v3705_v4 = vpop.permute.xlu1 %3704  ;;  %v3715_v54 = vpop.permute.xlu0 %3714 }
 0x610   : > { %v3727_v35 = vmul.f32 %v3705_v4, %v5904_v25  ;;  %4071 = vrot.lane.b32.xlu0 %v4055_v31, %s5090_s0  ;;  %4077 = vrot.lane.b32.xlu1 %v4058_v61, %s5090_s0  ;;  %v3732_v5 = vmul.f32 %v3715_v54, %v5907_v6 }
 0x612   : > { %v4056_v10 = vpack.c.bf16 %v3727_v35, %v3727_v35  ;;  %v4061_v11 = vpack.c.bf16 %v3732_v5, %v3732_v5 }
 0x613   : > { %v3711_v22 = vpop.permute.xlu0 %3710 }
 0x614   : > { %4073 = vrot.lane.b32.xlu1 %v4056_v10, %s5090_s0  ;;  %v3730_v33 = vmul.f32 %v3711_v22, %v5910_v21 }
 0x615   : > { %v3713_v37 = vpop.permute.xlu1 %3712 }
 0x616   : > { %v3731_v34 = vmul.f32 %v3713_v37, %v5916_v24  ;;  %v4059_v56 = vpack.c.bf16 %v3730_v33, %v3730_v33 }
 0x617   : > { %v3671_v44 = vpop.permute.xlu0 %3670 }
 0x618   : > { %v4060_v36 = vpack.c.bf16 %v3731_v34, %v3731_v34  ;;  %v3694_v1 = vmul.f32 %v3671_v44, %v5898_v19 }
 0x619   : > { %v3717_v32 = vpop.permute.xlu1 %3716 }
 0x61a   : > { %v3733_v45 = vmul.f32 %v3717_v32, %v5913_v28  ;;  %v3734_v40 = vpack.c.bf16 %v3694_v1, %v3694_v1 }
 0x61b   : > { %v3675_v23 = vpop.permute.xlu0 %3674 }
 0x61c   : > { %v4062_v9 = vpack.c.bf16 %v3733_v45, %v3733_v45  ;;  %v3696_v3 = vmul.f32 %v3675_v23, %v5895_v2 }
 0x61d   : > { %v3673_v17 = vpop.permute.xlu1 %3672 }
 0x61e   : > { %4085 = vrot.lane.b32.xlu1 %v4062_v9, %s5090_s0  ;;  %v3695_v41 = vmul.f32 %v3673_v17, %v5904_v25  ;;  %v3736_v15 = vpack.c.bf16 %v3696_v3, %v3696_v3 }
 0x61f   : > { %v3679_v18 = vpop.permute.xlu0 %3678 }
 0x620   : > { %v3735_v63 = vpack.c.bf16 %v3695_v41, %v3695_v41  ;;  %v3698_v25 = vmul.f32 %v3679_v18, %v5910_v21 }
 0x621   : > { %v3677_v12 = vpop.permute.xlu1 %3676 }
 0x622   : > { %4081 = vrot.lane.b32.xlu1 %v4060_v36, %s5090_s0  ;;  %v3697_v42 = vmul.f32 %v3677_v12, %v5901_v47  ;;  %v3738_v43 = vpack.c.bf16 %v3698_v25, %v3698_v25 }
 0x624   : > { %v3737_v0 = vpack.c.bf16 %v3697_v42, %v3697_v42 }
 0x625   : > { %v3685_v20 = vpop.permute.xlu1 %3684 }
 0x626   : > { %v3701_v19 = vmul.f32 %v3685_v20, %v5913_v28  ;;  %v3683_v28 = vpop.permute.xlu0 %3682 }
 0x627   : > { %v3700_v60 = vmul.f32 %v3683_v28, %v5907_v6 }
 0x628   : > { %v3741_v52 = vpack.c.bf16 %v3701_v19, %v3701_v19 }
 0x629   : > { %v3681_v46 = vpop.permute.xlu1 %3680 }
 0x62a   : > { %v3699_v48 = vmul.f32 %v3681_v46, %v5916_v24  ;;  %v3740_v24 = vpack.c.bf16 %v3700_v60, %v3700_v60  ;;  %v5092_v60 = vmov 0  }
 0x62c   : > { %v3739_v50 = vpack.c.bf16 %v3699_v48, %v3699_v48 }
 0x62e   : > { %3742 = vxpose.xlu0.c.b16.start.end [1/1] (short) (narrow) %v3734_v40, 16 }
 0x637   : > { %4083 = vrot.lane.b32.xlu0 %v4061_v11, %s5090_s0 }
 0x63b   : > { %4079 = vrot.lane.b32.xlu0 %v4059_v56, %s5090_s0 }
 0x645   : > { %3758 = vxpose.xlu1.c.b16.start.end [1/1] (short) (narrow) %v3735_v63, 16 }
 0x649   : > { %3854 = vxpose.xlu1.c.b16.start.end [1/1] (short) (narrow) %v3741_v52, 16 }
 0x64d   : > { %3822 = vxpose.xlu1.c.b16.start.end [1/1] (short) (narrow) %v3739_v50, 16 }
 0x659   : > { %3774 = vxpose.xlu0.c.b16.start.end [1/1] (short) (narrow) %v3736_v15, 16 }
 0x65d   : > { %3790 = vxpose.xlu0.c.b16.start.end [1/1] (short) (narrow) %v3737_v0, 16 }
 0x661   : > { %3806 = vxpose.xlu0.c.b16.start.end [1/1] (short) (narrow) %v3738_v43, 16 }
 0x665   : > { %3838 = vxpose.xlu0.c.b16.start.end [1/1] (short) (narrow) %v3740_v24, 16 }
 0x67e   : > { %v4076_v62 = vpop.permute.xlu0 %4075 }
 0x67f   : > { %4127 = vxpose.xlu0.c.b16.start.end [1/1] (short) (narrow) %v4076_v62, 16 }
 0x682   : > { %v4072_v49 = vpop.permute.xlu0 %4071  ;;  %v4078_v2 = vpop.permute.xlu1 %4077 }
 0x683   : > { %4095 = vxpose.xlu0.c.b16.start.end [1/1] (short) (narrow) %v4072_v49, 16  ;;  %4143 = vxpose.xlu1.c.b16.start.end [1/1] (short) (narrow) %v4078_v2, 16 }
 0x686   : > { %v4074_v13 = vpop.permute.xlu1 %4073 }
 0x687   : > { %4111 = vxpose.xlu1.c.b16.start.end [1/1] (short) (narrow) %v4074_v13, 16 }
 0x690   : > { %v4086_v47 = vpop.permute.xlu1 %4085  ;;  %v3750_v21 = vpop.trf.xlu0 }
 0x691   : > { %v3874_v10 = vshrl.u32 %v3750_v21, 16 }
 0x694   : > { %v4082_v59 = vpop.permute.xlu1 %4081 }
 0x695   : > { %4175 = vxpose.xlu1.c.b16.start.end [1/1] (short) (narrow) %v4082_v59, 16 }
 0x699   : > { %4207 = vxpose.xlu1.c.b16.start.end [1/1] (short) (narrow) %v4086_v47, 16 }
 0x6a7   : > { %v3766_v6 = vpop.trf.xlu1 }
 0x6a8   : > { %v3872_v51 = vpack.i.b16 %v3766_v6, %v3750_v21  ;;  %v3875_v31 = vshrl.u32 %v3766_v6, 16 }
 0x6a9   : > { %v4084_v16 = vpop.permute.xlu0 %4083 }
 0x6aa   : > { %v3876_v22 = vpack.i.b16 %v3875_v31, %v3874_v10 }
 0x6ab   : > { %v3862_v53 = vpop.trf.xlu1 }
 0x6ac   : > { %v3899_v4 = vshrl.u32 %v3862_v53, 16 }
 0x6ad   : > { %v4080_v29 = vpop.permute.xlu0 %4079 }
 0x6ae   : > { %4159 = vxpose.xlu0.c.b16.start.end [1/1] (short) (narrow) %v4080_v29, 16 }
 0x6af   : > { %v3830_v8 = vpop.trf.xlu1 }
 0x6b0   : > { %v3891_v30 = vshrl.u32 %v3830_v8, 16 }
 0x6b2   : > { %4191 = vxpose.xlu0.c.b16.start.end [1/1] (short) (narrow) %v4084_v16, 16 }
 0x6bb   : > { %v3782_v14 = vpop.trf.xlu0 }
 0x6bc   : > { %v3882_v57 = vshrl.u32 %v3782_v14, 16 }
 0x6bf   : > { %v3798_v39 = vpop.trf.xlu0 }
 0x6c0   : > { %v3883_v7 = vshrl.u32 %v3798_v39, 16  ;;  %v3880_v61 = vpack.i.b16 %v3798_v39, %v3782_v14 }
 0x6c2   : > { %v3884_v45 = vpack.i.b16 %v3883_v7, %v3882_v57 }
 0x6c3   : > { %v3814_v27 = vpop.trf.xlu0 }
 0x6c4   : > { %v3890_v55 = vshrl.u32 %v3814_v27, 16  ;;  %v3888_v26 = vpack.i.b16 %v3830_v8, %v3814_v27 }
 0x6c6   : > { %v3892_v37 = vpack.i.b16 %v3891_v30, %v3890_v55  ;;  %v3902_v54 = vcombine.low %v3872_v51, %v3888_v26  ;;  %v3903_v32 = vcombine.high %v3872_v51, %v3888_v26 }
 0x6c7   : > { %v3846_v35 = vpop.trf.xlu0 }
 0x6c8   : > { %v3896_v34 = vpack.i.b16 %v3862_v53, %v3846_v35  ;;  %v3898_v9 = vshrl.u32 %v3846_v35, 16  ;;  %v3910_v40 = vrot.slane %v3902_v54, %v5696_v38  ;;  %v3917_v5 = vrot.slane %v3903_v32, %v5696_v38 }
 0x6c9   : > { %v3970_v17 = vcombine.low %v3876_v22, %v3892_v37  ;;  %v3971_v11 = vcombine.high %v3876_v22, %v3892_v37 }
 0x6ca   : > { %v3900_v36 = vpack.i.b16 %v3899_v4, %v3898_v9  ;;  %v3918_v44 = vcombine.low %v3880_v61, %v3896_v34  ;;  %v3919_v1 = vcombine.high %v3880_v61, %v3896_v34 }
 0x6cb   : > { %v3978_v52 = vrot.slane %v3970_v17, %v5696_v38  ;;  %v3985_v48 = vrot.slane %v3971_v11, %v5696_v38 }
 0x6cc   : > { %v3926_v33 = vrot.slane %v3918_v44, %v5696_v38  ;;  %v3933_v12 = vrot.slane %v3919_v1, %v5696_v38  ;;  %v3986_v56 = vcombine.low %v3884_v45, %v3900_v36  ;;  %v3987_v20 = vcombine.high %v3884_v45, %v3900_v36 }
 0x6ce   : > { %v3934_v41 = vcombine.low %v3910_v40, %v3926_v33  ;;  %v3935_v63 = vcombine.high %v3910_v40, %v3926_v33  ;;  %v3950_v19 = vcombine.low %v3917_v5, %v3933_v12  ;;  %v3951_v46 = vcombine.high %v3917_v5, %v3933_v12 }
 0x6cf   : > { %v3994_v50 = vrot.slane %v3986_v56, %v5696_v38  ;;  %v4001_v23 = vrot.slane %v3987_v20, %v5696_v38 }
 0x6d0   : > { %v3942_v3 = vrot.slane %v3934_v41, %v5707_v58  ;;  %v3949_v18 = vrot.slane %v3935_v63, %v5707_v58  ;;  %v3958_v15 = vrot.slane %v3950_v19, %v5707_v58  ;;  %v3965_v42 = vrot.slane %v3951_v46, %v5707_v58 }
 0x6d1   : > { %v4002_v25 = vcombine.low %v3978_v52, %v3994_v50  ;;  %v4003_v0 = vcombine.high %v3978_v52, %v3994_v50  ;;  %v4018_v28 = vcombine.low %v3985_v48, %v4001_v23  ;;  %v4019_v43 = vcombine.high %v3985_v48, %v4001_v23 }
 0x6d2   : > { %v3966_v24 = vcombine.high %v3942_v3, %v5092_v60  ;;  %v3967_v62 = vcombine.high %v3949_v18, %v5092_v60  ;;  %v3968_v49 = vcombine.high %v3958_v15, %v5092_v60  ;;  %v3969_v2 = vcombine.high %v3965_v42, %v5092_v60  ;;  %4039 = vst.msk [vmem:[%s5959_s29] sm:$0xf] %vm4038_vm4, %v3942_v3 }
 0x6d3   : > { %4043 = vst.msk [vmem:[%s5959_s29 + $0x10] sm:$0xf] %vm4038_vm4, %v3949_v18  ;;  %4047 = vst.msk [vmem:[%s5959_s29 + $0x20] sm:$0xf] %vm4038_vm4, %v3958_v15  ;;  %v4010_v13 = vrot.slane %v4002_v25, %v5707_v58  ;;  %v4017_v47 = vrot.slane %v4003_v0, %v5707_v58  ;;  %v4026_v59 = vrot.slane %v4018_v28, %v5707_v58 }
 0x6d4   : > { %4051 = vst.msk [vmem:[%s5959_s29 + $0x30] sm:$0xf] %vm4038_vm4, %v3965_v42  ;;  %v4033_v21 = vrot.slane %v4019_v43, %v5707_v58  ;;  %4041 = vst.msk [vmem:[%s5959_s29 + $0x8] sm:$0xf] %vm4038_vm4, %v3966_v24 }
 0x6d5   : > { %4045 = vst.msk [vmem:[%s5959_s29 + $0x18] sm:$0xf] %vm4038_vm4, %v3967_v62  ;;  %4049 = vst.msk [vmem:[%s5959_s29 + $0x28] sm:$0xf] %vm4038_vm4, %v3968_v49  ;;  %v4034_v16 = vcombine.high %v4010_v13, %v5092_v60  ;;  %v4035_v29 = vcombine.high %v4017_v47, %v5092_v60  ;;  %v4036_v6 = vcombine.high %v4026_v59, %v5092_v60 }
 0x6d6   : > { %4053 = vst.msk [vmem:[%s5959_s29 + $0x38] sm:$0xf] %vm4038_vm4, %v3969_v2  ;;  %v4037_v14 = vcombine.high %v4033_v21, %v5092_v60  ;;  %4040 = vst.msk [vmem:[%s5959_s29 + $0x4] sm:$0xf] %vm4038_vm4, %v4010_v13 }
 0x6d7   : > { %4044 = vst.msk [vmem:[%s5959_s29 + $0x14] sm:$0xf] %vm4038_vm4, %v4017_v47  ;;  %4048 = vst.msk [vmem:[%s5959_s29 + $0x24] sm:$0xf] %vm4038_vm4, %v4026_v59 }
 0x6d8   : > { %4052 = vst.msk [vmem:[%s5959_s29 + $0x34] sm:$0xf] %vm4038_vm4, %v4033_v21  ;;  %4042 = vst.msk [vmem:[%s5959_s29 + $0xc] sm:$0xf] %vm4038_vm4, %v4034_v16 }
 0x6d9   : > { %4046 = vst.msk [vmem:[%s5959_s29 + $0x1c] sm:$0xf] %vm4038_vm4, %v4035_v29  ;;  %4050 = vst.msk [vmem:[%s5959_s29 + $0x2c] sm:$0xf] %vm4038_vm4, %v4036_v6 }
 0x6da   : > { %4054 = vst.msk [vmem:[%s5959_s29 + $0x3c] sm:$0xf] %vm4038_vm4, %v4037_v14 }
 0x6e1   : > { %v4135_v39 = vpop.trf.xlu0 }
 0x6e2   : > { %v4235_v35 = vshrl.u32 %v4135_v39, 16 }
 0x6e5   : > { %v4151_v53 = vpop.trf.xlu1  ;;  %v4103_v27 = vpop.trf.xlu0 }
 0x6e6   : > { %v4227_v31 = vshrl.u32 %v4103_v27, 16  ;;  %v4236_v10 = vshrl.u32 %v4151_v53, 16  ;;  %v4233_v9 = vpack.i.b16 %v4151_v53, %v4135_v39 }
 0x6e8   : > { %v4237_v1 = vpack.i.b16 %v4236_v10, %v4235_v35 }
 0x6e9   : > { %v4119_v8 = vpop.trf.xlu1 }
 0x6ea   : > { %v4225_v61 = vpack.i.b16 %v4119_v8, %v4103_v27  ;;  %v4228_v4 = vshrl.u32 %v4119_v8, 16 }
 0x6ec   : > { %v4229_v44 = vpack.i.b16 %v4228_v4, %v4227_v31 }
 0x6f7   : > { %v4183_v55 = vpop.trf.xlu1 }
 0x6f8   : > { %v4244_v7 = vshrl.u32 %v4183_v55, 16 }
 0x6fb   : > { %v4215_v51 = vpop.trf.xlu1 }
 0x6fc   : > { %v4252_v54 = vshrl.u32 %v4215_v51, 16 }
 0x710   : > { %v4167_v26 = vpop.trf.xlu0 }
 0x711   : > { %v4243_v30 = vshrl.u32 %v4167_v26, 16  ;;  %v4241_v57 = vpack.i.b16 %v4183_v55, %v4167_v26 }
 0x713   : > { %v4245_v32 = vpack.i.b16 %v4244_v7, %v4243_v30  ;;  %v4255_v45 = vcombine.low %v4225_v61, %v4241_v57  ;;  %v4256_v34 = vcombine.high %v4225_v61, %v4241_v57 }
 0x714   : > { %v4199_v37 = vpop.trf.xlu0 }
 0x715   : > { %v4251_v22 = vshrl.u32 %v4199_v37, 16  ;;  %v4249_v36 = vpack.i.b16 %v4215_v51, %v4199_v37  ;;  %v4263_v11 = vrot.slane %v4255_v45, %v5696_v38  ;;  %v4270_v33 = vrot.slane %v4256_v34, %v5696_v38 }
 0x716   : > { %v4323_v12 = vcombine.low %v4229_v44, %v4245_v32  ;;  %v4324_v56 = vcombine.high %v4229_v44, %v4245_v32 }
 0x717   : > { %v4253_v40 = vpack.i.b16 %v4252_v54, %v4251_v22  ;;  %v4271_v5 = vcombine.low %v4233_v9, %v4249_v36  ;;  %v4272_v17 = vcombine.high %v4233_v9, %v4249_v36 }
 0x718   : > { %v4331_v23 = vrot.slane %v4323_v12, %v5696_v38  ;;  %v4338_v3 = vrot.slane %v4324_v56, %v5696_v38 }
 0x719   : > { %v4279_v20 = vrot.slane %v4271_v5, %v5696_v38  ;;  %v4286_v41 = vrot.slane %v4272_v17, %v5696_v38  ;;  %v4339_v63 = vcombine.low %v4237_v1, %v4253_v40  ;;  %v4340_v19 = vcombine.high %v4237_v1, %v4253_v40 }
 0x71b   : > { %v4287_v46 = vcombine.low %v4263_v11, %v4279_v20  ;;  %v4288_v52 = vcombine.high %v4263_v11, %v4279_v20  ;;  %v4303_v48 = vcombine.low %v4270_v33, %v4286_v41  ;;  %v4304_v50 = vcombine.high %v4270_v33, %v4286_v41 }
 0x71c   : > { %v4347_v18 = vrot.slane %v4339_v63, %v5696_v38  ;;  %v4354_v15 = vrot.slane %v4340_v19, %v5696_v38 }
 0x71d   : > { %v4295_v42 = vrot.slane %v4287_v46, %v5707_v58  ;;  %v4302_v25 = vrot.slane %v4288_v52, %v5707_v58  ;;  %v4311_v0 = vrot.slane %v4303_v48, %v5707_v58  ;;  %v4318_v28 = vrot.slane %v4304_v50, %v5707_v58 }
 0x71e   : > { %v4355_v43 = vcombine.low %v4331_v23, %v4347_v18  ;;  %v4356_v24 = vcombine.high %v4331_v23, %v4347_v18  ;;  %v4371_v62 = vcombine.low %v4338_v3, %v4354_v15  ;;  %v4372_v49 = vcombine.high %v4338_v3, %v4354_v15 }
 0x71f   : > { %v4319_v2 = vcombine.high %v4295_v42, %v5092_v60  ;;  %v4320_v38 = vcombine.high %v4302_v25, %v5092_v60  ;;  %v4321_v13 = vcombine.high %v4311_v0, %v5092_v60  ;;  %v4322_v47 = vcombine.high %v4318_v28, %v5092_v60  ;;  %4391 = vst.msk [vmem:[%s6021_s20] sm:$0xf] %vm4038_vm4, %v4295_v42 }
 0x720   : > { %4395 = vst.msk [vmem:[%s6021_s20 + $0x10] sm:$0xf] %vm4038_vm4, %v4302_v25  ;;  %4399 = vst.msk [vmem:[%s6021_s20 + $0x20] sm:$0xf] %vm4038_vm4, %v4311_v0  ;;  %v4363_v59 = vrot.slane %v4355_v43, %v5707_v58  ;;  %v4370_v21 = vrot.slane %v4356_v24, %v5707_v58  ;;  %v4379_v16 = vrot.slane %v4371_v62, %v5707_v58 }
 0x721   : > { %4403 = vst.msk [vmem:[%s6021_s20 + $0x30] sm:$0xf] %vm4038_vm4, %v4318_v28  ;;  %v4386_v29 = vrot.slane %v4372_v49, %v5707_v58  ;;  %4393 = vst.msk [vmem:[%s6021_s20 + $0x8] sm:$0xf] %vm4038_vm4, %v4319_v2 }
 0x722   : > { %4397 = vst.msk [vmem:[%s6021_s20 + $0x18] sm:$0xf] %vm4038_vm4, %v4320_v38  ;;  %4401 = vst.msk [vmem:[%s6021_s20 + $0x28] sm:$0xf] %vm4038_vm4, %v4321_v13  ;;  %v4387_v6 = vcombine.high %v4363_v59, %v5092_v60  ;;  %v4388_v14 = vcombine.high %v4370_v21, %v5092_v60  ;;  %v4389_v53 = vcombine.high %v4379_v16, %v5092_v60 }
 0x723   : > { %4405 = vst.msk [vmem:[%s6021_s20 + $0x38] sm:$0xf] %vm4038_vm4, %v4322_v47  ;;  %v4390_v39 = vcombine.high %v4386_v29, %v5092_v60  ;;  %4392 = vst.msk [vmem:[%s6021_s20 + $0x4] sm:$0xf] %vm4038_vm4, %v4363_v59 }
 0x724   : > { %4396 = vst.msk [vmem:[%s6021_s20 + $0x14] sm:$0xf] %vm4038_vm4, %v4370_v21  ;;  %4400 = vst.msk [vmem:[%s6021_s20 + $0x24] sm:$0xf] %vm4038_vm4, %v4379_v16 }
 0x725   : > { %4404 = vst.msk [vmem:[%s6021_s20 + $0x34] sm:$0xf] %vm4038_vm4, %v4386_v29  ;;  %4394 = vst.msk [vmem:[%s6021_s20 + $0xc] sm:$0xf] %vm4038_vm4, %v4387_v6 }
 0x726   : > { %4398 = vst.msk [vmem:[%s6021_s20 + $0x1c] sm:$0xf] %vm4038_vm4, %v4388_v14  ;;  %4402 = vst.msk [vmem:[%s6021_s20 + $0x2c] sm:$0xf] %vm4038_vm4, %v4389_v53 }
 0x727   : > { %4406 = vst.msk [vmem:[%s6021_s20 + $0x3c] sm:$0xf] %vm4038_vm4, %v4390_v39 }
 0x728 PF: > { %s28_s26 = sadd.s32 1, %s5084_s26   ;;  %s6106_s24 = smov %s5080_s25 }
 0x729   : > { %p25_p5 = scmp.ge.s32.totalorder %s28_s26, 4   ;;  %s6107_s25 = smov %s6109_s27 }
 0x72b   :  { %27 = sbr.rel (!%p25_p5) target bundleno = 3 (0x3), region = 148 }

</bundles_post_ra>
